<compile_context>
chip_gen: v5e
topology: v5e:2x2
jax: 0.10.0
libtpu: 0.0.40
codegen_flags: <defaults>
</compile_context>

<pallas_src>
import functools
import math

import jax
import jax.numpy as jnp
import numpy as np
from jax.experimental import pallas as pl
from jax.experimental.pallas import tpu as pltpu

_TWO_PI = 2.0 * math.pi
_HALF_PI = math.pi / 2.0


def _round_up(v, m):
    return ((v + m - 1) // m) * m


def _sinusoidal_kernel(x_ref, o_ref, *, in_dim, num_freq, freq_values,
                       include_input):
    """x_ref: (tm, in_dim)   o_ref: (tm, out_dim); rows on sublanes."""
    nf = num_freq
    df = in_dim * nf
    tm = x_ref.shape[0]
    width = o_ref.shape[-1]          # 2*df (+ in_dim if include_input)

    x = x_ref[...].astype(jnp.float32)                        # (tm, in_dim)

    # ---- per-lane constants, built on (1, width) one-vreg arrays ----------
    lane = jax.lax.broadcasted_iota(jnp.int32, (1, width), 1)

    # Frequency per output lane (exact 2**linspace values as scalar constants).
    freq_lane = jnp.zeros((1, width), jnp.float32)
    for g in range(2 * in_dim):                                # 2*in_dim groups of nf
        base = g * nf
        for f, fv in enumerate(freq_values):
            freq_lane = jnp.where(lane == base + f, jnp.float32(fv), freq_lane)

    # pi/2 phase shift on the "cos" half -> a single sin pass covers both.
    phase_off = jnp.where((lane >= df) & (lane < 2 * df),
                          jnp.float32(_HALF_PI), jnp.float32(0.0))

    # ---- gather the right input column onto each output lane --------------
    x_g = jnp.zeros((tm, width), jnp.float32)
    for d in range(in_dim):
        sel = ((lane >= d * nf) & (lane < (d + 1) * nf)) | \
              ((lane >= df + d * nf) & (lane < df + (d + 1) * nf))
        if include_input:
            sel = sel | (lane == 2 * df + d)
        x_g = jnp.where(sel, x[:, d:d + 1], x_g)               # lane broadcast

    # ---- encode ------------------------------------------------------------
    si = (_TWO_PI * x_g) * freq_lane          # same op order as the torch code
    enc = jnp.sin(si + phase_off)
    if include_input:
        enc = jnp.where(lane >= 2 * df, x_g, enc)              # passthrough tail
    o_ref[...] = enc.astype(o_ref.dtype)


def sinusoidal_encoding_pallas(x, *, num_frequencies, min_freq_exp, max_freq_exp,
                               include_input=True, tm_max=4096):
    """x: (..., in_dim). Returns (..., out_dim) matching the PyTorch module."""
    in_dim = x.shape[-1]
    if num_frequencies == 0:
        # Mirrors the PyTorch forward exactly.
        return x if include_input else jnp.zeros_like(x)

    dtype = x.dtype
    lead_shape = x.shape[:-1]
    n = int(np.prod(lead_shape)) if lead_shape else 1
    out_dim = 2 * in_dim * num_frequencies + (in_dim if include_input else 0)

    # Exact frequencies from the hyperparameters (matches 2**linspace).
    freq_values = tuple(
        float(v) for v in 2.0 ** np.linspace(min_freq_exp, max_freq_exp,
                                             num_frequencies))

    x2 = x.reshape(n, in_dim)                                  # feature-last

    # Row tile: as large as useful, never inflated just to create grid steps.
    tm_cap = max(128, (int(tm_max) // 128) * 128)
    tm = min(tm_cap, _round_up(n, 128))
    grid = (pl.cdiv(n, tm),)                                   # ragged last block OK

    kernel = functools.partial(
        _sinusoidal_kernel, in_dim=in_dim, num_freq=num_frequencies,
        freq_values=freq_values, include_input=include_input)

    out = pl.pallas_call(
        kernel,
        out_shape=jax.ShapeDtypeStruct((n, out_dim), dtype),
        grid_spec=pltpu.PrefetchScalarGridSpec(
            num_scalar_prefetch=0,
            grid=grid,
            in_specs=[pl.BlockSpec((tm, in_dim), lambda i: (i, 0))],
            out_specs=pl.BlockSpec((tm, out_dim), lambda i: (i, 0)),
        ),
        compiler_params=pltpu.CompilerParams(
            dimension_semantics=("parallel",),
            vmem_limit_bytes=32 * 1024 * 1024),
    )(x2)

    return out.reshape(*lead_shape, out_dim)


def sinusoidal_encoding_ref(x, *, num_frequencies, min_freq_exp, max_freq_exp,
                            include_input=True):
    """Pure-JAX reference mirroring the PyTorch forward exactly."""
    if num_frequencies == 0:
        return x if include_input else jnp.zeros_like(x)
    dtype = x.dtype
    scaled = 2.0 * jnp.pi * x
    freqs = 2.0 ** jnp.linspace(min_freq_exp, max_freq_exp, num_frequencies)
    si = scaled[..., None] * freqs
    si = si.reshape(*si.shape[:-2], -1)
    enc = jnp.sin(jnp.concatenate([si, si + jnp.pi / 2.0], axis=-1)).astype(dtype)
    if include_input:
        enc = jnp.concatenate([enc, x], axis=-1)
    return enc


if __name__ == "__main__":
    # Module hyperparameters (deterministic, in-script).
    in_dim = 4
    num_frequencies = 8
    min_freq_exp = 0.0
    max_freq_exp = 7.0

    key = jax.random.PRNGKey(0)
    # Small input consistent with the forward: (..., in_dim), values in [0, 1].
    x = jax.random.uniform(key, (2, 128, in_dim), dtype=jnp.float32)

    out = sinusoidal_encoding_pallas(
        x, num_frequencies=num_frequencies, min_freq_exp=min_freq_exp,
        max_freq_exp=max_freq_exp, include_input=True)
    out = jax.block_until_ready(out)

    ref = sinusoidal_encoding_ref(
        x, num_frequencies=num_frequencies, min_freq_exp=min_freq_exp,
        max_freq_exp=max_freq_exp, include_input=True)

    expected_out_dim = in_dim * num_frequencies * 2 + in_dim
    assert out.shape == (2, 128, expected_out_dim), out.shape
    assert out.dtype == x.dtype
    # atol: f32 sin at |arg| up to 2*pi*2^7 ~ 804 can differ by a few ulps of
    # the argument between the Mosaic and XLA sin implementations (~5e-5 abs).
    np.testing.assert_allclose(np.asarray(out), np.asarray(ref),
                               atol=1e-4, rtol=1e-5)

    # Also exercise include_input=False (no passthrough tail lanes).
    out_nf = sinusoidal_encoding_pallas(
        x, num_frequencies=num_frequencies, min_freq_exp=min_freq_exp,
        max_freq_exp=max_freq_exp, include_input=False)
    out_nf = jax.block_until_ready(out_nf)
    ref_nf = sinusoidal_encoding_ref(
        x, num_frequencies=num_frequencies, min_freq_exp=min_freq_exp,
        max_freq_exp=max_freq_exp, include_input=False)
    assert out_nf.shape == (2, 128, in_dim * num_frequencies * 2), out_nf.shape
    np.testing.assert_allclose(np.asarray(out_nf), np.asarray(ref_nf),
                               atol=1e-4, rtol=1e-5)

    print("KERNEL_OK")
</pallas_src>

<mosaic_0001>
module attributes {stable_mosaic.version = 11 : i64} {
  func.func @_sinusoidal_kernel(%arg0: i32, %arg1: memref<256x4xf32, #tpu.memory_space<vmem>>, %arg2: memref<256x68xf32, #tpu.memory_space<vmem>>) attributes {dimension_semantics = [#tpu.dimension_semantics<parallel>], iteration_bounds = array<i64: 1>, scalar_prefetch = 0 : i64, scratch_operands = 0 : i64, tpu.core_type = #tpu.core_type<tc>, window_params = [{transform_indices = @transform_0, window_bounds = array<i64: 256, 4>}, {transform_indices = @transform_1, window_bounds = array<i64: 256, 68>}]} {
    %c0 = arith.constant 0 : index
    %c0_0 = arith.constant 0 : index
    %0 = vector.load %arg1[%c0, %c0_0] : memref<256x4xf32, #tpu.memory_space<vmem>>, vector<256x4xf32>
    %1 = tpu.iota {dimensions = array<i32: 1>} : vector<1x68xi32>
    %cst = arith.constant 0.000000e+00 : f32
    %2 = vector.broadcast %cst : f32 to vector<1x68xf32>
    %c0_i32 = arith.constant 0 : i32
    %3 = vector.broadcast %c0_i32 : i32 to vector<1x68xi32>
    %4 = arith.cmpi eq, %1, %3 : vector<1x68xi32>
    %cst_1 = arith.constant 1.000000e+00 : f32
    %5 = vector.broadcast %cst_1 : f32 to vector<1x68xf32>
    %6 = arith.select %4, %5, %2 : vector<1x68xi1>, vector<1x68xf32>
    %c1_i32 = arith.constant 1 : i32
    %7 = vector.broadcast %c1_i32 : i32 to vector<1x68xi32>
    %8 = arith.cmpi eq, %1, %7 : vector<1x68xi32>
    %cst_2 = arith.constant 2.000000e+00 : f32
    %9 = vector.broadcast %cst_2 : f32 to vector<1x68xf32>
    %10 = arith.select %8, %9, %6 : vector<1x68xi1>, vector<1x68xf32>
    %c2_i32 = arith.constant 2 : i32
    %11 = vector.broadcast %c2_i32 : i32 to vector<1x68xi32>
    %12 = arith.cmpi eq, %1, %11 : vector<1x68xi32>
    %cst_3 = arith.constant 4.000000e+00 : f32
    %13 = vector.broadcast %cst_3 : f32 to vector<1x68xf32>
    %14 = arith.select %12, %13, %10 : vector<1x68xi1>, vector<1x68xf32>
    %c3_i32 = arith.constant 3 : i32
    %15 = vector.broadcast %c3_i32 : i32 to vector<1x68xi32>
    %16 = arith.cmpi eq, %1, %15 : vector<1x68xi32>
    %cst_4 = arith.constant 8.000000e+00 : f32
    %17 = vector.broadcast %cst_4 : f32 to vector<1x68xf32>
    %18 = arith.select %16, %17, %14 : vector<1x68xi1>, vector<1x68xf32>
    %c4_i32 = arith.constant 4 : i32
    %19 = vector.broadcast %c4_i32 : i32 to vector<1x68xi32>
    %20 = arith.cmpi eq, %1, %19 : vector<1x68xi32>
    %cst_5 = arith.constant 1.600000e+01 : f32
    %21 = vector.broadcast %cst_5 : f32 to vector<1x68xf32>
    %22 = arith.select %20, %21, %18 : vector<1x68xi1>, vector<1x68xf32>
    %c5_i32 = arith.constant 5 : i32
    %23 = vector.broadcast %c5_i32 : i32 to vector<1x68xi32>
    %24 = arith.cmpi eq, %1, %23 : vector<1x68xi32>
    %cst_6 = arith.constant 3.200000e+01 : f32
    %25 = vector.broadcast %cst_6 : f32 to vector<1x68xf32>
    %26 = arith.select %24, %25, %22 : vector<1x68xi1>, vector<1x68xf32>
    %c6_i32 = arith.constant 6 : i32
    %27 = vector.broadcast %c6_i32 : i32 to vector<1x68xi32>
    %28 = arith.cmpi eq, %1, %27 : vector<1x68xi32>
    %cst_7 = arith.constant 6.400000e+01 : f32
    %29 = vector.broadcast %cst_7 : f32 to vector<1x68xf32>
    %30 = arith.select %28, %29, %26 : vector<1x68xi1>, vector<1x68xf32>
    %c7_i32 = arith.constant 7 : i32
    %31 = vector.broadcast %c7_i32 : i32 to vector<1x68xi32>
    %32 = arith.cmpi eq, %1, %31 : vector<1x68xi32>
    %cst_8 = arith.constant 1.280000e+02 : f32
    %33 = vector.broadcast %cst_8 : f32 to vector<1x68xf32>
    %34 = arith.select %32, %33, %30 : vector<1x68xi1>, vector<1x68xf32>
    %c8_i32 = arith.constant 8 : i32
    %35 = vector.broadcast %c8_i32 : i32 to vector<1x68xi32>
    %36 = arith.cmpi eq, %1, %35 : vector<1x68xi32>
    %cst_9 = arith.constant 1.000000e+00 : f32
    %37 = vector.broadcast %cst_9 : f32 to vector<1x68xf32>
    %38 = arith.select %36, %37, %34 : vector<1x68xi1>, vector<1x68xf32>
    %c9_i32 = arith.constant 9 : i32
    %39 = vector.broadcast %c9_i32 : i32 to vector<1x68xi32>
    %40 = arith.cmpi eq, %1, %39 : vector<1x68xi32>
    %cst_10 = arith.constant 2.000000e+00 : f32
    %41 = vector.broadcast %cst_10 : f32 to vector<1x68xf32>
    %42 = arith.select %40, %41, %38 : vector<1x68xi1>, vector<1x68xf32>
    %c10_i32 = arith.constant 10 : i32
    %43 = vector.broadcast %c10_i32 : i32 to vector<1x68xi32>
    %44 = arith.cmpi eq, %1, %43 : vector<1x68xi32>
    %cst_11 = arith.constant 4.000000e+00 : f32
    %45 = vector.broadcast %cst_11 : f32 to vector<1x68xf32>
    %46 = arith.select %44, %45, %42 : vector<1x68xi1>, vector<1x68xf32>
    %c11_i32 = arith.constant 11 : i32
    %47 = vector.broadcast %c11_i32 : i32 to vector<1x68xi32>
    %48 = arith.cmpi eq, %1, %47 : vector<1x68xi32>
    %cst_12 = arith.constant 8.000000e+00 : f32
    %49 = vector.broadcast %cst_12 : f32 to vector<1x68xf32>
    %50 = arith.select %48, %49, %46 : vector<1x68xi1>, vector<1x68xf32>
    %c12_i32 = arith.constant 12 : i32
    %51 = vector.broadcast %c12_i32 : i32 to vector<1x68xi32>
    %52 = arith.cmpi eq, %1, %51 : vector<1x68xi32>
    %cst_13 = arith.constant 1.600000e+01 : f32
    %53 = vector.broadcast %cst_13 : f32 to vector<1x68xf32>
    %54 = arith.select %52, %53, %50 : vector<1x68xi1>, vector<1x68xf32>
    %c13_i32 = arith.constant 13 : i32
    %55 = vector.broadcast %c13_i32 : i32 to vector<1x68xi32>
    %56 = arith.cmpi eq, %1, %55 : vector<1x68xi32>
    %cst_14 = arith.constant 3.200000e+01 : f32
    %57 = vector.broadcast %cst_14 : f32 to vector<1x68xf32>
    %58 = arith.select %56, %57, %54 : vector<1x68xi1>, vector<1x68xf32>
    %c14_i32 = arith.constant 14 : i32
    %59 = vector.broadcast %c14_i32 : i32 to vector<1x68xi32>
    %60 = arith.cmpi eq, %1, %59 : vector<1x68xi32>
    %cst_15 = arith.constant 6.400000e+01 : f32
    %61 = vector.broadcast %cst_15 : f32 to vector<1x68xf32>
    %62 = arith.select %60, %61, %58 : vector<1x68xi1>, vector<1x68xf32>
    %c15_i32 = arith.constant 15 : i32
    %63 = vector.broadcast %c15_i32 : i32 to vector<1x68xi32>
    %64 = arith.cmpi eq, %1, %63 : vector<1x68xi32>
    %cst_16 = arith.constant 1.280000e+02 : f32
    %65 = vector.broadcast %cst_16 : f32 to vector<1x68xf32>
    %66 = arith.select %64, %65, %62 : vector<1x68xi1>, vector<1x68xf32>
    %c16_i32 = arith.constant 16 : i32
    %67 = vector.broadcast %c16_i32 : i32 to vector<1x68xi32>
    %68 = arith.cmpi eq, %1, %67 : vector<1x68xi32>
    %cst_17 = arith.constant 1.000000e+00 : f32
    %69 = vector.broadcast %cst_17 : f32 to vector<1x68xf32>
    %70 = arith.select %68, %69, %66 : vector<1x68xi1>, vector<1x68xf32>
    %c17_i32 = arith.constant 17 : i32
    %71 = vector.broadcast %c17_i32 : i32 to vector<1x68xi32>
    %72 = arith.cmpi eq, %1, %71 : vector<1x68xi32>
    %cst_18 = arith.constant 2.000000e+00 : f32
    %73 = vector.broadcast %cst_18 : f32 to vector<1x68xf32>
    %74 = arith.select %72, %73, %70 : vector<1x68xi1>, vector<1x68xf32>
    %c18_i32 = arith.constant 18 : i32
    %75 = vector.broadcast %c18_i32 : i32 to vector<1x68xi32>
    %76 = arith.cmpi eq, %1, %75 : vector<1x68xi32>
    %cst_19 = arith.constant 4.000000e+00 : f32
    %77 = vector.broadcast %cst_19 : f32 to vector<1x68xf32>
    %78 = arith.select %76, %77, %74 : vector<1x68xi1>, vector<1x68xf32>
    %c19_i32 = arith.constant 19 : i32
    %79 = vector.broadcast %c19_i32 : i32 to vector<1x68xi32>
    %80 = arith.cmpi eq, %1, %79 : vector<1x68xi32>
    %cst_20 = arith.constant 8.000000e+00 : f32
    %81 = vector.broadcast %cst_20 : f32 to vector<1x68xf32>
    %82 = arith.select %80, %81, %78 : vector<1x68xi1>, vector<1x68xf32>
    %c20_i32 = arith.constant 20 : i32
    %83 = vector.broadcast %c20_i32 : i32 to vector<1x68xi32>
    %84 = arith.cmpi eq, %1, %83 : vector<1x68xi32>
    %cst_21 = arith.constant 1.600000e+01 : f32
    %85 = vector.broadcast %cst_21 : f32 to vector<1x68xf32>
    %86 = arith.select %84, %85, %82 : vector<1x68xi1>, vector<1x68xf32>
    %c21_i32 = arith.constant 21 : i32
    %87 = vector.broadcast %c21_i32 : i32 to vector<1x68xi32>
    %88 = arith.cmpi eq, %1, %87 : vector<1x68xi32>
    %cst_22 = arith.constant 3.200000e+01 : f32
    %89 = vector.broadcast %cst_22 : f32 to vector<1x68xf32>
    %90 = arith.select %88, %89, %86 : vector<1x68xi1>, vector<1x68xf32>
    %c22_i32 = arith.constant 22 : i32
    %91 = vector.broadcast %c22_i32 : i32 to vector<1x68xi32>
    %92 = arith.cmpi eq, %1, %91 : vector<1x68xi32>
    %cst_23 = arith.constant 6.400000e+01 : f32
    %93 = vector.broadcast %cst_23 : f32 to vector<1x68xf32>
    %94 = arith.select %92, %93, %90 : vector<1x68xi1>, vector<1x68xf32>
    %c23_i32 = arith.constant 23 : i32
    %95 = vector.broadcast %c23_i32 : i32 to vector<1x68xi32>
    %96 = arith.cmpi eq, %1, %95 : vector<1x68xi32>
    %cst_24 = arith.constant 1.280000e+02 : f32
    %97 = vector.broadcast %cst_24 : f32 to vector<1x68xf32>
    %98 = arith.select %96, %97, %94 : vector<1x68xi1>, vector<1x68xf32>
    %c24_i32 = arith.constant 24 : i32
    %99 = vector.broadcast %c24_i32 : i32 to vector<1x68xi32>
    %100 = arith.cmpi eq, %1, %99 : vector<1x68xi32>
    %cst_25 = arith.constant 1.000000e+00 : f32
    %101 = vector.broadcast %cst_25 : f32 to vector<1x68xf32>
    %102 = arith.select %100, %101, %98 : vector<1x68xi1>, vector<1x68xf32>
    %c25_i32 = arith.constant 25 : i32
    %103 = vector.broadcast %c25_i32 : i32 to vector<1x68xi32>
    %104 = arith.cmpi eq, %1, %103 : vector<1x68xi32>
    %cst_26 = arith.constant 2.000000e+00 : f32
    %105 = vector.broadcast %cst_26 : f32 to vector<1x68xf32>
    %106 = arith.select %104, %105, %102 : vector<1x68xi1>, vector<1x68xf32>
    %c26_i32 = arith.constant 26 : i32
    %107 = vector.broadcast %c26_i32 : i32 to vector<1x68xi32>
    %108 = arith.cmpi eq, %1, %107 : vector<1x68xi32>
    %cst_27 = arith.constant 4.000000e+00 : f32
    %109 = vector.broadcast %cst_27 : f32 to vector<1x68xf32>
    %110 = arith.select %108, %109, %106 : vector<1x68xi1>, vector<1x68xf32>
    %c27_i32 = arith.constant 27 : i32
    %111 = vector.broadcast %c27_i32 : i32 to vector<1x68xi32>
    %112 = arith.cmpi eq, %1, %111 : vector<1x68xi32>
    %cst_28 = arith.constant 8.000000e+00 : f32
    %113 = vector.broadcast %cst_28 : f32 to vector<1x68xf32>
    %114 = arith.select %112, %113, %110 : vector<1x68xi1>, vector<1x68xf32>
    %c28_i32 = arith.constant 28 : i32
    %115 = vector.broadcast %c28_i32 : i32 to vector<1x68xi32>
    %116 = arith.cmpi eq, %1, %115 : vector<1x68xi32>
    %cst_29 = arith.constant 1.600000e+01 : f32
    %117 = vector.broadcast %cst_29 : f32 to vector<1x68xf32>
    %118 = arith.select %116, %117, %114 : vector<1x68xi1>, vector<1x68xf32>
    %c29_i32 = arith.constant 29 : i32
    %119 = vector.broadcast %c29_i32 : i32 to vector<1x68xi32>
    %120 = arith.cmpi eq, %1, %119 : vector<1x68xi32>
    %cst_30 = arith.constant 3.200000e+01 : f32
    %121 = vector.broadcast %cst_30 : f32 to vector<1x68xf32>
    %122 = arith.select %120, %121, %118 : vector<1x68xi1>, vector<1x68xf32>
    %c30_i32 = arith.constant 30 : i32
    %123 = vector.broadcast %c30_i32 : i32 to vector<1x68xi32>
    %124 = arith.cmpi eq, %1, %123 : vector<1x68xi32>
    %cst_31 = arith.constant 6.400000e+01 : f32
    %125 = vector.broadcast %cst_31 : f32 to vector<1x68xf32>
    %126 = arith.select %124, %125, %122 : vector<1x68xi1>, vector<1x68xf32>
    %c31_i32 = arith.constant 31 : i32
    %127 = vector.broadcast %c31_i32 : i32 to vector<1x68xi32>
    %128 = arith.cmpi eq, %1, %127 : vector<1x68xi32>
    %cst_32 = arith.constant 1.280000e+02 : f32
    %129 = vector.broadcast %cst_32 : f32 to vector<1x68xf32>
    %130 = arith.select %128, %129, %126 : vector<1x68xi1>, vector<1x68xf32>
    %c32_i32 = arith.constant 32 : i32
    %131 = vector.broadcast %c32_i32 : i32 to vector<1x68xi32>
    %132 = arith.cmpi eq, %1, %131 : vector<1x68xi32>
    %cst_33 = arith.constant 1.000000e+00 : f32
    %133 = vector.broadcast %cst_33 : f32 to vector<1x68xf32>
    %134 = arith.select %132, %133, %130 : vector<1x68xi1>, vector<1x68xf32>
    %c33_i32 = arith.constant 33 : i32
    %135 = vector.broadcast %c33_i32 : i32 to vector<1x68xi32>
    %136 = arith.cmpi eq, %1, %135 : vector<1x68xi32>
    %cst_34 = arith.constant 2.000000e+00 : f32
    %137 = vector.broadcast %cst_34 : f32 to vector<1x68xf32>
    %138 = arith.select %136, %137, %134 : vector<1x68xi1>, vector<1x68xf32>
    %c34_i32 = arith.constant 34 : i32
    %139 = vector.broadcast %c34_i32 : i32 to vector<1x68xi32>
    %140 = arith.cmpi eq, %1, %139 : vector<1x68xi32>
    %cst_35 = arith.constant 4.000000e+00 : f32
    %141 = vector.broadcast %cst_35 : f32 to vector<1x68xf32>
    %142 = arith.select %140, %141, %138 : vector<1x68xi1>, vector<1x68xf32>
    %c35_i32 = arith.constant 35 : i32
    %143 = vector.broadcast %c35_i32 : i32 to vector<1x68xi32>
    %144 = arith.cmpi eq, %1, %143 : vector<1x68xi32>
    %cst_36 = arith.constant 8.000000e+00 : f32
    %145 = vector.broadcast %cst_36 : f32 to vector<1x68xf32>
    %146 = arith.select %144, %145, %142 : vector<1x68xi1>, vector<1x68xf32>
    %c36_i32 = arith.constant 36 : i32
    %147 = vector.broadcast %c36_i32 : i32 to vector<1x68xi32>
    %148 = arith.cmpi eq, %1, %147 : vector<1x68xi32>
    %cst_37 = arith.constant 1.600000e+01 : f32
    %149 = vector.broadcast %cst_37 : f32 to vector<1x68xf32>
    %150 = arith.select %148, %149, %146 : vector<1x68xi1>, vector<1x68xf32>
    %c37_i32 = arith.constant 37 : i32
    %151 = vector.broadcast %c37_i32 : i32 to vector<1x68xi32>
    %152 = arith.cmpi eq, %1, %151 : vector<1x68xi32>
    %cst_38 = arith.constant 3.200000e+01 : f32
    %153 = vector.broadcast %cst_38 : f32 to vector<1x68xf32>
    %154 = arith.select %152, %153, %150 : vector<1x68xi1>, vector<1x68xf32>
    %c38_i32 = arith.constant 38 : i32
    %155 = vector.broadcast %c38_i32 : i32 to vector<1x68xi32>
    %156 = arith.cmpi eq, %1, %155 : vector<1x68xi32>
    %cst_39 = arith.constant 6.400000e+01 : f32
    %157 = vector.broadcast %cst_39 : f32 to vector<1x68xf32>
    %158 = arith.select %156, %157, %154 : vector<1x68xi1>, vector<1x68xf32>
    %c39_i32 = arith.constant 39 : i32
    %159 = vector.broadcast %c39_i32 : i32 to vector<1x68xi32>
    %160 = arith.cmpi eq, %1, %159 : vector<1x68xi32>
    %cst_40 = arith.constant 1.280000e+02 : f32
    %161 = vector.broadcast %cst_40 : f32 to vector<1x68xf32>
    %162 = arith.select %160, %161, %158 : vector<1x68xi1>, vector<1x68xf32>
    %c40_i32 = arith.constant 40 : i32
    %163 = vector.broadcast %c40_i32 : i32 to vector<1x68xi32>
    %164 = arith.cmpi eq, %1, %163 : vector<1x68xi32>
    %cst_41 = arith.constant 1.000000e+00 : f32
    %165 = vector.broadcast %cst_41 : f32 to vector<1x68xf32>
    %166 = arith.select %164, %165, %162 : vector<1x68xi1>, vector<1x68xf32>
    %c41_i32 = arith.constant 41 : i32
    %167 = vector.broadcast %c41_i32 : i32 to vector<1x68xi32>
    %168 = arith.cmpi eq, %1, %167 : vector<1x68xi32>
    %cst_42 = arith.constant 2.000000e+00 : f32
    %169 = vector.broadcast %cst_42 : f32 to vector<1x68xf32>
    %170 = arith.select %168, %169, %166 : vector<1x68xi1>, vector<1x68xf32>
    %c42_i32 = arith.constant 42 : i32
    %171 = vector.broadcast %c42_i32 : i32 to vector<1x68xi32>
    %172 = arith.cmpi eq, %1, %171 : vector<1x68xi32>
    %cst_43 = arith.constant 4.000000e+00 : f32
    %173 = vector.broadcast %cst_43 : f32 to vector<1x68xf32>
    %174 = arith.select %172, %173, %170 : vector<1x68xi1>, vector<1x68xf32>
    %c43_i32 = arith.constant 43 : i32
    %175 = vector.broadcast %c43_i32 : i32 to vector<1x68xi32>
    %176 = arith.cmpi eq, %1, %175 : vector<1x68xi32>
    %cst_44 = arith.constant 8.000000e+00 : f32
    %177 = vector.broadcast %cst_44 : f32 to vector<1x68xf32>
    %178 = arith.select %176, %177, %174 : vector<1x68xi1>, vector<1x68xf32>
    %c44_i32 = arith.constant 44 : i32
    %179 = vector.broadcast %c44_i32 : i32 to vector<1x68xi32>
    %180 = arith.cmpi eq, %1, %179 : vector<1x68xi32>
    %cst_45 = arith.constant 1.600000e+01 : f32
    %181 = vector.broadcast %cst_45 : f32 to vector<1x68xf32>
    %182 = arith.select %180, %181, %178 : vector<1x68xi1>, vector<1x68xf32>
    %c45_i32 = arith.constant 45 : i32
    %183 = vector.broadcast %c45_i32 : i32 to vector<1x68xi32>
    %184 = arith.cmpi eq, %1, %183 : vector<1x68xi32>
    %cst_46 = arith.constant 3.200000e+01 : f32
    %185 = vector.broadcast %cst_46 : f32 to vector<1x68xf32>
    %186 = arith.select %184, %185, %182 : vector<1x68xi1>, vector<1x68xf32>
    %c46_i32 = arith.constant 46 : i32
    %187 = vector.broadcast %c46_i32 : i32 to vector<1x68xi32>
    %188 = arith.cmpi eq, %1, %187 : vector<1x68xi32>
    %cst_47 = arith.constant 6.400000e+01 : f32
    %189 = vector.broadcast %cst_47 : f32 to vector<1x68xf32>
    %190 = arith.select %188, %189, %186 : vector<1x68xi1>, vector<1x68xf32>
    %c47_i32 = arith.constant 47 : i32
    %191 = vector.broadcast %c47_i32 : i32 to vector<1x68xi32>
    %192 = arith.cmpi eq, %1, %191 : vector<1x68xi32>
    %cst_48 = arith.constant 1.280000e+02 : f32
    %193 = vector.broadcast %cst_48 : f32 to vector<1x68xf32>
    %194 = arith.select %192, %193, %190 : vector<1x68xi1>, vector<1x68xf32>
    %c48_i32 = arith.constant 48 : i32
    %195 = vector.broadcast %c48_i32 : i32 to vector<1x68xi32>
    %196 = arith.cmpi eq, %1, %195 : vector<1x68xi32>
    %cst_49 = arith.constant 1.000000e+00 : f32
    %197 = vector.broadcast %cst_49 : f32 to vector<1x68xf32>
    %198 = arith.select %196, %197, %194 : vector<1x68xi1>, vector<1x68xf32>
    %c49_i32 = arith.constant 49 : i32
    %199 = vector.broadcast %c49_i32 : i32 to vector<1x68xi32>
    %200 = arith.cmpi eq, %1, %199 : vector<1x68xi32>
    %cst_50 = arith.constant 2.000000e+00 : f32
    %201 = vector.broadcast %cst_50 : f32 to vector<1x68xf32>
    %202 = arith.select %200, %201, %198 : vector<1x68xi1>, vector<1x68xf32>
    %c50_i32 = arith.constant 50 : i32
    %203 = vector.broadcast %c50_i32 : i32 to vector<1x68xi32>
    %204 = arith.cmpi eq, %1, %203 : vector<1x68xi32>
    %cst_51 = arith.constant 4.000000e+00 : f32
    %205 = vector.broadcast %cst_51 : f32 to vector<1x68xf32>
    %206 = arith.select %204, %205, %202 : vector<1x68xi1>, vector<1x68xf32>
    %c51_i32 = arith.constant 51 : i32
    %207 = vector.broadcast %c51_i32 : i32 to vector<1x68xi32>
    %208 = arith.cmpi eq, %1, %207 : vector<1x68xi32>
    %cst_52 = arith.constant 8.000000e+00 : f32
    %209 = vector.broadcast %cst_52 : f32 to vector<1x68xf32>
    %210 = arith.select %208, %209, %206 : vector<1x68xi1>, vector<1x68xf32>
    %c52_i32 = arith.constant 52 : i32
    %211 = vector.broadcast %c52_i32 : i32 to vector<1x68xi32>
    %212 = arith.cmpi eq, %1, %211 : vector<1x68xi32>
    %cst_53 = arith.constant 1.600000e+01 : f32
    %213 = vector.broadcast %cst_53 : f32 to vector<1x68xf32>
    %214 = arith.select %212, %213, %210 : vector<1x68xi1>, vector<1x68xf32>
    %c53_i32 = arith.constant 53 : i32
    %215 = vector.broadcast %c53_i32 : i32 to vector<1x68xi32>
    %216 = arith.cmpi eq, %1, %215 : vector<1x68xi32>
    %cst_54 = arith.constant 3.200000e+01 : f32
    %217 = vector.broadcast %cst_54 : f32 to vector<1x68xf32>
    %218 = arith.select %216, %217, %214 : vector<1x68xi1>, vector<1x68xf32>
    %c54_i32 = arith.constant 54 : i32
    %219 = vector.broadcast %c54_i32 : i32 to vector<1x68xi32>
    %220 = arith.cmpi eq, %1, %219 : vector<1x68xi32>
    %cst_55 = arith.constant 6.400000e+01 : f32
    %221 = vector.broadcast %cst_55 : f32 to vector<1x68xf32>
    %222 = arith.select %220, %221, %218 : vector<1x68xi1>, vector<1x68xf32>
    %c55_i32 = arith.constant 55 : i32
    %223 = vector.broadcast %c55_i32 : i32 to vector<1x68xi32>
    %224 = arith.cmpi eq, %1, %223 : vector<1x68xi32>
    %cst_56 = arith.constant 1.280000e+02 : f32
    %225 = vector.broadcast %cst_56 : f32 to vector<1x68xf32>
    %226 = arith.select %224, %225, %222 : vector<1x68xi1>, vector<1x68xf32>
    %c56_i32 = arith.constant 56 : i32
    %227 = vector.broadcast %c56_i32 : i32 to vector<1x68xi32>
    %228 = arith.cmpi eq, %1, %227 : vector<1x68xi32>
    %cst_57 = arith.constant 1.000000e+00 : f32
    %229 = vector.broadcast %cst_57 : f32 to vector<1x68xf32>
    %230 = arith.select %228, %229, %226 : vector<1x68xi1>, vector<1x68xf32>
    %c57_i32 = arith.constant 57 : i32
    %231 = vector.broadcast %c57_i32 : i32 to vector<1x68xi32>
    %232 = arith.cmpi eq, %1, %231 : vector<1x68xi32>
    %cst_58 = arith.constant 2.000000e+00 : f32
    %233 = vector.broadcast %cst_58 : f32 to vector<1x68xf32>
    %234 = arith.select %232, %233, %230 : vector<1x68xi1>, vector<1x68xf32>
    %c58_i32 = arith.constant 58 : i32
    %235 = vector.broadcast %c58_i32 : i32 to vector<1x68xi32>
    %236 = arith.cmpi eq, %1, %235 : vector<1x68xi32>
    %cst_59 = arith.constant 4.000000e+00 : f32
    %237 = vector.broadcast %cst_59 : f32 to vector<1x68xf32>
    %238 = arith.select %236, %237, %234 : vector<1x68xi1>, vector<1x68xf32>
    %c59_i32 = arith.constant 59 : i32
    %239 = vector.broadcast %c59_i32 : i32 to vector<1x68xi32>
    %240 = arith.cmpi eq, %1, %239 : vector<1x68xi32>
    %cst_60 = arith.constant 8.000000e+00 : f32
    %241 = vector.broadcast %cst_60 : f32 to vector<1x68xf32>
    %242 = arith.select %240, %241, %238 : vector<1x68xi1>, vector<1x68xf32>
    %c60_i32 = arith.constant 60 : i32
    %243 = vector.broadcast %c60_i32 : i32 to vector<1x68xi32>
    %244 = arith.cmpi eq, %1, %243 : vector<1x68xi32>
    %cst_61 = arith.constant 1.600000e+01 : f32
    %245 = vector.broadcast %cst_61 : f32 to vector<1x68xf32>
    %246 = arith.select %244, %245, %242 : vector<1x68xi1>, vector<1x68xf32>
    %c61_i32 = arith.constant 61 : i32
    %247 = vector.broadcast %c61_i32 : i32 to vector<1x68xi32>
    %248 = arith.cmpi eq, %1, %247 : vector<1x68xi32>
    %cst_62 = arith.constant 3.200000e+01 : f32
    %249 = vector.broadcast %cst_62 : f32 to vector<1x68xf32>
    %250 = arith.select %248, %249, %246 : vector<1x68xi1>, vector<1x68xf32>
    %c62_i32 = arith.constant 62 : i32
    %251 = vector.broadcast %c62_i32 : i32 to vector<1x68xi32>
    %252 = arith.cmpi eq, %1, %251 : vector<1x68xi32>
    %cst_63 = arith.constant 6.400000e+01 : f32
    %253 = vector.broadcast %cst_63 : f32 to vector<1x68xf32>
    %254 = arith.select %252, %253, %250 : vector<1x68xi1>, vector<1x68xf32>
    %c63_i32 = arith.constant 63 : i32
    %255 = vector.broadcast %c63_i32 : i32 to vector<1x68xi32>
    %256 = arith.cmpi eq, %1, %255 : vector<1x68xi32>
    %cst_64 = arith.constant 1.280000e+02 : f32
    %257 = vector.broadcast %cst_64 : f32 to vector<1x68xf32>
    %258 = arith.select %256, %257, %254 : vector<1x68xi1>, vector<1x68xf32>
    %c32_i32_65 = arith.constant 32 : i32
    %259 = vector.broadcast %c32_i32_65 : i32 to vector<1x68xi32>
    %260 = arith.cmpi sge, %1, %259 : vector<1x68xi32>
    %c64_i32 = arith.constant 64 : i32
    %261 = vector.broadcast %c64_i32 : i32 to vector<1x68xi32>
    %262 = arith.cmpi slt, %1, %261 : vector<1x68xi32>
    %263 = arith.andi %260, %262 : vector<1x68xi1>
    %cst_66 = arith.constant 1.57079637 : f32
    %cst_67 = arith.constant 0.000000e+00 : f32
    %264 = vector.broadcast %cst_66 : f32 to vector<1x68xf32>
    %265 = vector.broadcast %cst_67 : f32 to vector<1x68xf32>
    %266 = arith.select %263, %264, %265 : vector<1x68xi1>, vector<1x68xf32>
    %cst_68 = arith.constant 0.000000e+00 : f32
    %267 = vector.broadcast %cst_68 : f32 to vector<256x68xf32>
    %c0_i32_69 = arith.constant 0 : i32
    %268 = vector.broadcast %c0_i32_69 : i32 to vector<1x68xi32>
    %269 = arith.cmpi sge, %1, %268 : vector<1x68xi32>
    %c8_i32_70 = arith.constant 8 : i32
    %270 = vector.broadcast %c8_i32_70 : i32 to vector<1x68xi32>
    %271 = arith.cmpi slt, %1, %270 : vector<1x68xi32>
    %272 = arith.andi %269, %271 : vector<1x68xi1>
    %c32_i32_71 = arith.constant 32 : i32
    %273 = vector.broadcast %c32_i32_71 : i32 to vector<1x68xi32>
    %274 = arith.cmpi sge, %1, %273 : vector<1x68xi32>
    %c40_i32_72 = arith.constant 40 : i32
    %275 = vector.broadcast %c40_i32_72 : i32 to vector<1x68xi32>
    %276 = arith.cmpi slt, %1, %275 : vector<1x68xi32>
    %277 = arith.andi %274, %276 : vector<1x68xi1>
    %278 = arith.ori %272, %277 : vector<1x68xi1>
    %c64_i32_73 = arith.constant 64 : i32
    %279 = vector.broadcast %c64_i32_73 : i32 to vector<1x68xi32>
    %280 = arith.cmpi eq, %1, %279 : vector<1x68xi32>
    %281 = arith.ori %278, %280 : vector<1x68xi1>
    %282 = vector.extract_strided_slice %0 {offsets = [0, 0], sizes = [256, 1], strides = [1, 1]} : vector<256x4xf32> to vector<256x1xf32>
    %283 = vector.shape_cast %281 : vector<1x68xi1> to vector<1x68xi1>
    %284 = vector.broadcast %283 : vector<1x68xi1> to vector<256x68xi1>
    %285 = vector.shape_cast %282 : vector<256x1xf32> to vector<256x1xf32>
    %286 = vector.broadcast %285 : vector<256x1xf32> to vector<256x68xf32>
    %287 = arith.select %284, %286, %267 : vector<256x68xi1>, vector<256x68xf32>
    %c8_i32_74 = arith.constant 8 : i32
    %288 = vector.broadcast %c8_i32_74 : i32 to vector<1x68xi32>
    %289 = arith.cmpi sge, %1, %288 : vector<1x68xi32>
    %c16_i32_75 = arith.constant 16 : i32
    %290 = vector.broadcast %c16_i32_75 : i32 to vector<1x68xi32>
    %291 = arith.cmpi slt, %1, %290 : vector<1x68xi32>
    %292 = arith.andi %289, %291 : vector<1x68xi1>
    %c40_i32_76 = arith.constant 40 : i32
    %293 = vector.broadcast %c40_i32_76 : i32 to vector<1x68xi32>
    %294 = arith.cmpi sge, %1, %293 : vector<1x68xi32>
    %c48_i32_77 = arith.constant 48 : i32
    %295 = vector.broadcast %c48_i32_77 : i32 to vector<1x68xi32>
    %296 = arith.cmpi slt, %1, %295 : vector<1x68xi32>
    %297 = arith.andi %294, %296 : vector<1x68xi1>
    %298 = arith.ori %292, %297 : vector<1x68xi1>
    %c65_i32 = arith.constant 65 : i32
    %299 = vector.broadcast %c65_i32 : i32 to vector<1x68xi32>
    %300 = arith.cmpi eq, %1, %299 : vector<1x68xi32>
    %301 = arith.ori %298, %300 : vector<1x68xi1>
    %302 = vector.extract_strided_slice %0 {offsets = [0, 1], sizes = [256, 1], strides = [1, 1]} : vector<256x4xf32> to vector<256x1xf32>
    %303 = vector.shape_cast %301 : vector<1x68xi1> to vector<1x68xi1>
    %304 = vector.broadcast %303 : vector<1x68xi1> to vector<256x68xi1>
    %305 = vector.shape_cast %302 : vector<256x1xf32> to vector<256x1xf32>
    %306 = vector.broadcast %305 : vector<256x1xf32> to vector<256x68xf32>
    %307 = arith.select %304, %306, %287 : vector<256x68xi1>, vector<256x68xf32>
    %c16_i32_78 = arith.constant 16 : i32
    %308 = vector.broadcast %c16_i32_78 : i32 to vector<1x68xi32>
    %309 = arith.cmpi sge, %1, %308 : vector<1x68xi32>
    %c24_i32_79 = arith.constant 24 : i32
    %310 = vector.broadcast %c24_i32_79 : i32 to vector<1x68xi32>
    %311 = arith.cmpi slt, %1, %310 : vector<1x68xi32>
    %312 = arith.andi %309, %311 : vector<1x68xi1>
    %c48_i32_80 = arith.constant 48 : i32
    %313 = vector.broadcast %c48_i32_80 : i32 to vector<1x68xi32>
    %314 = arith.cmpi sge, %1, %313 : vector<1x68xi32>
    %c56_i32_81 = arith.constant 56 : i32
    %315 = vector.broadcast %c56_i32_81 : i32 to vector<1x68xi32>
    %316 = arith.cmpi slt, %1, %315 : vector<1x68xi32>
    %317 = arith.andi %314, %316 : vector<1x68xi1>
    %318 = arith.ori %312, %317 : vector<1x68xi1>
    %c66_i32 = arith.constant 66 : i32
    %319 = vector.broadcast %c66_i32 : i32 to vector<1x68xi32>
    %320 = arith.cmpi eq, %1, %319 : vector<1x68xi32>
    %321 = arith.ori %318, %320 : vector<1x68xi1>
    %322 = vector.extract_strided_slice %0 {offsets = [0, 2], sizes = [256, 1], strides = [1, 1]} : vector<256x4xf32> to vector<256x1xf32>
    %323 = vector.shape_cast %321 : vector<1x68xi1> to vector<1x68xi1>
    %324 = vector.broadcast %323 : vector<1x68xi1> to vector<256x68xi1>
    %325 = vector.shape_cast %322 : vector<256x1xf32> to vector<256x1xf32>
    %326 = vector.broadcast %325 : vector<256x1xf32> to vector<256x68xf32>
    %327 = arith.select %324, %326, %307 : vector<256x68xi1>, vector<256x68xf32>
    %c24_i32_82 = arith.constant 24 : i32
    %328 = vector.broadcast %c24_i32_82 : i32 to vector<1x68xi32>
    %329 = arith.cmpi sge, %1, %328 : vector<1x68xi32>
    %c32_i32_83 = arith.constant 32 : i32
    %330 = vector.broadcast %c32_i32_83 : i32 to vector<1x68xi32>
    %331 = arith.cmpi slt, %1, %330 : vector<1x68xi32>
    %332 = arith.andi %329, %331 : vector<1x68xi1>
    %c56_i32_84 = arith.constant 56 : i32
    %333 = vector.broadcast %c56_i32_84 : i32 to vector<1x68xi32>
    %334 = arith.cmpi sge, %1, %333 : vector<1x68xi32>
    %c64_i32_85 = arith.constant 64 : i32
    %335 = vector.broadcast %c64_i32_85 : i32 to vector<1x68xi32>
    %336 = arith.cmpi slt, %1, %335 : vector<1x68xi32>
    %337 = arith.andi %334, %336 : vector<1x68xi1>
    %338 = arith.ori %332, %337 : vector<1x68xi1>
    %c67_i32 = arith.constant 67 : i32
    %339 = vector.broadcast %c67_i32 : i32 to vector<1x68xi32>
    %340 = arith.cmpi eq, %1, %339 : vector<1x68xi32>
    %341 = arith.ori %338, %340 : vector<1x68xi1>
    %342 = vector.extract_strided_slice %0 {offsets = [0, 3], sizes = [256, 1], strides = [1, 1]} : vector<256x4xf32> to vector<256x1xf32>
    %343 = vector.shape_cast %341 : vector<1x68xi1> to vector<1x68xi1>
    %344 = vector.broadcast %343 : vector<1x68xi1> to vector<256x68xi1>
    %345 = vector.shape_cast %342 : vector<256x1xf32> to vector<256x1xf32>
    %346 = vector.broadcast %345 : vector<256x1xf32> to vector<256x68xf32>
    %347 = arith.select %344, %346, %327 : vector<256x68xi1>, vector<256x68xf32>
    %cst_86 = arith.constant 6.28318548 : f32
    %348 = vector.broadcast %cst_86 : f32 to vector<256x68xf32>
    %349 = arith.mulf %348, %347 : vector<256x68xf32>
    %350 = vector.broadcast %258 : vector<1x68xf32> to vector<256x68xf32>
    %351 = arith.mulf %349, %350 : vector<256x68xf32>
    %352 = vector.broadcast %266 : vector<1x68xf32> to vector<256x68xf32>
    %353 = arith.addf %351, %352 : vector<256x68xf32>
    %354 = math.sin %353 : vector<256x68xf32>
    %c64_i32_87 = arith.constant 64 : i32
    %355 = vector.broadcast %c64_i32_87 : i32 to vector<1x68xi32>
    %356 = arith.cmpi sge, %1, %355 : vector<1x68xi32>
    %357 = vector.shape_cast %356 : vector<1x68xi1> to vector<1x68xi1>
    %358 = vector.broadcast %357 : vector<1x68xi1> to vector<256x68xi1>
    %359 = arith.select %358, %347, %354 : vector<256x68xi1>, vector<256x68xf32>
    %c0_88 = arith.constant 0 : index
    %c0_89 = arith.constant 0 : index
    %360 = vector.load %arg2[%c0_88, %c0_89] : memref<256x68xf32, #tpu.memory_space<vmem>>, vector<256x68xf32>
    tpu.vector_store %arg2[%c0_88, %c0_89], %359 {strides = array<i32>} : memref<256x68xf32, #tpu.memory_space<vmem>>, vector<256x68xf32>,
    return
  }
  func.func @transform_0(%arg0: i32) -> (i32, i32) {
    %c0_i32 = arith.constant 0 : i32
    %c0_i32_0 = arith.constant 0 : i32
    return %arg0, %c0_i32 : i32, i32
  }
  func.func @transform_1(%arg0: i32) -> (i32, i32) {
    %c0_i32 = arith.constant 0 : i32
    %c0_i32_0 = arith.constant 0 : i32
    return %arg0, %c0_i32 : i32, i32
  }
}

</mosaic_0001>

<bundles_post_ra>
// kernel: tpu_custom_call.1
= control target key start
LH: loop header
LB: loop body
LE: loop exit
PB: predicated region body
PF: predicated region fallthrough
CT: control target
= control target key end

     0   :  { %v11097_v0 = vmov 0   ;;  %v6136_v33 = vmov 1   ;;  %v40_v52 = vlaneseq  ;;  %v6137_v60 = vmov 2   ;;  %s11095_s0 = inlined_call_operand.vmem [shape: f32[256,4], index: 0, kind: input, shape index: {}]   ;;  %s11096_s1 = inlined_call_operand.vmem [shape: f32[256,68], index: 1, kind: output, shape index: {}]  }
   0x1   :  { %6125 = vset.pattern.permute.xlu2 %v11097_v0  ;;  %6124 = vset.pattern.permute.xlu1 %v11097_v0  ;;  %v6161_v1 = vld [vmem:[%s11095_s0 + $0x20] sm:$0xff]  ;;  %v6166_v2 = vld [vmem:[%s11095_s0 + $0x10] sm:$0xff]  ;;  %v6180_v4 = vld [vmem:[%s11095_s0 + $0x28] sm:$0xff] }
   0x2   :  { %11176 = vst [vmem:[#allocation2_spill] sm:$0xff] %v6161_v1  ;;  %v6171_v3 = vld [vmem:[%s11095_s0] sm:$0xff]  ;;  %6123 = vset.pattern.permute.xlu0 %v11097_v0  ;;  %206 = vperm.xlu2 %6125, %v6161_v1   ;;  %v6185_v5 = vld [vmem:[%s11095_s0 + $0x18] sm:$0xff]  ;;  %v6190_v6 = vld [vmem:[%s11095_s0 + $0x8] sm:$0xff]  ;;  %v6421_v56 = vand.u32 127, %v40_v52 }
   0x3   :  { %11177 = vst [vmem:[#allocation3_spill] sm:$0xff] %v6171_v3  ;;  %196 = vperm.xlu1 %6124, %v6166_v2   ;;  %186 = vperm.xlu0 %6123, %v6171_v3   ;;  %v6198_v7 = vld [vmem:[%s11095_s0 + $0x40] sm:$0xff]  ;;  %v6203_v8 = vld [vmem:[%s11095_s0 + $0x38] sm:$0xff]  ;;  %v6208_v9 = vld [vmem:[%s11095_s0 + $0x30] sm:$0xff] }
   0x4   :  { %11178 = vst [vmem:[#allocation4_spill] sm:$0xff] %v6180_v4  ;;  %v6216_v10 = vld [vmem:[%s11095_s0 + $0x58] sm:$0xff]  ;;  %v6221_v11 = vld [vmem:[%s11095_s0 + $0x50] sm:$0xff]  ;;  %v6226_v12 = vld [vmem:[%s11095_s0 + $0x48] sm:$0xff]  ;;  %vm376_vm0 = vcmp.ge.s32.totalorder %v6421_v56, 8  ;;  %vm377_vm1 = vcmp.lt.s32.totalorder %v6421_v56, 16 }
   0x5   :  { %11179 = vst [vmem:[#allocation5_spill] sm:$0xff] %v6185_v5  ;;  %v6234_v13 = vld [vmem:[%s11095_s0 + $0x70] sm:$0xff]  ;;  %v6239_v14 = vld [vmem:[%s11095_s0 + $0x68] sm:$0xff]  ;;  %v6244_v15 = vld [vmem:[%s11095_s0 + $0x60] sm:$0xff]  ;;  %vm379_vm2 = vcmp.ge.s32.totalorder %v6421_v56, 40  ;;  %vm380_vm3 = vcmp.lt.s32.totalorder %v6421_v56, 48 }
   0x6   :  { %11180 = vst [vmem:[#allocation6_spill] sm:$0xff] %v6198_v7  ;;  %v6252_v16 = vld [vmem:[%s11095_s0 + $0x88] sm:$0xff]  ;;  %v6257_v17 = vld [vmem:[%s11095_s0 + $0x80] sm:$0xff]  ;;  %v6262_v18 = vld [vmem:[%s11095_s0 + $0x78] sm:$0xff]  ;;  %vm170_vm4 = vcmp.ge.s32.totalorder %v6421_v56, 32  ;;  %vm177_vm5 = vcmp.lt.s32.totalorder %v6421_v56, 40 }
   0x7   :  { %11181 = vst [vmem:[#allocation7_spill] sm:$0xff] %v6216_v10  ;;  %v6270_v19 = vld [vmem:[%s11095_s0 + $0xa0] sm:$0xff]  ;;  %v6275_v20 = vld [vmem:[%s11095_s0 + $0x98] sm:$0xff]  ;;  %v6280_v21 = vld [vmem:[%s11095_s0 + $0x90] sm:$0xff]  ;;  %vm175_vm8 = vcmp.lt.s32.totalorder %v6421_v56, 8  ;;  %vm383_vm11 = vcmp.eq.s32.totalorder %v6421_v56, 65 }
   0x8   :  { %11182 = vst [vmem:[#allocation8_spill] sm:$0xff] %v6226_v12  ;;  %v6288_v22 = vld [vmem:[%s11095_s0 + $0xb8] sm:$0xff]  ;;  %v6293_v23 = vld [vmem:[%s11095_s0 + $0xb0] sm:$0xff]  ;;  %v6298_v24 = vld [vmem:[%s11095_s0 + $0xa8] sm:$0xff]  ;;  %vm180_vm13 = vcmp.eq.s32.totalorder %v6421_v56, 64 }
   0x9   :  { %v6306_v25 = vld [vmem:[%s11095_s0 + $0xd0] sm:$0xff]  ;;  %v6311_v26 = vld [vmem:[%s11095_s0 + $0xc8] sm:$0xff]  ;;  %v6316_v27 = vld [vmem:[%s11095_s0 + $0xc0] sm:$0xff] }
   0xa   :  { %211 = vperm.xlu2 %6125, %v6180_v4   ;;  %v6324_v28 = vld [vmem:[%s11095_s0 + $0xe8] sm:$0xff]  ;;  %v6329_v29 = vld [vmem:[%s11095_s0 + $0xe0] sm:$0xff]  ;;  %v6334_v30 = vld [vmem:[%s11095_s0 + $0xd8] sm:$0xff] }
   0xb   :  { %201 = vperm.xlu1 %6124, %v6185_v5   ;;  %191 = vperm.xlu0 %6123, %v6190_v6   ;;  %11183 = vst [vmem:[#allocation9_spill] sm:$0xff] %v6324_v28  ;;  %v6342_v31 = vld [vmem:[%s11095_s0 + $0xf8] sm:$0xff]  ;;  %v6347_v32 = vld [vmem:[%s11095_s0 + $0xf0] sm:$0xff]  ;;  %vm378_vm6 = vmand %vm376_vm0, %vm377_vm1  ;;  %vm547_vm0 = vcmp.ge.s32.totalorder %v6421_v56, 16  ;;  %vm548_vm1 = vcmp.lt.s32.totalorder %v6421_v56, 24 }
   0xc   :  { %11184 = vst [vmem:[#allocation10_spill] sm:$0xff] %v6329_v29  ;;  %vm381_vm7 = vmand %vm379_vm2, %vm380_vm3  ;;  %vm550_vm2 = vcmp.ge.s32.totalorder %v6421_v56, 48  ;;  %vm551_vm3 = vcmp.lt.s32.totalorder %v6421_v56, 56 }
   0xd   :  { %11185 = vst [vmem:[#allocation11_spill] sm:$0xff] %v6342_v31  ;;  %vm178_vm9 = vmand %vm170_vm4, %vm177_vm5 }
   0xe   :  { %vm382_vm10 = vmor %vm378_vm6, %vm381_vm7 }
   0xf   :  { %vm179_vm12 = vmor %vm175_vm8, %vm178_vm9  ;;  %vm554_vm8 = vcmp.eq.s32.totalorder %v6421_v56, 66  ;;  %vm42_vm9 = vcmp.eq.s32.totalorder %v6421_v56, 0 }
  0x10   :  { %vm6444_vm14 = vmor %vm382_vm10, %vm383_vm11  ;;  %vm44_vm11 = vcmp.eq.s32.totalorder %v6421_v56, 1 }
  0x11   :  { %vm6448_vm15 = vmor %vm179_vm12, %vm180_vm13  ;;  %vm46_vm12 = vcmp.eq.s32.totalorder %v6421_v56, 2  ;;  %vm48_vm13 = vcmp.eq.s32.totalorder %v6421_v56, 3 }
  0x12   :  { %226 = vperm.xlu2 %6125, %v6198_v7   ;;  %vm549_vm5 = vmand %vm547_vm0, %vm548_vm1  ;;  %vm50_vm0 = vcmp.eq.s32.totalorder %v6421_v56, 4  ;;  %vm52_vm1 = vcmp.eq.s32.totalorder %v6421_v56, 5 }
  0x13   :  { %221 = vperm.xlu1 %6124, %v6203_v8   ;;  %216 = vperm.xlu0 %6123, %v6208_v9   ;;  %vm552_vm6 = vmand %vm550_vm2, %vm551_vm3  ;;  %vm54_vm2 = vcmp.eq.s32.totalorder %v6421_v56, 6  ;;  %vm56_vm3 = vcmp.eq.s32.totalorder %v6421_v56, 7 }
  0x14   :  { %vm553_vm7 = vmor %vm549_vm5, %vm552_vm6  ;;  %vm58_vm5 = vcmp.eq.s32.totalorder %v6421_v56, 8  ;;  %vm60_vm6 = vcmp.eq.s32.totalorder %v6421_v56, 9 }
  0x15   :  { %vm6681_vm10 = vmor %vm553_vm7, %vm554_vm8  ;;  %vm62_vm7 = vcmp.eq.s32.totalorder %v6421_v56, 10  ;;  %vm64_vm8 = vcmp.eq.s32.totalorder %v6421_v56, 11 }
  0x1a   :  { %241 = vperm.xlu2 %6125, %v6216_v10  }
  0x1b   :  { %236 = vperm.xlu1 %6124, %v6221_v11   ;;  %231 = vperm.xlu0 %6123, %v6226_v12  }
  0x22   :  { %256 = vperm.xlu2 %6125, %v6234_v13  }
  0x23   :  { %251 = vperm.xlu1 %6124, %v6239_v14   ;;  %246 = vperm.xlu0 %6123, %v6244_v15  }
  0x2a   :  { %271 = vperm.xlu2 %6125, %v6252_v16  }
  0x2b   :  { %266 = vperm.xlu1 %6124, %v6257_v17   ;;  %261 = vperm.xlu0 %6123, %v6262_v18  }
  0x32   :  { %286 = vperm.xlu2 %6125, %v6270_v19  }
  0x33   :  { %281 = vperm.xlu1 %6124, %v6275_v20   ;;  %276 = vperm.xlu0 %6123, %v6280_v21  }
  0x3a   :  { %301 = vperm.xlu2 %6125, %v6288_v22  }
  0x3b   :  { %296 = vperm.xlu1 %6124, %v6293_v23   ;;  %291 = vperm.xlu0 %6123, %v6298_v24  }
  0x42   :  { %316 = vperm.xlu2 %6125, %v6306_v25  }
  0x43   :  { %311 = vperm.xlu1 %6124, %v6311_v26   ;;  %306 = vperm.xlu0 %6123, %v6316_v27  }
  0x4a   :  { %331 = vperm.xlu2 %6125, %v6324_v28  }
  0x4b   :  { %326 = vperm.xlu1 %6124, %v6329_v29   ;;  %321 = vperm.xlu0 %6123, %v6334_v30  }
  0x52   :  { %6126 = vset.pattern.permute.xlu2 %v6136_v33 }
  0x53   :  { %341 = vperm.xlu1 %6124, %v6342_v31   ;;  %336 = vperm.xlu0 %6123, %v6347_v32  }
  0x54   :  { %388 = vperm.xlu2 %6126, %v6171_v3  }
  0x5b   :  { %6128 = vset.pattern.permute.xlu1 %v6136_v33  ;;  %6127 = vset.pattern.permute.xlu0 %v6136_v33 }
  0x5c   :  { %396 = vperm.xlu1 %6128, %v6166_v2   ;;  %400 = vperm.xlu2 %6126, %v6185_v5   ;;  %v6354_v34 = vpop.permute.xlu2 %206 }
  0x5d   :  { %392 = vperm.xlu0 %6127, %v6190_v6  }
  0x64   :  { %404 = vperm.xlu1 %6128, %v6161_v1   ;;  %408 = vperm.xlu2 %6126, %v6180_v4   ;;  %v6359_v35 = vpop.permute.xlu2 %211 }
  0x65   :  { %412 = vperm.xlu0 %6127, %v6208_v9  }
  0x6c   :  { %416 = vperm.xlu1 %6128, %v6203_v8   ;;  %420 = vperm.xlu2 %6126, %v6198_v7   ;;  %v6364_v36 = vpop.permute.xlu2 %226 }
  0x6d   :  { %424 = vperm.xlu0 %6127, %v6226_v12  }
  0x74   :  { %428 = vperm.xlu1 %6128, %v6221_v11   ;;  %432 = vperm.xlu2 %6126, %v6216_v10   ;;  %v6369_v37 = vpop.permute.xlu2 %241 }
  0x75   :  { %436 = vperm.xlu0 %6127, %v6244_v15   ;;  %v6372_v38 = vpop.permute.xlu1 %196  ;;  %v6374_v39 = vpop.permute.xlu0 %186 }
  0x76   :  { %v344_v52 = vsel %vm6448_vm15, %v6374_v39, 0.0 }
  0x7c   :  { %440 = vperm.xlu1 %6128, %v6239_v14   ;;  %444 = vperm.xlu2 %6126, %v6234_v13   ;;  %v6378_v40 = vpop.permute.xlu2 %256 }
  0x7d   :  { %448 = vperm.xlu0 %6127, %v6262_v18   ;;  %v6381_v41 = vpop.permute.xlu1 %201  ;;  %v6383_v42 = vpop.permute.xlu0 %191 }
  0x7e   :  { %11186 = vst [vmem:[#allocation12_spill] sm:$0xff] %v6381_v41 }
  0x84   :  { %452 = vperm.xlu1 %6128, %v6257_v17   ;;  %456 = vperm.xlu2 %6126, %v6252_v16   ;;  %v6387_v43 = vpop.permute.xlu2 %271 }
  0x85   :  { %460 = vperm.xlu0 %6127, %v6280_v21   ;;  %v6390_v44 = vpop.permute.xlu1 %221  ;;  %v6392_v45 = vpop.permute.xlu0 %216 }
  0x8c   :  { %464 = vperm.xlu1 %6128, %v6275_v20   ;;  %468 = vperm.xlu2 %6126, %v6270_v19   ;;  %v6396_v46 = vpop.permute.xlu2 %286 }
  0x8d   :  { %472 = vperm.xlu0 %6127, %v6298_v24   ;;  %v6399_v47 = vpop.permute.xlu1 %236  ;;  %v6401_v48 = vpop.permute.xlu0 %231 }
  0x94   :  { %476 = vperm.xlu1 %6128, %v6293_v23   ;;  %480 = vperm.xlu2 %6126, %v6288_v22   ;;  %v6405_v49 = vpop.permute.xlu2 %301 }
  0x95   :  { %484 = vperm.xlu0 %6127, %v6316_v27   ;;  %v6408_v50 = vpop.permute.xlu1 %251  ;;  %v6410_v51 = vpop.permute.xlu0 %246 }
  0x9c   :  { %488 = vperm.xlu1 %6128, %v6311_v26   ;;  %492 = vperm.xlu2 %6126, %v6306_v25   ;;  %v6414_v53 = vpop.permute.xlu2 %316 }
  0x9d   :  { %496 = vperm.xlu0 %6127, %v6334_v30   ;;  %v6417_v54 = vpop.permute.xlu1 %266  ;;  %v6419_v55 = vpop.permute.xlu0 %261 }
  0xa4   :  { %500 = vperm.xlu1 %6128, %v6329_v29   ;;  %504 = vperm.xlu2 %6126, %v6324_v28   ;;  %v6431_v57 = vpop.permute.xlu2 %331 }
  0xa5   :  { %508 = vperm.xlu0 %6127, %v6347_v32   ;;  %v6434_v58 = vpop.permute.xlu1 %281  ;;  %v6436_v59 = vpop.permute.xlu0 %276 }
  0xac   :  { %512 = vperm.xlu1 %6128, %v6342_v31   ;;  %6129 = vset.pattern.permute.xlu2 %v6137_v60 }
  0xad   :  { %6130 = vset.pattern.permute.xlu0 %v6137_v60  ;;  %v6452_v63 = vpop.permute.xlu1 %296  ;;  %559 = vperm.xlu2 %6129, %v6171_v3   ;;  %v6455_v33 = vpop.permute.xlu0 %291 }
  0xae   :  { %11191 = vst [vmem:[#allocation13_spill] sm:$0xff] %v6452_v63  ;;  %563 = vperm.xlu0 %6130, %v6190_v6   ;;  %v389_v0 = vpop.permute.xlu2 %388 }
  0xaf   :  { %v6463_v41 = vsel %vm6444_vm14, %v389_v0, %v344_v52 }
  0xb4   :  { %6131 = vset.pattern.permute.xlu1 %v6137_v60  ;;  %v349_v60 = vsel %vm6448_vm15, %v6359_v35, 0.0 }
  0xb5   :  { %567 = vperm.xlu1 %6131, %v6166_v2   ;;  %v6466_v31 = vpop.permute.xlu1 %311  ;;  %571 = vperm.xlu2 %6129, %v6185_v5   ;;  %v6469_v3 = vpop.permute.xlu0 %306 }
  0xb6   :  { %583 = vperm.xlu0 %6130, %v6208_v9   ;;  %v6472_v63 = vpop.permute.xlu2 %400 }
  0xbd   :  { %575 = vperm.xlu1 %6131, %v6161_v1   ;;  %v6475_v39 = vpop.permute.xlu1 %326  ;;  %579 = vperm.xlu2 %6129, %v6180_v4   ;;  %v6478_v0 = vpop.permute.xlu0 %321 }
  0xbe   :  { %11192 = vst [vmem:[#allocation14_spill] sm:$0xff] %v6475_v39  ;;  %595 = vperm.xlu0 %6130, %v6226_v12   ;;  %v409_v52 = vpop.permute.xlu2 %408  ;;  %v352_v39 = vsel %vm6448_vm15, %v6364_v36, 0.0 }
  0xbf   :  { %v6486_v5 = vsel %vm6444_vm14, %v409_v52, %v349_v60  ;;  %v355_v60 = vsel %vm6448_vm15, %v6369_v37, 0.0  ;;  %v346_v52 = vsel %vm6448_vm15, %v6372_v38, 0.0 }
  0xc5   :  { %587 = vperm.xlu1 %6131, %v6203_v8   ;;  %v6489_v1 = vpop.permute.xlu1 %341  ;;  %591 = vperm.xlu2 %6129, %v6198_v7   ;;  %v6492_v4 = vpop.permute.xlu0 %336 }
  0xc6   :  { %607 = vperm.xlu0 %6130, %v6244_v15   ;;  %v421_v35 = vpop.permute.xlu2 %420 }
  0xc7   :  { %v6500_v12 = vsel %vm6444_vm14, %v421_v35, %v352_v39  ;;  %v345_v39 = vsel %vm6448_vm15, %v6383_v42, 0.0  ;;  %v348_v42 = vsel %vm6448_vm15, %v6354_v34, 0.0 }
  0xcd   :  { %599 = vperm.xlu1 %6131, %v6221_v11   ;;  %603 = vperm.xlu2 %6129, %v6216_v10  }
  0xce   :  { %619 = vperm.xlu0 %6130, %v6262_v18   ;;  %v397_v36 = vpop.permute.xlu1 %396  ;;  %v433_v7 = vpop.permute.xlu2 %432 }
  0xcf   :  { %v6516_v35 = vsel %vm6444_vm14, %v397_v36, %v346_v52  ;;  %v6520_v10 = vsel %vm6444_vm14, %v433_v7, %v355_v60  ;;  %v393_v37 = vpop.permute.xlu0 %392  ;;  %v358_v52 = vsel %vm6448_vm15, %v6378_v40, 0.0  ;;  %v350_v36 = vsel %vm6448_vm15, %v6392_v45, 0.0 }
  0xd0   :  { %11193 = vst [vmem:[#allocation15_spill] sm:$0xff] %v6516_v35  ;;  %v6524_v38 = vsel %vm6444_vm14, %v393_v37, %v345_v39  ;;  %v361_v45 = vsel %vm6448_vm15, %v6387_v43, 0.0 }
  0xd1   :  { %11194 = vst [vmem:[#allocation16_spill] sm:$0xff] %v6520_v10 }
  0xd5   :  { %611 = vperm.xlu1 %6131, %v6239_v14   ;;  %615 = vperm.xlu2 %6129, %v6234_v13  }
  0xd6   :  { %631 = vperm.xlu0 %6130, %v6280_v21   ;;  %v405_v7 = vpop.permute.xlu1 %404  ;;  %v445_v60 = vpop.permute.xlu2 %444 }
  0xd7   :  { %v6540_v39 = vsel %vm6444_vm14, %v405_v7, %v348_v42  ;;  %v6544_v37 = vsel %vm6444_vm14, %v445_v60, %v358_v52  ;;  %v413_v34 = vpop.permute.xlu0 %412  ;;  %v351_v42 = vsel %vm6448_vm15, %v6390_v44, 0.0  ;;  %v353_v60 = vsel %vm6448_vm15, %v6401_v48, 0.0 }
  0xd8   :  { %11195 = vst [vmem:[#allocation17_spill] sm:$0xff] %v6540_v39  ;;  %v6548_v40 = vsel %vm6444_vm14, %v413_v34, %v350_v36  ;;  %v364_v48 = vsel %vm6448_vm15, %v6396_v46, 0.0 }
  0xd9   :  { %11196 = vst [vmem:[#allocation18_spill] sm:$0xff] %v6544_v37 }
  0xdd   :  { %623 = vperm.xlu1 %6131, %v6257_v17   ;;  %627 = vperm.xlu2 %6129, %v6252_v16  }
  0xde   :  { %643 = vperm.xlu0 %6130, %v6298_v24   ;;  %v417_v52 = vpop.permute.xlu1 %416  ;;  %v457_v7 = vpop.permute.xlu2 %456 }
  0xdf   :  { %v6564_v36 = vsel %vm6444_vm14, %v417_v52, %v351_v42  ;;  %v6568_v34 = vsel %vm6444_vm14, %v457_v7, %v361_v45  ;;  %v425_v43 = vpop.permute.xlu0 %424  ;;  %v354_v42 = vsel %vm6448_vm15, %v6399_v47, 0.0  ;;  %v356_v7 = vsel %vm6448_vm15, %v6410_v51, 0.0 }
  0xe0   :  { %11197 = vst [vmem:[#allocation19_spill] sm:$0xff] %v6564_v36  ;;  %v6572_v44 = vsel %vm6444_vm14, %v425_v43, %v353_v60  ;;  %v367_v51 = vsel %vm6448_vm15, %v6405_v49, 0.0 }
  0xe1   :  { %11198 = vst [vmem:[#allocation20_spill] sm:$0xff] %v6568_v34 }
  0xe2   :  { %11199 = vst [vmem:[#allocation21_spill] sm:$0xff] %v6572_v44 }
  0xe5   :  { %635 = vperm.xlu1 %6131, %v6275_v20   ;;  %639 = vperm.xlu2 %6129, %v6270_v19  }
  0xe6   :  { %655 = vperm.xlu0 %6130, %v6316_v27   ;;  %v429_v45 = vpop.permute.xlu1 %428  ;;  %v469_v52 = vpop.permute.xlu2 %468 }
  0xe7   :  { %v6588_v60 = vsel %vm6444_vm14, %v429_v45, %v354_v42  ;;  %v6592_v43 = vsel %vm6444_vm14, %v469_v52, %v364_v48  ;;  %v437_v46 = vpop.permute.xlu0 %436  ;;  %v357_v42 = vsel %vm6448_vm15, %v6408_v50, 0.0  ;;  %v359_v52 = vsel %vm6448_vm15, %v6419_v55, 0.0 }
  0xe8   :  { %11200 = vst [vmem:[#allocation22_spill] sm:$0xff] %v6588_v60  ;;  %v6596_v47 = vsel %vm6444_vm14, %v437_v46, %v356_v7  ;;  %v370_v55 = vsel %vm6448_vm15, %v6414_v53, 0.0  ;;  %v11268_v60 = vmov 683565275  }
  0xe9   :  { %11201 = vst [vmem:[#allocation23_spill] sm:$0xff] %v6592_v43 }
  0xea   :  { %11202 = vst [vmem:[#allocation24_spill] sm:$0xff] %v6596_v47 }
  0xed   :  { %647 = vperm.xlu1 %6131, %v6293_v23   ;;  %651 = vperm.xlu2 %6129, %v6288_v22  }
  0xee   :  { %667 = vperm.xlu0 %6130, %v6334_v30   ;;  %v441_v48 = vpop.permute.xlu1 %440  ;;  %v481_v45 = vpop.permute.xlu2 %480 }
  0xef   :  { %v6612_v7 = vsel %vm6444_vm14, %v441_v48, %v357_v42  ;;  %v6616_v46 = vsel %vm6444_vm14, %v481_v45, %v367_v51  ;;  %v449_v49 = vpop.permute.xlu0 %448  ;;  %v360_v42 = vsel %vm6448_vm15, %v6417_v54, 0.0  ;;  %v362_v45 = vsel %vm6448_vm15, %v6436_v59, 0.0 }
  0xf0   :  { %11203 = vst [vmem:[#allocation25_spill] sm:$0xff] %v6612_v7  ;;  %v6620_v50 = vsel %vm6444_vm14, %v449_v49, %v359_v52  ;;  %v373_v59 = vsel %vm6448_vm15, %v6431_v57, 0.0  ;;  %v11154_v7 = vmov 1326507024  }
  0xf1   :  { %11204 = vst [vmem:[#allocation26_spill] sm:$0xff] %v6616_v46 }
  0xf2   :  { %11205 = vst [vmem:[#allocation27_spill] sm:$0xff] %v6620_v50 }
  0xf5   :  { %659 = vperm.xlu1 %6131, %v6311_v26   ;;  %663 = vperm.xlu2 %6129, %v6306_v25  }
  0xf6   :  { %679 = vperm.xlu0 %6130, %v6347_v32   ;;  %v453_v51 = vpop.permute.xlu1 %452  ;;  %v493_v48 = vpop.permute.xlu2 %492 }
  0xf7   :  { %v6636_v52 = vsel %vm6444_vm14, %v453_v51, %v360_v42  ;;  %v6640_v49 = vsel %vm6444_vm14, %v493_v48, %v370_v55  ;;  %v461_v53 = vpop.permute.xlu0 %460  ;;  %v363_v55 = vsel %vm6448_vm15, %v6434_v58, 0.0  ;;  %v6138_v42 = vmov 3  }
  0xf8   :  { %11206 = vst [vmem:[#allocation28_spill] sm:$0xff] %v6636_v52  ;;  %v6644_v54 = vsel %vm6444_vm14, %v461_v53, %v362_v45  ;;  %v365_v45 = vsel %vm6448_vm15, %v6455_v33, 0.0  ;;  %v11212_v33 = vld [vmem:[#allocation11_spill] sm:$0xff]  ;;  %v11143_v52 = vmov 2475754826  }
  0xf9   :  { %11207 = vst [vmem:[#allocation29_spill] sm:$0xff] %v6640_v49 }
  0xfa   :  { %11208 = vst [vmem:[#allocation30_spill] sm:$0xff] %v6644_v54 }
  0xfd   :  { %671 = vperm.xlu1 %6131, %v6329_v29   ;;  %675 = vperm.xlu2 %6129, %v6324_v28  }
  0xfe   :  { %6133 = vset.pattern.permute.xlu0 %v6138_v42  ;;  %v465_v51 = vpop.permute.xlu1 %464  ;;  %v505_v48 = vpop.permute.xlu2 %504 }
  0xff   :  { %v6663_v53 = vsel %vm6444_vm14, %v465_v51, %v363_v55  ;;  %v6667_v57 = vsel %vm6444_vm14, %v505_v48, %v373_v59  ;;  %733 = vperm.xlu0 %6133, %v6190_v6   ;;  %v473_v58 = vpop.permute.xlu0 %472  ;;  %v11111_v59 = vmov 0.0   ;;  %v11215_v51 = vld [vmem:[#allocation13_spill] sm:$0xff] }
 0x100   :  { %11209 = vst [vmem:[#allocation31_spill] sm:$0xff] %v6663_v53  ;;  %v6676_v28 = vsel %vm6444_vm14, %v473_v58, %v365_v45  ;;  %v43_v55 = vsel %vm42_vm9, 1.0, %v11111_v59  ;;  %v366_v48 = vsel %vm6448_vm15, %v11215_v51, 0.0  ;;  %v11216_v58 = vld [vmem:[#allocation3_spill] sm:$0xff]  ;;  %vm66_vm9 = vcmp.eq.s32.totalorder %v6421_v56, 12 }
 0x101   :  { %11210 = vst [vmem:[#allocation32_spill] sm:$0xff] %v6667_v57  ;;  %v45_v57 = vsel %vm44_vm11, 2.0, %v43_v55  ;;  %vm68_vm11 = vcmp.eq.s32.totalorder %v6421_v56, 13 }
 0x102   :  { %11211 = vst [vmem:[#allocation33_spill] sm:$0xff] %v6676_v28  ;;  %v47_v51 = vsel %vm46_vm12, 4.0, %v45_v57  ;;  %vm70_vm12 = vcmp.eq.s32.totalorder %v6421_v56, 14  ;;  %v11148_v28 = vmov 2102212464  }
 0x105   :  { %683 = vperm.xlu1 %6131, %v11212_v33   ;;  %6132 = vset.pattern.permute.xlu2 %v6138_v42  ;;  %v368_v33 = vsel %vm6448_vm15, %v6469_v3, 0.0 }
 0x106   :  { %v477_v45 = vpop.permute.xlu1 %476  ;;  %729 = vperm.xlu2 %6132, %v11216_v58   ;;  %v49_v58 = vsel %vm48_vm13, 8.0, %v47_v51  ;;  %vm72_vm13 = vcmp.eq.s32.totalorder %v6421_v56, 15 }
 0x107   :  { %v6697_v53 = vsel %vm6444_vm14, %v477_v45, %v366_v48  ;;  %753 = vperm.xlu0 %6133, %v6208_v9   ;;  %v485_v59 = vpop.permute.xlu0 %484  ;;  %v6700_v29 = vpop.permute.xlu2 %559  ;;  %v51_v48 = vsel %vm50_vm0, 16.0, %v49_v58  ;;  %v369_v58 = vsel %vm6448_vm15, %v6466_v31, 0.0  ;;  %vm74_vm0 = vcmp.eq.s32.totalorder %v6421_v56, 16 }
 0x108   :  { %11217 = vst [vmem:[#allocation13_spill] sm:$0xff] %v6697_v53  ;;  %v6705_v55 = vsel %vm6444_vm14, %v485_v59, %v368_v33  ;;  %v53_v9 = vsel %vm52_vm1, 32.0, %v51_v48  ;;  %v11219_v33 = vld [vmem:[#allocation12_spill] sm:$0xff]  ;;  %vm76_vm1 = vcmp.eq.s32.totalorder %v6421_v56, 17  ;;  %v11263_v53 = vmov 0.0  }
 0x109   :  { %11218 = vst [vmem:[#allocation3_spill] sm:$0xff] %v6705_v55  ;;  %v55_v57 = vsel %vm54_vm2, 64.0, %v53_v9  ;;  %v347_v59 = vsel %vm6448_vm15, %v11219_v33, 0.0  ;;  %vm78_vm2 = vcmp.eq.s32.totalorder %v6421_v56, 18 }
 0x10a   :  { %v57_v45 = vsel %vm56_vm3, 128.0, %v55_v57  ;;  %v6726_v48 = vsel %vm6444_vm14, %v6472_v63, %v347_v59  ;;  %v11220_v57 = vld [vmem:[#allocation5_spill] sm:$0xff]  ;;  %vm80_vm3 = vcmp.eq.s32.totalorder %v6421_v56, 19 }
 0x10b   :  { %v59_v51 = vsel %vm58_vm5, 1.0, %v57_v45  ;;  %v11222_v45 = vld [vmem:[#allocation8_spill] sm:$0xff]  ;;  %vm82_vm5 = vcmp.eq.s32.totalorder %v6421_v56, 20 }
 0x10c   :  { %v61_v3 = vsel %vm60_vm6, 2.0, %v59_v51  ;;  %vm84_vm6 = vcmp.eq.s32.totalorder %v6421_v56, 21 }
 0x10d   :  { %6134 = vset.pattern.permute.xlu1 %v6138_v42  ;;  %v371_v42 = vsel %vm6448_vm15, %v6478_v0, 0.0  ;;  %v11226_v0 = vld [vmem:[#allocation4_spill] sm:$0xff] }
 0x10e   :  { %737 = vperm.xlu1 %6134, %v6166_v2   ;;  %v489_v9 = vpop.permute.xlu1 %488  ;;  %741 = vperm.xlu2 %6132, %v11220_v57   ;;  %v63_v2 = vsel %vm62_vm7, 4.0, %v61_v3  ;;  %vm86_vm7 = vcmp.eq.s32.totalorder %v6421_v56, 22 }
 0x10f   :  { %v6736_v31 = vsel %vm6444_vm14, %v489_v9, %v369_v58  ;;  %765 = vperm.xlu0 %6133, %v11222_v45   ;;  %v497_v63 = vpop.permute.xlu0 %496  ;;  %v6739_v33 = vpop.permute.xlu2 %571  ;;  %v65_v51 = vsel %vm64_vm8, 8.0, %v63_v2  ;;  %v11224_v45 = vld [vmem:[#allocation14_spill] sm:$0xff]  ;;  %vm88_vm8 = vcmp.eq.s32.totalorder %v6421_v56, 23 }
 0x110   :  { %11221 = vst [vmem:[#allocation12_spill] sm:$0xff] %v6736_v31  ;;  %v6744_v59 = vsel %vm6444_vm14, %v497_v63, %v371_v42  ;;  %v67_v58 = vsel %vm66_vm9, 16.0, %v65_v51  ;;  %v372_v63 = vsel %vm6448_vm15, %v11224_v45, 0.0  ;;  %v11225_v2 = vld [vmem:[#allocation2_spill] sm:$0xff]  ;;  %vm90_vm9 = vcmp.eq.s32.totalorder %v6421_v56, 24 }
 0x111   :  { %11223 = vst [vmem:[#allocation5_spill] sm:$0xff] %v6744_v59  ;;  %v69_v9 = vsel %vm68_vm11, 32.0, %v67_v58  ;;  %vm92_vm11 = vcmp.eq.s32.totalorder %v6421_v56, 25 }
 0x112   :  { %v71_v3 = vsel %vm70_vm12, 64.0, %v69_v9  ;;  %v374_v9 = vsel %vm6448_vm15, %v6492_v4, 0.0  ;;  %vm94_vm12 = vcmp.eq.s32.totalorder %v6421_v56, 26 }
 0x113   :  { %v73_v57 = vsel %vm72_vm13, 128.0, %v71_v3  ;;  %vm96_vm13 = vcmp.eq.s32.totalorder %v6421_v56, 27 }
 0x114   :  { %v75_v42 = vsel %vm74_vm0, 1.0, %v73_v57  ;;  %vm102_vm0 = vcmp.eq.s32.totalorder %v6421_v56, 30 }
 0x115   :  { %v77_v58 = vsel %vm76_vm1, 2.0, %v75_v42  ;;  %vm104_vm1 = vcmp.eq.s32.totalorder %v6421_v56, 31 }
 0x116   :  { %745 = vperm.xlu1 %6134, %v11225_v2   ;;  %v501_v51 = vpop.permute.xlu1 %500  ;;  %749 = vperm.xlu2 %6132, %v11226_v0   ;;  %v79_v2 = vsel %vm78_vm2, 4.0, %v77_v58  ;;  %vm106_vm2 = vcmp.eq.s32.totalorder %v6421_v56, 32 }
 0x117   :  { %v6767_v3 = vsel %vm6444_vm14, %v501_v51, %v372_v63  ;;  %777 = vperm.xlu0 %6133, %v6244_v15   ;;  %v509_v57 = vpop.permute.xlu0 %508  ;;  %v6770_v45 = vpop.permute.xlu2 %579  ;;  %v81_v42 = vsel %vm80_vm3, 8.0, %v79_v2  ;;  %vm108_vm3 = vcmp.eq.s32.totalorder %v6421_v56, 33 }
 0x118   :  { %11227 = vst [vmem:[#allocation8_spill] sm:$0xff] %v6767_v3  ;;  %v6775_v0 = vsel %vm6444_vm14, %v509_v57, %v374_v9  ;;  %v83_v63 = vsel %vm82_vm5, 16.0, %v81_v42  ;;  %v375_v57 = vsel %vm6448_vm15, %v6489_v1, 0.0  ;;  %v11229_v42 = vld [vmem:[#allocation6_spill] sm:$0xff]  ;;  %vm98_vm15 = vcmp.eq.s32.totalorder %v6421_v56, 28 }
 0x119   :  { %11228 = vst [vmem:[#allocation14_spill] sm:$0xff] %v6775_v0  ;;  %v85_v15 = vsel %vm84_vm6, 32.0, %v83_v63  ;;  %vm110_vm5 = vcmp.eq.s32.totalorder %v6421_v56, 34  ;;  %vm112_vm6 = vcmp.eq.s32.totalorder %v6421_v56, 35 }
 0x11a   :  { %v87_v51 = vsel %vm86_vm7, 64.0, %v85_v15  ;;  %vm114_vm7 = vcmp.eq.s32.totalorder %v6421_v56, 36 }
 0x11b   :  { %v89_v58 = vsel %vm88_vm8, 128.0, %v87_v51  ;;  %vm116_vm8 = vcmp.eq.s32.totalorder %v6421_v56, 37 }
 0x11c   :  { %v91_v9 = vsel %vm90_vm9, 1.0, %v89_v58  ;;  %vm118_vm9 = vcmp.eq.s32.totalorder %v6421_v56, 38 }
 0x11d   :  { %v93_v63 = vsel %vm92_vm11, 2.0, %v91_v9  ;;  %vm120_vm11 = vcmp.eq.s32.totalorder %v6421_v56, 39 }
 0x11e   :  { %757 = vperm.xlu1 %6134, %v6203_v8   ;;  %v513_v2 = vpop.permute.xlu1 %512  ;;  %761 = vperm.xlu2 %6132, %v11229_v42   ;;  %v95_v58 = vsel %vm94_vm12, 4.0, %v93_v63  ;;  %v11230_v63 = vld [vmem:[#allocation7_spill] sm:$0xff]  ;;  %vm122_vm12 = vcmp.eq.s32.totalorder %v6421_v56, 40 }
 0x11f   :  { %v6795_v15 = vsel %vm6444_vm14, %v513_v2, %v375_v57  ;;  %789 = vperm.xlu0 %6133, %v6262_v18   ;;  %v6798_v51 = vpop.permute.xlu2 %591  ;;  %v97_v62 = vsel %vm96_vm13, 8.0, %v95_v58  ;;  %vm100_vm14 = vcmp.eq.s32.totalorder %v6421_v56, 29  ;;  %vm124_vm13 = vcmp.eq.s32.totalorder %v6421_v56, 41 }
 0x120   :  { %v6805_v8 = vpop.permute.xlu0 %563  ;;  %v99_v61 = vsel %vm98_vm15, 16.0, %v97_v62  ;;  %vm126_vm15 = vcmp.eq.s32.totalorder %v6421_v56, 42 }
 0x121   :  { %v101_v9 = vsel %vm100_vm14, 32.0, %v99_v61  ;;  %vm128_vm14 = vcmp.eq.s32.totalorder %v6421_v56, 43 }
 0x122   :  { %v103_v57 = vsel %vm102_vm0, 64.0, %v101_v9  ;;  %vm130_vm0 = vcmp.eq.s32.totalorder %v6421_v56, 44 }
 0x123   :  { %v105_v2 = vsel %vm104_vm1, 128.0, %v103_v57  ;;  %vm132_vm1 = vcmp.eq.s32.totalorder %v6421_v56, 45 }
 0x124   :  { %v107_v42 = vsel %vm106_vm2, 1.0, %v105_v2  ;;  %vm134_vm2 = vcmp.eq.s32.totalorder %v6421_v56, 46 }
 0x125   :  { %v109_v58 = vsel %vm108_vm3, 2.0, %v107_v42  ;;  %vm136_vm3 = vcmp.eq.s32.totalorder %v6421_v56, 47 }
 0x126   :  { %769 = vperm.xlu1 %6134, %v6221_v11   ;;  %773 = vperm.xlu2 %6132, %v11230_v63   ;;  %v111_v9 = vsel %vm110_vm5, 4.0, %v109_v58  ;;  %vm138_vm5 = vcmp.eq.s32.totalorder %v6421_v56, 48 }
 0x127   :  { %801 = vperm.xlu0 %6133, %v6280_v21   ;;  %v6821_v62 = vpop.permute.xlu1 %567  ;;  %v6823_v61 = vpop.permute.xlu2 %603  ;;  %v113_v21 = vsel %vm112_vm6, 8.0, %v111_v9  ;;  %vm140_vm6 = vcmp.eq.s32.totalorder %v6421_v56, 49 }
 0x128   :  { %11231 = vst [vmem:[#allocation2_spill] sm:$0xff] %v6821_v62  ;;  %v6834_v2 = vpop.permute.xlu0 %583  ;;  %v115_v63 = vsel %vm114_vm7, 16.0, %v113_v21  ;;  %vm142_vm7 = vcmp.eq.s32.totalorder %v6421_v56, 50 }
 0x129   :  { %11232 = vst [vmem:[#allocation4_spill] sm:$0xff] %v6823_v61  ;;  %v117_v58 = vsel %vm116_vm8, 32.0, %v115_v63  ;;  %vm144_vm8 = vcmp.eq.s32.totalorder %v6421_v56, 51 }
 0x12a   :  { %v119_v57 = vsel %vm118_vm9, 64.0, %v117_v58  ;;  %vm146_vm9 = vcmp.eq.s32.totalorder %v6421_v56, 52 }
 0x12b   :  { %v121_v11 = vsel %vm120_vm11, 128.0, %v119_v57  ;;  %vm148_vm11 = vcmp.eq.s32.totalorder %v6421_v56, 53 }
 0x12c   :  { %v123_v9 = vsel %vm122_vm12, 1.0, %v121_v11  ;;  %vm150_vm12 = vcmp.eq.s32.totalorder %v6421_v56, 54 }
 0x12d   :  { %v125_v42 = vsel %vm124_vm13, 2.0, %v123_v9  ;;  %vm152_vm13 = vcmp.eq.s32.totalorder %v6421_v56, 55 }
 0x12e   :  { %781 = vperm.xlu1 %6134, %v6239_v14   ;;  %785 = vperm.xlu2 %6132, %v6234_v13   ;;  %v127_v58 = vsel %vm126_vm15, 4.0, %v125_v42  ;;  %vm154_vm15 = vcmp.eq.s32.totalorder %v6421_v56, 56 }
 0x12f   :  { %813 = vperm.xlu0 %6133, %v6298_v24   ;;  %v6850_v21 = vpop.permute.xlu1 %575  ;;  %v6852_v63 = vpop.permute.xlu2 %615  ;;  %v129_v24 = vsel %vm128_vm14, 8.0, %v127_v58  ;;  %vm156_vm14 = vcmp.eq.s32.totalorder %v6421_v56, 57 }
 0x130   :  { %11233 = vst [vmem:[#allocation6_spill] sm:$0xff] %v6850_v21  ;;  %v6863_v14 = vpop.permute.xlu0 %595  ;;  %v131_v42 = vsel %vm130_vm0, 16.0, %v129_v24  ;;  %vm158_vm0 = vcmp.eq.s32.totalorder %v6421_v56, 58 }
 0x131   :  { %11234 = vst [vmem:[#allocation7_spill] sm:$0xff] %v6852_v63  ;;  %v133_v9 = vsel %vm132_vm1, 32.0, %v131_v42  ;;  %vm160_vm1 = vcmp.eq.s32.totalorder %v6421_v56, 59 }
 0x132   :  { %11235 = vst [vmem:[#allocation34_spill] sm:$0xff] %v6863_v14  ;;  %v135_v57 = vsel %vm134_vm2, 64.0, %v133_v9  ;;  %vm718_vm2 = vcmp.ge.s32.totalorder %v6421_v56, 24 }
 0x133   :  { %v137_v13 = vsel %vm136_vm3, 128.0, %v135_v57  ;;  %vm719_vm3 = vcmp.lt.s32.totalorder %v6421_v56, 32 }
 0x134   :  { %v139_v58 = vsel %vm138_vm5, 1.0, %v137_v13  ;;  %vm171_vm5 = vcmp.lt.s32.totalorder %v6421_v56, 64 }
 0x135   :  { %v141_v11 = vsel %vm140_vm6, 2.0, %v139_v58  ;;  %vm162_vm6 = vcmp.eq.s32.totalorder %v6421_v56, 60 }
 0x136   :  { %793 = vperm.xlu1 %6134, %v6257_v17   ;;  %797 = vperm.xlu2 %6132, %v6252_v16   ;;  %v143_v13 = vsel %vm142_vm7, 4.0, %v141_v11  ;;  %vm721_vm7 = vcmp.ge.s32.totalorder %v6421_v56, 56 }
 0x137   :  { %825 = vperm.xlu0 %6133, %v6316_v27   ;;  %v6878_v24 = vpop.permute.xlu1 %587  ;;  %v6880_v42 = vpop.permute.xlu2 %627  ;;  %v145_v9 = vsel %vm144_vm8, 8.0, %v143_v13  ;;  %vm6979_vm8 = vmand %vm718_vm2, %vm719_vm3 }
 0x138   :  { %11236 = vst [vmem:[#allocation35_spill] sm:$0xff] %v6878_v24  ;;  %v6891_v16 = vpop.permute.xlu0 %607 }
 0x139   :  { %11237 = vst [vmem:[#allocation36_spill] sm:$0xff] %v6880_v42 }
 0x13a   :  { %11238 = vst [vmem:[#allocation37_spill] sm:$0xff] %v6891_v16 }
 0x13e   :  { %805 = vperm.xlu1 %6134, %v6275_v20   ;;  %809 = vperm.xlu2 %6132, %v6270_v19   ;;  %v147_v20 = vsel %vm146_vm9, 16.0, %v145_v9  ;;  %vm164_vm9 = vcmp.eq.s32.totalorder %v6421_v56, 61 }
 0x13f   :  { %837 = vperm.xlu0 %6133, %v6334_v30   ;;  %v6902_v58 = vpop.permute.xlu1 %599  ;;  %v6904_v17 = vpop.permute.xlu2 %639  ;;  %v149_v30 = vsel %vm148_vm11, 32.0, %v147_v20  ;;  %vm722_vm11 = vmand %vm721_vm7, %vm171_vm5 }
 0x140   :  { %11239 = vst [vmem:[#allocation38_spill] sm:$0xff] %v6902_v58  ;;  %v6914_v57 = vpop.permute.xlu0 %619  ;;  %v151_v11 = vsel %vm150_vm12, 64.0, %v149_v30  ;;  %vm166_vm12 = vcmp.eq.s32.totalorder %v6421_v56, 62 }
 0x141   :  { %11240 = vst [vmem:[#allocation39_spill] sm:$0xff] %v6904_v17  ;;  %v153_v30 = vsel %vm152_vm13, 128.0, %v151_v11  ;;  %vm723_vm13 = vmor %vm6979_vm8, %vm722_vm11 }
 0x142   :  { %11241 = vst [vmem:[#allocation40_spill] sm:$0xff] %v6914_v57  ;;  %v155_v19 = vsel %vm154_vm15, 1.0, %v153_v30  ;;  %v11248_v30 = vld [vmem:[#allocation10_spill] sm:$0xff]  ;;  %vm724_vm15 = vcmp.eq.s32.totalorder %v6421_v56, 67 }
 0x143   :  { %v157_v27 = vsel %vm156_vm14, 2.0, %v155_v19  ;;  %vm168_vm14 = vcmp.eq.s32.totalorder %v6421_v56, 63 }
 0x144   :  { %v159_v19 = vsel %vm158_vm0, 4.0, %v157_v27  ;;  %vm7006_vm0 = vmor %vm723_vm13, %vm724_vm15 }
 0x145   :  { %v161_v11 = vsel %vm160_vm1, 8.0, %v159_v19  ;;  %vm172_vm1 = vmand %vm170_vm4, %vm171_vm5 }
 0x146   :  { %817 = vperm.xlu1 %6134, %v6293_v23   ;;  %821 = vperm.xlu2 %6132, %v6288_v22  }
 0x147   :  { %849 = vperm.xlu0 %6133, %v6347_v32   ;;  %v6926_v9 = vpop.permute.xlu1 %611  ;;  %v6928_v13 = vpop.permute.xlu2 %651  ;;  %v11249_v32 = vld [vmem:[#allocation9_spill] sm:$0xff] }
 0x148   :  { %11242 = vst [vmem:[#allocation41_spill] sm:$0xff] %v6926_v9  ;;  %v6938_v22 = vpop.permute.xlu0 %631 }
 0x149   :  { %11243 = vst [vmem:[#allocation42_spill] sm:$0xff] %v6928_v13  ;;  %v11150_v13 = vmov 920167782  }
 0x14a   :  { %11244 = vst [vmem:[#allocation43_spill] sm:$0xff] %v6938_v22 }
 0x14e   :  { %829 = vperm.xlu1 %6134, %v6311_v26   ;;  %833 = vperm.xlu2 %6132, %v6306_v25  }
 0x14f   :  { %v6948_v20 = vpop.permute.xlu1 %623  ;;  %v6950_v23 = vpop.permute.xlu2 %663 }
 0x150   :  { %11245 = vst [vmem:[#allocation44_spill] sm:$0xff] %v6948_v20  ;;  %v6961_v26 = vpop.permute.xlu0 %643 }
 0x151   :  { %11246 = vst [vmem:[#allocation45_spill] sm:$0xff] %v6950_v23 }
 0x152   :  { %11247 = vst [vmem:[#allocation46_spill] sm:$0xff] %v6961_v26 }
 0x156   :  { %841 = vperm.xlu1 %6134, %v11248_v30   ;;  %845 = vperm.xlu2 %6132, %v11249_v32   ;;  %v163_v32 = vsel %vm162_vm6, 16.0, %v161_v11  ;;  %v11257_v30 = vld [vmem:[#allocation11_spill] sm:$0xff] }
 0x157   :  { %v6975_v1 = vpop.permute.xlu1 %635  ;;  %v6977_v27 = vpop.permute.xlu2 %675  ;;  %v165_v23 = vsel %vm164_vm9, 32.0, %v163_v32 }
 0x158   :  { %11250 = vst [vmem:[#allocation10_spill] sm:$0xff] %v6975_v1  ;;  %v6991_v3 = vpop.permute.xlu0 %655  ;;  %v167_v11 = vsel %vm166_vm12, 64.0, %v165_v23 }
 0x159   :  { %11251 = vst [vmem:[#allocation9_spill] sm:$0xff] %v6977_v27  ;;  %v7026_v49 = vsel %vm168_vm14, 128.0, %v167_v11  ;;  %v11262_v27 = vsel %vm6681_vm10, %v6700_v29, %v6463_v41 }
 0x15a   :  { %11256 = vst [vmem:[#allocation47_spill] sm:$0xff] %v6991_v3 }
 0x15e   :  { %853 = vperm.xlu1 %6134, %v11257_v30  }
 0x15f   :  { %v7010_v4 = vpop.permute.xlu1 %647 }
 0x160   :  { %11260 = vst [vmem:[#allocation11_spill] sm:$0xff] %v7010_v4  ;;  %v7020_v30 = vpop.permute.xlu0 %667  ;;  %v730_v23 = vpop.permute.xlu2 %729  ;;  %v7039_v4 = vsel %vm172_vm1, 1.5707964, %v11263_v53 }
 0x161   :  { %11261 = vst [vmem:[#allocation48_spill] sm:$0xff] %v7020_v30  ;;  %v7035_v18 = vsel %vm7006_vm0, %v730_v23, %v11262_v27 }
 0x162   :  { %v888_v25 = vmul.f32 6.2831855, %v7035_v18 }
 0x164   :  { %v920_v1 = vmul.f32 %v888_v25, %v7026_v49  ;;  %v11266_v25 = vsel %vm6681_vm10, %v6739_v33, %v6726_v48 }
 0x166   :  { %v7043_v32 = vadd.f32 %v920_v1, %v7039_v4 }
 0x167   :  { %v7045_v11 = vpop.permute.xlu1 %659 }
 0x168   :  { %11264 = vst [vmem:[#allocation49_spill] sm:$0xff] %v7045_v11  ;;  %v987_v29 = vand.u32 2139095040, %v7043_v32  ;;  %v7049_v41 = vpop.permute.xlu0 %679  ;;  %v742_v27 = vpop.permute.xlu2 %741  ;;  %v11267_v30 = vand.u32 2147483647, %v7043_v32 }
 0x169   :  { %11265 = vst [vmem:[#allocation50_spill] sm:$0xff] %v7049_v41  ;;  %v7066_v23 = vsel %vm7006_vm0, %v742_v27, %v11266_v25 }
 0x16a   :  { %v988_v59 = vshrl.u32 %v987_v29, 23  ;;  %v991_v55 = vand.u32 8388607, %v11267_v30  ;;  %v891_v53 = vmul.f32 6.2831855, %v7066_v23 }
 0x16c   :  { %v6016_v31 = vadd.s32 4294967169, %v988_v59  ;;  %v992_v11 = vor.u32 8388608, %v991_v55  ;;  %v923_v3 = vmul.f32 %v891_v53, %v7026_v49  ;;  %v11134_v53 = vmov 683565275  }
 0x16e   :  { %v994_v1 = vadd.s32 1, %v6016_v31  ;;  %v7073_v0 = vadd.f32 %v923_v3, %v7039_v4  ;;  %v7075_v48 = vshll.u32 %v992_v11, 8 }
 0x170   :  { %vm995_vm4 = vcmp.gt.s32.totalorder %v994_v1, 0  ;;  %v11133_v27 = vand.u32 2147483647, %v7073_v0  ;;  %v1452_v29 = vand.u32 2139095040, %v7073_v0  ;;  %v1033_v59 = vand.u32 65535, %v7075_v48 }
 0x171   :  { %v996_v33 = vsel %vm995_vm4, %v994_v1, 0  ;;  %v11146_v1 = vmov 2131351028  }
 0x172   :  { %v998_v25 = vand.u32 31, %v996_v33  ;;  %v997_v30 = vshrl.u32 %v996_v33, 5  ;;  %v1453_v55 = vshrl.u32 %v1452_v29, 23  ;;  %v1456_v31 = vand.u32 8388607, %v11133_v27 }
 0x174   :  { %v999_v41 = vsub.s32 32, %v998_v25  ;;  %v1001_v3 = vshll.u32 %v11134_v53, %v998_v25  ;;  %v1004_v11 = vshll.u32 %v11143_v52, %v998_v25  ;;  %v1007_v20 = vshll.u32 %v11146_v1, %v998_v25 }
 0x175   :  { %v1010_v26 = vshll.u32 %v11148_v28, %v998_v25  ;;  %v1013_v27 = vshll.u32 %v11150_v13, %v998_v25  ;;  %vm1016_vm2 = vcmp.lt.s32.totalorder %v997_v30, 1  ;;  %vm1017_vm3 = vcmp.lt.s32.totalorder %v997_v30, 2 }
 0x176   :  { %v1002_v33 = vshrl.u32 %v11143_v52, %v999_v41  ;;  %v1005_v46 = vshrl.u32 %v11146_v1, %v999_v41  ;;  %v1008_v29 = vshrl.u32 %v11148_v28, %v999_v41  ;;  %v1011_v53 = vshrl.u32 %v11150_v13, %v999_v41 }
 0x177   :  { %v1014_v9 = vshrl.u32 %v11154_v7, %v999_v41  ;;  %v6025_v17 = vadd.s32 4294967169, %v1453_v55  ;;  %v1000_v52 = vshrl.u32 %v11268_v60, %v999_v41  ;;  %vm1019_vm5 = vcmp.lt.s32.totalorder %v997_v30, 4 }
 0x178   :  { %v1003_v54 = vor.u32 %v1002_v33, %v1001_v3  ;;  %v1006_v22 = vor.u32 %v1005_v46, %v1004_v11  ;;  %v1009_v43 = vor.u32 %v1008_v29, %v1007_v20  ;;  %v1012_v58 = vor.u32 %v1011_v53, %v1010_v26  ;;  %v750_v11 = vpop.permute.xlu2 %749 }
 0x179   :  { %v1015_v1 = vor.u32 %v1014_v9, %v1013_v27  ;;  %vm1018_vm6 = vcmp.lt.s32.totalorder %v997_v30, 3  ;;  %v1457_v7 = vor.u32 8388608, %v1456_v31  ;;  %v1459_v34 = vadd.s32 1, %v6025_v17 }
 0x17a   :  { %v1021_v28 = vsel %vm1019_vm5, %v1009_v43, 2102212464  ;;  %v1024_v25 = vsel %vm1016_vm2, %v1003_v54, %v1006_v22  ;;  %v1028_v13 = vsel %vm1016_vm2, %v1006_v22, %v1009_v43  ;;  %v1025_v50 = vsel %vm1019_vm5, %v1012_v58, 920167782 }
 0x17b   :  { %v1029_v57 = vsel %vm1019_vm5, %v1015_v1, 1326507024  ;;  %v1020_v3 = vsel %vm1016_vm2, %v1000_v52, %v1003_v54  ;;  %v1022_v46 = vsel %vm1018_vm6, %v1006_v22, %v1021_v28  ;;  %v1026_v20 = vsel %vm1018_vm6, %v1009_v43, %v1025_v50 }
 0x17c   :  { %v1030_v55 = vsel %vm1018_vm6, %v1012_v58, %v1029_v57  ;;  %v1027_v26 = vsel %vm1017_vm3, %v1024_v25, %v1026_v20  ;;  %v1034_v41 = vshrl.u32 %v7075_v48, 16  ;;  %vm1460_vm7 = vcmp.gt.s32.totalorder %v1459_v34, 0 }
 0x17d   :  { %v1031_v9 = vsel %vm1017_vm3, %v1028_v13, %v1030_v55  ;;  %v1057_v33 = vand.u32 65535, %v1027_v26  ;;  %v1058_v29 = vshrl.u32 %v1027_v26, 16  ;;  %v7100_v31 = vsel %vm1017_vm3, %v1020_v3, %v1022_v46 }
 0x17e   :  { %v1035_v27 = vand.u32 65535, %v1031_v9  ;;  %v1036_v53 = vshrl.u32 %v1031_v9, 16  ;;  %v11269_v28 = vsel %vm6681_vm10, %v6770_v45, %v6486_v5  ;;  %v1461_v54 = vsel %vm1460_vm7, %v1459_v34, 0 }
 0x17f   :  { %v7109_v43 = vsel %vm7006_vm0, %v750_v11, %v11269_v28  ;;  %v7111_v57 = vshll.u32 %v1457_v7, 8  ;;  %v1060_v13 = vmul.u32 %v1058_v29, %v1033_v59  ;;  %v1061_v22 = vmul.u32 %v1057_v33, %v1034_v41 }
 0x180   :  { %11270 = vst [vmem:[#allocation51_spill] sm:$0xff] %v7109_v43  ;;  %v1038_v50 = vmul.u32 %v1036_v53, %v1033_v59  ;;  %v1039_v52 = vmul.u32 %v1035_v27, %v1034_v41  ;;  %v1037_v17 = vmul.u32 %v1035_v27, %v1033_v59  ;;  %v1040_v58 = vmul.u32 %v1036_v53, %v1034_v41 }
 0x181   :  { %v1059_v25 = vmul.u32 %v1057_v33, %v1033_v59  ;;  %v1062_v3 = vmul.u32 %v1058_v29, %v1034_v41  ;;  %v1063_v5 = vshll.u32 %v1060_v13, 16  ;;  %v1064_v45 = vshrl.u32 %v1060_v13, 16 }
 0x182   :  { %v1041_v30 = vshll.u32 %v1038_v50, 16  ;;  %v1042_v1 = vshrl.u32 %v1038_v50, 16  ;;  %v1043_v46 = vshll.u32 %v1039_v52, 16  ;;  %v1044_v20 = vshrl.u32 %v1039_v52, 16 }
 0x183   :  { %v1065_v11 = vshll.u32 %v1061_v22, 16  ;;  %v1463_v26 = vand.u32 31, %v1461_v54  ;;  %v11271_v9 = vmov 0   ;;  %v1066_v7 = vshrl.u32 %v1061_v22, 16 }
 0x184   :  { %vm1045_vm8 = vc.u32 %v1037_v17, %v1041_v30  ;;  %v1047_v55 = vadd.s32 %v1041_v30, %v1037_v17  ;;  %vm1067_vm9 = vc.u32 %v1059_v25, %v1063_v5  ;;  %v1069_v27 = vadd.s32 %v1063_v5, %v1059_v25 }
 0x185   :  { %v1046_v34 = vsel %vm1045_vm8, 1, %v11271_v9  ;;  %v1068_v28 = vsel %vm1067_vm9, 1, %v11271_v9  ;;  %v7115_v50 = vsub.s32 32, %v1463_v26  ;;  %v7118_v33 = vshrl.u32 %v1461_v54, 5 }
 0x186   :  { %v1048_v53 = vadd.s32 %v1046_v34, %v1040_v58  ;;  %vm1049_vm11 = vc.u32 %v1047_v55, %v1043_v46  ;;  %v1070_v41 = vadd.s32 %v1068_v28, %v1062_v3  ;;  %vm1071_vm12 = vc.u32 %v1069_v27, %v1065_v11 }
 0x187   :  { %v1050_v59 = vsel %vm1049_vm11, 1, %v11271_v9  ;;  %v1072_v52 = vsel %vm1071_vm12, 1, %v11271_v9  ;;  %v7121_v17 = vadd.s32 %v1069_v27, %v1065_v11  ;;  %v1466_v13 = vshll.u32 %v11268_v60, %v1463_v26 }
 0x188   :  { %v1052_v29 = vadd.s32 %v1050_v59, %v1048_v53  ;;  %v1074_v22 = vadd.s32 %v1072_v52, %v1070_v41  ;;  %v11272_v58 = vmov 2475754826   ;;  %v11273_v46 = vmov 2131351028  }
 0x189   :  { %v1467_v30 = vshrl.u32 %v11272_v58, %v7115_v50  ;;  %v1469_v25 = vshll.u32 %v11272_v58, %v1463_v26  ;;  %v1470_v5 = vshrl.u32 %v11273_v46, %v7115_v50  ;;  %v1472_v54 = vshll.u32 %v11273_v46, %v1463_v26 }
 0x18a   :  { %v1053_v3 = vadd.s32 %v1052_v29, %v1042_v1  ;;  %v11274_v55 = vmov 2102212464   ;;  %v1075_v27 = vadd.s32 %v1074_v22, %v1064_v45  ;;  %v11275_v59 = vmov 920167782  }
 0x18b   :  { %v1473_v34 = vshrl.u32 %v11274_v55, %v7115_v50  ;;  %v1475_v11 = vshll.u32 %v11274_v55, %v1463_v26  ;;  %v7133_v53 = vor.u32 %v1467_v30, %v1466_v13  ;;  %v7135_v28 = vor.u32 %v1470_v5, %v1469_v25 }
 0x18c   :  { %v1476_v41 = vshrl.u32 %v11275_v59, %v7115_v50  ;;  %v7139_v52 = vadd.s32 %v1053_v3, %v1044_v20  ;;  %v1478_v1 = vshll.u32 %v11275_v59, %v1463_v26  ;;  %v11276_v29 = vmov 1326507024  }
 0x18d   :  { %v1474_v42 = vor.u32 %v1473_v34, %v1472_v54  ;;  %v1479_v36 = vshrl.u32 %v11276_v29, %v7115_v50  ;;  %v1076_v24 = vadd.s32 %v1075_v27, %v1066_v7  ;;  %v893_v16 = vmul.f32 6.2831855, %v7109_v43 }
 0x18e   :  { %v1477_v47 = vor.u32 %v1476_v41, %v1475_v11  ;;  %v1077_v45 = vmul.u32 %v7075_v48, %v7100_v31  ;;  %vm1079_vm13 = vc.u32 %v7139_v52, %v7121_v17  ;;  %vm1481_vm15 = vcmp.lt.s32.totalorder %v7118_v33, 1 }
 0x18f   :  { %v1480_v13 = vor.u32 %v1479_v36, %v1478_v1  ;;  %v1080_v20 = vadd.s32 1, %v1076_v24  ;;  %vm1484_vm14 = vcmp.lt.s32.totalorder %v7118_v33, 4  ;;  %v1489_v26 = vsel %vm1481_vm15, %v7133_v53, %v7135_v28 }
 0x190   :  { %v1498_v7 = vand.u32 65535, %v7111_v57  ;;  %vm1483_vm1 = vcmp.lt.s32.totalorder %v7118_v33, 3  ;;  %v1490_v48 = vsel %vm1484_vm14, %v1477_v47, 920167782  ;;  %v1493_v36 = vsel %vm1481_vm15, %v7135_v28, %v1474_v42 }
 0x191   :  { %v1494_v31 = vsel %vm1484_vm14, %v1480_v13, 1326507024  ;;  %v1081_v22 = vsel %vm1079_vm13, %v1080_v20, %v1076_v24  ;;  %vm1482_vm4 = vcmp.lt.s32.totalorder %v7118_v33, 2  ;;  %v1491_v30 = vsel %vm1483_vm1, %v1474_v42, %v1490_v48 }
 0x192   :  { %v1495_v25 = vsel %vm1483_vm1, %v1477_v47, %v1494_v31  ;;  %v1082_v5 = vadd.s32 %v1081_v22, %v1077_v45  ;;  %v1492_v3 = vsel %vm1482_vm4, %v1489_v26, %v1491_v30  ;;  %v1499_v34 = vshrl.u32 %v7111_v57, 16 }
 0x193   :  { %v1496_v54 = vsel %vm1482_vm4, %v1493_v36, %v1495_v25  ;;  %v1523_v24 = vshrl.u32 %v1492_v3, 16  ;;  %v925_v41 = vmul.f32 %v893_v16, %v7026_v49  ;;  %v1522_v13 = vand.u32 65535, %v1492_v3 }
 0x194   :  { %v1500_v11 = vand.u32 65535, %v1496_v54  ;;  %v1501_v27 = vshrl.u32 %v1496_v54, 16  ;;  %v1083_v1 = vadd.s32 536870912, %v1082_v5  ;;  %v1465_v3 = vshrl.u32 %v11268_v60, %v7115_v50 }
 0x195   :  { %v1525_v47 = vmul.u32 %v1523_v24, %v1498_v7  ;;  %v7176_v26 = vadd.f32 %v925_v41, %v7039_v4  ;;  %v1524_v30 = vmul.u32 %v1522_v13, %v1498_v7  ;;  %v1526_v39 = vmul.u32 %v1522_v13, %v1499_v34 }
 0x196   :  { %v1503_v20 = vmul.u32 %v1501_v27, %v1498_v7  ;;  %v1504_v48 = vmul.u32 %v1500_v11, %v1499_v34  ;;  %v1084_v37 = vshrl.u32 %v1083_v1, 30  ;;  %v1502_v45 = vmul.u32 %v1500_v11, %v1498_v7 }
 0x197   :  { %v1505_v36 = vmul.u32 %v1501_v27, %v1499_v34  ;;  %v1528_v25 = vshll.u32 %v1525_v47, 16  ;;  %v1486_v1 = vsel %vm1484_vm14, %v1474_v42, 2102212464  ;;  %v1527_v44 = vmul.u32 %v1523_v24, %v1499_v34 }
 0x198   :  { %v1506_v31 = vshll.u32 %v1503_v20, 16  ;;  %v1085_v22 = vshll.u32 %v1084_v37, 30  ;;  %v1508_v63 = vshll.u32 %v1504_v48, 16  ;;  %v1507_v21 = vshrl.u32 %v1503_v20, 16 }
 0x199   :  { %vm1532_vm5 = vc.u32 %v1524_v30, %v1528_v25  ;;  %v1530_v13 = vshll.u32 %v1526_v39, 16  ;;  %v1762_v42 = vand.u32 2139095040, %v7176_v26  ;;  %vm986_vm7 = vcmp.lt.s32.totalorder %v7043_v32, 0 }
 0x19a   :  { %vm1510_vm2 = vc.u32 %v1502_v45, %v1506_v31  ;;  %v1512_v54 = vadd.s32 %v1506_v31, %v1502_v45  ;;  %v1086_v16 = vsub.s32 %v1082_v5, %v1085_v22  ;;  %v1533_v5 = vsel %vm1532_vm5, 1, %v11271_v9 }
 0x19b   :  { %v1511_v11 = vsel %vm1510_vm2, 1, %v11271_v9  ;;  %v1534_v31 = vadd.s32 %v1528_v25, %v1524_v30  ;;  %v1108_v22 = vsub.s32 4, %v1084_v37  ;;  %v1535_v14 = vadd.s32 %v1533_v5, %v1527_v44 }
 0x19c   :  { %v1513_v41 = vadd.s32 %v1511_v11, %v1505_v36  ;;  %vm1514_vm3 = vc.u32 %v1512_v54, %v1508_v63  ;;  %vm1087_vm6 = vcmp.lt.s32.totalorder %v1086_v16, 0  ;;  %v1088_v7 = vsub.s32 0, %v1086_v16 }
 0x19d   :  { %v1515_v27 = vsel %vm1514_vm3, 1, %v11271_v9  ;;  %vm1536_vm8 = vc.u32 %v1534_v31, %v1530_v13  ;;  %v1485_v36 = vsel %vm1481_vm15, %v1465_v3, %v7133_v53  ;;  %v1487_v34 = vsel %vm1483_vm1, %v7135_v28, %v1486_v1 }
 0x19e   :  { %v1517_v45 = vadd.s32 %v1515_v27, %v1513_v41  ;;  %v1089_v50 = vsel %vm1087_vm6, %v1088_v7, %v1086_v16  ;;  %v1509_v24 = vshrl.u32 %v1504_v48, 16  ;;  %v1537_v30 = vsel %vm1536_vm8, 1, %v11271_v9 }
 0x19f   :  { %v1090_v20 = vclz %v1089_v50  ;;  %v1529_v44 = vshrl.u32 %v1525_v47, 16  ;;  %v1539_v54 = vadd.s32 %v1537_v30, %v1535_v14  ;;  %v1763_v11 = vshrl.u32 %v1762_v42, 23 }
 0x1a0   :  { %v1518_v63 = vadd.s32 %v1517_v45, %v1507_v21  ;;  %v11277_v41 = vand.u32 2147483647, %v7043_v32  ;;  %v1109_v53 = vsel %vm986_vm7, %v1108_v22, %v1084_v37  ;;  %v1078_v28 = vadd.s32 %v7121_v17, %v7139_v52 }
 0x1a1   :  { %v6017_v25 = vadd.s32 4294967294, %v1090_v20  ;;  %v1531_v48 = vshrl.u32 %v1526_v39, 16  ;;  %v1540_v1 = vadd.s32 %v1539_v54, %v1529_v44  ;;  %v1488_v14 = vsel %vm1482_vm4, %v1485_v36, %v1487_v34 }
 0x1a2   :  { %vm7196_vm9 = vcmp.le.f32.partialorder %v11277_v41, 0.7853982  ;;  %v1519_v3 = vadd.s32 %v1518_v63, %v1509_v24  ;;  %v1538_v47 = vadd.s32 %v1534_v31, %v1530_v13  ;;  %v6031_v27 = vadd.s32 4294967169, %v1763_v11  ;;  %v734_v24 = vpop.permute.xlu0 %733 }
 0x1a3   :  { %vm6018_vm11 = vcmp.lt.s32.totalorder %v6017_v25, 0  ;;  %v1111_v50 = vsel %vm7196_vm9, 0, %v1109_v53  ;;  %v1541_v42 = vadd.s32 %v1540_v1, %v1531_v48  ;;  %v11168_v37 = vand.u32 2147483647, %v7176_v26 }
 0x1a4   :  { %v1093_v7 = vsel %vm6018_vm11, 0, %v6017_v25  ;;  %vm1544_vm12 = vc.u32 %v1519_v3, %v1538_v47  ;;  %v1769_v22 = vadd.s32 1, %v6031_v27  ;;  %v1128_v63 = vadd.s32 3, %v1111_v50 }
 0x1a5   :  { %v1094_v45 = vsub.s32 32, %v1093_v7  ;;  %v1098_v5 = vsub.s32 4294967266, %v1093_v7  ;;  %v1095_v17 = vshll.u32 %v1086_v16, %v1093_v7  ;;  %v1545_v20 = vadd.s32 1, %v1541_v42 }
 0x1a6   :  { %v1542_v33 = vmul.u32 %v7111_v57, %v1488_v14  ;;  %vm1770_vm13 = vcmp.gt.s32.totalorder %v1769_v22, 0  ;;  %v1766_v25 = vand.u32 8388607, %v11168_v37  ;;  %v11280_v57 = vsel %vm6681_vm10, %v6805_v8, %v6524_v38 }
 0x1a7   :  { %v1096_v52 = vshrl.u32 %v1078_v28, %v1094_v45  ;;  %v1099_v39 = vadd.s32 127, %v1098_v5  ;;  %v1546_v36 = vsel %vm1544_vm12, %v1545_v20, %v1541_v42  ;;  %v1771_v34 = vsel %vm1770_vm13, %v1769_v22, 0 }
 0x1a8   :  { %v1547_v30 = vadd.s32 %v1546_v36, %v1542_v33  ;;  %v1773_v44 = vand.u32 31, %v1771_v34  ;;  %v7221_v41 = vsel %vm7006_vm0, %v734_v24, %v11280_v57  ;;  %v7223_v48 = vand.u32 3, %v1128_v63 }
 0x1a9   :  { %v1097_v13 = vor.u32 %v1096_v52, %v1095_v17  ;;  %v1100_v31 = vshll.u32 %v1099_v39, 23  ;;  %11281 = vst [vmem:[#allocation52_spill] sm:$0xff] %v7221_v41  ;;  %v7225_v1 = vadd.s32 %v1538_v47, %v1519_v3  ;;  %v1767_v14 = vor.u32 8388608, %v1766_v25 }
 0x1aa   :  { %v1548_v11 = vadd.s32 536870912, %v1547_v30  ;;  %v7212_v16 = vsub.s32 32, %v1773_v44  ;;  %v1776_v38 = vshll.u32 %v11268_v60, %v1773_v44  ;;  %v889_v50 = vmul.f32 6.2831855, %v7221_v41 }
 0x1ab   :  { %v1101_v54 = vor.u32 4788187, %v1100_v31  ;;  %v1104_v28 = vcvt.s32.f32 %v1097_v13  ;;  %v1779_v3 = vshll.u32 %v11272_v58, %v1773_v44  ;;  %v1785_v22 = vshll.u32 %v11274_v55, %v1773_v44 }
 0x1ac   :  { %v1549_v7 = vshrl.u32 %v1548_v11, 30  ;;  %v1777_v27 = vshrl.u32 %v11272_v58, %v7212_v16  ;;  %v1780_v45 = vshrl.u32 %v11273_v46, %v7212_v16  ;;  %v1786_v8 = vshrl.u32 %v11275_v59, %v7212_v16 }
 0x1ad   :  { %v1102_v53 = vand.u32 2147483647, %v1101_v54  ;;  %v1783_v47 = vshrl.u32 %v11274_v55, %v7212_v16  ;;  %vm1451_vm15 = vcmp.lt.s32.totalorder %v7073_v0, 0  ;;  %v7240_v52 = vshrl.u32 %v1771_v34, 5 }
 0x1ae   :  { %v1550_v42 = vshll.u32 %v1549_v7, 30  ;;  %v1782_v39 = vshll.u32 %v11273_v46, %v1773_v44  ;;  %v1789_v20 = vshrl.u32 %v11276_v29, %v7212_v16  ;;  %v7247_v33 = vor.u32 %v1777_v27, %v1776_v38 }
 0x1af   :  { %v1105_v5 = vmul.f32 %v1104_v28, %v1102_v53  ;;  %v7249_v13 = vor.u32 %v1780_v45, %v1779_v3  ;;  %v1787_v31 = vor.u32 %v1786_v8, %v1785_v22  ;;  %v1788_v24 = vshll.u32 %v11275_v59, %v1773_v44 }
 0x1b0   :  { %v7245_v63 = vsub.s32 %v1547_v30, %v1550_v42  ;;  %v7254_v25 = vshll.u32 %v1767_v14, 8  ;;  %v921_v34 = vmul.f32 %v889_v50, %v7026_v49  ;;  %v7264_v11 = vor.u32 %v1783_v47, %v1782_v39 }
 0x1b1   :  { %v1106_v17 = vxor.u32 2147483648, %v1105_v5  ;;  %v11282_v44 = vand.u32 2147483647, %v7073_v0  ;;  %v1573_v28 = vsub.s32 4, %v1549_v7  ;;  %vm1791_vm4 = vcmp.lt.s32.totalorder %v7240_v52, 1 }
 0x1b2   :  { %vm1552_vm14 = vcmp.lt.s32.totalorder %v7245_v63, 0  ;;  %v1553_v30 = vsub.s32 0, %v7245_v63  ;;  %vm1794_vm2 = vcmp.lt.s32.totalorder %v7240_v52, 4  ;;  %v1790_v14 = vor.u32 %v1789_v20, %v1788_v24 }
 0x1b3   :  { %v1107_v36 = vsel %vm986_vm7, %v1106_v17, %v1105_v5  ;;  %vm7270_vm1 = vcmp.le.f32.partialorder %v11282_v44, 0.7853982  ;;  %v1799_v27 = vsel %vm1791_vm4, %v7247_v33, %v7249_v13  ;;  %v1800_v45 = vsel %vm1794_vm2, %v1787_v31, 920167782 }
 0x1b4   :  { %v7260_v54 = vsel %vm7196_vm9, %v7043_v32, %v1107_v36  ;;  %v1554_v21 = vsel %vm1552_vm14, %v1553_v30, %v7245_v63  ;;  %vm1793_vm3 = vcmp.lt.s32.totalorder %v7240_v52, 3  ;;  %vm11175_vm5 = vcmp.lt.s32.totalorder %v7240_v52, 2 }
 0x1b5   :  { %v1112_v57 = vmul.f32 %v7260_v54, %v7260_v54  ;;  %v1555_v8 = vclz %v1554_v21  ;;  %v1801_v50 = vsel %vm1793_vm3, %v7264_v11, %v1800_v45  ;;  %v1808_v42 = vand.u32 65535, %v7254_v25  ;;  %v7322_v45 = vpop.permute.xlu1 %671 }
 0x1b6   :  { %v7290_v3 = vadd.f32 %v921_v34, %v7039_v4  ;;  %v1802_v39 = vsel %vm11175_vm5, %v1799_v27, %v1801_v50  ;;  %v7296_v20 = vsel %vm1451_vm15, %v1573_v28, %v1549_v7  ;;  %v1803_v36 = vsel %vm1791_vm4, %v7249_v13, %v7264_v11  ;;  %11285 = vst [vmem:[#allocation53_spill] sm:$0xff] %v7322_v45 }
 0x1b7   :  { %v1113_v5 = vmul.f32 -0.001358992, %v1112_v57  ;;  %v1120_v38 = vmul.f32 -0.00019511016, %v1112_v57  ;;  %v6026_v17 = vadd.s32 4294967294, %v1555_v8  ;;  %v1833_v34 = vshrl.u32 %v1802_v39, 16 }
 0x1b8   :  { %v1804_v24 = vsel %vm1794_vm2, %v1790_v14, 1326507024  ;;  %v1809_v28 = vshrl.u32 %v7254_v25, 16  ;;  %v1832_v50 = vand.u32 65535, %v1802_v39  ;;  %vm1131_vm7 = vcmp.eq.s32.totalorder %v7223_v48, 0 }
 0x1b9   :  { %v1114_v47 = vadd.f32 0.041655596, %v1113_v5  ;;  %v1121_v22 = vadd.f32 0.008332121, %v1120_v38  ;;  %vm6027_vm6 = vcmp.lt.s32.totalorder %v6026_v17, 0  ;;  %v1805_v21 = vsel %vm1793_vm3, %v1787_v31, %v1804_v24 }
 0x1ba   :  { %v1558_v27 = vsel %vm6027_vm6, 0, %v6026_v17  ;;  %v1806_v7 = vsel %vm11175_vm5, %v1803_v36, %v1805_v21  ;;  %vm1134_vm8 = vcmp.eq.s32.totalorder %v7223_v48, 2  ;;  %v1576_v31 = vsel %vm7270_vm1, 0, %v7296_v20 }
 0x1bb   :  { %v1115_v30 = vmul.f32 %v1114_v47, %v1112_v57  ;;  %v1122_v44 = vmul.f32 %v1121_v22, %v1112_v57  ;;  %v1559_v8 = vsub.s32 32, %v1558_v27  ;;  %v1563_v14 = vsub.s32 4294967266, %v1558_v27 }
 0x1bc   :  { %v1810_v47 = vand.u32 65535, %v1806_v7  ;;  %v1811_v22 = vshrl.u32 %v1806_v7, 16  ;;  %vm5944_vm9 = vcmp.ge.s32.totalorder %v6421_v56, 64  ;;  %vm1130_vm11 = vcmp.lt.s32.totalorder %v7223_v48, 2 }
 0x1bd   :  { %v1116_v5 = vadd.f32 -0.4999988, %v1115_v30  ;;  %v1123_v38 = vadd.f32 -0.16666654, %v1122_v44  ;;  %v1561_v24 = vshrl.u32 %v7225_v1, %v1559_v8  ;;  %v7318_v39 = vmul.u32 %v1833_v34, %v1808_v42 }
 0x1be   :  { %vm5979_vm12 = vcmask 556032   ;;  %vm1127_vm13 = vweird.f32 %v7043_v32  ;;  %v1560_v30 = vshll.u32 %v7245_v63, %v1558_v27  ;;  %v1564_v44 = vadd.s32 127, %v1563_v14 }
 0x1bf   :  { %v1117_v17 = vmul.f32 %v1116_v5, %v1112_v57  ;;  %v1124_v36 = vmul.f32 %v1123_v38, %v1112_v57  ;;  %v1813_v21 = vmul.u32 %v1811_v22, %v1808_v42  ;;  %v1814_v20 = vmul.u32 %v1810_v47, %v1809_v28 }
 0x1c0   :  { %v1834_v5 = vmul.u32 %v1832_v50, %v1808_v42  ;;  %v7324_v57 = vmul.u32 %v1832_v50, %v1809_v28  ;;  %v1562_v38 = vor.u32 %v1561_v24, %v1560_v30  ;;  %v1565_v10 = vshll.u32 %v1564_v44, 23 }
 0x1c1   :  { %v1118_v37 = vadd.f32 1.0, %v1117_v17  ;;  %v1125_v7 = vadd.f32 1.0, %v1124_v36  ;;  %v1812_v1 = vmul.u32 %v1810_v47, %v1808_v42  ;;  %v1816_v8 = vshll.u32 %v1813_v21, 16 }
 0x1c2   :  { %v1815_v35 = vmul.u32 %v1811_v22, %v1809_v28  ;;  %v1818_v62 = vshll.u32 %v1814_v20, 16  ;;  %v1566_v63 = vor.u32 4788187, %v1565_v10  ;;  %v1838_v14 = vshll.u32 %v7318_v39, 16 }
 0x1c3   :  { %v1126_v61 = vmul.f32 %v1125_v7, %v7260_v54  ;;  %v1135_v41 = vxor.u32 2147483648, %v1118_v37  ;;  %vm1820_vm14 = vc.u32 %v1812_v1, %v1816_v8  ;;  %v1822_v27 = vadd.s32 %v1816_v8, %v1812_v1 }
 0x1c4   :  { %v1817_v36 = vshrl.u32 %v1813_v21, 16  ;;  %v1821_v45 = vsel %vm1820_vm14, 1, %v11271_v9  ;;  %v1837_v50 = vmul.u32 %v1833_v34, %v1809_v28  ;;  %v1567_v43 = vand.u32 2147483647, %v1566_v63 }
 0x1c5   :  { %v1132_v17 = vxor.u32 2147483648, %v1126_v61  ;;  %v1569_v24 = vcvt.s32.f32 %v1562_v38  ;;  %v1823_v30 = vadd.s32 %v1821_v45, %v1815_v35  ;;  %vm1824_vm6 = vc.u32 %v1822_v27, %v1818_v62 }
 0x1c6   :  { %v1136_v42 = vsel %vm1134_vm8, %v1135_v41, %v1126_v61  ;;  %v1825_v10 = vsel %vm1824_vm6, 1, %v11271_v9  ;;  %vm1842_vm5 = vc.u32 %v1834_v5, %v1838_v14  ;;  %v1840_v62 = vshll.u32 %v7324_v57, 16 }
 0x1c7   :  { %v1133_v54 = vsel %vm1131_vm7, %v1118_v37, %v1132_v17  ;;  %v1570_v22 = vmul.f32 %v1569_v24, %v1567_v43  ;;  %v1827_v44 = vadd.s32 %v1825_v10, %v1823_v30  ;;  %v1843_v34 = vsel %vm1842_vm5, 1, %v11271_v9 }
 0x1c8   :  { %v1137_v47 = vsel %vm1130_vm11, %v1133_v54, %v1136_v42  ;;  %v1844_v28 = vadd.s32 %v1838_v14, %v1834_v5  ;;  %v1845_v37 = vadd.s32 %v1843_v34, %v1837_v50  ;;  %v1775_v48 = vshrl.u32 %v11268_v60, %v7212_v16 }
 0x1c9   :  { %v1138_v35 = vsel %vm1127_vm13, nan, %v1137_v47  ;;  %v1571_v41 = vxor.u32 2147483648, %v1570_v22  ;;  %v1828_v45 = vadd.s32 %v1827_v44, %v1817_v36  ;;  %v1593_v32 = vadd.s32 3, %v1576_v31 }
 0x1ca   :  { %v5947_v61 = vsel %vm5944_vm9, %v7035_v18, %v1138_v35  ;;  %v1796_v43 = vsel %vm1794_vm2, %v7264_v11, 2102212464  ;;  %vm1846_vm5 = vc.u32 %v1844_v28, %v1840_v62  ;;  %v11286_v21 = vand.u32 2139095040, %v7290_v3  ;;  %v7354_v18 = vpop.permute.xlu1 %683 }
 0x1cb   :  { %5980 = vst.msk [vmem:[%s11096_s1] sm:$0xff] %vm5979_vm12, %v5947_v61  ;;  %v1572_v16 = vsel %vm1451_vm15, %v1571_v41, %v1570_v22  ;;  %v1795_v5 = vsel %vm1791_vm4, %v1775_v48, %v7247_v33  ;;  %v1819_v38 = vshrl.u32 %v1814_v20, 16  ;;  %v1847_v31 = vsel %vm1846_vm5, 1, %v11271_v9 }
 0x1cc   :  { %v1143_v7 = vshrl.u32 %v11286_v21, 23  ;;  %v1575_v11 = vsel %vm7270_vm1, %v7073_v0, %v1572_v16  ;;  %v1839_v1 = vshrl.u32 %v7318_v39, 16  ;;  %v1849_v8 = vadd.s32 %v1847_v31, %v1845_v37  ;;  %v762_v37 = vpop.permute.xlu2 %761 }
 0x1cd   :  { %v1577_v27 = vmul.f32 %v1575_v11, %v1575_v11  ;;  %v1797_v14 = vsel %vm1793_vm3, %v7249_v13, %v1796_v43  ;;  %v7369_v17 = vadd.s32 %v1828_v45, %v1819_v38  ;;  %v1841_v20 = vshrl.u32 %v7324_v57, 16 }
 0x1ce   :  { %v6019_v63 = vadd.s32 4294967169, %v1143_v7  ;;  %v1850_v53 = vadd.s32 %v1849_v8, %v1839_v1  ;;  %v1139_v36 = vand.u32 2147483647, %v7290_v3  ;;  %v7377_v30 = vadd.s32 %v1844_v28, %v1840_v62 }
 0x1cf   :  { %v1578_v50 = vmul.f32 -0.001358992, %v1577_v27  ;;  %v1585_v24 = vmul.f32 -0.00019511016, %v1577_v27  ;;  %v7379_v54 = vand.u32 3, %v1593_v32  ;;  %vm11287_vm15 = vcmp.lt.s32.totalorder %v7240_v52, 2 }
 0x1d0   :  { %v1149_v39 = vadd.s32 1, %v6019_v63  ;;  %v1798_v13 = vsel %vm11287_vm15, %v1795_v5, %v1797_v14  ;;  %v1851_v42 = vadd.s32 %v1850_v53, %v1841_v20  ;;  %vm1854_vm4 = vc.u32 %v7369_v17, %v7377_v30 }
 0x1d1   :  { %v1579_v10 = vadd.f32 0.041655596, %v1578_v50  ;;  %v1586_v47 = vadd.f32 0.008332121, %v1585_v24  ;;  %v1146_v44 = vand.u32 8388607, %v1139_v36  ;;  %v1852_v28 = vmul.u32 %v7254_v25, %v1798_v13 }
 0x1d2   :  { %vm1150_vm1 = vcmp.gt.s32.totalorder %v1149_v39, 0  ;;  %v1855_v22 = vadd.s32 1, %v1851_v42  ;;  %vm1599_vm2 = vcmp.eq.s32.totalorder %v7379_v54, 2  ;;  %vm1596_vm3 = vcmp.eq.s32.totalorder %v7379_v54, 0 }
 0x1d3   :  { %v1151_v57 = vsel %vm1150_vm1, %v1149_v39, 0  ;;  %v1580_v35 = vmul.f32 %v1579_v10, %v1577_v27  ;;  %v1587_v62 = vmul.f32 %v1586_v47, %v1577_v27  ;;  %v1147_v32 = vor.u32 8388608, %v1146_v44 }
 0x1d4   :  { %v1153_v34 = vand.u32 31, %v1151_v57  ;;  %v1856_v52 = vsel %vm1854_vm4, %v1855_v22, %v1851_v42  ;;  %v7392_v43 = vshrl.u32 %v1151_v57, 5  ;;  %v11288_v25 = vsel %vm6681_vm10, %v6798_v51, %v6500_v12 }
 0x1d5   :  { %v1581_v41 = vadd.f32 -0.4999988, %v1580_v35  ;;  %v1588_v48 = vadd.f32 -0.16666654, %v1587_v62  ;;  %v1857_v45 = vadd.s32 %v1856_v52, %v1852_v28  ;;  %v7403_v7 = vsel %vm7006_vm0, %v762_v37, %v11288_v25 }
 0x1d6   :  { %v7388_v61 = vsub.s32 32, %v1153_v34  ;;  %vm1595_vm7 = vcmp.lt.s32.totalorder %v7379_v54, 2  ;;  %v1156_v1 = vshll.u32 %v11268_v60, %v1153_v34  ;;  %v1165_v63 = vshll.u32 %v11274_v55, %v1153_v34 }
 0x1d7   :  { %v1582_v16 = vmul.f32 %v1581_v41, %v1577_v27  ;;  %v1589_v5 = vmul.f32 %v1588_v48, %v1577_v27  ;;  %v1858_v38 = vadd.s32 536870912, %v1857_v45  ;;  %v1159_v27 = vshll.u32 %v11272_v58, %v1153_v34 }
 0x1d8   :  { %v1157_v21 = vshrl.u32 %v11272_v58, %v7388_v61  ;;  %v1160_v31 = vshrl.u32 %v11273_v46, %v7388_v61  ;;  %v1163_v8 = vshrl.u32 %v11274_v55, %v7388_v61  ;;  %v1166_v12 = vshrl.u32 %v11275_v59, %v7388_v61 }
 0x1d9   :  { %v1583_v51 = vadd.f32 1.0, %v1582_v16  ;;  %v1590_v14 = vadd.f32 1.0, %v1589_v5  ;;  %v7414_v20 = vshrl.u32 %v1858_v38, 30  ;;  %v1162_v39 = vshll.u32 %v11273_v46, %v1153_v34 }
 0x1da   :  { %v1158_v53 = vor.u32 %v1157_v21, %v1156_v1  ;;  %v1167_v50 = vor.u32 %v1166_v12, %v1165_v63  ;;  %v1169_v24 = vshrl.u32 %v11276_v29, %v7388_v61  ;;  %v7421_v47 = vor.u32 %v1160_v31, %v1159_v27 }
 0x1db   :  { %v1591_v13 = vmul.f32 %v1590_v14, %v1575_v11  ;;  %v1600_v42 = vxor.u32 2147483648, %v1583_v51  ;;  %v1860_v10 = vshll.u32 %v7414_v20, 30  ;;  %v1164_v57 = vor.u32 %v1163_v8, %v1162_v39 }
 0x1dc   :  { %v1168_v22 = vshll.u32 %v11275_v59, %v1153_v34  ;;  %v7424_v44 = vshll.u32 %v1147_v32, 8  ;;  %v896_v35 = vmul.f32 6.2831855, %v7403_v7  ;;  %vm1171_vm8 = vcmp.lt.s32.totalorder %v7392_v43, 1 }
 0x1dd   :  { %v1597_v62 = vxor.u32 2147483648, %v1591_v13  ;;  %v1861_v28 = vsub.s32 %v1857_v45, %v1860_v10  ;;  %vm1174_vm11 = vcmp.lt.s32.totalorder %v7392_v43, 4  ;;  %v1601_v11 = vsel %vm1599_vm2, %v1600_v42, %v1591_v13 }
 0x1de   :  { %v1170_v37 = vor.u32 %v1169_v24, %v1168_v22  ;;  %vm1173_vm13 = vcmp.lt.s32.totalorder %v7392_v43, 3  ;;  %v1180_v52 = vsel %vm1174_vm11, %v1167_v50, 920167782  ;;  %v1179_v48 = vsel %vm1171_vm8, %v1158_v53, %v7421_v47 }
 0x1df   :  { %v1598_v34 = vsel %vm1596_vm3, %v1583_v51, %v1597_v62  ;;  %vm1862_vm14 = vcmp.lt.s32.totalorder %v1861_v28, 0  ;;  %v1863_v41 = vsub.s32 0, %v1861_v28  ;;  %vm1592_vm6 = vweird.f32 %v7073_v0 }
 0x1e0   :  { %v1602_v45 = vsel %vm1595_vm7, %v1598_v34, %v1601_v11  ;;  %v1181_v32 = vsel %vm1173_vm13, %v1164_v57, %v1180_v52  ;;  %v928_v21 = vmul.f32 %v896_v35, %v7026_v49  ;;  %vm1172_vm5 = vcmp.lt.s32.totalorder %v7392_v43, 2 }
 0x1e1   :  { %v1603_v25 = vsel %vm1592_vm6, nan, %v1602_v45  ;;  %v1864_v16 = vsel %vm1862_vm14, %v1863_v41, %v1861_v28  ;;  %v1183_v5 = vsel %vm1171_vm8, %v7421_v47, %v1164_v57  ;;  %v1182_v54 = vsel %vm1172_vm5, %v1179_v48, %v1181_v32 }
 0x1e2   :  { %v5950_v0 = vsel %vm5944_vm9, %v7066_v23, %v1603_v25  ;;  %v1865_v38 = vclz %v1864_v16  ;;  %v1184_v31 = vsel %vm1174_vm11, %v1170_v37, 1326507024  ;;  %v1853_v1 = vadd.s32 %v7377_v30, %v7369_v17 }
 0x1e3   :  { %5983 = vst.msk [vmem:[%s11096_s1 + $0x18] sm:$0xff] %vm5979_vm12, %v5950_v0  ;;  %v1185_v8 = vsel %vm1173_vm13, %v1167_v50, %v1184_v31  ;;  %v1188_v23 = vand.u32 65535, %v7424_v44  ;;  %v1212_v51 = vand.u32 65535, %v1182_v54  ;;  %v1213_v14 = vshrl.u32 %v1182_v54, 16 }
 0x1e4   :  { %v6032_v63 = vadd.s32 4294967294, %v1865_v38  ;;  %v1186_v12 = vsel %vm1172_vm5, %v1183_v5, %v1185_v8  ;;  %v1155_v27 = vshrl.u32 %v11268_v60, %v7388_v61  ;;  %v1189_v39 = vshrl.u32 %v7424_v44, 16 }
 0x1e5   :  { %v1190_v24 = vand.u32 65535, %v1186_v12  ;;  %v1191_v13 = vshrl.u32 %v1186_v12, 16  ;;  %v1883_v17 = vsub.s32 4, %v7414_v20  ;;  %v1215_v30 = vmul.u32 %v1213_v14, %v1188_v23 }
 0x1e6   :  { %vm6033_vm15 = vcmp.lt.s32.totalorder %v6032_v63, 0  ;;  %v7472_v50 = vadd.f32 %v928_v21, %v7039_v4  ;;  %v1175_v10 = vsel %vm1171_vm8, %v1155_v27, %v1158_v53  ;;  %v1176_v61 = vsel %vm1174_vm11, %v1164_v57, 2102212464 }
 0x1e7   :  { %v1868_v42 = vsel %vm6033_vm15, 0, %v6032_v63  ;;  %v1193_v22 = vmul.u32 %v1191_v13, %v1188_v23  ;;  %v1194_v35 = vmul.u32 %v1190_v24, %v1189_v39  ;;  %v1216_v37 = vmul.u32 %v1212_v51, %v1189_v39 }
 0x1e8   :  { %v1869_v62 = vsub.s32 32, %v1868_v42  ;;  %v1873_v11 = vsub.s32 4294967266, %v1868_v42  ;;  %vm1761_vm1 = vcmp.lt.s32.totalorder %v7176_v26, 0  ;;  %v1870_v52 = vshll.u32 %v1861_v28, %v1868_v42 }
 0x1e9   :  { %v1192_v34 = vmul.u32 %v1190_v24, %v1188_v23  ;;  %v1196_v41 = vshll.u32 %v1193_v22, 16  ;;  %v1214_v48 = vmul.u32 %v1212_v51, %v1188_v23  ;;  %v1195_v21 = vmul.u32 %v1191_v13, %v1189_v39 }
 0x1ea   :  { %v1871_v45 = vshrl.u32 %v1853_v1, %v1869_v62  ;;  %v1874_v32 = vadd.s32 127, %v1873_v11  ;;  %v1218_v25 = vshll.u32 %v1215_v30, 16  ;;  %v1198_v16 = vshll.u32 %v1194_v35, 16 }
 0x1eb   :  { %vm1200_vm4 = vc.u32 %v1192_v34, %v1196_v41  ;;  %v1202_v53 = vadd.s32 %v1196_v41, %v1192_v34  ;;  %v1217_v5 = vmul.u32 %v1213_v14, %v1189_v39  ;;  %v1220_v57 = vshll.u32 %v1216_v37, 16 }
 0x1ec   :  { %v1872_v0 = vor.u32 %v1871_v45, %v1870_v52  ;;  %v1875_v38 = vshll.u32 %v1874_v32, 23  ;;  %v1201_v54 = vsel %vm1200_vm4, 1, %v11271_v9  ;;  %vm1222_vm3 = vc.u32 %v1214_v48, %v1218_v25  ;;  %v754_v45 = vpop.permute.xlu0 %753 }
 0x1ed   :  { %v1203_v31 = vadd.s32 %v1201_v54, %v1195_v21  ;;  %vm1204_vm2 = vc.u32 %v1202_v53, %v1198_v16  ;;  %v1224_v28 = vadd.s32 %v1218_v25, %v1214_v48  ;;  %v1223_v1 = vsel %vm1222_vm3, 1, %v11271_v9 }
 0x1ee   :  { %v1876_v8 = vor.u32 4788187, %v1875_v38  ;;  %v1205_v23 = vsel %vm1204_vm2, 1, %v11271_v9  ;;  %v2224_v63 = vand.u32 2147483647, %v7472_v50  ;;  %v1197_v12 = vshrl.u32 %v1193_v22, 16 }
 0x1ef   :  { %v1207_v51 = vadd.s32 %v1205_v23, %v1203_v31  ;;  %v1225_v27 = vadd.s32 %v1223_v1, %v1217_v5  ;;  %vm1226_vm7 = vc.u32 %v1224_v28, %v1220_v57  ;;  %v1879_v39 = vcvt.s32.f32 %v1872_v0 }
 0x1f0   :  { %v1877_v14 = vand.u32 2147483647, %v1876_v8  ;;  %v1199_v24 = vshrl.u32 %v1194_v35, 16  ;;  %v1227_v13 = vsel %vm1226_vm7, 1, %v11271_v9  ;;  %v1219_v62 = vshrl.u32 %v1215_v30, 16 }
 0x1f1   :  { %v1208_v42 = vadd.s32 %v1207_v51, %v1197_v12  ;;  %v1229_v11 = vadd.s32 %v1227_v13, %v1225_v27  ;;  %v2227_v52 = vand.u32 2139095040, %v7472_v50  ;;  %v1884_v41 = vsel %vm1761_vm1, %v1883_v17, %v7414_v20 }
 0x1f2   :  { %v1880_v34 = vmul.f32 %v1879_v39, %v1877_v14  ;;  %v1177_v22 = vsel %vm1173_vm13, %v7421_v47, %v1176_v61  ;;  %v1221_v48 = vshrl.u32 %v1216_v37, 16  ;;  %v2231_v30 = vand.u32 8388607, %v2224_v63 }
 0x1f3   :  { %v1209_v32 = vadd.s32 %v1208_v42, %v1199_v24  ;;  %v1230_v35 = vadd.s32 %v1229_v11, %v1219_v62  ;;  %v2228_v21 = vshrl.u32 %v2227_v52, 23  ;;  %v11289_v25 = vand.u32 2147483647, %v7176_v26 }
 0x1f4   :  { %v1881_v53 = vxor.u32 2147483648, %v1880_v34  ;;  %v1228_v20 = vadd.s32 %v1224_v28, %v1220_v57  ;;  %v1178_v17 = vsel %vm1172_vm5, %v1175_v10, %v1177_v22  ;;  %v11292_v37 = vsel %vm6681_vm10, %v6834_v2, %v6548_v40 }
 0x1f5   :  { %vm7495_vm8 = vcmp.le.f32.partialorder %v11289_v25, 0.7853982  ;;  %v1231_v47 = vadd.s32 %v1230_v35, %v1221_v48  ;;  %v6040_v61 = vadd.s32 4294967169, %v2228_v21  ;;  %v7508_v5 = vsel %vm7006_vm0, %v754_v45, %v11292_v37 }
 0x1f6   :  { %v1882_v0 = vsel %vm1761_vm1, %v1881_v53, %v1880_v34  ;;  %v1886_v38 = vsel %vm7495_vm8, 0, %v1884_v41  ;;  %vm1234_vm11 = vc.u32 %v1209_v32, %v1228_v20  ;;  %v2232_v54 = vor.u32 8388608, %v2231_v30 }
 0x1f7   :  { %v1885_v43 = vsel %vm7495_vm8, %v7176_v26, %v1882_v0  ;;  %v1235_v10 = vadd.s32 1, %v1231_v47  ;;  %v2234_v57 = vadd.s32 1, %v6040_v61  ;;  %v1232_v40 = vmul.u32 %v7424_v44, %v1178_v17 }
 0x1f8   :  { %v1887_v31 = vmul.f32 %v1885_v43, %v1885_v43  ;;  %v894_v2 = vmul.f32 6.2831855, %v7508_v5  ;;  %v1903_v28 = vadd.s32 3, %v1886_v38  ;;  %v7519_v14 = vshll.u32 %v2232_v54, 8 }
 0x1f9   :  { %v1236_v8 = vsel %vm1234_vm11, %v1235_v10, %v1231_v47  ;;  %vm2235_vm13 = vcmp.gt.s32.totalorder %v2234_v57, 0  ;;  %v7526_v41 = vadd.s32 %v1228_v20, %v1209_v32  ;;  %vm1902_vm15 = vweird.f32 %v7176_v26 }
 0x1fa   :  { %v1888_v23 = vmul.f32 -0.001358992, %v1887_v31  ;;  %v1895_v1 = vmul.f32 -0.00019511016, %v1887_v31  ;;  %v1237_v12 = vadd.s32 %v1236_v8, %v1232_v40  ;;  %v2236_v51 = vsel %vm2235_vm13, %v2234_v57, 0 }
 0x1fb   :  { %v2238_v27 = vand.u32 31, %v2236_v51  ;;  %v926_v42 = vmul.f32 %v894_v2, %v7026_v49  ;;  %v1904_v62 = vand.u32 3, %v1903_v28  ;;  %v7529_v22 = vand.u32 65535, %v7519_v14 }
 0x1fc   :  { %v1889_v39 = vadd.f32 0.041655596, %v1888_v23  ;;  %v1896_v24 = vadd.f32 0.008332121, %v1895_v1  ;;  %v1238_v13 = vadd.s32 536870912, %v1237_v12  ;;  %v7535_v30 = vshrl.u32 %v2236_v51, 5 }
 0x1fd   :  { %v7522_v11 = vsub.s32 32, %v2238_v27  ;;  %v7533_v21 = vadd.f32 %v926_v42, %v7039_v4  ;;  %vm1906_vm14 = vcmp.eq.s32.totalorder %v1904_v62, 0  ;;  %vm1909_vm6 = vcmp.eq.s32.totalorder %v1904_v62, 2 }
 0x1fe   :  { %v1890_v44 = vmul.f32 %v1889_v39, %v1887_v31  ;;  %v1897_v52 = vmul.f32 %v1896_v24, %v1887_v31  ;;  %v7524_v34 = vshrl.u32 %v1238_v13, 30  ;;  %vm1905_vm5 = vcmp.lt.s32.totalorder %v1904_v62, 2  ;;  %v11295_v62 = vld [vmem:[#allocation51_spill] sm:$0xff] }
 0x1ff   :  { %v2242_v25 = vshrl.u32 %v11272_v58, %v7522_v11  ;;  %v2245_v32 = vshrl.u32 %v11273_v46, %v7522_v11  ;;  %v2251_v16 = vshrl.u32 %v11275_v59, %v7522_v11  ;;  %v2241_v47 = vshll.u32 %v11268_v60, %v2238_v27 }
 0x200   :  { %v1891_v48 = vadd.f32 -0.4999988, %v1890_v44  ;;  %v1898_v45 = vadd.f32 -0.16666654, %v1897_v52  ;;  %v1240_v35 = vshll.u32 %v7524_v34, 30  ;;  %v2244_v61 = vshll.u32 %v11272_v58, %v2238_v27 }
 0x201   :  { %v2248_v37 = vshrl.u32 %v11274_v55, %v7522_v11  ;;  %v2250_v0 = vshll.u32 %v11274_v55, %v2238_v27  ;;  %v2254_v38 = vshrl.u32 %v11276_v29, %v7522_v11  ;;  %vm1141_vm4 = vcmp.lt.s32.totalorder %v7290_v3, 0 }
 0x202   :  { %v1892_v53 = vmul.f32 %v1891_v48, %v1887_v31  ;;  %v1899_v20 = vmul.f32 %v1898_v45, %v1887_v31  ;;  %v7543_v17 = vsub.s32 %v1237_v12, %v1240_v35  ;;  %v2243_v31 = vor.u32 %v2242_v25, %v2241_v47 }
 0x203   :  { %v7556_v40 = vor.u32 %v2245_v32, %v2244_v61  ;;  %v2247_v2 = vshll.u32 %v11273_v46, %v2238_v27  ;;  %v2252_v28 = vor.u32 %v2251_v16, %v2250_v0  ;;  %v2253_v12 = vshll.u32 %v11275_v59, %v2238_v27 }
 0x204   :  { %v1893_v10 = vadd.f32 1.0, %v1892_v53  ;;  %v1900_v54 = vadd.f32 1.0, %v1899_v20  ;;  %vm1242_vm1 = vcmp.lt.s32.totalorder %v7543_v17, 0  ;;  %v1243_v57 = vsub.s32 0, %v7543_v17 }
 0x205   :  { %v2249_v39 = vor.u32 %v2248_v37, %v2247_v2  ;;  %v2274_v24 = vshrl.u32 %v7519_v14, 16  ;;  %v1914_v13 = vand.u32 2147483647, %v7533_v21  ;;  %vm7565_vm2 = vcmp.le.f32.partialorder %v1139_v36, 0.7853982 }
 0x206   :  { %v1901_v8 = vmul.f32 %v1900_v54, %v1885_v43  ;;  %v1910_v23 = vxor.u32 2147483648, %v1893_v10  ;;  %v1244_v1 = vsel %vm1242_vm1, %v1243_v57, %v7543_v17  ;;  %v1263_v43 = vsub.s32 4, %v7524_v34 }
 0x207   :  { %v1245_v51 = vclz %v1244_v1  ;;  %v2255_v52 = vor.u32 %v2254_v38, %v2253_v12  ;;  %vm2256_vm3 = vcmp.lt.s32.totalorder %v7535_v30, 1  ;;  %vm2257_vm7 = vcmp.lt.s32.totalorder %v7535_v30, 2 }
 0x208   :  { %v1907_v42 = vxor.u32 2147483648, %v1901_v8  ;;  %vm2259_vm8 = vcmp.lt.s32.totalorder %v7535_v30, 4  ;;  %v2264_v27 = vsel %vm2256_vm3, %v2243_v31, %v7556_v40  ;;  %v1911_v36 = vsel %vm1909_vm6, %v1910_v23, %v1901_v8 }
 0x209   :  { %v6020_v48 = vadd.s32 4294967294, %v1245_v51  ;;  %vm2258_vm11 = vcmp.lt.s32.totalorder %v7535_v30, 3  ;;  %v2265_v35 = vsel %vm2259_vm8, %v2252_v28, 920167782  ;;  %v2268_v16 = vsel %vm2256_vm3, %v7556_v40, %v2249_v39 }
 0x20a   :  { %v1908_v45 = vsel %vm1906_vm14, %v1893_v10, %v1907_v42  ;;  %v2266_v32 = vsel %vm2258_vm11, %v2249_v39, %v2265_v35  ;;  %v2269_v61 = vsel %vm2259_vm8, %v2255_v52, 1326507024  ;;  %v1917_v10 = vand.u32 2139095040, %v7533_v21 }
 0x20b   :  { %v1912_v25 = vsel %vm1905_vm5, %v1908_v45, %v1911_v36  ;;  %vm6021_vm13 = vcmp.lt.s32.totalorder %v6020_v48, 0  ;;  %v2267_v47 = vsel %vm2257_vm7, %v2264_v27, %v2266_v32  ;;  %v1264_v26 = vsel %vm1141_vm4, %v1263_v43, %v7524_v34 }
 0x20c   :  { %v1913_v53 = vsel %vm1902_vm15, nan, %v1912_v25  ;;  %v1248_v20 = vsel %vm6021_vm13, 0, %v6020_v48  ;;  %v2270_v54 = vsel %vm2258_vm11, %v2252_v28, %v2269_v61  ;;  %v2297_v57 = vand.u32 65535, %v2267_v47 }
 0x20d   :  { %v5952_v37 = vsel %vm5944_vm9, %v11295_v62, %v1913_v53  ;;  %v1249_v0 = vsub.s32 32, %v1248_v20  ;;  %v1253_v38 = vsub.s32 4294967266, %v1248_v20  ;;  %v2298_v2 = vshrl.u32 %v2267_v47, 16 }
 0x20e   :  { %5985 = vst.msk [vmem:[%s11096_s1 + $0x28] sm:$0xff] %vm5979_vm12, %v5952_v37  ;;  %v1250_v8 = vshll.u32 %v7543_v17, %v1248_v20  ;;  %v2271_v12 = vsel %vm2257_vm7, %v2268_v16, %v2270_v54  ;;  %v2240_v51 = vshrl.u32 %v11268_v60, %v7522_v11  ;;  %v1266_v28 = vsel %vm7565_vm2, 0, %v1264_v26 }
 0x20f   :  { %v1251_v23 = vshrl.u32 %v7526_v41, %v1249_v0  ;;  %v1254_v1 = vadd.s32 127, %v1253_v38  ;;  %v2275_v42 = vand.u32 65535, %v2271_v12  ;;  %v2276_v52 = vshrl.u32 %v2271_v12, 16 }
 0x210   :  { %v2300_v34 = vmul.u32 %v2298_v2, %v7529_v22  ;;  %v2301_v27 = vmul.u32 %v2297_v57, %v2274_v24  ;;  %v2260_v41 = vsel %vm2256_vm3, %v2240_v51, %v2243_v31  ;;  %v2261_v17 = vsel %vm2259_vm8, %v2249_v39, 2102212464 }
 0x211   :  { %v1252_v43 = vor.u32 %v1251_v23, %v1250_v8  ;;  %v1255_v48 = vshll.u32 %v1254_v1, 23  ;;  %v2278_v45 = vmul.u32 %v2276_v52, %v7529_v22  ;;  %v2279_v36 = vmul.u32 %v2275_v42, %v2274_v24 }
 0x212   :  { %v2299_v35 = vmul.u32 %v2297_v57, %v7529_v22  ;;  %v2302_v25 = vmul.u32 %v2298_v2, %v2274_v24  ;;  %v2303_v32 = vshll.u32 %v2300_v34, 16  ;;  %v2277_v53 = vmul.u32 %v2275_v42, %v7529_v22 }
 0x213   :  { %v1256_v11 = vor.u32 4788187, %v1255_v48  ;;  %v1259_v16 = vcvt.s32.f32 %v1252_v43  ;;  %v2280_v20 = vmul.u32 %v2276_v52, %v2274_v24  ;;  %v2281_v47 = vshll.u32 %v2278_v45, 16 }
 0x214   :  { %v2283_v62 = vshll.u32 %v2279_v36, 16  ;;  %v2305_v37 = vshll.u32 %v2301_v27, 16  ;;  %vm2307_vm14 = vc.u32 %v2299_v35, %v2303_v32  ;;  %v2309_v0 = vadd.s32 %v2303_v32, %v2299_v35 }
 0x215   :  { %v1257_v61 = vand.u32 2147483647, %v1256_v11  ;;  %vm2285_vm6 = vc.u32 %v2277_v53, %v2281_v47  ;;  %v2287_v31 = vadd.s32 %v2281_v47, %v2277_v53  ;;  %v2308_v39 = vsel %vm2307_vm14, 1, %v11271_v9 }
 0x216   :  { %v2286_v26 = vsel %vm2285_vm6, 1, %v11271_v9  ;;  %v2310_v54 = vadd.s32 %v2308_v39, %v2302_v25  ;;  %v1918_v57 = vshrl.u32 %v1917_v10, 23  ;;  %v2262_v22 = vsel %vm2258_vm11, %v7556_v40, %v2261_v17 }
 0x217   :  { %v1260_v38 = vmul.f32 %v1259_v16, %v1257_v61  ;;  %v2288_v24 = vadd.s32 %v2286_v26, %v2280_v20  ;;  %vm2289_vm5 = vc.u32 %v2287_v31, %v2283_v62  ;;  %vm2311_vm15 = vc.u32 %v2309_v0, %v2305_v37 }
 0x218   :  { %v2290_v8 = vsel %vm2289_vm5, 1, %v11271_v9  ;;  %v2312_v23 = vsel %vm2311_vm15, 1, %v11271_v9  ;;  %v6034_v1 = vadd.s32 4294967169, %v1918_v57  ;;  %v2282_v12 = vshrl.u32 %v2278_v45, 16 }
 0x219   :  { %v1261_v2 = vxor.u32 2147483648, %v1260_v38  ;;  %v2292_v51 = vadd.s32 %v2290_v8, %v2288_v24  ;;  %v2304_v42 = vshrl.u32 %v2300_v34, 16  ;;  %v2314_v52 = vadd.s32 %v2312_v23, %v2310_v54 }
 0x21a   :  { %v1283_v43 = vadd.s32 3, %v1266_v28  ;;  %v2284_v48 = vshrl.u32 %v2279_v36, 16  ;;  %v1924_v11 = vadd.s32 1, %v6034_v1  ;;  %v2306_v35 = vshrl.u32 %v2301_v27, 16 }
 0x21b   :  { %v1262_v10 = vsel %vm1141_vm4, %v1261_v2, %v1260_v38  ;;  %v2293_v17 = vadd.s32 %v2292_v51, %v2282_v12  ;;  %v2315_v25 = vadd.s32 %v2314_v52, %v2304_v42  ;;  %v2263_v45 = vsel %vm2257_vm7, %v2260_v41, %v2262_v22 }
 0x21c   :  { %v1265_v40 = vsel %vm7565_vm2, %v7290_v3, %v1262_v10  ;;  %v7636_v16 = vadd.s32 %v2309_v0, %v2305_v37  ;;  %vm1925_vm1 = vcmp.gt.s32.totalorder %v1924_v11, 0  ;;  %v1921_v28 = vand.u32 8388607, %v1914_v13 }
 0x21d   :  { %v1267_v32 = vmul.f32 %v1265_v40, %v1265_v40  ;;  %v7638_v34 = vadd.s32 %v2293_v17, %v2284_v48  ;;  %v2316_v53 = vadd.s32 %v2315_v25, %v2306_v35  ;;  %v1926_v36 = vsel %vm1925_vm1, %v1924_v11, 0 }
 0x21e   :  { %v1928_v47 = vand.u32 31, %v1926_v36  ;;  %v2317_v41 = vmul.u32 %v7519_v14, %v2263_v45  ;;  %v1284_v37 = vand.u32 3, %v1283_v43  ;;  %v1922_v26 = vor.u32 8388608, %v1921_v28 }
 0x21f   :  { %v1268_v20 = vmul.f32 -0.001358992, %v1267_v32  ;;  %v1275_v44 = vmul.f32 -0.00019511016, %v1267_v32  ;;  %vm2319_vm4 = vc.u32 %v7638_v34, %v7636_v16  ;;  %v2320_v27 = vadd.s32 1, %v2316_v53 }
 0x220   :  { %v7645_v62 = vsub.s32 32, %v1928_v47  ;;  %v7647_v54 = vshrl.u32 %v1926_v36, 5  ;;  %vm1286_vm2 = vcmp.eq.s32.totalorder %v1284_v37, 0  ;;  %v1931_v1 = vshll.u32 %v11268_v60, %v1928_v47  ;;  %v738_v36 = vpop.permute.xlu1 %737 }
 0x221   :  { %v1269_v61 = vadd.f32 0.041655596, %v1268_v20  ;;  %v1276_v30 = vadd.f32 0.008332121, %v1275_v44  ;;  %v2321_v31 = vsel %vm2319_vm4, %v2320_v27, %v2316_v53  ;;  %v1934_v12 = vshll.u32 %v11272_v58, %v1928_v47 }
 0x222   :  { %v2322_v38 = vadd.s32 %v2321_v31, %v2317_v41  ;;  %v1932_v57 = vshrl.u32 %v11272_v58, %v7645_v62  ;;  %v1935_v22 = vshrl.u32 %v11273_v46, %v7645_v62  ;;  %v1941_v24 = vshrl.u32 %v11275_v59, %v7645_v62  ;;  %v11296_v31 = vld [vmem:[#allocation2_spill] sm:$0xff] }
 0x223   :  { %v1270_v39 = vmul.f32 %v1269_v61, %v1267_v32  ;;  %v1277_v0 = vmul.f32 %v1276_v30, %v1267_v32  ;;  %v1938_v23 = vshrl.u32 %v11274_v55, %v7645_v62  ;;  %v1937_v51 = vshll.u32 %v11273_v46, %v1928_v47 }
 0x224   :  { %v2323_v8 = vadd.s32 536870912, %v2322_v38  ;;  %v1940_v42 = vshll.u32 %v11274_v55, %v1928_v47  ;;  %vm1285_vm3 = vcmp.lt.s32.totalorder %v1284_v37, 2  ;;  %v1944_v48 = vshrl.u32 %v11276_v29, %v7645_v62 }
 0x225   :  { %v1271_v14 = vadd.f32 -0.4999988, %v1270_v39  ;;  %v1278_v2 = vadd.f32 -0.16666654, %v1277_v0  ;;  %vm1282_vm7 = vweird.f32 %v7290_v3  ;;  %v7666_v11 = vor.u32 %v1932_v57, %v1931_v1  ;;  %v11297_v39 = vld [vmem:[#allocation15_spill] sm:$0xff] }
 0x226   :  { %v7661_v43 = vshrl.u32 %v2323_v8, 30  ;;  %v7668_v17 = vor.u32 %v1935_v22, %v1934_v12  ;;  %v1942_v35 = vor.u32 %v1941_v24, %v1940_v42  ;;  %v1943_v25 = vshll.u32 %v11275_v59, %v1928_v47 }
 0x227   :  { %v1272_v52 = vmul.f32 %v1271_v14, %v1267_v32  ;;  %v1279_v10 = vmul.f32 %v1278_v2, %v1267_v32  ;;  %v7672_v32 = vor.u32 %v1938_v23, %v1937_v51  ;;  %vm1289_vm8 = vcmp.eq.s32.totalorder %v1284_v37, 2 }
 0x228   :  { %v2325_v28 = vshll.u32 %v7661_v43, 30  ;;  %v1945_v20 = vor.u32 %v1944_v48, %v1943_v25  ;;  %vm1946_vm11 = vcmp.lt.s32.totalorder %v7647_v54, 1  ;;  %v7675_v44 = vshll.u32 %v1922_v26, 8 }
 0x229   :  { %v1273_v45 = vadd.f32 1.0, %v1272_v52  ;;  %v1280_v53 = vadd.f32 1.0, %v1279_v10  ;;  %vm1949_vm13 = vcmp.lt.s32.totalorder %v7647_v54, 4  ;;  %vm1948_vm14 = vcmp.lt.s32.totalorder %v7647_v54, 3 }
 0x22a   :  { %v2326_v30 = vsub.s32 %v2322_v38, %v2325_v28  ;;  %v1954_v47 = vsel %vm1946_vm11, %v7666_v11, %v7668_v17  ;;  %v1955_v41 = vsel %vm1949_vm13, %v1942_v35, 920167782  ;;  %v11298_v0 = vsel %vm6681_vm10, %v11296_v31, %v11297_v39 }
 0x22b   :  { %v1281_v27 = vmul.f32 %v1280_v53, %v1265_v40  ;;  %v1290_v61 = vxor.u32 2147483648, %v1273_v45  ;;  %v7692_v40 = vsel %vm7006_vm0, %v738_v36, %v11298_v0  ;;  %v1958_v57 = vsel %vm1946_vm11, %v7668_v17, %v7672_v32  ;;  %v11299_v53 = vld [vmem:[#allocation52_spill] sm:$0xff] }
 0x22c   :  { %vm2327_vm6 = vcmp.lt.s32.totalorder %v2326_v30, 0  ;;  %v2328_v26 = vsub.s32 0, %v2326_v30  ;;  %vm1947_vm5 = vcmp.lt.s32.totalorder %v7647_v54, 2  ;;  %v1956_v22 = vsel %vm1948_vm14, %v7672_v32, %v1955_v41 }
 0x22d   :  { %v1287_v38 = vxor.u32 2147483648, %v1281_v27  ;;  %v1959_v24 = vsel %vm1949_vm13, %v1945_v20, 1326507024  ;;  %v1963_v14 = vand.u32 65535, %v7675_v44  ;;  %v1291_v8 = vsel %vm1289_vm8, %v1290_v61, %v1281_v27 }
 0x22e   :  { %v2329_v23 = vsel %vm2327_vm6, %v2328_v26, %v2326_v30  ;;  %v1960_v1 = vsel %vm1948_vm14, %v1942_v35, %v1959_v24  ;;  %v1957_v42 = vsel %vm1947_vm5, %v1954_v47, %v1956_v22  ;;  %v1964_v48 = vshrl.u32 %v7675_v44, 16 }
 0x22f   :  { %v1288_v2 = vsel %vm1286_vm2, %v1273_v45, %v1287_v38  ;;  %v2330_v51 = vclz %v2329_v23  ;;  %v1961_v52 = vsel %vm1947_vm5, %v1958_v57, %v1960_v1  ;;  %v890_v20 = vmul.f32 6.2831855, %v7692_v40 }
 0x230   :  { %v1292_v12 = vsel %vm1285_vm3, %v1288_v2, %v1291_v8  ;;  %v1965_v25 = vand.u32 65535, %v1961_v52  ;;  %v1966_v45 = vshrl.u32 %v1961_v52, 16  ;;  %v2318_v3 = vadd.s32 %v7636_v16, %v7638_v34 }
 0x231   :  { %v1293_v10 = vsel %vm1282_vm7, nan, %v1292_v12  ;;  %v6041_v37 = vadd.s32 4294967294, %v2330_v51  ;;  %v1987_v27 = vand.u32 65535, %v1957_v42  ;;  %v1988_v61 = vshrl.u32 %v1957_v42, 16 }
 0x232   :  { %v5948_v35 = vsel %vm5944_vm9, %v11299_v53, %v1293_v10  ;;  %v1968_v28 = vmul.u32 %v1966_v45, %v1963_v14  ;;  %v1969_v36 = vmul.u32 %v1965_v25, %v1964_v48  ;;  %v1930_v41 = vshrl.u32 %v11268_v60, %v7645_v62 }
 0x233   :  { %5981 = vst.msk [vmem:[%s11096_s1 + $0x8] sm:$0xff] %vm5979_vm12, %v5948_v35  ;;  %vm6042_vm15 = vcmp.lt.s32.totalorder %v6041_v37, 0  ;;  %v1967_v31 = vmul.u32 %v1965_v25, %v1963_v14  ;;  %v1970_v26 = vmul.u32 %v1966_v45, %v1964_v48  ;;  %vm2226_vm1 = vcmp.lt.s32.totalorder %v7472_v50, 0  ;;  %v774_v35 = vpop.permute.xlu2 %773 }
 0x234   :  { %v2333_v47 = vsel %vm6042_vm15, 0, %v6041_v37  ;;  %v1971_v39 = vshll.u32 %v1968_v28, 16  ;;  %v1973_v57 = vshll.u32 %v1969_v36, 16  ;;  %v1990_v2 = vmul.u32 %v1988_v61, %v1963_v14 }
 0x235   :  { %v2334_v0 = vsub.s32 32, %v2333_v47  ;;  %v2338_v38 = vsub.s32 4294967266, %v2333_v47  ;;  %v2335_v22 = vshll.u32 %v2326_v30, %v2333_v47  ;;  %v1991_v23 = vmul.u32 %v1987_v27, %v1964_v48 }
 0x236   :  { %vm1975_vm4 = vc.u32 %v1967_v31, %v1971_v39  ;;  %v1977_v24 = vadd.s32 %v1971_v39, %v1967_v31  ;;  %v1989_v62 = vmul.u32 %v1987_v27, %v1963_v14  ;;  %v1993_v12 = vshll.u32 %v1990_v2, 16 }
 0x237   :  { %v2336_v16 = vshrl.u32 %v2318_v3, %v2334_v0  ;;  %v2339_v34 = vadd.s32 127, %v2338_v38  ;;  %v1976_v8 = vsel %vm1975_vm4, 1, %v11271_v9  ;;  %vm7733_vm3 = vcmp.le.f32.partialorder %v2224_v63, 0.7853982 }
 0x238   :  { %v1978_v1 = vadd.s32 %v1976_v8, %v1970_v26  ;;  %vm1979_vm2 = vc.u32 %v1977_v24, %v1973_v57  ;;  %v2348_v52 = vsub.s32 4, %v7661_v43  ;;  %v1972_v25 = vshrl.u32 %v1968_v28, 16  ;;  %v11303_v28 = vld [vmem:[#allocation16_spill] sm:$0xff] }
 0x239   :  { %v2337_v42 = vor.u32 %v2336_v16, %v2335_v22  ;;  %v2340_v30 = vshll.u32 %v2339_v34, 23  ;;  %v1980_v10 = vsel %vm1979_vm2, 1, %v11271_v9  ;;  %v1992_v53 = vmul.u32 %v1988_v61, %v1964_v48  ;;  %v11302_v48 = vld [vmem:[#allocation4_spill] sm:$0xff] }
 0x23a   :  { %v1982_v45 = vadd.s32 %v1980_v10, %v1978_v1  ;;  %vm1997_vm7 = vc.u32 %v1989_v62, %v1993_v12  ;;  %v1995_v14 = vshll.u32 %v1991_v23, 16  ;;  %v1999_v27 = vadd.s32 %v1993_v12, %v1989_v62 }
 0x23b   :  { %v2341_v37 = vor.u32 4788187, %v2340_v30  ;;  %v1998_v3 = vsel %vm1997_vm7, 1, %v11271_v9  ;;  %v1951_v63 = vsel %vm1949_vm13, %v7672_v32, 2102212464  ;;  %v922_v39 = vmul.f32 %v890_v20, %v7026_v49 }
 0x23c   :  { %v1983_v47 = vadd.s32 %v1982_v45, %v1972_v25  ;;  %v2000_v31 = vadd.s32 %v1998_v3, %v1992_v53  ;;  %v2344_v38 = vcvt.s32.f32 %v2337_v42  ;;  %vm2001_vm8 = vc.u32 %v1999_v27, %v1995_v14 }
 0x23d   :  { %v2342_v0 = vand.u32 2147483647, %v2341_v37  ;;  %v11304_v61 = vsel %vm6681_vm10, %v11302_v48, %v11303_v28  ;;  %v1974_v57 = vshrl.u32 %v1969_v36, 16  ;;  %v2002_v22 = vsel %vm2001_vm8, 1, %v11271_v9 }
 0x23e   :  { %v7751_v26 = vsel %vm7006_vm0, %v774_v35, %v11304_v61  ;;  %v7755_v32 = vadd.f32 %v922_v39, %v7039_v4  ;;  %v2349_v16 = vsel %vm2226_vm1, %v2348_v52, %v7661_v43  ;;  %v1994_v34 = vshrl.u32 %v1990_v2, 16 }
 0x23f   :  { %v899_v20 = vmul.f32 6.2831855, %v7751_v26  ;;  %v2345_v24 = vmul.f32 %v2344_v38, %v2342_v0  ;;  %v2004_v8 = vadd.s32 %v2002_v22, %v2000_v31  ;;  %v1950_v1 = vsel %vm1946_vm11, %v1930_v41, %v7666_v11 }
 0x240   :  { %v1952_v36 = vsel %vm1948_vm14, %v7668_v17, %v1951_v63  ;;  %v1984_v62 = vadd.s32 %v1983_v47, %v1974_v57  ;;  %v1294_v12 = vand.u32 2147483647, %v7755_v32  ;;  %v1996_v30 = vshrl.u32 %v1991_v23, 16 }
 0x241   :  { %v2346_v42 = vxor.u32 2147483648, %v2345_v24  ;;  %v2005_v10 = vadd.s32 %v2004_v8, %v1994_v34  ;;  %v1297_v25 = vand.u32 2139095040, %v7755_v32  ;;  %v2351_v43 = vsel %vm7733_vm3, 0, %v2349_v16 }
 0x242   :  { %v2003_v2 = vadd.s32 %v1999_v27, %v1995_v14  ;;  %v931_v52 = vmul.f32 %v899_v20, %v7026_v49  ;;  %v1953_v17 = vsel %vm1947_vm5, %v1950_v1, %v1952_v36  ;;  %v1301_v53 = vand.u32 8388607, %v1294_v12 }
 0x243   :  { %v2347_v11 = vsel %vm2226_vm1, %v2346_v42, %v2345_v24  ;;  %v2006_v41 = vadd.s32 %v2005_v10, %v1996_v30  ;;  %v1298_v45 = vshrl.u32 %v1297_v25, 23  ;;  %v2368_v27 = vadd.s32 3, %v2351_v43 }
 0x244   :  { %v2350_v23 = vsel %vm7733_vm3, %v7472_v50, %v2347_v11  ;;  %vm2009_vm11 = vc.u32 %v1984_v62, %v2003_v2  ;;  %v7782_v3 = vadd.f32 %v931_v52, %v7039_v4  ;;  %v2007_v54 = vmul.u32 %v7675_v44, %v1953_v17 }
 0x245   :  { %v2352_v35 = vmul.f32 %v2350_v23, %v2350_v23  ;;  %v2010_v37 = vadd.s32 1, %v2006_v41  ;;  %v6022_v14 = vadd.s32 4294967169, %v1298_v45  ;;  %v1302_v51 = vor.u32 8388608, %v1301_v53 }
 0x246   :  { %v2692_v28 = vand.u32 2139095040, %v7782_v3  ;;  %v2369_v61 = vand.u32 3, %v2368_v27  ;;  %v2689_v44 = vand.u32 2147483647, %v7782_v3  ;;  %v2008_v52 = vadd.s32 %v2003_v2, %v1984_v62 }
 0x247   :  { %v2353_v63 = vmul.f32 -0.001358992, %v2352_v35  ;;  %v2360_v47 = vmul.f32 -0.00019511016, %v2352_v35  ;;  %v2011_v31 = vsel %vm2009_vm11, %v2010_v37, %v2006_v41  ;;  %v1304_v39 = vadd.s32 1, %v6022_v14 }
 0x248   :  { %v2012_v0 = vadd.s32 %v2011_v31, %v2007_v54  ;;  %v7786_v8 = vshll.u32 %v1302_v51, 8  ;;  %v2693_v42 = vshrl.u32 %v2692_v28, 23  ;;  %vm2371_vm14 = vcmp.eq.s32.totalorder %v2369_v61, 0 }
 0x249   :  { %v2354_v38 = vadd.f32 0.041655596, %v2353_v63  ;;  %v2361_v48 = vadd.f32 0.008332121, %v2360_v47  ;;  %vm1305_vm13 = vcmp.gt.s32.totalorder %v1304_v39, 0  ;;  %vm2370_vm6 = vcmp.lt.s32.totalorder %v2369_v61, 2 }
 0x24a   :  { %v2013_v57 = vadd.s32 536870912, %v2012_v0  ;;  %v1306_v22 = vsel %vm1305_vm13, %v1304_v39, 0  ;;  %vm2374_vm5 = vcmp.eq.s32.totalorder %v2369_v61, 2  ;;  %vm2367_vm15 = vweird.f32 %v7472_v50 }
 0x24b   :  { %v2355_v20 = vmul.f32 %v2354_v38, %v2352_v35  ;;  %v2362_v24 = vmul.f32 %v2361_v48, %v2352_v35  ;;  %v1308_v16 = vand.u32 31, %v1306_v22  ;;  %vm1916_vm1 = vcmp.lt.s32.totalorder %v7533_v21, 0 }
 0x24c   :  { %v2014_v34 = vshrl.u32 %v2013_v57, 30  ;;  %v7794_v17 = vand.u32 65535, %v7786_v8  ;;  %v7797_v41 = vshrl.u32 %v7786_v8, 16  ;;  %v7801_v45 = vand.u32 8388607, %v2689_v44 }
 0x24d   :  { %v2356_v1 = vadd.f32 -0.4999988, %v2355_v20  ;;  %v2363_v36 = vadd.f32 -0.16666654, %v2362_v24  ;;  %v1309_v10 = vsub.s32 32, %v1308_v16  ;;  %v7803_v37 = vshrl.u32 %v1306_v22, 5 }
 0x24e   :  { %v2015_v30 = vshll.u32 %v2014_v34, 30  ;;  %v6049_v62 = vadd.s32 4294967169, %v2693_v42  ;;  %v1311_v14 = vshll.u32 %v11268_v60, %v1308_v16  ;;  %v2038_v47 = vsub.s32 4, %v2014_v34 }
 0x24f   :  { %v2357_v25 = vmul.f32 %v2356_v1, %v2352_v35  ;;  %v2364_v43 = vmul.f32 %v2363_v36, %v2352_v35  ;;  %v1312_v27 = vshrl.u32 %v11272_v58, %v1309_v10  ;;  %v1315_v31 = vshrl.u32 %v11273_v46, %v1309_v10 }
 0x250   :  { %v7791_v11 = vsub.s32 %v2012_v0, %v2015_v30  ;;  %v1314_v0 = vshll.u32 %v11272_v58, %v1308_v16  ;;  %v1318_v51 = vshrl.u32 %v11274_v55, %v1309_v10  ;;  %v1321_v38 = vshrl.u32 %v11275_v59, %v1309_v10 }
 0x251   :  { %v2358_v53 = vadd.f32 1.0, %v2357_v25  ;;  %v2365_v35 = vadd.f32 1.0, %v2364_v43  ;;  %vm7816_vm2 = vcmp.le.f32.partialorder %v1914_v13, 0.7853982  ;;  %v1317_v57 = vshll.u32 %v11273_v46, %v1308_v16 }
 0x252   :  { %vm2017_vm4 = vcmp.lt.s32.totalorder %v7791_v11, 0  ;;  %v2018_v2 = vsub.s32 0, %v7791_v11  ;;  %v1324_v22 = vshrl.u32 %v11276_v29, %v1309_v10  ;;  %v1310_v20 = vshrl.u32 %v11268_v60, %v1309_v10 }
 0x253   :  { %v2366_v54 = vmul.f32 %v2365_v35, %v2350_v23  ;;  %v2375_v63 = vxor.u32 2147483648, %v2358_v53  ;;  %v1313_v24 = vor.u32 %v1312_v27, %v1311_v14  ;;  %v1320_v1 = vshll.u32 %v11274_v55, %v1308_v16 }
 0x254   :  { %v2019_v39 = vsel %vm2017_vm4, %v2018_v2, %v7791_v11  ;;  %v1323_v36 = vshll.u32 %v11275_v59, %v1308_v16  ;;  %v1316_v25 = vor.u32 %v1315_v31, %v1314_v0  ;;  %v1319_v35 = vor.u32 %v1318_v51, %v1317_v57 }
 0x255   :  { %v2372_v48 = vxor.u32 2147483648, %v2366_v54  ;;  %v2020_v23 = vclz %v2019_v39  ;;  %v2376_v30 = vsel %vm2374_vm5, %v2375_v63, %v2366_v54  ;;  %v1322_v2 = vor.u32 %v1321_v38, %v1320_v1 }
 0x256   :  { %v1325_v39 = vor.u32 %v1324_v22, %v1323_v36  ;;  %v2039_v10 = vsel %vm1916_vm1, %v2038_v47, %v2014_v34  ;;  %vm1326_vm7 = vcmp.lt.s32.totalorder %v7803_v37, 1  ;;  %vm1327_vm8 = vcmp.lt.s32.totalorder %v7803_v37, 2 }
 0x257   :  { %v2373_v42 = vsel %vm2371_vm14, %v2358_v53, %v2372_v48  ;;  %v6035_v13 = vadd.s32 4294967294, %v2020_v23  ;;  %vm1328_vm11 = vcmp.lt.s32.totalorder %v7803_v37, 3  ;;  %vm1329_vm13 = vcmp.lt.s32.totalorder %v7803_v37, 4 }
 0x258   :  { %v2377_v43 = vsel %vm2370_vm6, %v2373_v42, %v2376_v30  ;;  %v1334_v34 = vsel %vm1326_vm7, %v1313_v24, %v1316_v25  ;;  %v1339_v27 = vsel %vm1329_vm13, %v1325_v39, 1326507024  ;;  %v2041_v0 = vsel %vm7816_vm2, 0, %v2039_v10 }
 0x259   :  { %v2378_v33 = vsel %vm2367_vm15, nan, %v2377_v43  ;;  %vm6036_vm3 = vcmp.lt.s32.totalorder %v6035_v13, 0  ;;  %v1340_v31 = vsel %vm1328_vm11, %v1322_v2, %v1339_v27  ;;  %v1331_v51 = vsel %vm1329_vm13, %v1319_v35, 2102212464 }
 0x25a   :  { %v5955_v16 = vsel %vm5944_vm9, %v7403_v7, %v2378_v33  ;;  %v2023_v53 = vsel %vm6036_vm3, 0, %v6035_v13  ;;  %v1335_v33 = vsel %vm1329_vm13, %v1322_v2, 920167782  ;;  %v1338_v7 = vsel %vm1326_vm7, %v1316_v25, %v1319_v35 }
 0x25b   :  { %5988 = vst.msk [vmem:[%s11096_s1 + $0x40] sm:$0xff] %vm5979_vm12, %v5955_v16  ;;  %v2024_v50 = vsub.s32 32, %v2023_v53  ;;  %v2028_v61 = vsub.s32 4294967266, %v2023_v53  ;;  %v2025_v14 = vshll.u32 %v7791_v11, %v2023_v53  ;;  %v1336_v47 = vsel %vm1328_vm11, %v1319_v35, %v1335_v33 }
 0x25c   :  { %v1337_v11 = vsel %vm1327_vm8, %v1334_v34, %v1336_v47  ;;  %v1341_v38 = vsel %vm1327_vm8, %v1338_v7, %v1340_v31  ;;  %v2697_v36 = vor.u32 8388608, %v7801_v45  ;;  %v2699_v42 = vadd.s32 1, %v6049_v62 }
 0x25d   :  { %v2026_v54 = vshrl.u32 %v2008_v52, %v2024_v50  ;;  %v2029_v63 = vadd.s32 127, %v2028_v61  ;;  %v1345_v52 = vand.u32 65535, %v1341_v38  ;;  %v1346_v57 = vshrl.u32 %v1341_v38, 16 }
 0x25e   :  { %v1367_v22 = vand.u32 65535, %v1337_v11  ;;  %v1368_v1 = vshrl.u32 %v1337_v11, 16  ;;  %v7859_v13 = vadd.s32 3, %v2041_v0  ;;  %v1330_v43 = vsel %vm1326_vm7, %v1310_v20, %v1313_v24 }
 0x25f   :  { %v2027_v48 = vor.u32 %v2026_v54, %v2025_v14  ;;  %v2030_v23 = vshll.u32 %v2029_v63, 23  ;;  %v1348_v35 = vmul.u32 %v1346_v57, %v7794_v17  ;;  %v1332_v39 = vsel %vm1328_vm11, %v1316_v25, %v1331_v51 }
 0x260   :  { %v1349_v10 = vmul.u32 %v1345_v52, %v7797_v41  ;;  %v1370_v16 = vmul.u32 %v1368_v1, %v7794_v17  ;;  %v1347_v50 = vmul.u32 %v1345_v52, %v7794_v17  ;;  %v1371_v61 = vmul.u32 %v1367_v22, %v7797_v41 }
 0x261   :  { %v2031_v30 = vor.u32 4788187, %v2030_v23  ;;  %v2034_v2 = vcvt.s32.f32 %v2027_v48  ;;  %v1351_v62 = vshll.u32 %v1348_v35, 16  ;;  %v1350_v34 = vmul.u32 %v1346_v57, %v7797_v41 }
 0x262   :  { %v1369_v20 = vmul.u32 %v1367_v22, %v7794_v17  ;;  %v1373_v24 = vshll.u32 %v1370_v16, 16  ;;  %vm2700_vm14 = vcmp.gt.s32.totalorder %v2699_v42, 0  ;;  %v1353_v33 = vshll.u32 %v1349_v10, 16 }
 0x263   :  { %v2032_v53 = vand.u32 2147483647, %v2031_v30  ;;  %vm1355_vm6 = vc.u32 %v1347_v50, %v1351_v62  ;;  %v1357_v25 = vadd.s32 %v1351_v62, %v1347_v50  ;;  %v1372_v27 = vmul.u32 %v1368_v1, %v7797_v41 }
 0x264   :  { %v1356_v7 = vsel %vm1355_vm6, 1, %v11271_v9  ;;  %v1375_v54 = vshll.u32 %v1371_v61, 16  ;;  %vm1377_vm5 = vc.u32 %v1369_v20, %v1373_v24  ;;  %v1379_v17 = vadd.s32 %v1373_v24, %v1369_v20 }
 0x265   :  { %v2035_v14 = vmul.f32 %v2034_v2, %v2032_v53  ;;  %v1358_v47 = vadd.s32 %v1356_v7, %v1350_v34  ;;  %vm1359_vm15 = vc.u32 %v1357_v25, %v1353_v33  ;;  %v1378_v31 = vsel %vm1377_vm5, 1, %v11271_v9 }
 0x266   :  { %v1360_v0 = vsel %vm1359_vm15, 1, %v11271_v9  ;;  %v1380_v51 = vadd.s32 %v1378_v31, %v1372_v27  ;;  %v2701_v11 = vsel %vm2700_vm14, %v2699_v42, 0  ;;  %v1352_v48 = vshrl.u32 %v1348_v35, 16 }
 0x267   :  { %v2036_v63 = vxor.u32 2147483648, %v2035_v14  ;;  %v1362_v23 = vadd.s32 %v1360_v0, %v1358_v47  ;;  %v2703_v52 = vand.u32 31, %v2701_v11  ;;  %v1333_v57 = vsel %vm1327_vm8, %v1330_v43, %v1332_v39 }
 0x268   :  { %v1354_v22 = vshrl.u32 %v1349_v10, 16  ;;  %vm1381_vm4 = vc.u32 %v1379_v17, %v1375_v54  ;;  %v1374_v53 = vshrl.u32 %v1370_v16, 16  ;;  %v1376_v50 = vshrl.u32 %v1371_v61, 16 }
 0x269   :  { %v2037_v38 = vsel %vm1916_vm1, %v2036_v63, %v2035_v14  ;;  %v1363_v30 = vadd.s32 %v1362_v23, %v1352_v48  ;;  %v1382_v2 = vsel %vm1381_vm4, 1, %v11271_v9  ;;  %v7885_v42 = vsub.s32 32, %v2703_v52 }
 0x26a   :  { %v2040_v41 = vsel %vm7816_vm2, %v7533_v21, %v2037_v38  ;;  %v1384_v35 = vadd.s32 %v1382_v2, %v1380_v51  ;;  %v7887_v62 = vshrl.u32 %v2701_v11, 5  ;;  %v7891_v24 = vadd.s32 %v1379_v17, %v1375_v54 }
 0x26b   :  { %v2042_v1 = vmul.f32 %v2040_v41, %v2040_v41  ;;  %v7889_v28 = vadd.s32 %v1363_v30, %v1354_v22  ;;  %v2706_v43 = vshll.u32 %v11268_v60, %v2703_v52  ;;  %v2707_v39 = vshrl.u32 %v11272_v58, %v7885_v42 }
 0x26c   :  { %v1385_v37 = vadd.s32 %v1384_v35, %v1374_v53  ;;  %v2710_v10 = vshrl.u32 %v11273_v46, %v7885_v42  ;;  %v2709_v14 = vshll.u32 %v11272_v58, %v2703_v52  ;;  %v2712_v33 = vshll.u32 %v11273_v46, %v2703_v52 }
 0x26d   :  { %v2043_v34 = vmul.f32 -0.001358992, %v2042_v1  ;;  %v2050_v20 = vmul.f32 -0.00019511016, %v2042_v1  ;;  %vm1389_vm1 = vc.u32 %v7889_v28, %v7891_v24  ;;  %v7902_v7 = vor.u32 %v2707_v39, %v2706_v43 }
 0x26e   :  { %v1386_v25 = vadd.s32 %v1385_v37, %v1376_v50  ;;  %v2713_v27 = vshrl.u32 %v11274_v55, %v7885_v42  ;;  %v2715_v47 = vshll.u32 %v11274_v55, %v2703_v52  ;;  %v2716_v31 = vshrl.u32 %v11275_v59, %v7885_v42 }
 0x26f   :  { %v2044_v16 = vadd.f32 0.041655596, %v2043_v34  ;;  %v2051_v61 = vadd.f32 0.008332121, %v2050_v20  ;;  %v7909_v17 = vor.u32 %v2710_v10, %v2709_v14  ;;  %v2718_v51 = vshll.u32 %v11275_v59, %v2703_v52 }
 0x270   :  { %v1390_v0 = vadd.s32 1, %v1386_v25  ;;  %v2719_v11 = vshrl.u32 %v11276_v29, %v7885_v42  ;;  %v1387_v23 = vmul.u32 %v7786_v8, %v1333_v57  ;;  %v2717_v22 = vor.u32 %v2716_v31, %v2715_v47 }
 0x271   :  { %v2045_v54 = vmul.f32 %v2044_v16, %v2042_v1  ;;  %v2052_v63 = vmul.f32 %v2051_v61, %v2042_v1  ;;  %v2714_v2 = vor.u32 %v2713_v27, %v2712_v33  ;;  %vm2721_vm2 = vcmp.lt.s32.totalorder %v7887_v62, 1 }
 0x272   :  { %v1391_v30 = vsel %vm1389_vm1, %v1390_v0, %v1386_v25  ;;  %v2720_v53 = vor.u32 %v2719_v11, %v2718_v51  ;;  %vm2724_vm3 = vcmp.lt.s32.totalorder %v7887_v62, 4  ;;  %v2059_v52 = vand.u32 3, %v7859_v13 }
 0x273   :  { %v2046_v38 = vadd.f32 -0.4999988, %v2045_v54  ;;  %v2053_v48 = vadd.f32 -0.16666654, %v2052_v63  ;;  %v1392_v34 = vadd.s32 %v1391_v30, %v1387_v23  ;;  %v2729_v20 = vsel %vm2721_vm2, %v7902_v7, %v7909_v17  ;;  %v11307_v30 = vld [vmem:[#allocation34_spill] sm:$0xff] }
 0x274   :  { %v2730_v8 = vsel %vm2724_vm3, %v2717_v22, 920167782  ;;  %v7926_v57 = vshll.u32 %v2697_v36, 8  ;;  %vm2723_vm7 = vcmp.lt.s32.totalorder %v7887_v62, 3  ;;  %vm2722_vm8 = vcmp.lt.s32.totalorder %v7887_v62, 2 }
 0x275   :  { %v2047_v50 = vmul.f32 %v2046_v38, %v2042_v1  ;;  %v2054_v35 = vmul.f32 %v2053_v48, %v2042_v1  ;;  %v1393_v1 = vadd.s32 536870912, %v1392_v34  ;;  %v2731_v13 = vsel %vm2723_vm7, %v2714_v2, %v2730_v8 }
 0x276   :  { %v2733_v39 = vsel %vm2721_vm2, %v7909_v17, %v2714_v2  ;;  %v2734_v10 = vsel %vm2724_vm3, %v2720_v53, 1326507024  ;;  %v2732_v61 = vsel %vm2722_vm8, %v2729_v20, %v2731_v13  ;;  %vm2057_vm11 = vweird.f32 %v7533_v21  ;;  %v11308_v53 = vld [vmem:[#allocation21_spill] sm:$0xff] }
 0x277   :  { %v2048_v37 = vadd.f32 1.0, %v2047_v50  ;;  %v2055_v43 = vadd.f32 1.0, %v2054_v35  ;;  %v7937_v16 = vshrl.u32 %v1393_v1, 30  ;;  %vm2060_vm13 = vcmp.lt.s32.totalorder %v2059_v52, 2 }
 0x278   :  { %v2735_v14 = vsel %vm2723_vm7, %v2717_v22, %v2734_v10  ;;  %v2763_v33 = vshrl.u32 %v2732_v61, 16  ;;  %vm2064_vm14 = vcmp.eq.s32.totalorder %v2059_v52, 2  ;;  %v2738_v54 = vand.u32 65535, %v7926_v57 }
 0x279   :  { %v2056_v45 = vmul.f32 %v2055_v43, %v2040_v41  ;;  %v2065_v36 = vxor.u32 2147483648, %v2048_v37  ;;  %v1395_v27 = vshll.u32 %v7937_v16, 30  ;;  %v766_v41 = vpop.permute.xlu0 %765  ;;  %vm2061_vm6 = vcmp.eq.s32.totalorder %v2059_v52, 0 }
 0x27a   :  { %v2736_v47 = vsel %vm2722_vm8, %v2733_v39, %v2735_v14  ;;  %v2762_v31 = vand.u32 65535, %v2732_v61  ;;  %v7950_v38 = vmul.u32 %v2763_v33, %v2738_v54  ;;  %v2739_v23 = vshrl.u32 %v7926_v57, 16 }
 0x27b   :  { %v2062_v25 = vxor.u32 2147483648, %v2056_v45  ;;  %v2066_v63 = vsel %vm2064_vm14, %v2065_v36, %v2056_v45  ;;  %v7948_v51 = vsub.s32 %v1392_v34, %v1395_v27  ;;  %v2740_v11 = vand.u32 65535, %v2736_v47 }
 0x27c   :  { %v2741_v22 = vshrl.u32 %v2736_v47, 16  ;;  %v11309_v50 = vsel %vm6681_vm10, %v11307_v30, %v11308_v53  ;;  %v2705_v20 = vshrl.u32 %v11268_v60, %v7885_v42  ;;  %v2766_v13 = vmul.u32 %v2762_v31, %v2739_v23 }
 0x27d   :  { %v2063_v0 = vsel %vm2061_vm6, %v2048_v37, %v2062_v25  ;;  %v7961_v35 = vsel %vm7006_vm0, %v766_v41, %v11309_v50  ;;  %vm1397_vm5 = vcmp.lt.s32.totalorder %v7948_v51, 0  ;;  %v1398_v52 = vsub.s32 0, %v7948_v51 }
 0x27e   :  { %v2067_v48 = vsel %vm2060_vm13, %v2063_v0, %v2066_v63  ;;  %v1388_v37 = vadd.s32 %v7891_v24, %v7889_v28  ;;  %v2743_v43 = vmul.u32 %v2741_v22, %v2738_v54  ;;  %v2744_v1 = vmul.u32 %v2740_v11, %v2739_v23 }
 0x27f   :  { %v2068_v34 = vsel %vm2057_vm11, nan, %v2067_v48  ;;  %v1399_v21 = vsel %vm1397_vm5, %v1398_v52, %v7948_v51  ;;  %v2725_v42 = vsel %vm2721_vm2, %v2705_v20, %v7902_v7  ;;  %v2768_v39 = vshll.u32 %v7950_v38, 16 }
 0x280   :  { %v5953_v8 = vsel %vm5944_vm9, %v7508_v5, %v2068_v34  ;;  %v1400_v5 = vclz %v1399_v21  ;;  %v2726_v28 = vsel %vm2724_vm3, %v2714_v2, 2102212464  ;;  %v2742_v24 = vmul.u32 %v2740_v11, %v2738_v54 }
 0x281   :  { %5986 = vst.msk [vmem:[%s11096_s1 + $0x30] sm:$0xff] %vm5979_vm12, %v5953_v8  ;;  %v2746_v10 = vshll.u32 %v2743_v43, 16  ;;  %v1418_v45 = vsub.s32 4, %v7937_v16  ;;  %v2745_v36 = vmul.u32 %v2741_v22, %v2739_v23  ;;  %v2764_v61 = vmul.u32 %v2762_v31, %v2738_v54 }
 0x282   :  { %v897_v14 = vmul.f32 6.2831855, %v7961_v35  ;;  %v6023_v25 = vadd.s32 4294967294, %v1400_v5  ;;  %v2748_v27 = vshll.u32 %v2744_v1, 16  ;;  %vm1296_vm4 = vcmp.lt.s32.totalorder %v7755_v32, 0 }
 0x283   :  { %vm2750_vm15 = vc.u32 %v2742_v24, %v2746_v10  ;;  %v2752_v41 = vadd.s32 %v2746_v10, %v2742_v24  ;;  %v2767_v63 = vmul.u32 %v2763_v33, %v2739_v23  ;;  %v2770_v47 = vshll.u32 %v2766_v13, 16  ;;  %v746_v23 = vpop.permute.xlu1 %745 }
 0x284   :  { %v2751_v7 = vsel %vm2750_vm15, 1, %v11271_v9  ;;  %vm2772_vm1 = vc.u32 %v2764_v61, %v2768_v39  ;;  %vm6024_vm2 = vcmp.lt.s32.totalorder %v6023_v25, 0  ;;  %v2774_v31 = vadd.s32 %v2768_v39, %v2764_v61  ;;  %v11311_v61 = vld [vmem:[#allocation17_spill] sm:$0xff] }
 0x285   :  { %v2753_v2 = vadd.s32 %v2751_v7, %v2745_v36  ;;  %vm2754_vm3 = vc.u32 %v2752_v41, %v2748_v27  ;;  %v2773_v0 = vsel %vm2772_vm1, 1, %v11271_v9  ;;  %v1403_v11 = vsel %vm6024_vm2, 0, %v6023_v25 }
 0x286   :  { %v2755_v54 = vsel %vm2754_vm3, 1, %v11271_v9  ;;  %v2775_v48 = vadd.s32 %v2773_v0, %v2767_v63  ;;  %v1404_v22 = vsub.s32 32, %v1403_v11  ;;  %v1408_v30 = vsub.s32 4294967266, %v1403_v11 }
 0x287   :  { %v2747_v53 = vshrl.u32 %v2743_v43, 16  ;;  %v2757_v50 = vadd.s32 %v2755_v54, %v2753_v2  ;;  %v1405_v34 = vshll.u32 %v7948_v51, %v1403_v11  ;;  %v2749_v52 = vshrl.u32 %v2744_v1, 16 }
 0x288   :  { %vm2776_vm11 = vc.u32 %v2774_v31, %v2770_v47  ;;  %v929_v33 = vmul.f32 %v897_v14, %v7026_v49  ;;  %v1406_v20 = vshrl.u32 %v1388_v37, %v1404_v22  ;;  %v1409_v8 = vadd.s32 127, %v1408_v30  ;;  %v11310_v37 = vld [vmem:[#allocation6_spill] sm:$0xff] }
 0x289   :  { %v2758_v21 = vadd.s32 %v2757_v50, %v2747_v53  ;;  %v2777_v5 = vsel %vm2776_vm11, 1, %v11271_v9  ;;  %v2727_v39 = vsel %vm2723_vm7, %v7909_v17, %v2726_v28  ;;  %v2769_v24 = vshrl.u32 %v7950_v38, 16 }
 0x28a   :  { %v2779_v43 = vadd.s32 %v2777_v5, %v2775_v48  ;;  %v7999_v10 = vadd.f32 %v929_v33, %v7039_v4  ;;  %v1407_v51 = vor.u32 %v1406_v20, %v1405_v34  ;;  %v1410_v1 = vshll.u32 %v1409_v8, 23 }
 0x28b   :  { %v2759_v36 = vadd.s32 %v2758_v21, %v2749_v52  ;;  %v11312_v14 = vsel %vm6681_vm10, %v11310_v37, %v11311_v61  ;;  %v2771_v27 = vshrl.u32 %v2766_v13, 16  ;;  %v1419_v7 = vsel %vm1296_vm4, %v1418_v45, %v7937_v16 }
 0x28c   :  { %v8008_v25 = vsel %vm7006_vm0, %v746_v23, %v11312_v14  ;;  %v2780_v17 = vadd.s32 %v2779_v43, %v2769_v24  ;;  %v2379_v38 = vand.u32 2147483647, %v7999_v10  ;;  %v2382_v28 = vand.u32 2139095040, %v7999_v10 }
 0x28d   :  { %v1411_v41 = vor.u32 4788187, %v1410_v1  ;;  %v2728_v63 = vsel %vm2722_vm8, %v2725_v42, %v2727_v39  ;;  %v2778_v2 = vadd.s32 %v2774_v31, %v2770_v47  ;;  %v892_v13 = vmul.f32 6.2831855, %v8008_v25 }
 0x28e   :  { %v2781_v0 = vadd.s32 %v2780_v17, %v2771_v27  ;;  %v2383_v11 = vshrl.u32 %v2382_v28, 23  ;;  %v2386_v54 = vand.u32 8388607, %v2379_v38  ;;  %v1414_v22 = vcvt.s32.f32 %v1407_v51 }
 0x28f   :  { %v1412_v48 = vand.u32 2147483647, %v1411_v41  ;;  %vm2784_vm7 = vc.u32 %v2759_v36, %v2778_v2  ;;  %vm8022_vm13 = vcmp.le.f32.partialorder %v1294_v12, 0.7853982  ;;  %v2782_v47 = vmul.u32 %v7926_v57, %v2728_v63 }
 0x290   :  { %v2785_v16 = vadd.s32 1, %v2781_v0  ;;  %v6043_v62 = vadd.s32 4294967169, %v2383_v11  ;;  %v1421_v45 = vsel %vm8022_vm13, 0, %v1419_v7  ;;  %v2387_v53 = vor.u32 8388608, %v2386_v54 }
 0x291   :  { %v1415_v42 = vmul.f32 %v1414_v22, %v1412_v48  ;;  %v924_v34 = vmul.f32 %v892_v13, %v7026_v49  ;;  %v1438_v23 = vadd.s32 3, %v1421_v45  ;;  %vm8044_vm14 = vcmp.le.f32.partialorder %v2689_v44, 0.7853982 }
 0x292   :  { %v2786_v31 = vsel %vm2784_vm7, %v2785_v16, %v2781_v0  ;;  %v2389_v50 = vadd.s32 1, %v6043_v62  ;;  %v8035_v57 = vshll.u32 %v2387_v53, 8  ;;  %vm2691_vm6 = vcmp.lt.s32.totalorder %v7782_v3, 0 }
 0x293   :  { %v1416_v52 = vxor.u32 2147483648, %v1415_v42  ;;  %v2787_v33 = vadd.s32 %v2786_v31, %v2782_v47  ;;  %v8038_v39 = vadd.f32 %v924_v34, %v7039_v4  ;;  %v8040_v51 = vand.u32 3, %v1438_v23 }
 0x294   :  { %vm2390_vm8 = vcmp.gt.s32.totalorder %v2389_v50, 0  ;;  %v8049_v14 = vadd.s32 %v2778_v2, %v2759_v36  ;;  %v8052_v41 = vand.u32 65535, %v8035_v57  ;;  %v8058_v11 = vshrl.u32 %v8035_v57, 16 }
 0x295   :  { %v1417_v12 = vsel %vm1296_vm4, %v1416_v52, %v1415_v42  ;;  %v2788_v20 = vadd.s32 536870912, %v2787_v33  ;;  %v2391_v8 = vsel %vm2390_vm8, %v2389_v50, 0  ;;  %v1604_v7 = vand.u32 2147483647, %v8038_v39 }
 0x296   :  { %v1420_v21 = vsel %vm8022_vm13, %v7755_v32, %v1417_v12  ;;  %v2393_v5 = vand.u32 31, %v2391_v8  ;;  %v8060_v54 = vshrl.u32 %v2391_v8, 5  ;;  %v1607_v13 = vand.u32 2139095040, %v8038_v39 }
 0x297   :  { %v1422_v24 = vmul.f32 %v1420_v21, %v1420_v21  ;;  %v2789_v43 = vshrl.u32 %v2788_v20, 30  ;;  %vm1441_vm15 = vcmp.eq.s32.totalorder %v8040_v51, 0  ;;  %vm1444_vm4 = vcmp.eq.s32.totalorder %v8040_v51, 2 }
 0x298   :  { %v2394_v28 = vsub.s32 32, %v2393_v5  ;;  %v2396_v36 = vshll.u32 %v11268_v60, %v2393_v5  ;;  %v2399_v2 = vshll.u32 %v11272_v58, %v2393_v5  ;;  %vm1440_vm1 = vcmp.lt.s32.totalorder %v8040_v51, 2 }
 0x299   :  { %v1423_v37 = vmul.f32 -0.001358992, %v1422_v24  ;;  %v1430_v61 = vmul.f32 -0.00019511016, %v1422_v24  ;;  %v2790_v27 = vshll.u32 %v2789_v43, 30  ;;  %v2813_v17 = vsub.s32 4, %v2789_v43 }
 0x29a   :  { %v2397_v62 = vshrl.u32 %v11272_v58, %v2394_v28  ;;  %v2400_v42 = vshrl.u32 %v11273_v46, %v2394_v28  ;;  %v2403_v45 = vshrl.u32 %v11274_v55, %v2394_v28  ;;  %v2406_v50 = vshrl.u32 %v11275_v59, %v2394_v28 }
 0x29b   :  { %v1424_v63 = vadd.f32 0.041655596, %v1423_v37  ;;  %v1431_v0 = vadd.f32 0.008332121, %v1430_v61  ;;  %v8055_v44 = vsub.s32 %v2787_v33, %v2790_v27  ;;  %v8069_v16 = vsel %vm2691_vm6, %v2813_v17, %v2789_v43 }
 0x29c   :  { %v2395_v52 = vshrl.u32 %v11268_v60, %v2394_v28  ;;  %v2402_v33 = vshll.u32 %v11273_v46, %v2393_v5  ;;  %v2409_v23 = vshrl.u32 %v11276_v29, %v2394_v28  ;;  %v2816_v8 = vsel %vm8044_vm14, 0, %v8069_v16 }
 0x29d   :  { %v1425_v48 = vmul.f32 %v1424_v63, %v1422_v24  ;;  %v1432_v22 = vmul.f32 %v1431_v0, %v1422_v24  ;;  %vm2792_vm5 = vcmp.lt.s32.totalorder %v8055_v44, 0  ;;  %v2793_v30 = vsub.s32 0, %v8055_v44 }
 0x29e   :  { %v2405_v43 = vshll.u32 %v11274_v55, %v2393_v5  ;;  %vm1437_vm2 = vweird.f32 %v7755_v32  ;;  %v2398_v61 = vor.u32 %v2397_v62, %v2396_v36  ;;  %v8087_v27 = vor.u32 %v2400_v42, %v2399_v2 }
 0x29f   :  { %v1426_v47 = vadd.f32 -0.4999988, %v1425_v48  ;;  %v1433_v31 = vadd.f32 -0.16666654, %v1432_v22  ;;  %v2794_v53 = vsel %vm2792_vm5, %v2793_v30, %v8055_v44  ;;  %v2408_v17 = vshll.u32 %v11275_v59, %v2393_v5 }
 0x2a0   :  { %v2795_v34 = vclz %v2794_v53  ;;  %v2404_v0 = vor.u32 %v2403_v45, %v2402_v33  ;;  %vm2411_vm11 = vcmp.lt.s32.totalorder %v8060_v54, 1  ;;  %vm2412_vm7 = vcmp.lt.s32.totalorder %v8060_v54, 2 }
 0x2a1   :  { %v1427_v12 = vmul.f32 %v1426_v47, %v1422_v24  ;;  %v1434_v20 = vmul.f32 %v1433_v31, %v1422_v24  ;;  %v2407_v24 = vor.u32 %v2406_v50, %v2405_v43  ;;  %v2410_v48 = vor.u32 %v2409_v23, %v2408_v17 }
 0x2a2   :  { %v6050_v37 = vadd.s32 4294967294, %v2795_v34  ;;  %vm2413_vm13 = vcmp.lt.s32.totalorder %v8060_v54, 3  ;;  %vm2414_vm8 = vcmp.lt.s32.totalorder %v8060_v54, 4  ;;  %v2419_v5 = vsel %vm2411_vm11, %v2398_v61, %v8087_v27 }
 0x2a3   :  { %v1428_v63 = vadd.f32 1.0, %v1427_v12  ;;  %v1435_v28 = vadd.f32 1.0, %v1434_v20  ;;  %v2420_v45 = vsel %vm2414_vm8, %v2407_v24, 920167782  ;;  %v2424_v50 = vsel %vm2414_vm8, %v2410_v48, 1326507024 }
 0x2a4   :  { %vm6051_vm3 = vcmp.lt.s32.totalorder %v6050_v37, 0  ;;  %v2421_v53 = vsel %vm2413_vm13, %v2404_v0, %v2420_v45  ;;  %v2425_v23 = vsel %vm2413_vm13, %v2407_v24, %v2424_v50  ;;  %v1608_v51 = vshrl.u32 %v1607_v13, 23 }
 0x2a5   :  { %v1436_v22 = vmul.f32 %v1435_v28, %v1420_v21  ;;  %v1445_v30 = vxor.u32 2147483648, %v1428_v63  ;;  %v2798_v16 = vsel %vm6051_vm3, 0, %v6050_v37  ;;  %v2423_v21 = vsel %vm2411_vm11, %v8087_v27, %v2404_v0 }
 0x2a6   :  { %v2799_v36 = vsub.s32 32, %v2798_v16  ;;  %v2803_v2 = vsub.s32 4294967266, %v2798_v16  ;;  %v2800_v42 = vshll.u32 %v8055_v44, %v2798_v16  ;;  %v2422_v33 = vsel %vm2412_vm7, %v2419_v5, %v2421_v53 }
 0x2a7   :  { %v1442_v62 = vxor.u32 2147483648, %v1436_v22  ;;  %v1446_v44 = vsel %vm1444_vm4, %v1445_v30, %v1436_v22  ;;  %v2426_v43 = vsel %vm2412_vm7, %v2423_v21, %v2425_v23  ;;  %v2452_v28 = vand.u32 65535, %v2422_v33 }
 0x2a8   :  { %v2801_v47 = vshrl.u32 %v8049_v14, %v2799_v36  ;;  %v2804_v31 = vadd.s32 127, %v2803_v2  ;;  %v2430_v17 = vand.u32 65535, %v2426_v43  ;;  %v2453_v24 = vshrl.u32 %v2422_v33, 16 }
 0x2a9   :  { %v1443_v34 = vsel %vm1441_vm15, %v1428_v63, %v1442_v62  ;;  %v2431_v63 = vshrl.u32 %v2426_v43, 16  ;;  %v2833_v30 = vadd.s32 3, %v2816_v8  ;;  %v2415_v32 = vsel %vm2411_vm11, %v2395_v52, %v2398_v61 }
 0x2aa   :  { %v1447_v14 = vsel %vm1440_vm1, %v1443_v34, %v1446_v44  ;;  %v2802_v12 = vor.u32 %v2801_v47, %v2800_v42  ;;  %v2805_v20 = vshll.u32 %v2804_v31, 23  ;;  %v2434_v36 = vmul.u32 %v2430_v17, %v8058_v11 }
 0x2ab   :  { %v1448_v37 = vsel %vm1437_vm2, nan, %v1447_v14  ;;  %v2433_v16 = vmul.u32 %v2431_v63, %v8052_v41  ;;  %v2455_v5 = vmul.u32 %v2453_v24, %v8052_v41  ;;  %v2456_v62 = vmul.u32 %v2452_v28, %v8058_v11 }
 0x2ac   :  { %v5949_v48 = vsel %vm5944_vm9, %v7692_v40, %v1448_v37  ;;  %v2806_v22 = vor.u32 4788187, %v2805_v20  ;;  %v2809_v40 = vcvt.s32.f32 %v2802_v12  ;;  %v2416_v13 = vsel %vm2414_vm8, %v2404_v0, 2102212464 }
 0x2ad   :  { %5982 = vst.msk [vmem:[%s11096_s1 + $0x10] sm:$0xff] %vm5979_vm12, %v5949_v48  ;;  %v2432_v42 = vmul.u32 %v2430_v17, %v8052_v41  ;;  %v2435_v8 = vmul.u32 %v2431_v63, %v8058_v11  ;;  %v2436_v45 = vshll.u32 %v2433_v16, 16  ;;  %v2438_v52 = vshll.u32 %v2434_v36, 16 }
 0x2ae   :  { %v2807_v2 = vand.u32 2147483647, %v2806_v22  ;;  %v2454_v61 = vmul.u32 %v2452_v28, %v8052_v41  ;;  %v2458_v47 = vshll.u32 %v2455_v5, 16  ;;  %v2457_v53 = vmul.u32 %v2453_v24, %v8058_v11 }
 0x2af   :  { %vm2440_vm5 = vc.u32 %v2432_v42, %v2436_v45  ;;  %v2442_v31 = vadd.s32 %v2436_v45, %v2432_v42  ;;  %v2460_v50 = vshll.u32 %v2456_v62, 16  ;;  %v6028_v14 = vadd.s32 4294967169, %v1608_v51 }
 0x2b0   :  { %v2810_v21 = vmul.f32 %v2809_v40, %v2807_v2  ;;  %v2441_v44 = vsel %vm2440_vm5, 1, %v11271_v9  ;;  %vm2462_vm15 = vc.u32 %v2454_v61, %v2458_v47  ;;  %v2464_v0 = vadd.s32 %v2458_v47, %v2454_v61 }
 0x2b1   :  { %v2443_v33 = vadd.s32 %v2441_v44, %v2435_v8  ;;  %vm2444_vm4 = vc.u32 %v2442_v31, %v2438_v52  ;;  %v2463_v23 = vsel %vm2462_vm15, 1, %v11271_v9  ;;  %v2437_v43 = vshrl.u32 %v2433_v16, 16 }
 0x2b2   :  { %v2811_v34 = vxor.u32 2147483648, %v2810_v21  ;;  %v2445_v41 = vsel %vm2444_vm4, 1, %v11271_v9  ;;  %v2465_v20 = vadd.s32 %v2463_v23, %v2457_v53  ;;  %vm2466_vm1 = vc.u32 %v2464_v0, %v2460_v50 }
 0x2b3   :  { %v2447_v37 = vadd.s32 %v2445_v41, %v2443_v33  ;;  %v2467_v17 = vsel %vm2466_vm1, 1, %v11271_v9  ;;  %v2459_v28 = vshrl.u32 %v2455_v5, 16  ;;  %v1614_v22 = vadd.s32 1, %v6028_v14 }
 0x2b4   :  { %v2812_v12 = vsel %vm2691_vm6, %v2811_v34, %v2810_v21  ;;  %v2469_v48 = vadd.s32 %v2467_v17, %v2465_v20  ;;  %v2417_v24 = vsel %vm2413_vm13, %v8087_v27, %v2416_v13  ;;  %v2439_v51 = vshrl.u32 %v2434_v36, 16 }
 0x2b5   :  { %v2815_v11 = vsel %vm8044_vm14, %v7782_v3, %v2812_v12  ;;  %v2448_v2 = vadd.s32 %v2447_v37, %v2437_v43  ;;  %v2461_v40 = vshrl.u32 %v2456_v62, 16  ;;  %vm1615_vm6 = vcmp.gt.s32.totalorder %v1614_v22, 0 }
 0x2b6   :  { %v2817_v63 = vmul.f32 %v2815_v11, %v2815_v11  ;;  %v2470_v45 = vadd.s32 %v2469_v48, %v2459_v28  ;;  %v8157_v16 = vadd.s32 %v2464_v0, %v2460_v50  ;;  %v1611_v5 = vand.u32 8388607, %v1604_v7 }
 0x2b7   :  { %v8155_v1 = vadd.s32 %v2448_v2, %v2439_v51  ;;  %v1616_v21 = vsel %vm1615_vm6, %v1614_v22, 0  ;;  %v2418_v27 = vsel %vm2412_vm7, %v2415_v32, %v2417_v24  ;;  %v2834_v31 = vand.u32 3, %v2833_v30 }
 0x2b8   :  { %v2818_v42 = vmul.f32 -0.001358992, %v2817_v63  ;;  %v2825_v8 = vmul.f32 -0.00019511016, %v2817_v63  ;;  %v2471_v36 = vadd.s32 %v2470_v45, %v2461_v40  ;;  %v1618_v62 = vand.u32 31, %v1616_v21 }
 0x2b9   :  { %vm2474_vm14 = vc.u32 %v8155_v1, %v8157_v16  ;;  %v2472_v50 = vmul.u32 %v8035_v57, %v2418_v27  ;;  %v1612_v23 = vor.u32 8388608, %v1611_v5  ;;  %vm2835_vm2 = vcmp.lt.s32.totalorder %v2834_v31, 2 }
 0x2ba   :  { %v2819_v52 = vadd.f32 0.041655596, %v2818_v42  ;;  %v2826_v61 = vadd.f32 0.008332121, %v2825_v8  ;;  %v2475_v53 = vadd.s32 1, %v2471_v36  ;;  %v8166_v34 = vsub.s32 32, %v1618_v62 }
 0x2bb   :  { %v1621_v54 = vshll.u32 %v11268_v60, %v1618_v62  ;;  %vm2832_vm3 = vweird.f32 %v7782_v3  ;;  %v8178_v37 = vshrl.u32 %v1616_v21, 5  ;;  %v1624_v17 = vshll.u32 %v11272_v58, %v1618_v62 }
 0x2bc   :  { %v2820_v13 = vmul.f32 %v2819_v52, %v2817_v63  ;;  %v2827_v47 = vmul.f32 %v2826_v61, %v2817_v63  ;;  %v2476_v33 = vsel %vm2474_vm14, %v2475_v53, %v2471_v36  ;;  %v1622_v32 = vshrl.u32 %v11272_v58, %v8166_v34 }
 0x2bd   :  { %v2477_v14 = vadd.s32 %v2476_v33, %v2472_v50  ;;  %v1625_v12 = vshrl.u32 %v11273_v46, %v8166_v34  ;;  %v1628_v57 = vshrl.u32 %v11274_v55, %v8166_v34  ;;  %v1631_v20 = vshrl.u32 %v11275_v59, %v8166_v34 }
 0x2be   :  { %v2821_v44 = vadd.f32 -0.4999988, %v2820_v13  ;;  %v2828_v0 = vadd.f32 -0.16666654, %v2827_v47  ;;  %v1630_v28 = vshll.u32 %v11274_v55, %v1618_v62  ;;  %v1623_v24 = vor.u32 %v1622_v32, %v1621_v54 }
 0x2bf   :  { %v2478_v43 = vadd.s32 536870912, %v2477_v14  ;;  %v8185_v2 = vor.u32 %v1625_v12, %v1624_v17  ;;  %v1634_v42 = vshrl.u32 %v11276_v29, %v8166_v34  ;;  %v1633_v21 = vshll.u32 %v11275_v59, %v1618_v62 }
 0x2c0   :  { %v2822_v41 = vmul.f32 %v2821_v44, %v2817_v63  ;;  %v2829_v30 = vmul.f32 %v2828_v0, %v2817_v63  ;;  %v1627_v63 = vshll.u32 %v11273_v46, %v1618_v62  ;;  %v1632_v40 = vor.u32 %v1631_v20, %v1630_v28  ;;  %v786_v44 = vpop.permute.xlu2 %785 }
 0x2c1   :  { %v8183_v51 = vshrl.u32 %v2478_v43, 30  ;;  %vm2836_vm11 = vcmp.eq.s32.totalorder %v2834_v31, 0  ;;  %vm2839_vm7 = vcmp.eq.s32.totalorder %v2834_v31, 2  ;;  %v8191_v61 = vshll.u32 %v1612_v23, 8 }
 0x2c2   :  { %v2823_v48 = vadd.f32 1.0, %v2822_v41  ;;  %v2830_v22 = vadd.f32 1.0, %v2829_v30  ;;  %v1629_v5 = vor.u32 %v1628_v57, %v1627_v63  ;;  %v1635_v36 = vor.u32 %v1634_v42, %v1633_v21  ;;  %v11317_v30 = vld [vmem:[#allocation7_spill] sm:$0xff]  ;;  %v11318_v57 = vld [vmem:[#allocation18_spill] sm:$0xff] }
 0x2c3   :  { %v2480_v52 = vshll.u32 %v8183_v51, 30  ;;  %vm1636_vm13 = vcmp.lt.s32.totalorder %v8178_v37, 1  ;;  %vm1639_vm8 = vcmp.lt.s32.totalorder %v8178_v37, 4  ;;  %vm1638_vm5 = vcmp.lt.s32.totalorder %v8178_v37, 3 }
 0x2c4   :  { %v2831_v8 = vmul.f32 %v2830_v22, %v2815_v11  ;;  %v2840_v45 = vxor.u32 2147483648, %v2823_v48  ;;  %v1644_v11 = vsel %vm1636_vm13, %v1623_v24, %v8185_v2  ;;  %v1645_v62 = vsel %vm1639_vm8, %v1632_v40, 920167782 }
 0x2c5   :  { %v2481_v13 = vsub.s32 %v2477_v14, %v2480_v52  ;;  %vm1637_vm15 = vcmp.lt.s32.totalorder %v8178_v37, 2  ;;  %v1646_v50 = vsel %vm1638_vm5, %v1629_v5, %v1645_v62  ;;  %v1648_v23 = vsel %vm1636_vm13, %v8185_v2, %v1629_v5 }
 0x2c6   :  { %v2837_v27 = vxor.u32 2147483648, %v2831_v8  ;;  %v2841_v53 = vsel %vm2839_vm7, %v2840_v45, %v2831_v8  ;;  %v1647_v54 = vsel %vm1637_vm15, %v1644_v11, %v1646_v50  ;;  %v1649_v32 = vsel %vm1639_vm8, %v1635_v36, 1326507024 }
 0x2c7   :  { %vm2482_vm4 = vcmp.lt.s32.totalorder %v2481_v13, 0  ;;  %v2483_v33 = vsub.s32 0, %v2481_v13  ;;  %v1650_v41 = vsel %vm1638_vm5, %v1632_v40, %v1649_v32  ;;  %v11319_v3 = vsel %vm6681_vm10, %v11317_v30, %v11318_v57 }
 0x2c8   :  { %v2838_v47 = vsel %vm2836_vm11, %v2823_v48, %v2837_v27  ;;  %v8226_v20 = vsel %vm7006_vm0, %v786_v44, %v11319_v3  ;;  %v1653_v17 = vand.u32 65535, %v8191_v61  ;;  %v1678_v28 = vshrl.u32 %v1647_v54, 16 }
 0x2c9   :  { %v2842_v0 = vsel %vm2835_vm2, %v2838_v47, %v2841_v53  ;;  %v2484_v12 = vsel %vm2482_vm4, %v2483_v33, %v2481_v13  ;;  %v1620_v48 = vshrl.u32 %v11268_v60, %v8166_v34  ;;  %v1654_v22 = vshrl.u32 %v8191_v61, 16 }
 0x2ca   :  { %v2843_v14 = vsel %vm2832_vm3, nan, %v2842_v0  ;;  %v2485_v43 = vclz %v2484_v12  ;;  %v1677_v40 = vand.u32 65535, %v1647_v54  ;;  %v1680_v45 = vmul.u32 %v1678_v28, %v1653_v17 }
 0x2cb   :  { %v5958_v31 = vsel %vm5944_vm9, %v7751_v26, %v2843_v14  ;;  %v1651_v26 = vsel %vm1637_vm15, %v1648_v23, %v1650_v41  ;;  %v2473_v21 = vadd.s32 %v8157_v16, %v8155_v1  ;;  %v1640_v52 = vsel %vm1636_vm13, %v1620_v48, %v1623_v24 }
 0x2cc   :  { %5991 = vst.msk [vmem:[%s11096_s1 + $0x58] sm:$0xff] %vm5979_vm12, %v5958_v31  ;;  %v1655_v63 = vand.u32 65535, %v1651_v26  ;;  %v6044_v42 = vadd.s32 4294967294, %v2485_v43  ;;  %v1656_v8 = vshrl.u32 %v1651_v26, 16  ;;  %v902_v36 = vmul.f32 6.2831855, %v8226_v20 }
 0x2cd   :  { %v1641_v34 = vsel %vm1639_vm8, %v1629_v5, 2102212464  ;;  %v1683_v62 = vshll.u32 %v1680_v45, 16  ;;  %v1679_v50 = vmul.u32 %v1677_v40, %v1653_v17  ;;  %v1681_v44 = vmul.u32 %v1677_v40, %v1654_v22 }
 0x2ce   :  { %v1659_v27 = vmul.u32 %v1655_v63, %v1654_v22  ;;  %vm6045_vm1 = vcmp.lt.s32.totalorder %v6044_v42, 0  ;;  %v1658_v11 = vmul.u32 %v1656_v8, %v1653_v17  ;;  %v1657_v53 = vmul.u32 %v1655_v63, %v1653_v17 }
 0x2cf   :  { %v2488_v47 = vsel %vm6045_vm1, 0, %v6044_v42  ;;  %vm2381_vm6 = vcmp.lt.s32.totalorder %v7999_v10, 0  ;;  %v1682_v33 = vmul.u32 %v1678_v28, %v1654_v22  ;;  %v1660_v23 = vmul.u32 %v1656_v8, %v1654_v22 }
 0x2d0   :  { %v2489_v0 = vsub.s32 32, %v2488_v47  ;;  %v2493_v1 = vsub.s32 4294967266, %v2488_v47  ;;  %v1661_v16 = vshll.u32 %v1658_v11, 16  ;;  %v2490_v24 = vshll.u32 %v2481_v13, %v2488_v47 }
 0x2d1   :  { %v1663_v14 = vshll.u32 %v1659_v27, 16  ;;  %vm1687_vm14 = vc.u32 %v1679_v50, %v1683_v62  ;;  %v1685_v12 = vshll.u32 %v1681_v44, 16  ;;  %v1689_v30 = vadd.s32 %v1683_v62, %v1679_v50  ;;  %v778_v62 = vpop.permute.xlu0 %777 }
 0x2d2   :  { %v2491_v54 = vshrl.u32 %v2473_v21, %v2489_v0  ;;  %v2494_v32 = vadd.s32 127, %v2493_v1  ;;  %vm1665_vm2 = vc.u32 %v1657_v53, %v1661_v16  ;;  %v1667_v5 = vadd.s32 %v1661_v16, %v1657_v53 }
 0x2d3   :  { %v1666_v31 = vsel %vm1665_vm2, 1, %v11271_v9  ;;  %v1688_v41 = vsel %vm1687_vm14, 1, %v11271_v9  ;;  %v2503_v26 = vsub.s32 4, %v8183_v51  ;;  %vm1691_vm11 = vc.u32 %v1689_v30, %v1685_v12 }
 0x2d4   :  { %v2492_v57 = vor.u32 %v2491_v54, %v2490_v24  ;;  %v2495_v3 = vshll.u32 %v2494_v32, 23  ;;  %v1668_v43 = vadd.s32 %v1666_v31, %v1660_v23  ;;  %vm1669_vm3 = vc.u32 %v1667_v5, %v1663_v14 }
 0x2d5   :  { %v1670_v13 = vsel %vm1669_vm3, 1, %v11271_v9  ;;  %v1690_v17 = vadd.s32 %v1688_v41, %v1682_v33  ;;  %v1662_v48 = vshrl.u32 %v1658_v11, 16  ;;  %v1692_v63 = vsel %vm1691_vm11, 1, %v11271_v9 }
 0x2d6   :  { %v2496_v28 = vor.u32 4788187, %v2495_v3  ;;  %v1672_v22 = vadd.s32 %v1670_v13, %v1668_v43  ;;  %v1642_v40 = vsel %vm1638_vm5, %v8185_v2, %v1641_v34  ;;  %v1684_v42 = vshrl.u32 %v1680_v45, 16  ;;  %v11321_v34 = vld [vmem:[#allocation24_spill] sm:$0xff] }
 0x2d7   :  { %v1694_v8 = vadd.s32 %v1692_v63, %v1690_v17  ;;  %v934_v21 = vmul.f32 %v902_v36, %v7026_v49  ;;  %v2499_v53 = vcvt.s32.f32 %v2492_v57  ;;  %v1664_v50 = vshrl.u32 %v1659_v27, 16  ;;  %v11320_v36 = vld [vmem:[#allocation37_spill] sm:$0xff] }
 0x2d8   :  { %v2497_v47 = vand.u32 2147483647, %v2496_v28  ;;  %v1673_v0 = vadd.s32 %v1672_v22, %v1662_v48  ;;  %v2504_v11 = vsel %vm2381_vm6, %v2503_v26, %v8183_v51  ;;  %v1686_v1 = vshrl.u32 %v1681_v44, 16 }
 0x2d9   :  { %v1695_v16 = vadd.s32 %v1694_v8, %v1684_v42  ;;  %v8259_v33 = vadd.f32 %v934_v21, %v7039_v4  ;;  %v1693_v45 = vadd.s32 %v1689_v30, %v1685_v12  ;;  %v11322_v23 = vsel %vm6681_vm10, %v11320_v36, %v11321_v34 }
 0x2da   :  { %v2500_v24 = vmul.f32 %v2499_v53, %v2497_v47  ;;  %v1674_v2 = vadd.s32 %v1673_v0, %v1664_v50  ;;  %v8268_v27 = vsel %vm7006_vm0, %v778_v62, %v11322_v23  ;;  %v1643_v51 = vsel %vm1637_vm15, %v1640_v52, %v1642_v40 }
 0x2db   :  { %v1696_v44 = vadd.s32 %v1695_v16, %v1686_v1  ;;  %v3154_v14 = vand.u32 2147483647, %v8259_v33  ;;  %v3157_v54 = vand.u32 2139095040, %v8259_v33  ;;  %vm2380_vm7 = vcmp.le.f32.partialorder %v2379_v38, 0.7853982 }
 0x2dc   :  { %v2501_v32 = vxor.u32 2147483648, %v2500_v24  ;;  %vm1699_vm13 = vc.u32 %v1674_v2, %v1693_v45  ;;  %v900_v41 = vmul.f32 6.2831855, %v8268_v27  ;;  %v2506_v52 = vsel %vm2380_vm7, 0, %v2504_v11 }
 0x2dd   :  { %v1700_v5 = vadd.s32 1, %v1696_v44  ;;  %v3158_v31 = vshrl.u32 %v3157_v54, 23  ;;  %v3161_v12 = vand.u32 8388607, %v3154_v14  ;;  %v1697_v30 = vmul.u32 %v8191_v61, %v1643_v51 }
 0x2de   :  { %v2502_v37 = vsel %vm2381_vm6, %v2501_v32, %v2500_v24  ;;  %v2523_v13 = vadd.s32 3, %v2506_v52  ;;  %v932_v48 = vmul.f32 %v900_v41, %v7026_v49  ;;  %vm1606_vm5 = vcmp.lt.s32.totalorder %v8038_v39, 0 }
 0x2df   :  { %v2505_v57 = vsel %vm2380_vm7, %v7999_v10, %v2502_v37  ;;  %v1701_v3 = vsel %vm1699_vm13, %v1700_v5, %v1696_v44  ;;  %v6058_v43 = vadd.s32 4294967169, %v3158_v31  ;;  %v3162_v17 = vor.u32 8388608, %v3161_v12 }
 0x2e0   :  { %v2507_v38 = vmul.f32 %v2505_v57, %v2505_v57  ;;  %v1702_v26 = vadd.s32 %v1701_v3, %v1697_v30  ;;  %v2524_v61 = vand.u32 3, %v2523_v13  ;;  %v8287_v50 = vadd.f32 %v932_v48, %v7039_v4 }
 0x2e1   :  { %v3164_v28 = vadd.s32 1, %v6058_v43  ;;  %v8284_v53 = vshll.u32 %v3162_v17, 8  ;;  %v1698_v23 = vadd.s32 %v1693_v45, %v1674_v2  ;;  %vm2522_vm14 = vweird.f32 %v7999_v10 }
 0x2e2   :  { %v2508_v22 = vmul.f32 -0.001358992, %v2507_v38  ;;  %v2515_v63 = vmul.f32 -0.00019511016, %v2507_v38  ;;  %v1703_v40 = vadd.s32 536870912, %v1702_v26  ;;  %vm2526_vm15 = vcmp.eq.s32.totalorder %v2524_v61, 0 }
 0x2e3   :  { %vm3165_vm8 = vcmp.gt.s32.totalorder %v3164_v28, 0  ;;  %vm2529_vm4 = vcmp.eq.s32.totalorder %v2524_v61, 2  ;;  %v8295_v51 = vand.u32 65535, %v8284_v53  ;;  %v2847_v44 = vand.u32 2139095040, %v8287_v50 }
 0x2e4   :  { %v2509_v42 = vadd.f32 0.041655596, %v2508_v22  ;;  %v2516_v8 = vadd.f32 0.008332121, %v2515_v63  ;;  %v1704_v21 = vshrl.u32 %v1703_v40, 30  ;;  %v3166_v62 = vsel %vm3165_vm8, %v3164_v28, 0 }
 0x2e5   :  { %v3168_v47 = vand.u32 31, %v3166_v62  ;;  %vm2525_vm1 = vcmp.lt.s32.totalorder %v2524_v61, 2  ;;  %v8301_v12 = vshrl.u32 %v3166_v62, 5  ;;  %vm8325_vm2 = vcmp.le.f32.partialorder %v1604_v7, 0.7853982 }
 0x2e6   :  { %v2510_v0 = vmul.f32 %v2509_v42, %v2507_v38  ;;  %v2517_v11 = vmul.f32 %v2516_v8, %v2507_v38  ;;  %v1705_v1 = vshll.u32 %v1704_v21, 30  ;;  %v1728_v31 = vsub.s32 4, %v1704_v21 }
 0x2e7   :  { %v8289_v16 = vsub.s32 32, %v3168_v47  ;;  %v3171_v41 = vshll.u32 %v11268_v60, %v3168_v47  ;;  %v3174_v43 = vshll.u32 %v11272_v58, %v3168_v47  ;;  %v3180_v28 = vshll.u32 %v11274_v55, %v3168_v47 }
 0x2e8   :  { %v2511_v24 = vadd.f32 -0.4999988, %v2510_v0  ;;  %v2518_v36 = vadd.f32 -0.16666654, %v2517_v11  ;;  %v8292_v34 = vsub.s32 %v1702_v26, %v1705_v1  ;;  %v3177_v40 = vshll.u32 %v11273_v46, %v3168_v47 }
 0x2e9   :  { %v3172_v2 = vshrl.u32 %v11272_v58, %v8289_v16  ;;  %v3175_v30 = vshrl.u32 %v11273_v46, %v8289_v16  ;;  %v3181_v26 = vshrl.u32 %v11275_v59, %v8289_v16  ;;  %v3184_v48 = vshrl.u32 %v11276_v29, %v8289_v16 }
 0x2ea   :  { %v2512_v54 = vmul.f32 %v2511_v24, %v2507_v38  ;;  %v2519_v32 = vmul.f32 %v2518_v36, %v2507_v38  ;;  %vm1707_vm6 = vcmp.lt.s32.totalorder %v8292_v34, 0  ;;  %v1708_v5 = vsub.s32 0, %v8292_v34 }
 0x2eb   :  { %v3178_v38 = vshrl.u32 %v11274_v55, %v8289_v16  ;;  %v3173_v63 = vor.u32 %v3172_v2, %v3171_v41  ;;  %v3204_v42 = vshrl.u32 %v8284_v53, 16  ;;  %v8319_v62 = vor.u32 %v3175_v30, %v3174_v43 }
 0x2ec   :  { %v2513_v45 = vadd.f32 1.0, %v2512_v54  ;;  %v2520_v37 = vadd.f32 1.0, %v2519_v32  ;;  %v1709_v52 = vsel %vm1707_vm6, %v1708_v5, %v8292_v34  ;;  %v3182_v0 = vor.u32 %v3181_v26, %v3180_v28 }
 0x2ed   :  { %v1710_v3 = vclz %v1709_v52  ;;  %v3183_v11 = vshll.u32 %v11275_v59, %v3168_v47  ;;  %v8331_v24 = vsel %vm1606_vm5, %v1728_v31, %v1704_v21  ;;  %v3179_v36 = vor.u32 %v3178_v38, %v3177_v40 }
 0x2ee   :  { %v2521_v13 = vmul.f32 %v2520_v37, %v2505_v57  ;;  %v2530_v17 = vxor.u32 2147483648, %v2513_v45  ;;  %vm3186_vm11 = vcmp.lt.s32.totalorder %v8301_v12, 1  ;;  %vm3189_vm7 = vcmp.lt.s32.totalorder %v8301_v12, 4 }
 0x2ef   :  { %v6029_v22 = vadd.s32 4294967294, %v1710_v3  ;;  %v3185_v5 = vor.u32 %v3184_v48, %v3183_v11  ;;  %vm3188_vm13 = vcmp.lt.s32.totalorder %v8301_v12, 3  ;;  %v3194_v21 = vsel %vm3186_vm11, %v3173_v63, %v8319_v62 }
 0x2f0   :  { %v2527_v8 = vxor.u32 2147483648, %v2521_v13  ;;  %v2531_v57 = vsel %vm2529_vm4, %v2530_v17, %v2521_v13  ;;  %v3195_v31 = vsel %vm3189_vm7, %v3182_v0, 920167782  ;;  %vm3187_vm8 = vcmp.lt.s32.totalorder %v8301_v12, 2 }
 0x2f1   :  { %vm6030_vm3 = vcmp.lt.s32.totalorder %v6029_v22, 0  ;;  %v3196_v10 = vsel %vm3188_vm13, %v3179_v36, %v3195_v31  ;;  %v3198_v30 = vsel %vm3186_vm11, %v8319_v62, %v3179_v36  ;;  %v3170_v38 = vshrl.u32 %v11268_v60, %v8289_v16 }
 0x2f2   :  { %v2528_v54 = vsel %vm2526_vm15, %v2513_v45, %v2527_v8  ;;  %v1713_v32 = vsel %vm6030_vm3, 0, %v6029_v22  ;;  %v3197_v3 = vsel %vm3187_vm8, %v3194_v21, %v3196_v10  ;;  %v2848_v40 = vshrl.u32 %v2847_v44, 23 }
 0x2f3   :  { %v2532_v47 = vsel %vm2525_vm1, %v2528_v54, %v2531_v57  ;;  %v1714_v41 = vsub.s32 32, %v1713_v32  ;;  %v1718_v2 = vsub.s32 4294967266, %v1713_v32  ;;  %v1715_v45 = vshll.u32 %v8292_v34, %v1713_v32 }
 0x2f4   :  { %v2533_v7 = vsel %vm2522_vm14, nan, %v2532_v47  ;;  %v3227_v13 = vand.u32 65535, %v3197_v3  ;;  %v3228_v17 = vshrl.u32 %v3197_v3, 16  ;;  %v1731_v8 = vsel %vm8325_vm2, 0, %v8331_v24 }
 0x2f5   :  { %v5956_v61 = vsel %vm5944_vm9, %v7961_v35, %v2533_v7  ;;  %v1716_v37 = vshrl.u32 %v1698_v23, %v1714_v41  ;;  %v1719_v52 = vadd.s32 127, %v1718_v2  ;;  %v3199_v35 = vsel %vm3189_vm7, %v3185_v5, 1326507024 }
 0x2f6   :  { %5989 = vst.msk [vmem:[%s11096_s1 + $0x48] sm:$0xff] %vm5979_vm12, %v5956_v61  ;;  %v3200_v43 = vsel %vm3188_vm13, %v3182_v0, %v3199_v35  ;;  %v3190_v0 = vsel %vm3186_vm11, %v3170_v38, %v3173_v63  ;;  %v3230_v16 = vmul.u32 %v3228_v17, %v8295_v51  ;;  %v3231_v11 = vmul.u32 %v3227_v13, %v3204_v42 }
 0x2f7   :  { %v1717_v34 = vor.u32 %v1716_v37, %v1715_v45  ;;  %v1720_v23 = vshll.u32 %v1719_v52, 23  ;;  %v3201_v26 = vsel %vm3187_vm8, %v3198_v30, %v3200_v43  ;;  %v3191_v47 = vsel %vm3189_vm7, %v3179_v36, 2102212464 }
 0x2f8   :  { %v3205_v48 = vand.u32 65535, %v3201_v26  ;;  %v3206_v22 = vshrl.u32 %v3201_v26, 16  ;;  %v3229_v44 = vmul.u32 %v3227_v13, %v8295_v51  ;;  %v3232_v41 = vmul.u32 %v3228_v17, %v3204_v42 }
 0x2f9   :  { %v1721_v28 = vor.u32 4788187, %v1720_v23  ;;  %v1724_v54 = vcvt.s32.f32 %v1717_v34  ;;  %v3233_v2 = vshll.u32 %v3230_v16, 16  ;;  %v3235_v61 = vshll.u32 %v3231_v11, 16 }
 0x2fa   :  { %v3208_v32 = vmul.u32 %v3206_v22, %v8295_v51  ;;  %v3209_v5 = vmul.u32 %v3205_v48, %v3204_v42  ;;  %v3207_v24 = vmul.u32 %v3205_v48, %v8295_v51  ;;  %v3210_v21 = vmul.u32 %v3206_v22, %v3204_v42 }
 0x2fb   :  { %v1722_v57 = vand.u32 2147483647, %v1721_v28  ;;  %vm3237_vm15 = vc.u32 %v3229_v44, %v3233_v2  ;;  %v3239_v45 = vadd.s32 %v3233_v2, %v3229_v44  ;;  %v3234_v30 = vshrl.u32 %v3230_v16, 16 }
 0x2fc   :  { %v3211_v63 = vshll.u32 %v3208_v32, 16  ;;  %v3213_v31 = vshll.u32 %v3209_v5, 16  ;;  %v3238_v10 = vsel %vm3237_vm15, 1, %v11271_v9  ;;  %v6052_v38 = vadd.s32 4294967169, %v2848_v40 }
 0x2fd   :  { %v1725_v7 = vmul.f32 %v1724_v54, %v1722_v57  ;;  %v3240_v35 = vadd.s32 %v3238_v10, %v3232_v41  ;;  %vm3241_vm1 = vc.u32 %v3239_v45, %v3235_v61  ;;  %v3192_v13 = vsel %vm3188_vm13, %v8319_v62, %v3191_v47 }
 0x2fe   :  { %vm3215_vm4 = vc.u32 %v3207_v24, %v3211_v63  ;;  %v3217_v52 = vadd.s32 %v3211_v63, %v3207_v24  ;;  %v3242_v42 = vsel %vm3241_vm1, 1, %v11271_v9  ;;  %v3212_v17 = vshrl.u32 %v3208_v32, 16 }
 0x2ff   :  { %v1726_v37 = vxor.u32 2147483648, %v1725_v7  ;;  %v3216_v36 = vsel %vm3215_vm4, 1, %v11271_v9  ;;  %v3244_v43 = vadd.s32 %v3242_v42, %v3240_v35  ;;  %v1748_v48 = vadd.s32 3, %v1731_v8 }
 0x300   :  { %v3218_v51 = vadd.s32 %v3216_v36, %v3210_v21  ;;  %vm3219_vm6 = vc.u32 %v3217_v52, %v3213_v31  ;;  %v3236_v22 = vshrl.u32 %v3231_v11, 16  ;;  %v2854_v57 = vadd.s32 1, %v6052_v38 }
 0x301   :  { %v1727_v34 = vsel %vm1606_vm5, %v1726_v37, %v1725_v7  ;;  %v3220_v3 = vsel %vm3219_vm6, 1, %v11271_v9  ;;  %v3245_v16 = vadd.s32 %v3244_v43, %v3234_v30  ;;  %v3214_v41 = vshrl.u32 %v3209_v5, 16 }
 0x302   :  { %v1730_v23 = vsel %vm8325_vm2, %v8038_v39, %v1727_v34  ;;  %v3222_v28 = vadd.s32 %v3220_v3, %v3218_v51  ;;  %v3193_v2 = vsel %vm3187_vm8, %v3190_v0, %v3192_v13  ;;  %v8396_v7 = vadd.s32 %v3239_v45, %v3235_v61 }
 0x303   :  { %v1732_v26 = vmul.f32 %v1730_v23, %v1730_v23  ;;  %v3246_v40 = vadd.s32 %v3245_v16, %v3236_v22  ;;  %vm2855_vm5 = vcmp.gt.s32.totalorder %v2854_v57, 0  ;;  %v1749_v8 = vand.u32 3, %v1748_v48 }
 0x304   :  { %v3223_v1 = vadd.s32 %v3222_v28, %v3212_v17  ;;  %v2856_v32 = vsel %vm2855_vm5, %v2854_v57, 0  ;;  %v2844_v47 = vand.u32 2147483647, %v8287_v50  ;;  %v3247_v37 = vmul.u32 %v8284_v53, %v3193_v2 }
 0x305   :  { %v1733_v54 = vmul.f32 -0.001358992, %v1732_v26  ;;  %v1740_v44 = vmul.f32 -0.00019511016, %v1732_v26  ;;  %v3250_v11 = vadd.s32 1, %v3246_v40  ;;  %v2858_v63 = vand.u32 31, %v2856_v32 }
 0x306   :  { %v8398_v62 = vadd.s32 %v3223_v1, %v3214_v41  ;;  %vm1751_vm2 = vcmp.eq.s32.totalorder %v1749_v8, 0  ;;  %v2851_v10 = vand.u32 8388607, %v2844_v47  ;;  %v8408_v36 = vshrl.u32 %v2856_v32, 5 }
 0x307   :  { %v1734_v24 = vadd.f32 0.041655596, %v1733_v54  ;;  %v1741_v21 = vadd.f32 0.008332121, %v1740_v44  ;;  %v8404_v0 = vsub.s32 32, %v2858_v63  ;;  %vm1750_vm3 = vcmp.lt.s32.totalorder %v1749_v8, 2 }
 0x308   :  { %vm3249_vm14 = vc.u32 %v8398_v62, %v8396_v7  ;;  %vm1747_vm11 = vweird.f32 %v8038_v39  ;;  %v2861_v42 = vshll.u32 %v11268_v60, %v2858_v63  ;;  %v2870_v43 = vshll.u32 %v11274_v55, %v2858_v63 }
 0x309   :  { %v1735_v31 = vmul.f32 %v1734_v24, %v1732_v26  ;;  %v1742_v5 = vmul.f32 %v1741_v21, %v1732_v26  ;;  %v3251_v12 = vsel %vm3249_vm14, %v3250_v11, %v3246_v40  ;;  %v2862_v30 = vshrl.u32 %v11272_v58, %v8404_v0  ;;  %v758_v11 = vpop.permute.xlu1 %757 }
 0x30a   :  { %v3252_v52 = vadd.s32 %v3251_v12, %v3247_v37  ;;  %v2865_v51 = vshrl.u32 %v11273_v46, %v8404_v0  ;;  %v2868_v3 = vshrl.u32 %v11274_v55, %v8404_v0  ;;  %v2871_v38 = vshrl.u32 %v11275_v59, %v8404_v0 }
 0x30b   :  { %v1736_v61 = vadd.f32 -0.4999988, %v1735_v31  ;;  %v1743_v45 = vadd.f32 -0.16666654, %v1742_v5  ;;  %v2864_v28 = vshll.u32 %v11272_v58, %v2858_v63  ;;  %v8424_v48 = vor.u32 %v2862_v30, %v2861_v42  ;;  %v11326_v30 = vld [vmem:[#allocation19_spill] sm:$0xff] }
 0x30c   :  { %v3253_v34 = vadd.s32 536870912, %v3252_v52  ;;  %v2867_v22 = vshll.u32 %v11273_v46, %v2858_v63  ;;  %v2872_v16 = vor.u32 %v2871_v38, %v2870_v43  ;;  %v2874_v57 = vshrl.u32 %v11276_v29, %v8404_v0 }
 0x30d   :  { %v1737_v35 = vmul.f32 %v1736_v61, %v1732_v26  ;;  %v1744_v53 = vmul.f32 %v1743_v45, %v1732_v26  ;;  %v8430_v1 = vor.u32 %v2865_v51, %v2864_v28  ;;  %vm1754_vm7 = vcmp.eq.s32.totalorder %v1749_v8, 2 }
 0x30e   :  { %v8421_v26 = vshrl.u32 %v3253_v34, 30  ;;  %v2852_v2 = vor.u32 8388608, %v2851_v10  ;;  %v8432_v40 = vor.u32 %v2868_v3, %v2867_v22  ;;  %v2873_v24 = vshll.u32 %v11275_v59, %v2858_v63  ;;  %v11325_v10 = vld [vmem:[#allocation35_spill] sm:$0xff] }
 0x30f   :  { %v1738_v13 = vadd.f32 1.0, %v1737_v35  ;;  %v1745_v17 = vadd.f32 1.0, %v1744_v53  ;;  %vm2876_vm13 = vcmp.lt.s32.totalorder %v8408_v36, 1  ;;  %vm2879_vm8 = vcmp.lt.s32.totalorder %v8408_v36, 4 }
 0x310   :  { %v3255_v41 = vshll.u32 %v8421_v26, 30  ;;  %vm2878_vm15 = vcmp.lt.s32.totalorder %v8408_v36, 3  ;;  %v2885_v5 = vsel %vm2879_vm8, %v2872_v16, 920167782  ;;  %v2884_v63 = vsel %vm2876_vm13, %v8424_v48, %v8430_v1 }
 0x311   :  { %v1746_v54 = vmul.f32 %v1745_v17, %v1730_v23  ;;  %v1755_v44 = vxor.u32 2147483648, %v1738_v13  ;;  %v2875_v23 = vor.u32 %v2874_v57, %v2873_v24  ;;  %v2886_v45 = vsel %vm2878_vm15, %v8432_v40, %v2885_v5 }
 0x312   :  { %v3256_v32 = vsub.s32 %v3252_v52, %v3255_v41  ;;  %v8449_v52 = vshll.u32 %v2852_v2, 8  ;;  %v11327_v35 = vsel %vm6681_vm10, %v11325_v10, %v11326_v30  ;;  %vm2877_vm1 = vcmp.lt.s32.totalorder %v8408_v36, 2 }
 0x313   :  { %v1752_v21 = vxor.u32 2147483648, %v1746_v54  ;;  %v1756_v31 = vsel %vm1754_vm7, %v1755_v44, %v1746_v54  ;;  %v8458_v53 = vsel %vm7006_vm0, %v758_v11, %v11327_v35  ;;  %v2888_v51 = vsel %vm2876_vm13, %v8430_v1, %v8432_v40 }
 0x314   :  { %vm3257_vm4 = vcmp.lt.s32.totalorder %v3256_v32, 0  ;;  %v3258_v12 = vsub.s32 0, %v3256_v32  ;;  %v2887_v43 = vsel %vm2877_vm1, %v2884_v63, %v2886_v45  ;;  %v2889_v39 = vsel %vm2879_vm8, %v2875_v23, 1326507024 }
 0x315   :  { %v1753_v37 = vsel %vm1751_vm2, %v1738_v13, %v1752_v21  ;;  %v2890_v38 = vsel %vm2878_vm15, %v2872_v16, %v2889_v39  ;;  %v895_v28 = vmul.f32 6.2831855, %v8458_v53  ;;  %v2893_v22 = vand.u32 65535, %v8449_v52 }
 0x316   :  { %v1757_v61 = vsel %vm1750_vm3, %v1753_v37, %v1756_v31  ;;  %v3259_v8 = vsel %vm3257_vm4, %v3258_v12, %v3256_v32  ;;  %v2891_v17 = vsel %vm2877_vm1, %v2888_v51, %v2890_v38  ;;  %v2894_v57 = vshrl.u32 %v8449_v52, 16 }
 0x317   :  { %v1758_v34 = vsel %vm1747_vm11, nan, %v1757_v61  ;;  %v3260_v3 = vclz %v3259_v8  ;;  %v2895_v54 = vand.u32 65535, %v2891_v17  ;;  %v2896_v44 = vshrl.u32 %v2891_v17, 16 }
 0x318   :  { %v5951_v42 = vsel %vm5944_vm9, %v8008_v25, %v1758_v34  ;;  %v2917_v25 = vand.u32 65535, %v2887_v43  ;;  %v2918_v41 = vshrl.u32 %v2887_v43, 16  ;;  %v3248_v2 = vadd.s32 %v8396_v7, %v8398_v62 }
 0x319   :  { %5984 = vst.msk [vmem:[%s11096_s1 + $0x20] sm:$0xff] %vm5979_vm12, %v5951_v42  ;;  %v6059_v13 = vadd.s32 4294967294, %v3260_v3  ;;  %v2898_v16 = vmul.u32 %v2896_v44, %v2893_v22  ;;  %v2899_v21 = vmul.u32 %v2895_v54, %v2894_v57  ;;  %v3278_v23 = vsub.s32 4, %v8421_v26 }
 0x31a   :  { %v2919_v5 = vmul.u32 %v2917_v25, %v2893_v22  ;;  %v2897_v37 = vmul.u32 %v2895_v54, %v2893_v22  ;;  %v2921_v63 = vmul.u32 %v2917_v25, %v2894_v57  ;;  %v927_v61 = vmul.f32 %v895_v28, %v7026_v49 }
 0x31b   :  { %vm6060_vm6 = vcmp.lt.s32.totalorder %v6059_v13, 0  ;;  %v2901_v12 = vshll.u32 %v2898_v16, 16  ;;  %vm3156_vm5 = vcmp.lt.s32.totalorder %v8259_v33, 0  ;;  %v2920_v35 = vmul.u32 %v2918_v41, %v2893_v22 }
 0x31c   :  { %v3263_v24 = vsel %vm6060_vm6, 0, %v6059_v13  ;;  %v2900_v7 = vmul.u32 %v2896_v44, %v2894_v57  ;;  %v2903_v62 = vshll.u32 %v2899_v21, 16  ;;  %v2902_v43 = vshrl.u32 %v2898_v16, 16 }
 0x31d   :  { %v3264_v11 = vsub.s32 32, %v3263_v24  ;;  %v3268_v31 = vsub.s32 4294967266, %v3263_v24  ;;  %v3265_v45 = vshll.u32 %v3256_v32, %v3263_v24  ;;  %vm2905_vm14 = vc.u32 %v2897_v37, %v2901_v12 }
 0x31e   :  { %v2907_v34 = vadd.s32 %v2901_v12, %v2897_v37  ;;  %v2906_v42 = vsel %vm2905_vm14, 1, %v11271_v9  ;;  %v2923_v3 = vshll.u32 %v2920_v35, 16  ;;  %v8492_v38 = vadd.f32 %v927_v61, %v7039_v4 }
 0x31f   :  { %v3266_v10 = vshrl.u32 %v3248_v2, %v3264_v11  ;;  %v3269_v30 = vadd.s32 127, %v3268_v31  ;;  %v2908_v39 = vadd.s32 %v2906_v42, %v2900_v7  ;;  %v2922_v17 = vmul.u32 %v2918_v41, %v2894_v57 }
 0x320   :  { %vm2909_vm2 = vc.u32 %v2907_v34, %v2903_v62  ;;  %vm2927_vm3 = vc.u32 %v2919_v5, %v2923_v3  ;;  %v2925_v28 = vshll.u32 %v2921_v63, 16  ;;  %v2929_v54 = vadd.s32 %v2923_v3, %v2919_v5 }
 0x321   :  { %v3267_v8 = vor.u32 %v3266_v10, %v3265_v45  ;;  %v3270_v51 = vshll.u32 %v3269_v30, 23  ;;  %v2910_v32 = vsel %vm2909_vm2, 1, %v11271_v9  ;;  %v2928_v22 = vsel %vm2927_vm3, 1, %v11271_v9 }
 0x322   :  { %v2912_v25 = vadd.s32 %v2910_v32, %v2908_v39  ;;  %v2930_v24 = vadd.s32 %v2928_v22, %v2922_v17  ;;  %v2072_v16 = vand.u32 2139095040, %v8492_v38  ;;  %v2860_v11 = vshrl.u32 %v11268_v60, %v8404_v0 }
 0x323   :  { %v3271_v13 = vor.u32 4788187, %v3270_v51  ;;  %v3274_v2 = vcvt.s32.f32 %v3267_v8  ;;  %v2881_v31 = vsel %vm2879_vm8, %v8432_v40, 2102212464  ;;  %vm2931_vm11 = vc.u32 %v2929_v54, %v2925_v28 }
 0x324   :  { %v2913_v37 = vadd.s32 %v2912_v25, %v2902_v43  ;;  %v2904_v41 = vshrl.u32 %v2899_v21, 16  ;;  %v2932_v12 = vsel %vm2931_vm11, 1, %v11271_v9  ;;  %v2073_v61 = vshrl.u32 %v2072_v16, 23  ;;  %v11328_v16 = vld [vmem:[#allocation36_spill] sm:$0xff] }
 0x325   :  { %v3272_v44 = vand.u32 2147483647, %v3271_v13  ;;  %v3279_v5 = vsel %vm3156_vm5, %v3278_v23, %v8421_v26  ;;  %v2880_v45 = vsel %vm2876_vm13, %v2860_v11, %v8424_v48  ;;  %v2924_v0 = vshrl.u32 %v2920_v35, 16  ;;  %v11329_v11 = vld [vmem:[#allocation20_spill] sm:$0xff] }
 0x326   :  { %v2934_v10 = vadd.s32 %v2932_v12, %v2930_v24  ;;  %v2882_v40 = vsel %vm2878_vm15, %v8430_v1, %v2881_v31  ;;  %v8512_v7 = vadd.s32 %v2913_v37, %v2904_v41  ;;  %v6037_v21 = vadd.s32 4294967169, %v2073_v61 }
 0x327   :  { %v3275_v57 = vmul.f32 %v3274_v2, %v3272_v44  ;;  %vm3155_vm7 = vcmp.le.f32.partialorder %v3154_v14, 0.7853982  ;;  %v2926_v62 = vshrl.u32 %v2921_v63, 16  ;;  %v2069_v26 = vand.u32 2147483647, %v8492_v38 }
 0x328   :  { %v2935_v34 = vadd.s32 %v2934_v10, %v2924_v0  ;;  %v3281_v23 = vsel %vm3155_vm7, 0, %v3279_v5  ;;  %v8519_v35 = vadd.s32 %v2929_v54, %v2925_v28  ;;  %v2079_v8 = vadd.s32 1, %v6037_v21  ;;  %v798_v28 = vpop.permute.xlu2 %797 }
 0x329   :  { %v3276_v30 = vxor.u32 2147483648, %v3275_v57  ;;  %v2883_v1 = vsel %vm2877_vm1, %v2880_v45, %v2882_v40  ;;  %v3298_v14 = vadd.s32 3, %v3281_v23  ;;  %v2076_v43 = vand.u32 8388607, %v2069_v26 }
 0x32a   :  { %v2936_v42 = vadd.s32 %v2935_v34, %v2926_v62  ;;  %vm2939_vm13 = vc.u32 %v8512_v7, %v8519_v35  ;;  %vm2080_vm8 = vcmp.gt.s32.totalorder %v2079_v8, 0  ;;  %v2937_v17 = vmul.u32 %v8449_v52, %v2883_v1 }
 0x32b   :  { %v3277_v48 = vsel %vm3156_vm5, %v3276_v30, %v3275_v57  ;;  %v2081_v39 = vsel %vm2080_vm8, %v2079_v8, 0  ;;  %v3299_v24 = vand.u32 3, %v3298_v14  ;;  %v11330_v31 = vsel %vm6681_vm10, %v11328_v16, %v11329_v11 }
 0x32c   :  { %v3280_v51 = vsel %vm3155_vm7, %v8259_v33, %v3277_v48  ;;  %v2940_v63 = vadd.s32 1, %v2936_v42  ;;  %v2083_v25 = vand.u32 31, %v2081_v39  ;;  %v8538_v37 = vsel %vm7006_vm0, %v798_v28, %v11330_v31 }
 0x32d   :  { %v3282_v3 = vmul.f32 %v3280_v51, %v3280_v51  ;;  %v2077_v12 = vor.u32 8388608, %v2076_v43  ;;  %v8540_v61 = vshrl.u32 %v2081_v39, 5  ;;  %vm3301_vm15 = vcmp.eq.s32.totalorder %v3299_v24, 0 }
 0x32e   :  { %v2941_v36 = vsel %vm2939_vm13, %v2940_v63, %v2936_v42  ;;  %v8529_v2 = vsub.s32 32, %v2083_v25  ;;  %v2086_v21 = vshll.u32 %v11268_v60, %v2083_v25  ;;  %v2089_v62 = vshll.u32 %v11272_v58, %v2083_v25 }
 0x32f   :  { %v3283_v13 = vmul.f32 -0.001358992, %v3282_v3  ;;  %v3290_v32 = vmul.f32 -0.00019511016, %v3282_v3  ;;  %v2942_v44 = vadd.s32 %v2941_v36, %v2937_v17  ;;  %v2092_v34 = vshll.u32 %v11273_v46, %v2083_v25 }
 0x330   :  { %v2087_v5 = vshrl.u32 %v11272_v58, %v8529_v2  ;;  %v2090_v45 = vshrl.u32 %v11273_v46, %v8529_v2  ;;  %v2096_v0 = vshrl.u32 %v11275_v59, %v8529_v2  ;;  %v2093_v48 = vshrl.u32 %v11274_v55, %v8529_v2 }
 0x331   :  { %v3284_v22 = vadd.f32 0.041655596, %v3283_v13  ;;  %v3291_v54 = vadd.f32 0.008332121, %v3290_v32  ;;  %v2943_v41 = vadd.s32 536870912, %v2942_v44  ;;  %v2095_v23 = vshll.u32 %v11274_v55, %v2083_v25 }
 0x332   :  { %vm3300_vm4 = vcmp.lt.s32.totalorder %v3299_v24, 2  ;;  %v2098_v14 = vshll.u32 %v11275_v59, %v2083_v25  ;;  %v8558_v63 = vor.u32 %v2087_v5, %v2086_v21  ;;  %v8560_v43 = vor.u32 %v2090_v45, %v2089_v62 }
 0x333   :  { %v3285_v57 = vmul.f32 %v3284_v22, %v3282_v3  ;;  %v3292_v52 = vmul.f32 %v3291_v54, %v3282_v3  ;;  %v8548_v40 = vshrl.u32 %v2943_v41, 30  ;;  %v2097_v39 = vor.u32 %v2096_v0, %v2095_v23 }
 0x334   :  { %v2099_v13 = vshrl.u32 %v11276_v29, %v8529_v2  ;;  %v905_v36 = vmul.f32 6.2831855, %v8538_v37  ;;  %v8565_v22 = vor.u32 %v2093_v48, %v2092_v34  ;;  %vm2101_vm1 = vcmp.lt.s32.totalorder %v8540_v61, 1 }
 0x335   :  { %v3286_v10 = vadd.f32 -0.4999988, %v3285_v57  ;;  %v3293_v30 = vadd.f32 -0.16666654, %v3292_v52  ;;  %v2945_v42 = vshll.u32 %v8548_v40, 30  ;;  %vm2104_vm6 = vcmp.lt.s32.totalorder %v8540_v61, 4 }
 0x336   :  { %vm3304_vm14 = vcmp.eq.s32.totalorder %v3299_v24, 2  ;;  %v2109_v11 = vsel %vm2101_vm1, %v8558_v63, %v8560_v43  ;;  %v8575_v31 = vshll.u32 %v2077_v12, 8  ;;  %vm2103_vm2 = vcmp.lt.s32.totalorder %v8540_v61, 3 }
 0x337   :  { %v3287_v8 = vmul.f32 %v3286_v10, %v3282_v3  ;;  %v3294_v1 = vmul.f32 %v3293_v30, %v3282_v3  ;;  %v2946_v28 = vsub.s32 %v2942_v44, %v2945_v42  ;;  %v2100_v3 = vor.u32 %v2099_v13, %v2098_v14 }
 0x338   :  { %v2110_v44 = vsel %vm2104_vm6, %v2097_v39, 920167782  ;;  %vm2102_vm3 = vcmp.lt.s32.totalorder %v8540_v61, 2  ;;  %v2113_v10 = vsel %vm2101_vm1, %v8560_v43, %v8565_v22  ;;  %vm3297_vm11 = vweird.f32 %v8259_v33 }
 0x339   :  { %v3288_v32 = vadd.f32 1.0, %v3287_v8  ;;  %v3295_v17 = vadd.f32 1.0, %v3294_v1  ;;  %vm2947_vm5 = vcmp.lt.s32.totalorder %v2946_v28, 0  ;;  %v2948_v16 = vsub.s32 0, %v2946_v28 }
 0x33a   :  { %v2111_v45 = vsel %vm2103_vm2, %v8565_v22, %v2110_v44  ;;  %v2114_v30 = vsel %vm2104_vm6, %v2100_v3, 1326507024  ;;  %v2118_v34 = vand.u32 65535, %v8575_v31  ;;  %vm2846_vm13 = vcmp.lt.s32.totalorder %v8287_v50, 0 }
 0x33b   :  { %v3296_v25 = vmul.f32 %v3295_v17, %v3280_v51  ;;  %v3305_v54 = vxor.u32 2147483648, %v3288_v32  ;;  %v2949_v52 = vsel %vm2947_vm5, %v2948_v16, %v2946_v28  ;;  %v937_v51 = vmul.f32 %v905_v36, %v7026_v49 }
 0x33c   :  { %v2950_v5 = vclz %v2949_v52  ;;  %v2112_v12 = vsel %vm2102_vm3, %v2109_v11, %v2111_v45  ;;  %v2115_v23 = vsel %vm2103_vm2, %v2097_v39, %v2114_v30  ;;  %v2119_v39 = vshrl.u32 %v8575_v31, 16 }
 0x33d   :  { %v3302_v57 = vxor.u32 2147483648, %v3296_v25  ;;  %v3306_v41 = vsel %vm3304_vm14, %v3305_v54, %v3296_v25  ;;  %v2142_v8 = vand.u32 65535, %v2112_v12  ;;  %v8598_v1 = vadd.f32 %v937_v51, %v7039_v4 }
 0x33e   :  { %v6053_v62 = vadd.s32 4294967294, %v2950_v5  ;;  %v2116_v33 = vsel %vm2102_vm3, %v2113_v10, %v2115_v23  ;;  %v2143_v24 = vshrl.u32 %v2112_v12, 16  ;;  %v2938_v17 = vadd.s32 %v8519_v35, %v8512_v7 }
 0x33f   :  { %v3303_v0 = vsel %vm3301_vm15, %v3288_v32, %v3302_v57  ;;  %v2120_v13 = vand.u32 65535, %v2116_v33  ;;  %v2121_v32 = vshrl.u32 %v2116_v33, 16  ;;  %v2085_v25 = vshrl.u32 %v11268_v60, %v8529_v2 }
 0x340   :  { %v3307_v21 = vsel %vm3300_vm4, %v3303_v0, %v3306_v41  ;;  %vm6054_vm7 = vcmp.lt.s32.totalorder %v6053_v62, 0  ;;  %v2145_v3 = vmul.u32 %v2143_v24, %v2118_v34  ;;  %v3622_v11 = vand.u32 2139095040, %v8598_v1 }
 0x341   :  { %v3308_v48 = vsel %vm3297_vm11, nan, %v3307_v21  ;;  %v2953_v14 = vsel %vm6054_vm7, 0, %v6053_v62  ;;  %v2123_v54 = vmul.u32 %v2121_v32, %v2118_v34  ;;  %v2124_v16 = vmul.u32 %v2120_v13, %v2119_v39 }
 0x342   :  { %v5961_v42 = vsel %vm5944_vm9, %v8226_v20, %v3308_v48  ;;  %v2954_v36 = vsub.s32 32, %v2953_v14  ;;  %v2958_v20 = vsub.s32 4294967266, %v2953_v14  ;;  %v2955_v44 = vshll.u32 %v2946_v28, %v2953_v14 }
 0x343   :  { %5994 = vst.msk [vmem:[%s11096_s1 + $0x70] sm:$0xff] %vm5979_vm12, %v5961_v42  ;;  %v2146_v51 = vmul.u32 %v2142_v8, %v2119_v39  ;;  %v2968_v41 = vsub.s32 4, %v8548_v40  ;;  %v2122_v5 = vmul.u32 %v2120_v13, %v2118_v34  ;;  %v2126_v7 = vshll.u32 %v2123_v54, 16 }
 0x344   :  { %v2956_v57 = vshrl.u32 %v2938_v17, %v2954_v36  ;;  %v2959_v52 = vadd.s32 127, %v2958_v20  ;;  %v2144_v35 = vmul.u32 %v2142_v8, %v2118_v34  ;;  %v2125_v12 = vmul.u32 %v2121_v32, %v2119_v39 }
 0x345   :  { %v2148_v10 = vshll.u32 %v2145_v3, 16  ;;  %vm8619_vm8 = vcmp.le.f32.partialorder %v2844_v47, 0.7853982  ;;  %v2128_v30 = vshll.u32 %v2124_v16, 16  ;;  %vm2130_vm15 = vc.u32 %v2122_v5, %v2126_v7 }
 0x346   :  { %v2957_v45 = vor.u32 %v2956_v57, %v2955_v44  ;;  %v2960_v0 = vshll.u32 %v2959_v52, 23  ;;  %v2132_v28 = vadd.s32 %v2126_v7, %v2122_v5  ;;  %v2147_v21 = vmul.u32 %v2143_v24, %v2119_v39 }
 0x347   :  { %v2131_v48 = vsel %vm2130_vm15, 1, %v11271_v9  ;;  %v2150_v23 = vshll.u32 %v2146_v51, 16  ;;  %vm2152_vm4 = vc.u32 %v2144_v35, %v2148_v10  ;;  %v2154_v42 = vadd.s32 %v2148_v10, %v2144_v35 }
 0x348   :  { %v2961_v62 = vor.u32 4788187, %v2960_v0  ;;  %v2133_v34 = vadd.s32 %v2131_v48, %v2125_v12  ;;  %vm2134_vm5 = vc.u32 %v2132_v28, %v2128_v30  ;;  %v2153_v8 = vsel %vm2152_vm4, 1, %v11271_v9 }
 0x349   :  { %v2964_v14 = vcvt.s32.f32 %v2957_v45  ;;  %v2135_v47 = vsel %vm2134_vm5, 1, %v11271_v9  ;;  %v2155_v13 = vadd.s32 %v2153_v8, %v2147_v21  ;;  %v2106_v32 = vsel %vm2104_vm6, %v8565_v22, 2102212464  ;;  %v790_v8 = vpop.permute.xlu0 %789 }
 0x34a   :  { %v2962_v33 = vand.u32 2147483647, %v2961_v62  ;;  %v2127_v24 = vshrl.u32 %v2123_v54, 16  ;;  %v2137_v39 = vadd.s32 %v2135_v47, %v2133_v34  ;;  %vm2156_vm14 = vc.u32 %v2154_v42, %v2150_v23 }
 0x34b   :  { %v2969_v36 = vsel %vm2846_vm13, %v2968_v41, %v8548_v40  ;;  %v2157_v20 = vsel %vm2156_vm14, 1, %v11271_v9  ;;  %v3623_v44 = vshrl.u32 %v3622_v11, 23  ;;  %v2129_v57 = vshrl.u32 %v2124_v16, 16 }
 0x34c   :  { %v2965_v17 = vmul.f32 %v2964_v14, %v2962_v33  ;;  %v2138_v52 = vadd.s32 %v2137_v39, %v2127_v24  ;;  %v2149_v5 = vshrl.u32 %v2145_v3, 16  ;;  %v2159_v7 = vadd.s32 %v2157_v20, %v2155_v13  ;;  %v11334_v24 = vld [vmem:[#allocation27_spill] sm:$0xff] }
 0x34d   :  { %v2105_v22 = vsel %vm2101_vm1, %v2085_v25, %v8558_v63  ;;  %v2107_v54 = vsel %vm2103_vm2, %v8560_v43, %v2106_v32  ;;  %v6067_v45 = vadd.s32 4294967169, %v3623_v44  ;;  %v2151_v40 = vshrl.u32 %v2146_v51, 16  ;;  %v11333_v32 = vld [vmem:[#allocation40_spill] sm:$0xff] }
 0x34e   :  { %v2966_v35 = vxor.u32 2147483648, %v2965_v17  ;;  %v8639_v0 = vadd.s32 %v2138_v52, %v2129_v57  ;;  %v2160_v41 = vadd.s32 %v2159_v7, %v2149_v5  ;;  %v3619_v11 = vand.u32 2147483647, %v8598_v1 }
 0x34f   :  { %v2971_v16 = vsel %vm8619_vm8, 0, %v2969_v36  ;;  %v8646_v12 = vadd.s32 %v2154_v42, %v2150_v23  ;;  %v3629_v63 = vadd.s32 1, %v6067_v45  ;;  %v2108_v25 = vsel %vm2102_vm3, %v2105_v22, %v2107_v54 }
 0x350   :  { %v2967_v3 = vsel %vm2846_vm13, %v2966_v35, %v2965_v17  ;;  %v2161_v51 = vadd.s32 %v2160_v41, %v2151_v40  ;;  %v2988_v30 = vadd.s32 3, %v2971_v16  ;;  %v3626_v21 = vand.u32 8388607, %v3619_v11 }
 0x351   :  { %v2970_v43 = vsel %vm8619_vm8, %v8287_v50, %v2967_v3  ;;  %vm2164_vm1 = vc.u32 %v8639_v0, %v8646_v12  ;;  %vm3630_vm6 = vcmp.gt.s32.totalorder %v3629_v63, 0  ;;  %v2162_v2 = vmul.u32 %v8575_v31, %v2108_v25 }
 0x352   :  { %v2972_v10 = vmul.f32 %v2970_v43, %v2970_v43  ;;  %v2165_v28 = vadd.s32 1, %v2161_v51  ;;  %v3631_v62 = vsel %vm3630_vm6, %v3629_v63, 0  ;;  %v2989_v13 = vand.u32 3, %v2988_v30 }
 0x353   :  { %v3633_v34 = vand.u32 31, %v3631_v62  ;;  %v11335_v39 = vsel %vm6681_vm10, %v11333_v32, %v11334_v24  ;;  %v3627_v44 = vor.u32 8388608, %v3626_v21  ;;  %v8669_v57 = vshrl.u32 %v3631_v62, 5 }
 0x354   :  { %v2973_v48 = vmul.f32 -0.001358992, %v2972_v10  ;;  %v2980_v23 = vmul.f32 -0.00019511016, %v2972_v10  ;;  %v2166_v61 = vsel %vm2164_vm1, %v2165_v28, %v2161_v51  ;;  %v8667_v17 = vsel %vm7006_vm0, %v790_v8, %v11335_v39 }
 0x355   :  { %v2167_v14 = vadd.s32 %v2166_v61, %v2162_v2  ;;  %v8658_v47 = vsub.s32 32, %v3633_v34  ;;  %v3636_v45 = vshll.u32 %v11268_v60, %v3633_v34  ;;  %vm2991_vm2 = vcmp.eq.s32.totalorder %v2989_v13, 0 }
 0x356   :  { %v2974_v42 = vadd.f32 0.041655596, %v2973_v48  ;;  %v2981_v33 = vadd.f32 0.008332121, %v2980_v23  ;;  %v3639_v40 = vshll.u32 %v11272_v58, %v3633_v34  ;;  %v3642_v41 = vshll.u32 %v11273_v46, %v3633_v34 }
 0x357   :  { %v2168_v20 = vadd.s32 536870912, %v2167_v14  ;;  %v3637_v52 = vshrl.u32 %v11272_v58, %v8658_v47  ;;  %v3640_v5 = vshrl.u32 %v11273_v46, %v8658_v47  ;;  %v3646_v7 = vshrl.u32 %v11275_v59, %v8658_v47 }
 0x358   :  { %v2975_v36 = vmul.f32 %v2974_v42, %v2972_v10  ;;  %v2982_v31 = vmul.f32 %v2981_v33, %v2972_v10  ;;  %v3643_v3 = vshrl.u32 %v11274_v55, %v8658_v47  ;;  %v3645_v16 = vshll.u32 %v11274_v55, %v3633_v34 }
 0x359   :  { %v8677_v54 = vshrl.u32 %v2168_v20, 30  ;;  %vm2990_vm3 = vcmp.lt.s32.totalorder %v2989_v13, 2  ;;  %v3648_v30 = vshll.u32 %v11275_v59, %v3633_v34  ;;  %v8687_v28 = vor.u32 %v3637_v52, %v3636_v45 }
 0x35a   :  { %v2976_v35 = vadd.f32 -0.4999988, %v2975_v36  ;;  %v2983_v22 = vadd.f32 -0.16666654, %v2982_v31  ;;  %v8689_v21 = vor.u32 %v3640_v5, %v3639_v40  ;;  %v3647_v62 = vor.u32 %v3646_v7, %v3645_v16 }
 0x35b   :  { %v2170_v51 = vshll.u32 %v8677_v54, 30  ;;  %v3649_v48 = vshrl.u32 %v11276_v29, %v8658_v47  ;;  %v903_v61 = vmul.f32 6.2831855, %v8667_v17  ;;  %v8694_v42 = vor.u32 %v3643_v3, %v3642_v41 }
 0x35c   :  { %v2977_v63 = vmul.f32 %v2976_v35, %v2972_v10  ;;  %v2984_v25 = vmul.f32 %v2983_v22, %v2972_v10  ;;  %vm3651_vm11 = vcmp.lt.s32.totalorder %v8669_v57, 1  ;;  %vm3654_vm7 = vcmp.lt.s32.totalorder %v8669_v57, 4 }
 0x35d   :  { %v2171_v8 = vsub.s32 %v2167_v14, %v2170_v51  ;;  %v3650_v10 = vor.u32 %v3649_v48, %v3648_v30  ;;  %vm2994_vm8 = vcmp.eq.s32.totalorder %v2989_v13, 2  ;;  %v3659_v24 = vsel %vm3651_vm11, %v8687_v28, %v8689_v21 }
 0x35e   :  { %v2978_v23 = vadd.f32 1.0, %v2977_v63  ;;  %v2985_v2 = vadd.f32 1.0, %v2984_v25  ;;  %v3660_v14 = vsel %vm3654_vm7, %v3647_v62, 920167782  ;;  %v8704_v39 = vshll.u32 %v3627_v44, 8 }
 0x35f   :  { %vm2172_vm13 = vcmp.lt.s32.totalorder %v2171_v8, 0  ;;  %v2173_v32 = vsub.s32 0, %v2171_v8  ;;  %vm3653_vm15 = vcmp.lt.s32.totalorder %v8669_v57, 3  ;;  %vm3652_vm4 = vcmp.lt.s32.totalorder %v8669_v57, 2 }
 0x360   :  { %v2986_v34 = vmul.f32 %v2985_v2, %v2970_v43  ;;  %v2995_v33 = vxor.u32 2147483648, %v2978_v23  ;;  %v935_v43 = vmul.f32 %v903_v61, %v7026_v49  ;;  %v3661_v5 = vsel %vm3653_vm15, %v8694_v42, %v3660_v14 }
 0x361   :  { %v2174_v31 = vsel %vm2172_vm13, %v2173_v32, %v2171_v8  ;;  %v3662_v44 = vsel %vm3652_vm4, %v3659_v24, %v3661_v5  ;;  %v3663_v35 = vsel %vm3651_vm11, %v8689_v21, %v8694_v42  ;;  %v3664_v22 = vsel %vm3654_vm7, %v3650_v10, 1326507024 }
 0x362   :  { %v2992_v36 = vxor.u32 2147483648, %v2986_v34  ;;  %v2996_v20 = vsel %vm2994_vm8, %v2995_v33, %v2986_v34  ;;  %v2175_v52 = vclz %v2174_v31  ;;  %vm2987_vm5 = vweird.f32 %v8287_v50 }
 0x363   :  { %v3668_v41 = vand.u32 65535, %v8704_v39  ;;  %v3665_v16 = vsel %vm3653_vm15, %v3647_v62, %v3664_v22  ;;  %v3692_v63 = vand.u32 65535, %v3662_v44  ;;  %v8727_v25 = vadd.f32 %v935_v43, %v7039_v4 }
 0x364   :  { %v2993_v7 = vsel %vm2991_vm2, %v2978_v23, %v2992_v36  ;;  %v6038_v40 = vadd.s32 4294967294, %v2175_v52  ;;  %v3666_v50 = vsel %vm3652_vm4, %v3663_v35, %v3665_v16  ;;  %v3693_v13 = vshrl.u32 %v3662_v44, 16 }
 0x365   :  { %v2997_v45 = vsel %vm2990_vm3, %v2993_v7, %v2996_v20  ;;  %v3669_v62 = vshrl.u32 %v8704_v39, 16  ;;  %v3670_v48 = vand.u32 65535, %v3666_v50  ;;  %v3671_v23 = vshrl.u32 %v3666_v50, 16 }
 0x366   :  { %v2998_v3 = vsel %vm2987_vm5, nan, %v2997_v45  ;;  %vm6039_vm14 = vcmp.lt.s32.totalorder %v6038_v40, 0  ;;  %v2163_v2 = vadd.s32 %v8646_v12, %v8639_v0  ;;  %v3695_v10 = vmul.u32 %v3693_v13, %v3668_v41 }
 0x367   :  { %v5959_v51 = vsel %vm5944_vm9, %v8268_v27, %v2998_v3  ;;  %v2178_v30 = vsel %vm6039_vm14, 0, %v6038_v40  ;;  %vm2071_vm1 = vcmp.lt.s32.totalorder %v8492_v38, 0  ;;  %v3635_v34 = vshrl.u32 %v11268_v60, %v8658_v47 }
 0x368   :  { %5992 = vst.msk [vmem:[%s11096_s1 + $0x60] sm:$0xff] %vm5979_vm12, %v5959_v51  ;;  %v2179_v61 = vsub.s32 32, %v2178_v30  ;;  %v2183_v27 = vsub.s32 4294967266, %v2178_v30  ;;  %v3673_v33 = vmul.u32 %v3671_v23, %v3668_v41  ;;  %v3674_v32 = vmul.u32 %v3670_v48, %v3669_v62 }
 0x369   :  { %v3312_v24 = vand.u32 2139095040, %v8727_v25  ;;  %v2180_v14 = vshll.u32 %v2171_v8, %v2178_v30  ;;  %v3696_v43 = vmul.u32 %v3692_v63, %v3669_v62  ;;  %v2193_v20 = vsub.s32 4, %v8677_v54 }
 0x36a   :  { %v2181_v36 = vshrl.u32 %v2163_v2, %v2179_v61  ;;  %v2184_v31 = vadd.s32 127, %v2183_v27  ;;  %v3672_v52 = vmul.u32 %v3670_v48, %v3668_v41  ;;  %v3676_v0 = vshll.u32 %v3673_v33, 16 }
 0x36b   :  { %v3694_v12 = vmul.u32 %v3692_v63, %v3668_v41  ;;  %v3675_v44 = vmul.u32 %v3671_v23, %v3669_v62  ;;  %v3698_v35 = vshll.u32 %v3695_v10, 16  ;;  %vm8748_vm6 = vcmp.le.f32.partialorder %v2069_v26, 0.7853982 }
 0x36c   :  { %v2182_v5 = vor.u32 %v2181_v36, %v2180_v14  ;;  %v2185_v7 = vshll.u32 %v2184_v31, 23  ;;  %v3678_v22 = vshll.u32 %v3674_v32, 16  ;;  %vm3680_vm2 = vc.u32 %v3672_v52, %v3676_v0 }
 0x36d   :  { %v3682_v8 = vadd.s32 %v3676_v0, %v3672_v52  ;;  %v3697_v45 = vmul.u32 %v3693_v13, %v3669_v62  ;;  %v3681_v3 = vsel %vm3680_vm2, 1, %v11271_v9  ;;  %v3700_v16 = vshll.u32 %v3696_v43, 16 }
 0x36e   :  { %v2186_v40 = vor.u32 4788187, %v2185_v7  ;;  %vm3702_vm3 = vc.u32 %v3694_v12, %v3698_v35  ;;  %v3683_v41 = vadd.s32 %v3681_v3, %v3675_v44  ;;  %v3704_v51 = vadd.s32 %v3698_v35, %v3694_v12 }
 0x36f   :  { %vm3684_vm13 = vc.u32 %v3682_v8, %v3678_v22  ;;  %v3703_v63 = vsel %vm3702_vm3, 1, %v11271_v9  ;;  %v2189_v30 = vcvt.s32.f32 %v2182_v5  ;;  %v3656_v23 = vsel %vm3654_vm7, %v8694_v42, 2102212464 }
 0x370   :  { %v2187_v50 = vand.u32 2147483647, %v2186_v40  ;;  %v3685_v26 = vsel %vm3684_vm13, 1, %v11271_v9  ;;  %v3705_v48 = vadd.s32 %v3703_v63, %v3697_v45  ;;  %v3677_v13 = vshrl.u32 %v3673_v33, 16  ;;  %v770_v63 = vpop.permute.xlu1 %769 }
 0x371   :  { %v3687_v62 = vadd.s32 %v3685_v26, %v3683_v41  ;;  %vm3706_vm8 = vc.u32 %v3704_v51, %v3700_v16  ;;  %v2194_v61 = vsel %vm2071_vm1, %v2193_v20, %v8677_v54  ;;  %v3313_v14 = vshrl.u32 %v3312_v24, 23 }
 0x372   :  { %v2190_v2 = vmul.f32 %v2189_v30, %v2187_v50  ;;  %v3707_v27 = vsel %vm3706_vm8, 1, %v11271_v9  ;;  %v3679_v36 = vshrl.u32 %v3674_v32, 16  ;;  %v3699_v52 = vshrl.u32 %v3695_v10, 16 }
 0x373   :  { %v3688_v31 = vadd.s32 %v3687_v62, %v3677_v13  ;;  %v3709_v0 = vadd.s32 %v3707_v27, %v3705_v48  ;;  %v3655_v42 = vsel %vm3651_vm11, %v3635_v34, %v8687_v28  ;;  %v3657_v33 = vsel %vm3653_vm15, %v8689_v21, %v3656_v23  ;;  %v11338_v23 = vld [vmem:[#allocation38_spill] sm:$0xff] }
 0x374   :  { %v2191_v12 = vxor.u32 2147483648, %v2190_v2  ;;  %v6061_v5 = vadd.s32 4294967169, %v3313_v14  ;;  %v3701_v54 = vshrl.u32 %v3696_v43, 16  ;;  %v3309_v24 = vand.u32 2147483647, %v8727_v25  ;;  %v11339_v13 = vld [vmem:[#allocation22_spill] sm:$0xff] }
 0x375   :  { %v8768_v7 = vadd.s32 %v3688_v31, %v3679_v36  ;;  %v3710_v20 = vadd.s32 %v3709_v0, %v3699_v52  ;;  %v2196_v32 = vsel %vm8748_vm6, 0, %v2194_v61  ;;  %v8775_v44 = vadd.s32 %v3704_v51, %v3700_v16 }
 0x376   :  { %v2192_v10 = vsel %vm2071_vm1, %v2191_v12, %v2190_v2  ;;  %v3319_v28 = vadd.s32 1, %v6061_v5  ;;  %v3658_v34 = vsel %vm3652_vm4, %v3655_v42, %v3657_v33  ;;  %v2213_v22 = vadd.s32 3, %v2196_v32 }
 0x377   :  { %v2195_v21 = vsel %vm8748_vm6, %v8492_v38, %v2192_v10  ;;  %v3711_v43 = vadd.s32 %v3710_v20, %v3701_v54  ;;  %vm3714_vm11 = vc.u32 %v8768_v7, %v8775_v44  ;;  %v3316_v45 = vand.u32 8388607, %v3309_v24 }
 0x378   :  { %v2197_v35 = vmul.f32 %v2195_v21, %v2195_v21  ;;  %vm3320_vm7 = vcmp.gt.s32.totalorder %v3319_v28, 0  ;;  %v3712_v47 = vmul.u32 %v8704_v39, %v3658_v34  ;;  %v2214_v48 = vand.u32 3, %v2213_v22 }
 0x379   :  { %v3715_v8 = vadd.s32 1, %v3711_v43  ;;  %v3321_v40 = vsel %vm3320_vm7, %v3319_v28, 0  ;;  %v11340_v62 = vsel %vm6681_vm10, %v11338_v23, %v11339_v13  ;;  %v3317_v14 = vor.u32 8388608, %v3316_v45 }
 0x37a   :  { %v2198_v3 = vmul.f32 -0.001358992, %v2197_v35  ;;  %v2205_v16 = vmul.f32 -0.00019511016, %v2197_v35  ;;  %v3323_v41 = vand.u32 31, %v3321_v40  ;;  %v8796_v2 = vsel %vm7006_vm0, %v770_v63, %v11340_v62 }
 0x37b   :  { %v3716_v57 = vsel %vm3714_vm11, %v3715_v8, %v3711_v43  ;;  %v8798_v36 = vshrl.u32 %v3321_v40, 5  ;;  %vm2216_vm15 = vcmp.eq.s32.totalorder %v2214_v48, 0  ;;  %vm2215_vm4 = vcmp.lt.s32.totalorder %v2214_v48, 2 }
 0x37c   :  { %v2199_v51 = vadd.f32 0.041655596, %v2198_v3  ;;  %v2206_v50 = vadd.f32 0.008332121, %v2205_v16  ;;  %v3717_v30 = vadd.s32 %v3716_v57, %v3712_v47  ;;  %v8787_v26 = vsub.s32 32, %v3323_v41 }
 0x37d   :  { %v3326_v5 = vshll.u32 %v11268_v60, %v3323_v41  ;;  %v3329_v54 = vshll.u32 %v11272_v58, %v3323_v41  ;;  %v3332_v20 = vshll.u32 %v11273_v46, %v3323_v41  ;;  %v3335_v32 = vshll.u32 %v11274_v55, %v3323_v41 }
 0x37e   :  { %v2200_v61 = vmul.f32 %v2199_v51, %v2197_v35  ;;  %v2207_v39 = vmul.f32 %v2206_v50, %v2197_v35  ;;  %v3718_v27 = vadd.s32 536870912, %v3717_v30  ;;  %v3327_v31 = vshrl.u32 %v11272_v58, %v8787_v26 }
 0x37f   :  { %v3330_v52 = vshrl.u32 %v11273_v46, %v8787_v26  ;;  %v3336_v0 = vshrl.u32 %v11275_v59, %v8787_v26  ;;  %v3333_v10 = vshrl.u32 %v11274_v55, %v8787_v26  ;;  %v3338_v22 = vshll.u32 %v11275_v59, %v3323_v41 }
 0x380   :  { %v2201_v12 = vadd.f32 -0.4999988, %v2200_v61  ;;  %v2208_v42 = vadd.f32 -0.16666654, %v2207_v39  ;;  %v8806_v33 = vshrl.u32 %v3718_v27, 30  ;;  %v8816_v8 = vor.u32 %v3327_v31, %v3326_v5 }
 0x381   :  { %v8818_v45 = vor.u32 %v3330_v52, %v3329_v54  ;;  %v3337_v40 = vor.u32 %v3336_v0, %v3335_v32  ;;  %v3339_v3 = vshrl.u32 %v11276_v29, %v8787_v26  ;;  %v898_v57 = vmul.f32 6.2831855, %v8796_v2 }
 0x382   :  { %v2202_v28 = vmul.f32 %v2201_v12, %v2197_v35  ;;  %v2209_v34 = vmul.f32 %v2208_v42, %v2197_v35  ;;  %v3720_v43 = vshll.u32 %v8806_v33, 30  ;;  %v8823_v51 = vor.u32 %v3333_v10, %v3332_v20 }
 0x383   :  { %v3340_v35 = vor.u32 %v3339_v3, %v3338_v22  ;;  %vm3341_vm5 = vcmp.lt.s32.totalorder %v8798_v36, 1  ;;  %vm3344_vm14 = vcmp.lt.s32.totalorder %v8798_v36, 4  ;;  %vm2219_vm6 = vcmp.eq.s32.totalorder %v2214_v48, 2 }
 0x384   :  { %v2203_v16 = vadd.f32 1.0, %v2202_v28  ;;  %v2210_v47 = vadd.f32 1.0, %v2209_v34  ;;  %v3721_v63 = vsub.s32 %v3717_v30, %v3720_v43  ;;  %v3349_v13 = vsel %vm3341_vm5, %v8816_v8, %v8818_v45 }
 0x385   :  { %v3350_v30 = vsel %vm3344_vm14, %v3337_v40, 920167782  ;;  %v8833_v62 = vshll.u32 %v3317_v14, 8  ;;  %vm3343_vm2 = vcmp.lt.s32.totalorder %v8798_v36, 3  ;;  %vm3342_vm3 = vcmp.lt.s32.totalorder %v8798_v36, 2 }
 0x386   :  { %v2211_v41 = vmul.f32 %v2210_v47, %v2195_v21  ;;  %v2220_v50 = vxor.u32 2147483648, %v2203_v16  ;;  %vm3722_vm1 = vcmp.lt.s32.totalorder %v3721_v63, 0  ;;  %v3723_v23 = vsub.s32 0, %v3721_v63 }
 0x387   :  { %v930_v21 = vmul.f32 %v898_v57, %v7026_v49  ;;  %v3351_v52 = vsel %vm3343_vm2, %v8823_v51, %v3350_v30  ;;  %v3353_v12 = vsel %vm3341_vm5, %v8818_v45, %v8823_v51  ;;  %v3354_v42 = vsel %vm3344_vm14, %v3340_v35, 1326507024 }
 0x388   :  { %v2217_v61 = vxor.u32 2147483648, %v2211_v41  ;;  %v3724_v39 = vsel %vm3722_vm1, %v3723_v23, %v3721_v63  ;;  %v2221_v27 = vsel %vm2219_vm6, %v2220_v50, %v2211_v41  ;;  %v3352_v14 = vsel %vm3342_vm3, %v3349_v13, %v3351_v52 }
 0x389   :  { %v3725_v31 = vclz %v3724_v39  ;;  %vm2212_vm13 = vweird.f32 %v8492_v38  ;;  %v3358_v20 = vand.u32 65535, %v8833_v62  ;;  %v3355_v32 = vsel %vm3343_vm2, %v3337_v40, %v3354_v42 }
 0x38a   :  { %v2218_v0 = vsel %vm2216_vm15, %v2203_v16, %v2217_v61  ;;  %v3382_v28 = vand.u32 65535, %v3352_v14  ;;  %v8856_v34 = vadd.f32 %v930_v21, %v7039_v4  ;;  %v3356_v38 = vsel %vm3342_vm3, %v3353_v12, %v3355_v32 }
 0x38b   :  { %v2222_v5 = vsel %vm2215_vm4, %v2218_v0, %v2221_v27  ;;  %v6068_v54 = vadd.s32 4294967294, %v3725_v31  ;;  %v3383_v48 = vshrl.u32 %v3352_v14, 16  ;;  %v3359_v40 = vshrl.u32 %v8833_v62, 16 }
 0x38c   :  { %v2223_v10 = vsel %vm2212_vm13, nan, %v2222_v5  ;;  %v3360_v3 = vand.u32 65535, %v3356_v38  ;;  %v3361_v16 = vshrl.u32 %v3356_v38, 16  ;;  %v3713_v47 = vadd.s32 %v8775_v44, %v8768_v7 }
 0x38d   :  { %v5954_v43 = vsel %vm5944_vm9, %v8458_v53, %v2223_v10  ;;  %vm6069_vm8 = vcmp.lt.s32.totalorder %v6068_v54, 0  ;;  %v3385_v35 = vmul.u32 %v3383_v48, %v3358_v20  ;;  %vm3621_vm11 = vcmp.lt.s32.totalorder %v8598_v1, 0 }
 0x38e   :  { %5987 = vst.msk [vmem:[%s11096_s1 + $0x38] sm:$0xff] %vm5979_vm12, %v5954_v43  ;;  %v3728_v22 = vsel %vm6069_vm8, 0, %v6068_v54  ;;  %v3325_v41 = vshrl.u32 %v11268_v60, %v8787_v26  ;;  %v3363_v50 = vmul.u32 %v3361_v16, %v3358_v20  ;;  %v3364_v23 = vmul.u32 %v3360_v3, %v3359_v40 }
 0x38f   :  { %v3729_v57 = vsub.s32 32, %v3728_v22  ;;  %v3733_v53 = vsub.s32 4294967266, %v3728_v22  ;;  %v2537_v13 = vand.u32 2139095040, %v8856_v34  ;;  %v3730_v30 = vshll.u32 %v3721_v63, %v3728_v22 }
 0x390   :  { %v3386_v21 = vmul.u32 %v3382_v28, %v3359_v40  ;;  %v3743_v27 = vsub.s32 4, %v8806_v33  ;;  %v3362_v31 = vmul.u32 %v3360_v3, %v3358_v20  ;;  %v3366_v7 = vshll.u32 %v3363_v50, 16 }
 0x391   :  { %v3731_v61 = vshrl.u32 %v3713_v47, %v3729_v57  ;;  %v3734_v39 = vadd.s32 127, %v3733_v53  ;;  %v3384_v44 = vmul.u32 %v3382_v28, %v3358_v20  ;;  %v3365_v14 = vmul.u32 %v3361_v16, %v3359_v40 }
 0x392   :  { %v3388_v12 = vshll.u32 %v3385_v35, 16  ;;  %vm8877_vm7 = vcmp.le.f32.partialorder %v3619_v11, 0.7853982  ;;  %v3368_v42 = vshll.u32 %v3364_v23, 16  ;;  %vm3370_vm15 = vc.u32 %v3362_v31, %v3366_v7 }
 0x393   :  { %v3732_v52 = vor.u32 %v3731_v61, %v3730_v30  ;;  %v3735_v0 = vshll.u32 %v3734_v39, 23  ;;  %v3372_v63 = vadd.s32 %v3366_v7, %v3362_v31  ;;  %v3387_v5 = vmul.u32 %v3383_v48, %v3359_v40 }
 0x394   :  { %v3371_v10 = vsel %vm3370_vm15, 1, %v11271_v9  ;;  %v3390_v32 = vshll.u32 %v3386_v21, 16  ;;  %vm3392_vm4 = vc.u32 %v3384_v44, %v3388_v12  ;;  %v3394_v43 = vadd.s32 %v3388_v12, %v3384_v44 }
 0x395   :  { %v3736_v54 = vor.u32 4788187, %v3735_v0  ;;  %v3373_v20 = vadd.s32 %v3371_v10, %v3365_v14  ;;  %vm3374_vm1 = vc.u32 %v3372_v63, %v3368_v42  ;;  %v3393_v28 = vsel %vm3392_vm4, 1, %v11271_v9 }
 0x396   :  { %v3739_v22 = vcvt.s32.f32 %v3732_v52  ;;  %v3375_v11 = vsel %vm3374_vm1, 1, %v11271_v9  ;;  %v3395_v3 = vadd.s32 %v3393_v28, %v3387_v5  ;;  %v3346_v16 = vsel %vm3344_vm14, %v8823_v51, 2102212464  ;;  %v810_v28 = vpop.permute.xlu2 %809 }
 0x397   :  { %v3737_v38 = vand.u32 2147483647, %v3736_v54  ;;  %v3367_v48 = vshrl.u32 %v3363_v50, 16  ;;  %v3377_v40 = vadd.s32 %v3375_v11, %v3373_v20  ;;  %vm3396_vm6 = vc.u32 %v3394_v43, %v3390_v32 }
 0x398   :  { %v3744_v57 = vsel %vm3621_vm11, %v3743_v27, %v8806_v33  ;;  %v3397_v53 = vsel %vm3396_vm6, 1, %v11271_v9  ;;  %v2538_v30 = vshrl.u32 %v2537_v13, 23  ;;  %v3369_v61 = vshrl.u32 %v3364_v23, 16 }
 0x399   :  { %v3740_v47 = vmul.f32 %v3739_v22, %v3737_v38  ;;  %v3378_v39 = vadd.s32 %v3377_v40, %v3367_v48  ;;  %v3389_v31 = vshrl.u32 %v3385_v35, 16  ;;  %v3399_v7 = vadd.s32 %v3397_v53, %v3395_v3  ;;  %v11344_v48 = vld [vmem:[#allocation23_spill] sm:$0xff] }
 0x39a   :  { %v3345_v51 = vsel %vm3341_vm5, %v3325_v41, %v8816_v8  ;;  %v3347_v50 = vsel %vm3343_vm2, %v8818_v45, %v3346_v16  ;;  %v6046_v52 = vadd.s32 4294967169, %v2538_v30  ;;  %v3391_v33 = vshrl.u32 %v3386_v21, 16  ;;  %v11343_v16 = vld [vmem:[#allocation39_spill] sm:$0xff] }
 0x39b   :  { %v3741_v44 = vxor.u32 2147483648, %v3740_v47  ;;  %v8897_v0 = vadd.s32 %v3378_v39, %v3369_v61  ;;  %v3400_v27 = vadd.s32 %v3399_v7, %v3389_v31  ;;  %v2534_v13 = vand.u32 2147483647, %v8856_v34 }
 0x39c   :  { %v3746_v23 = vsel %vm8877_vm7, 0, %v3744_v57  ;;  %v8904_v14 = vadd.s32 %v3394_v43, %v3390_v32  ;;  %v2544_v8 = vadd.s32 1, %v6046_v52  ;;  %v3348_v41 = vsel %vm3342_vm3, %v3345_v51, %v3347_v50 }
 0x39d   :  { %v3742_v35 = vsel %vm3621_vm11, %v3741_v44, %v3740_v47  ;;  %v3401_v21 = vadd.s32 %v3400_v27, %v3391_v33  ;;  %v3763_v42 = vadd.s32 3, %v3746_v23  ;;  %v2541_v5 = vand.u32 8388607, %v2534_v13 }
 0x39e   :  { %v3745_v45 = vsel %vm8877_vm7, %v8598_v1, %v3742_v35  ;;  %vm3404_vm5 = vc.u32 %v8897_v0, %v8904_v14  ;;  %vm2545_vm14 = vcmp.gt.s32.totalorder %v2544_v8, 0  ;;  %v3402_v26 = vmul.u32 %v8833_v62, %v3348_v41 }
 0x39f   :  { %v3747_v12 = vmul.f32 %v3745_v45, %v3745_v45  ;;  %v3405_v63 = vadd.s32 1, %v3401_v21  ;;  %v2546_v54 = vsel %vm2545_vm14, %v2544_v8, 0  ;;  %v3764_v3 = vand.u32 3, %v3763_v42 }
 0x3a0   :  { %v2548_v20 = vand.u32 31, %v2546_v54  ;;  %v11345_v40 = vsel %vm6681_vm10, %v11343_v16, %v11344_v48  ;;  %v2542_v30 = vor.u32 8388608, %v2541_v5  ;;  %v8927_v61 = vshrl.u32 %v2546_v54, 5 }
 0x3a1   :  { %v3748_v10 = vmul.f32 -0.001358992, %v3747_v12  ;;  %v3755_v32 = vmul.f32 -0.00019511016, %v3747_v12  ;;  %v3406_v36 = vsel %vm3404_vm5, %v3405_v63, %v3401_v21  ;;  %v8925_v47 = vsel %vm7006_vm0, %v810_v28, %v11345_v40 }
 0x3a2   :  { %v3407_v22 = vadd.s32 %v3406_v36, %v3402_v26  ;;  %v8916_v11 = vsub.s32 32, %v2548_v20  ;;  %v2551_v52 = vshll.u32 %v11268_v60, %v2548_v20  ;;  %vm3766_vm2 = vcmp.eq.s32.totalorder %v3764_v3, 0 }
 0x3a3   :  { %v3749_v43 = vadd.f32 0.041655596, %v3748_v10  ;;  %v3756_v38 = vadd.f32 0.008332121, %v3755_v32  ;;  %v2554_v33 = vshll.u32 %v11272_v58, %v2548_v20  ;;  %v2557_v27 = vshll.u32 %v11273_v46, %v2548_v20 }
 0x3a4   :  { %v3408_v53 = vadd.s32 536870912, %v3407_v22  ;;  %v2552_v39 = vshrl.u32 %v11272_v58, %v8916_v11  ;;  %v2555_v31 = vshrl.u32 %v11273_v46, %v8916_v11  ;;  %v2561_v7 = vshrl.u32 %v11275_v59, %v8916_v11 }
 0x3a5   :  { %v3750_v57 = vmul.f32 %v3749_v43, %v3747_v12  ;;  %v3757_v62 = vmul.f32 %v3756_v38, %v3747_v12  ;;  %v2558_v35 = vshrl.u32 %v11274_v55, %v8916_v11  ;;  %v2560_v23 = vshll.u32 %v11274_v55, %v2548_v20 }
 0x3a6   :  { %v8935_v50 = vshrl.u32 %v3408_v53, 30  ;;  %vm3765_vm3 = vcmp.lt.s32.totalorder %v3764_v3, 2  ;;  %v2563_v42 = vshll.u32 %v11275_v59, %v2548_v20  ;;  %v8945_v63 = vor.u32 %v2552_v39, %v2551_v52 }
 0x3a7   :  { %v3751_v44 = vadd.f32 -0.4999988, %v3750_v57  ;;  %v3758_v51 = vadd.f32 -0.16666654, %v3757_v62  ;;  %v8947_v5 = vor.u32 %v2555_v31, %v2554_v33  ;;  %v2562_v54 = vor.u32 %v2561_v7, %v2560_v23 }
 0x3a8   :  { %v3410_v21 = vshll.u32 %v8935_v50, 30  ;;  %v2564_v10 = vshrl.u32 %v11276_v29, %v8916_v11  ;;  %v908_v36 = vmul.f32 6.2831855, %v8925_v47  ;;  %v8952_v43 = vor.u32 %v2558_v35, %v2557_v27 }
 0x3a9   :  { %v3752_v8 = vmul.f32 %v3751_v44, %v3747_v12  ;;  %v3759_v41 = vmul.f32 %v3758_v51, %v3747_v12  ;;  %vm2566_vm13 = vcmp.lt.s32.totalorder %v8927_v61, 1  ;;  %vm2569_vm8 = vcmp.lt.s32.totalorder %v8927_v61, 4 }
 0x3aa   :  { %v3411_v28 = vsub.s32 %v3407_v22, %v3410_v21  ;;  %v2565_v12 = vor.u32 %v2564_v10, %v2563_v42  ;;  %vm3769_vm7 = vcmp.eq.s32.totalorder %v3764_v3, 2  ;;  %v2574_v48 = vsel %vm2566_vm13, %v8945_v63, %v8947_v5 }
 0x3ab   :  { %v3753_v32 = vadd.f32 1.0, %v3752_v8  ;;  %v3760_v26 = vadd.f32 1.0, %v3759_v41  ;;  %v2575_v22 = vsel %vm2569_vm8, %v2562_v54, 920167782  ;;  %v8962_v40 = vshll.u32 %v2542_v30, 8 }
 0x3ac   :  { %vm3412_vm11 = vcmp.lt.s32.totalorder %v3411_v28, 0  ;;  %v3413_v16 = vsub.s32 0, %v3411_v28  ;;  %vm2568_vm15 = vcmp.lt.s32.totalorder %v8927_v61, 3  ;;  %vm2567_vm4 = vcmp.lt.s32.totalorder %v8927_v61, 2 }
 0x3ad   :  { %v3761_v20 = vmul.f32 %v3760_v26, %v3745_v45  ;;  %v3770_v38 = vxor.u32 2147483648, %v3753_v32  ;;  %v940_v45 = vmul.f32 %v908_v36, %v7026_v49  ;;  %v2576_v31 = vsel %vm2568_vm15, %v8952_v43, %v2575_v22 }
 0x3ae   :  { %v3414_v62 = vsel %vm3412_vm11, %v3413_v16, %v3411_v28  ;;  %v2577_v30 = vsel %vm2567_vm4, %v2574_v48, %v2576_v31  ;;  %v2578_v44 = vsel %vm2566_vm13, %v8947_v5, %v8952_v43  ;;  %v2579_v51 = vsel %vm2569_vm8, %v2565_v12, 1326507024 }
 0x3af   :  { %v3767_v57 = vxor.u32 2147483648, %v3761_v20  ;;  %v3771_v53 = vsel %vm3769_vm7, %v3770_v38, %v3761_v20  ;;  %v3415_v39 = vclz %v3414_v62  ;;  %vm3762_vm1 = vweird.f32 %v8598_v1 }
 0x3b0   :  { %v2583_v27 = vand.u32 65535, %v8962_v40  ;;  %v2580_v23 = vsel %vm2568_vm15, %v2562_v54, %v2579_v51  ;;  %v2607_v8 = vand.u32 65535, %v2577_v30  ;;  %v8985_v41 = vadd.f32 %v940_v45, %v7039_v4 }
 0x3b1   :  { %v3768_v7 = vsel %vm3766_vm2, %v3753_v32, %v3767_v57  ;;  %v6062_v33 = vadd.s32 4294967294, %v3415_v39  ;;  %v2581_v1 = vsel %vm2567_vm4, %v2578_v44, %v2580_v23  ;;  %v2608_v3 = vshrl.u32 %v2577_v30, 16 }
 0x3b2   :  { %v3772_v52 = vsel %vm3765_vm3, %v3768_v7, %v3771_v53  ;;  %v2584_v54 = vshrl.u32 %v8962_v40, 16  ;;  %v2585_v10 = vand.u32 65535, %v2581_v1  ;;  %v2586_v32 = vshrl.u32 %v2581_v1, 16 }
 0x3b3   :  { %v3773_v35 = vsel %vm3762_vm1, nan, %v3772_v52  ;;  %vm6063_vm6 = vcmp.lt.s32.totalorder %v6062_v33, 0  ;;  %v3403_v26 = vadd.s32 %v8904_v14, %v8897_v0  ;;  %v2610_v12 = vmul.u32 %v2608_v3, %v2583_v27 }
 0x3b4   :  { %v5964_v21 = vsel %vm5944_vm9, %v8538_v37, %v3773_v35  ;;  %v3418_v42 = vsel %vm6063_vm6, 0, %v6062_v33  ;;  %vm3311_vm5 = vcmp.lt.s32.totalorder %v8727_v25, 0  ;;  %v2550_v20 = vshrl.u32 %v11268_v60, %v8916_v11 }
 0x3b5   :  { %5997 = vst.msk [vmem:[%s11096_s1 + $0x88] sm:$0xff] %vm5979_vm12, %v5964_v21  ;;  %v3419_v36 = vsub.s32 32, %v3418_v42  ;;  %v3423_v37 = vsub.s32 4294967266, %v3418_v42  ;;  %v2588_v38 = vmul.u32 %v2586_v32, %v2583_v27  ;;  %v2589_v16 = vmul.u32 %v2585_v10, %v2584_v54 }
 0x3b6   :  { %v4087_v48 = vand.u32 2139095040, %v8985_v41  ;;  %v3420_v22 = vshll.u32 %v3411_v28, %v3418_v42  ;;  %v2611_v45 = vmul.u32 %v2607_v8, %v2584_v54  ;;  %v3433_v53 = vsub.s32 4, %v8935_v50 }
 0x3b7   :  { %v3421_v57 = vshrl.u32 %v3403_v26, %v3419_v36  ;;  %v3424_v62 = vadd.s32 127, %v3423_v37  ;;  %v2587_v39 = vmul.u32 %v2585_v10, %v2583_v27  ;;  %v2591_v0 = vshll.u32 %v2588_v38, 16 }
 0x3b8   :  { %v2609_v14 = vmul.u32 %v2607_v8, %v2583_v27  ;;  %v2590_v30 = vmul.u32 %v2586_v32, %v2584_v54  ;;  %v2613_v44 = vshll.u32 %v2610_v12, 16  ;;  %vm9006_vm14 = vcmp.le.f32.partialorder %v3309_v24, 0.7853982 }
 0x3b9   :  { %v3422_v31 = vor.u32 %v3421_v57, %v3420_v22  ;;  %v3425_v7 = vshll.u32 %v3424_v62, 23  ;;  %v2593_v51 = vshll.u32 %v2589_v16, 16  ;;  %vm2595_vm2 = vc.u32 %v2587_v39, %v2591_v0 }
 0x3ba   :  { %v2597_v28 = vadd.s32 %v2591_v0, %v2587_v39  ;;  %v2612_v52 = vmul.u32 %v2608_v3, %v2584_v54  ;;  %v2596_v35 = vsel %vm2595_vm2, 1, %v11271_v9  ;;  %v2615_v23 = vshll.u32 %v2611_v45, 16 }
 0x3bb   :  { %v3426_v33 = vor.u32 4788187, %v3425_v7  ;;  %vm2617_vm3 = vc.u32 %v2609_v14, %v2613_v44  ;;  %v2598_v27 = vadd.s32 %v2596_v35, %v2590_v30  ;;  %v2619_v21 = vadd.s32 %v2613_v44, %v2609_v14 }
 0x3bc   :  { %vm2599_vm11 = vc.u32 %v2597_v28, %v2593_v51  ;;  %v2618_v8 = vsel %vm2617_vm3, 1, %v11271_v9  ;;  %v3429_v42 = vcvt.s32.f32 %v3422_v31  ;;  %v2571_v32 = vsel %vm2569_vm8, %v8952_v43, 2102212464 }
 0x3bd   :  { %v3427_v1 = vand.u32 2147483647, %v3426_v33  ;;  %v2600_v24 = vsel %vm2599_vm11, 1, %v11271_v9  ;;  %v2620_v10 = vadd.s32 %v2618_v8, %v2612_v52  ;;  %v2592_v3 = vshrl.u32 %v2588_v38, 16  ;;  %v802_v8 = vpop.permute.xlu0 %801 }
 0x3be   :  { %v2602_v54 = vadd.s32 %v2600_v24, %v2598_v27  ;;  %vm2621_vm7 = vc.u32 %v2619_v21, %v2615_v23  ;;  %v3434_v36 = vsel %vm3311_vm5, %v3433_v53, %v8935_v50  ;;  %v4088_v22 = vshrl.u32 %v4087_v48, 23 }
 0x3bf   :  { %v3430_v26 = vmul.f32 %v3429_v42, %v3427_v1  ;;  %v2622_v37 = vsel %vm2621_vm7, 1, %v11271_v9  ;;  %v2594_v57 = vshrl.u32 %v2589_v16, 16  ;;  %v2614_v39 = vshrl.u32 %v2610_v12, 16 }
 0x3c0   :  { %v2603_v62 = vadd.s32 %v2602_v54, %v2592_v3  ;;  %v2624_v0 = vadd.s32 %v2622_v37, %v2620_v10  ;;  %v2570_v43 = vsel %vm2566_vm13, %v2550_v20, %v8945_v63  ;;  %v2572_v38 = vsel %vm2568_vm15, %v8947_v5, %v2571_v32  ;;  %v11348_v32 = vld [vmem:[#allocation43_spill] sm:$0xff]  ;;  %v11349_v3 = vld [vmem:[#allocation30_spill] sm:$0xff] }
 0x3c1   :  { %v3431_v14 = vxor.u32 2147483648, %v3430_v26  ;;  %v6076_v31 = vadd.s32 4294967169, %v4088_v22  ;;  %v2616_v50 = vshrl.u32 %v2611_v45, 16  ;;  %v4084_v48 = vand.u32 2147483647, %v8985_v41 }
 0x3c2   :  { %v9026_v7 = vadd.s32 %v2603_v62, %v2594_v57  ;;  %v2625_v53 = vadd.s32 %v2624_v0, %v2614_v39  ;;  %v3436_v16 = vsel %vm9006_vm14, 0, %v3434_v36  ;;  %v9033_v30 = vadd.s32 %v2619_v21, %v2615_v23 }
 0x3c3   :  { %v3432_v12 = vsel %vm3311_vm5, %v3431_v14, %v3430_v26  ;;  %v4094_v63 = vadd.s32 1, %v6076_v31  ;;  %v2573_v20 = vsel %vm2567_vm4, %v2570_v43, %v2572_v38  ;;  %v3453_v51 = vadd.s32 3, %v3436_v16 }
 0x3c4   :  { %v3435_v5 = vsel %vm9006_vm14, %v8727_v25, %v3432_v12  ;;  %v2626_v45 = vadd.s32 %v2625_v53, %v2616_v50  ;;  %vm2629_vm13 = vc.u32 %v9026_v7, %v9033_v30  ;;  %v4091_v52 = vand.u32 8388607, %v4084_v48 }
 0x3c5   :  { %v3437_v44 = vmul.f32 %v3435_v5, %v3435_v5  ;;  %vm4095_vm8 = vcmp.gt.s32.totalorder %v4094_v63, 0  ;;  %v2627_v11 = vmul.u32 %v8962_v40, %v2573_v20  ;;  %v3454_v10 = vand.u32 3, %v3453_v51 }
 0x3c6   :  { %v2630_v28 = vadd.s32 1, %v2626_v45  ;;  %v4096_v33 = vsel %vm4095_vm8, %v4094_v63, 0  ;;  %v11350_v54 = vsel %vm6681_vm10, %v11348_v32, %v11349_v3  ;;  %v4092_v22 = vor.u32 8388608, %v4091_v52 }
 0x3c7   :  { %v3438_v35 = vmul.f32 -0.001358992, %v3437_v44  ;;  %v3445_v23 = vmul.f32 -0.00019511016, %v3437_v44  ;;  %v4098_v27 = vand.u32 31, %v4096_v33  ;;  %v9054_v26 = vsel %vm7006_vm0, %v802_v8, %v11350_v54 }
 0x3c8   :  { %v2631_v61 = vsel %vm2629_vm13, %v2630_v28, %v2626_v45  ;;  %v9056_v57 = vshrl.u32 %v4096_v33, 5  ;;  %vm3456_vm15 = vcmp.eq.s32.totalorder %v3454_v10, 0  ;;  %vm3455_vm4 = vcmp.lt.s32.totalorder %v3454_v10, 2 }
 0x3c9   :  { %v3439_v21 = vadd.f32 0.041655596, %v3438_v35  ;;  %v3446_v1 = vadd.f32 0.008332121, %v3445_v23  ;;  %v2632_v42 = vadd.s32 %v2631_v61, %v2627_v11  ;;  %v9045_v24 = vsub.s32 32, %v4098_v27 }
 0x3ca   :  { %v4101_v31 = vshll.u32 %v11268_v60, %v4098_v27  ;;  %v4104_v50 = vshll.u32 %v11272_v58, %v4098_v27  ;;  %v4107_v53 = vshll.u32 %v11273_v46, %v4098_v27  ;;  %v4110_v16 = vshll.u32 %v11274_v55, %v4098_v27 }
 0x3cb   :  { %v3440_v36 = vmul.f32 %v3439_v21, %v3437_v44  ;;  %v3447_v40 = vmul.f32 %v3446_v1, %v3437_v44  ;;  %v2633_v37 = vadd.s32 536870912, %v2632_v42  ;;  %v4102_v62 = vshrl.u32 %v11272_v58, %v9045_v24 }
 0x3cc   :  { %v4105_v39 = vshrl.u32 %v11273_v46, %v9045_v24  ;;  %v4111_v0 = vshrl.u32 %v11275_v59, %v9045_v24  ;;  %v4108_v12 = vshrl.u32 %v11274_v55, %v9045_v24  ;;  %v4113_v51 = vshll.u32 %v11275_v59, %v4098_v27 }
 0x3cd   :  { %v3441_v14 = vadd.f32 -0.4999988, %v3440_v36  ;;  %v3448_v43 = vadd.f32 -0.16666654, %v3447_v40  ;;  %v9064_v38 = vshrl.u32 %v2633_v37, 30  ;;  %v9074_v28 = vor.u32 %v4102_v62, %v4101_v31 }
 0x3ce   :  { %v9076_v52 = vor.u32 %v4105_v39, %v4104_v50  ;;  %v4112_v33 = vor.u32 %v4111_v0, %v4110_v16  ;;  %v4114_v35 = vshrl.u32 %v11276_v29, %v9045_v24  ;;  %v906_v61 = vmul.f32 6.2831855, %v9054_v26 }
 0x3cf   :  { %v3442_v63 = vmul.f32 %v3441_v14, %v3437_v44  ;;  %v3449_v20 = vmul.f32 %v3448_v43, %v3437_v44  ;;  %v2635_v45 = vshll.u32 %v9064_v38, 30  ;;  %v9081_v21 = vor.u32 %v4108_v12, %v4107_v53 }
 0x3d0   :  { %v4115_v44 = vor.u32 %v4114_v35, %v4113_v51  ;;  %vm4116_vm1 = vcmp.lt.s32.totalorder %v9056_v57, 1  ;;  %vm4119_vm6 = vcmp.lt.s32.totalorder %v9056_v57, 4  ;;  %vm3459_vm14 = vcmp.eq.s32.totalorder %v3454_v10, 2 }
 0x3d1   :  { %v3443_v23 = vadd.f32 1.0, %v3442_v63  ;;  %v3450_v11 = vadd.f32 1.0, %v3449_v20  ;;  %v2636_v8 = vsub.s32 %v2632_v42, %v2635_v45  ;;  %v4124_v3 = vsel %vm4116_vm1, %v9074_v28, %v9076_v52 }
 0x3d2   :  { %v4125_v42 = vsel %vm4119_vm6, %v4112_v33, 920167782  ;;  %v9091_v54 = vshll.u32 %v4092_v22, 8  ;;  %vm4118_vm2 = vcmp.lt.s32.totalorder %v9056_v57, 3  ;;  %vm4117_vm3 = vcmp.lt.s32.totalorder %v9056_v57, 2 }
 0x3d3   :  { %v3451_v27 = vmul.f32 %v3450_v11, %v3435_v5  ;;  %v3460_v1 = vxor.u32 2147483648, %v3443_v23  ;;  %vm2637_vm5 = vcmp.lt.s32.totalorder %v2636_v8, 0  ;;  %v2638_v32 = vsub.s32 0, %v2636_v8 }
 0x3d4   :  { %v938_v5 = vmul.f32 %v906_v61, %v7026_v49  ;;  %v4126_v39 = vsel %vm4118_vm2, %v9081_v21, %v4125_v42  ;;  %v4128_v14 = vsel %vm4116_vm1, %v9076_v52, %v9081_v21  ;;  %v4129_v43 = vsel %vm4119_vm6, %v4115_v44, 1326507024 }
 0x3d5   :  { %v3457_v36 = vxor.u32 2147483648, %v3451_v27  ;;  %v2639_v40 = vsel %vm2637_vm5, %v2638_v32, %v2636_v8  ;;  %v3461_v37 = vsel %vm3459_vm14, %v3460_v1, %v3451_v27  ;;  %v4127_v22 = vsel %vm4117_vm3, %v4124_v3, %v4126_v39 }
 0x3d6   :  { %v2640_v62 = vclz %v2639_v40  ;;  %vm3452_vm11 = vweird.f32 %v8727_v25  ;;  %v4133_v53 = vand.u32 65535, %v9091_v54  ;;  %v4130_v16 = vsel %vm4118_vm2, %v4112_v33, %v4129_v43 }
 0x3d7   :  { %v3458_v0 = vsel %vm3456_vm15, %v3443_v23, %v3457_v36  ;;  %v4157_v63 = vand.u32 65535, %v4127_v22  ;;  %v9114_v20 = vadd.f32 %v938_v5, %v7039_v4  ;;  %v4131_v25 = vsel %vm4117_vm3, %v4128_v14, %v4130_v16 }
 0x3d8   :  { %v3462_v31 = vsel %vm3455_vm4, %v3458_v0, %v3461_v37  ;;  %v6047_v50 = vadd.s32 4294967294, %v2640_v62  ;;  %v4158_v10 = vshrl.u32 %v4127_v22, 16  ;;  %v4134_v33 = vshrl.u32 %v9091_v54, 16 }
 0x3d9   :  { %v3463_v12 = vsel %vm3452_vm11, nan, %v3462_v31  ;;  %v4135_v35 = vand.u32 65535, %v4131_v25  ;;  %v4136_v23 = vshrl.u32 %v4131_v25, 16  ;;  %v2628_v11 = vadd.s32 %v9033_v30, %v9026_v7 }
 0x3da   :  { %v5962_v45 = vsel %vm5944_vm9, %v8667_v17, %v3463_v12  ;;  %vm6048_vm7 = vcmp.lt.s32.totalorder %v6047_v50, 0  ;;  %v4160_v44 = vmul.u32 %v4158_v10, %v4133_v53  ;;  %vm2536_vm13 = vcmp.lt.s32.totalorder %v8856_v34, 0 }
 0x3db   :  { %5995 = vst.msk [vmem:[%s11096_s1 + $0x78] sm:$0xff] %vm5979_vm12, %v5962_v45  ;;  %v2643_v51 = vsel %vm6048_vm7, 0, %v6047_v50  ;;  %v4100_v27 = vshrl.u32 %v11268_v60, %v9045_v24  ;;  %v4138_v1 = vmul.u32 %v4136_v23, %v4133_v53  ;;  %v4139_v32 = vmul.u32 %v4135_v35, %v4134_v33 }
 0x3dc   :  { %v2644_v61 = vsub.s32 32, %v2643_v51  ;;  %v2648_v17 = vsub.s32 4294967266, %v2643_v51  ;;  %v3777_v3 = vand.u32 2139095040, %v9114_v20  ;;  %v2645_v42 = vshll.u32 %v2636_v8, %v2643_v51 }
 0x3dd   :  { %v4161_v5 = vmul.u32 %v4157_v63, %v4134_v33  ;;  %v2658_v37 = vsub.s32 4, %v9064_v38  ;;  %v4137_v62 = vmul.u32 %v4135_v35, %v4133_v53  ;;  %v4141_v7 = vshll.u32 %v4138_v1, 16 }
 0x3de   :  { %v2646_v36 = vshrl.u32 %v2628_v11, %v2644_v61  ;;  %v2649_v40 = vadd.s32 127, %v2648_v17  ;;  %v4159_v30 = vmul.u32 %v4157_v63, %v4133_v53  ;;  %v4140_v22 = vmul.u32 %v4136_v23, %v4134_v33 }
 0x3df   :  { %v4163_v14 = vshll.u32 %v4160_v44, 16  ;;  %vm9135_vm8 = vcmp.le.f32.partialorder %v2534_v13, 0.7853982  ;;  %v4143_v43 = vshll.u32 %v4139_v32, 16  ;;  %vm4145_vm15 = vc.u32 %v4137_v62, %v4141_v7 }
 0x3e0   :  { %v2647_v39 = vor.u32 %v2646_v36, %v2645_v42  ;;  %v2650_v0 = vshll.u32 %v2649_v40, 23  ;;  %v4147_v8 = vadd.s32 %v4141_v7, %v4137_v62  ;;  %v4162_v31 = vmul.u32 %v4158_v10, %v4134_v33 }
 0x3e1   :  { %v4146_v12 = vsel %vm4145_vm15, 1, %v11271_v9  ;;  %v4165_v16 = vshll.u32 %v4161_v5, 16  ;;  %vm4167_vm4 = vc.u32 %v4159_v30, %v4163_v14  ;;  %v4169_v45 = vadd.s32 %v4163_v14, %v4159_v30 }
 0x3e2   :  { %v2651_v50 = vor.u32 4788187, %v2650_v0  ;;  %v4148_v53 = vadd.s32 %v4146_v12, %v4140_v22  ;;  %vm4149_vm5 = vc.u32 %v4147_v8, %v4143_v43  ;;  %v4168_v63 = vsel %vm4167_vm4, 1, %v11271_v9 }
 0x3e3   :  { %v2654_v51 = vcvt.s32.f32 %v2647_v39  ;;  %v4150_v13 = vsel %vm4149_vm5, 1, %v11271_v9  ;;  %v4170_v35 = vadd.s32 %v4168_v63, %v4162_v31  ;;  %v4121_v23 = vsel %vm4119_vm6, %v9081_v21, 2102212464  ;;  %v782_v63 = vpop.permute.xlu1 %781 }
 0x3e4   :  { %v2652_v25 = vand.u32 2147483647, %v2651_v50  ;;  %v4142_v10 = vshrl.u32 %v4138_v1, 16  ;;  %v4152_v33 = vadd.s32 %v4150_v13, %v4148_v53  ;;  %vm4171_vm14 = vc.u32 %v4169_v45, %v4165_v16 }
 0x3e5   :  { %v2659_v61 = vsel %vm2536_vm13, %v2658_v37, %v9064_v38  ;;  %v4172_v17 = vsel %vm4171_vm14, 1, %v11271_v9  ;;  %v3778_v42 = vshrl.u32 %v3777_v3, 23  ;;  %v4144_v36 = vshrl.u32 %v4139_v32, 16 }
 0x3e6   :  { %v2655_v11 = vmul.f32 %v2654_v51, %v2652_v25  ;;  %v4153_v40 = vadd.s32 %v4152_v33, %v4142_v10  ;;  %v4164_v62 = vshrl.u32 %v4160_v44, 16  ;;  %v4174_v7 = vadd.s32 %v4172_v17, %v4170_v35  ;;  %v11354_v10 = vld [vmem:[#allocation25_spill] sm:$0xff] }
 0x3e7   :  { %v4120_v21 = vsel %vm4116_vm1, %v4100_v27, %v9074_v28  ;;  %v4122_v1 = vsel %vm4118_vm2, %v9076_v52, %v4121_v23  ;;  %v6070_v39 = vadd.s32 4294967169, %v3778_v42  ;;  %v4166_v38 = vshrl.u32 %v4161_v5, 16  ;;  %v11353_v23 = vld [vmem:[#allocation41_spill] sm:$0xff] }
 0x3e8   :  { %v2656_v30 = vxor.u32 2147483648, %v2655_v11  ;;  %v9155_v0 = vadd.s32 %v4153_v40, %v4144_v36  ;;  %v4175_v37 = vadd.s32 %v4174_v7, %v4164_v62  ;;  %v3774_v3 = vand.u32 2147483647, %v9114_v20 }
 0x3e9   :  { %v2661_v32 = vsel %vm9135_vm8, 0, %v2659_v61  ;;  %v9162_v22 = vadd.s32 %v4169_v45, %v4165_v16  ;;  %v3784_v28 = vadd.s32 1, %v6070_v39  ;;  %v4123_v27 = vsel %vm4117_vm3, %v4120_v21, %v4122_v1 }
 0x3ea   :  { %v2657_v44 = vsel %vm2536_vm13, %v2656_v30, %v2655_v11  ;;  %v4176_v5 = vadd.s32 %v4175_v37, %v4166_v38  ;;  %v2678_v43 = vadd.s32 3, %v2661_v32  ;;  %v3781_v31 = vand.u32 8388607, %v3774_v3 }
 0x3eb   :  { %v2660_v52 = vsel %vm9135_vm8, %v8856_v34, %v2657_v44  ;;  %vm4179_vm1 = vc.u32 %v9155_v0, %v9162_v22  ;;  %vm3785_vm6 = vcmp.gt.s32.totalorder %v3784_v28, 0  ;;  %v4177_v24 = vmul.u32 %v9091_v54, %v4123_v27 }
 0x3ec   :  { %v2662_v14 = vmul.f32 %v2660_v52, %v2660_v52  ;;  %v4180_v8 = vadd.s32 1, %v4176_v5  ;;  %v3786_v50 = vsel %vm3785_vm6, %v3784_v28, 0  ;;  %v2679_v35 = vand.u32 3, %v2678_v43 }
 0x3ed   :  { %v3788_v53 = vand.u32 31, %v3786_v50  ;;  %v11355_v33 = vsel %vm6681_vm10, %v11353_v23, %v11354_v10  ;;  %v3782_v42 = vor.u32 8388608, %v3781_v31  ;;  %v9185_v36 = vshrl.u32 %v3786_v50, 5 }
 0x3ee   :  { %v2663_v12 = vmul.f32 -0.001358992, %v2662_v14  ;;  %v2670_v16 = vmul.f32 -0.00019511016, %v2662_v14  ;;  %v4181_v57 = vsel %vm4179_vm1, %v4180_v8, %v4176_v5  ;;  %v9183_v11 = vsel %vm7006_vm0, %v782_v63, %v11355_v33 }
 0x3ef   :  { %v4182_v51 = vadd.s32 %v4181_v57, %v4177_v24  ;;  %v9174_v13 = vsub.s32 32, %v3788_v53  ;;  %v3791_v39 = vshll.u32 %v11268_v60, %v3788_v53  ;;  %vm2681_vm2 = vcmp.eq.s32.totalorder %v2679_v35, 0 }
 0x3f0   :  { %v2664_v45 = vadd.f32 0.041655596, %v2663_v12  ;;  %v2671_v25 = vadd.f32 0.008332121, %v2670_v16  ;;  %v3794_v38 = vshll.u32 %v11272_v58, %v3788_v53  ;;  %v3797_v37 = vshll.u32 %v11273_v46, %v3788_v53 }
 0x3f1   :  { %v4183_v17 = vadd.s32 536870912, %v4182_v51  ;;  %v3792_v40 = vshrl.u32 %v11272_v58, %v9174_v13  ;;  %v3795_v62 = vshrl.u32 %v11273_v46, %v9174_v13  ;;  %v3801_v7 = vshrl.u32 %v11275_v59, %v9174_v13 }
 0x3f2   :  { %v2665_v61 = vmul.f32 %v2664_v45, %v2662_v14  ;;  %v2672_v54 = vmul.f32 %v2671_v25, %v2662_v14  ;;  %v3798_v44 = vshrl.u32 %v11274_v55, %v9174_v13  ;;  %v3800_v32 = vshll.u32 %v11274_v55, %v3788_v53 }
 0x3f3   :  { %v9193_v1 = vshrl.u32 %v4183_v17, 30  ;;  %vm2680_vm3 = vcmp.lt.s32.totalorder %v2679_v35, 2  ;;  %v3803_v43 = vshll.u32 %v11275_v59, %v3788_v53  ;;  %v9203_v8 = vor.u32 %v3792_v40, %v3791_v39 }
 0x3f4   :  { %v2666_v30 = vadd.f32 -0.4999988, %v2665_v61  ;;  %v2673_v21 = vadd.f32 -0.16666654, %v2672_v54  ;;  %v9205_v31 = vor.u32 %v3795_v62, %v3794_v38  ;;  %v3802_v50 = vor.u32 %v3801_v7, %v3800_v32 }
 0x3f5   :  { %v4185_v5 = vshll.u32 %v9193_v1, 30  ;;  %v3804_v12 = vshrl.u32 %v11276_v29, %v9174_v13  ;;  %v901_v57 = vmul.f32 6.2831855, %v9183_v11  ;;  %v9210_v45 = vor.u32 %v3798_v44, %v3797_v37 }
 0x3f6   :  { %v2667_v28 = vmul.f32 %v2666_v30, %v2662_v14  ;;  %v2674_v27 = vmul.f32 %v2673_v21, %v2662_v14  ;;  %vm3806_vm11 = vcmp.lt.s32.totalorder %v9185_v36, 1  ;;  %vm3809_vm7 = vcmp.lt.s32.totalorder %v9185_v36, 4 }
 0x3f7   :  { %v4186_v63 = vsub.s32 %v4182_v51, %v4185_v5  ;;  %v3805_v14 = vor.u32 %v3804_v12, %v3803_v43  ;;  %vm2684_vm8 = vcmp.eq.s32.totalorder %v2679_v35, 2  ;;  %v3814_v10 = vsel %vm3806_vm11, %v9203_v8, %v9205_v31 }
 0x3f8   :  { %v2668_v16 = vadd.f32 1.0, %v2667_v28  ;;  %v2675_v24 = vadd.f32 1.0, %v2674_v27  ;;  %v3815_v51 = vsel %vm3809_vm7, %v3802_v50, 920167782  ;;  %v9220_v33 = vshll.u32 %v3782_v42, 8 }
 0x3f9   :  { %vm4187_vm13 = vcmp.lt.s32.totalorder %v4186_v63, 0  ;;  %v4188_v23 = vsub.s32 0, %v4186_v63  ;;  %vm3808_vm15 = vcmp.lt.s32.totalorder %v9185_v36, 3  ;;  %vm3807_vm4 = vcmp.lt.s32.totalorder %v9185_v36, 2 }
 0x3fa   :  { %v2676_v53 = vmul.f32 %v2675_v24, %v2660_v52  ;;  %v2685_v25 = vxor.u32 2147483648, %v2668_v16  ;;  %v933_v52 = vmul.f32 %v901_v57, %v7026_v49  ;;  %v3816_v62 = vsel %vm3808_vm15, %v9210_v45, %v3815_v51 }
 0x3fb   :  { %v4189_v54 = vsel %vm4187_vm13, %v4188_v23, %v4186_v63  ;;  %v3817_v42 = vsel %vm3807_vm4, %v3814_v10, %v3816_v62  ;;  %v3818_v30 = vsel %vm3806_vm11, %v9205_v31, %v9210_v45  ;;  %v3819_v21 = vsel %vm3809_vm7, %v3805_v14, 1326507024 }
 0x3fc   :  { %v2682_v61 = vxor.u32 2147483648, %v2676_v53  ;;  %v2686_v17 = vsel %vm2684_vm8, %v2685_v25, %v2676_v53  ;;  %v4190_v40 = vclz %v4189_v54  ;;  %vm2677_vm5 = vweird.f32 %v8856_v34 }
 0x3fd   :  { %v3823_v37 = vand.u32 65535, %v9220_v33  ;;  %v3820_v32 = vsel %vm3808_vm15, %v3802_v50, %v3819_v21  ;;  %v3847_v28 = vand.u32 65535, %v3817_v42  ;;  %v9243_v27 = vadd.f32 %v933_v52, %v7039_v4 }
 0x3fe   :  { %v2683_v7 = vsel %vm2681_vm2, %v2668_v16, %v2682_v61  ;;  %v6077_v38 = vadd.s32 4294967294, %v4190_v40  ;;  %v3821_v34 = vsel %vm3807_vm4, %v3818_v30, %v3820_v32  ;;  %v3848_v35 = vshrl.u32 %v3817_v42, 16 }
 0x3ff   :  { %v2687_v39 = vsel %vm2680_vm3, %v2683_v7, %v2686_v17  ;;  %v3824_v50 = vshrl.u32 %v9220_v33, 16  ;;  %v3825_v12 = vand.u32 65535, %v3821_v34  ;;  %v3826_v16 = vshrl.u32 %v3821_v34, 16 }
 0x400   :  { %v2688_v44 = vsel %vm2677_vm5, nan, %v2687_v39  ;;  %vm6078_vm14 = vcmp.lt.s32.totalorder %v6077_v38, 0  ;;  %v4178_v24 = vadd.s32 %v9162_v22, %v9155_v0  ;;  %v3850_v14 = vmul.u32 %v3848_v35, %v3823_v37 }
 0x401   :  { %v5957_v5 = vsel %vm5944_vm9, %v8796_v2, %v2688_v44  ;;  %v4193_v43 = vsel %vm6078_vm14, 0, %v6077_v38  ;;  %vm4086_vm1 = vcmp.lt.s32.totalorder %v8985_v41, 0  ;;  %v3790_v53 = vshrl.u32 %v11268_v60, %v9174_v13 }
 0x402   :  { %5990 = vst.msk [vmem:[%s11096_s1 + $0x50] sm:$0xff] %vm5979_vm12, %v5957_v5  ;;  %v4194_v57 = vsub.s32 32, %v4193_v43  ;;  %v4198_v2 = vsub.s32 4294967266, %v4193_v43  ;;  %v3828_v25 = vmul.u32 %v3826_v16, %v3823_v37  ;;  %v3829_v23 = vmul.u32 %v3825_v12, %v3824_v50 }
 0x403   :  { %v3002_v10 = vand.u32 2139095040, %v9243_v27  ;;  %v4195_v51 = vshll.u32 %v4186_v63, %v4193_v43  ;;  %v3851_v52 = vmul.u32 %v3847_v28, %v3824_v50  ;;  %v4208_v17 = vsub.s32 4, %v9193_v1 }
 0x404   :  { %v4196_v61 = vshrl.u32 %v4178_v24, %v4194_v57  ;;  %v4199_v54 = vadd.s32 127, %v4198_v2  ;;  %v3827_v40 = vmul.u32 %v3825_v12, %v3823_v37  ;;  %v3831_v0 = vshll.u32 %v3828_v25, 16 }
 0x405   :  { %v3849_v22 = vmul.u32 %v3847_v28, %v3823_v37  ;;  %v3830_v42 = vmul.u32 %v3826_v16, %v3824_v50  ;;  %v3853_v30 = vshll.u32 %v3850_v14, 16  ;;  %vm9264_vm6 = vcmp.le.f32.partialorder %v4084_v48, 0.7853982 }
 0x406   :  { %v4197_v62 = vor.u32 %v4196_v61, %v4195_v51  ;;  %v4200_v7 = vshll.u32 %v4199_v54, 23  ;;  %v3833_v21 = vshll.u32 %v3829_v23, 16  ;;  %vm3835_vm2 = vc.u32 %v3827_v40, %v3831_v0 }
 0x407   :  { %v3837_v63 = vadd.s32 %v3831_v0, %v3827_v40  ;;  %v3852_v39 = vmul.u32 %v3848_v35, %v3824_v50  ;;  %v3836_v44 = vsel %vm3835_vm2, 1, %v11271_v9  ;;  %v3855_v32 = vshll.u32 %v3851_v52, 16 }
 0x408   :  { %v4201_v38 = vor.u32 4788187, %v4200_v7  ;;  %vm3857_vm3 = vc.u32 %v3849_v22, %v3853_v30  ;;  %v3838_v37 = vadd.s32 %v3836_v44, %v3830_v42  ;;  %v3859_v5 = vadd.s32 %v3853_v30, %v3849_v22 }
 0x409   :  { %vm3839_vm13 = vc.u32 %v3837_v63, %v3833_v21  ;;  %v3858_v28 = vsel %vm3857_vm3, 1, %v11271_v9  ;;  %v4204_v43 = vcvt.s32.f32 %v4197_v62  ;;  %v3811_v16 = vsel %vm3809_vm7, %v9210_v45, 2102212464 }
 0x40a   :  { %v4202_v34 = vand.u32 2147483647, %v4201_v38  ;;  %v3840_v48 = vsel %vm3839_vm13, 1, %v11271_v9  ;;  %v3860_v12 = vadd.s32 %v3858_v28, %v3852_v39  ;;  %v3832_v35 = vshrl.u32 %v3828_v25, 16  ;;  %v822_v28 = vpop.permute.xlu2 %821 }
 0x40b   :  { %v3842_v50 = vadd.s32 %v3840_v48, %v3838_v37  ;;  %vm3861_vm8 = vc.u32 %v3859_v5, %v3855_v32  ;;  %v4209_v57 = vsel %vm4086_vm1, %v4208_v17, %v9193_v1  ;;  %v3003_v51 = vshrl.u32 %v3002_v10, 23 }
 0x40c   :  { %v4205_v24 = vmul.f32 %v4204_v43, %v4202_v34  ;;  %v3862_v2 = vsel %vm3861_vm8, 1, %v11271_v9  ;;  %v3834_v61 = vshrl.u32 %v3829_v23, 16  ;;  %v3854_v40 = vshrl.u32 %v3850_v14, 16 }
 0x40d   :  { %v3843_v54 = vadd.s32 %v3842_v50, %v3832_v35  ;;  %v3864_v0 = vadd.s32 %v3862_v2, %v3860_v12  ;;  %v3810_v45 = vsel %vm3806_vm11, %v3790_v53, %v9203_v8  ;;  %v3812_v25 = vsel %vm3808_vm15, %v9205_v31, %v3811_v16  ;;  %v11358_v16 = vld [vmem:[#allocation42_spill] sm:$0xff] }
 0x40e   :  { %v4206_v22 = vxor.u32 2147483648, %v4205_v24  ;;  %v6055_v62 = vadd.s32 4294967169, %v3003_v51  ;;  %v3856_v1 = vshrl.u32 %v3851_v52, 16  ;;  %v2999_v10 = vand.u32 2147483647, %v9243_v27  ;;  %v11359_v35 = vld [vmem:[#allocation26_spill] sm:$0xff] }
 0x40f   :  { %v9284_v7 = vadd.s32 %v3843_v54, %v3834_v61  ;;  %v3865_v17 = vadd.s32 %v3864_v0, %v3854_v40  ;;  %v4211_v23 = vsel %vm9264_vm6, 0, %v4209_v57  ;;  %v9291_v42 = vadd.s32 %v3859_v5, %v3855_v32 }
 0x410   :  { %v4207_v14 = vsel %vm4086_vm1, %v4206_v22, %v4205_v24  ;;  %v3009_v8 = vadd.s32 1, %v6055_v62  ;;  %v3813_v53 = vsel %vm3807_vm4, %v3810_v45, %v3812_v25  ;;  %v4228_v21 = vadd.s32 3, %v4211_v23 }
 0x411   :  { %v4210_v31 = vsel %vm9264_vm6, %v8985_v41, %v4207_v14  ;;  %v3866_v52 = vadd.s32 %v3865_v17, %v3856_v1  ;;  %vm3869_vm11 = vc.u32 %v9284_v7, %v9291_v42  ;;  %v3006_v39 = vand.u32 8388607, %v2999_v10 }
 0x412   :  { %v4212_v30 = vmul.f32 %v4210_v31, %v4210_v31  ;;  %vm3010_vm7 = vcmp.gt.s32.totalorder %v3009_v8, 0  ;;  %v3867_v13 = vmul.u32 %v9220_v33, %v3813_v53  ;;  %v4229_v12 = vand.u32 3, %v4228_v21 }
 0x413   :  { %v3870_v63 = vadd.s32 1, %v3866_v52  ;;  %v3011_v38 = vsel %vm3010_vm7, %v3009_v8, 0  ;;  %v11360_v50 = vsel %vm6681_vm10, %v11358_v16, %v11359_v35  ;;  %v3007_v51 = vor.u32 8388608, %v3006_v39 }
 0x414   :  { %v4213_v44 = vmul.f32 -0.001358992, %v4212_v30  ;;  %v4220_v32 = vmul.f32 -0.00019511016, %v4212_v30  ;;  %v3013_v37 = vand.u32 31, %v3011_v38  ;;  %v9312_v24 = vsel %vm7006_vm0, %v822_v28, %v11360_v50 }
 0x415   :  { %v3871_v36 = vsel %vm3869_vm11, %v3870_v63, %v3866_v52  ;;  %v9314_v61 = vshrl.u32 %v3011_v38, 5  ;;  %vm4231_vm15 = vcmp.eq.s32.totalorder %v4229_v12, 0  ;;  %vm4230_vm4 = vcmp.lt.s32.totalorder %v4229_v12, 2 }
 0x416   :  { %v4214_v5 = vadd.f32 0.041655596, %v4213_v44  ;;  %v4221_v34 = vadd.f32 0.008332121, %v4220_v32  ;;  %v3872_v43 = vadd.s32 %v3871_v36, %v3867_v13  ;;  %v9303_v48 = vsub.s32 32, %v3013_v37 }
 0x417   :  { %v3016_v62 = vshll.u32 %v11268_v60, %v3013_v37  ;;  %v3019_v1 = vshll.u32 %v11272_v58, %v3013_v37  ;;  %v3022_v17 = vshll.u32 %v11273_v46, %v3013_v37  ;;  %v3025_v23 = vshll.u32 %v11274_v55, %v3013_v37 }
 0x418   :  { %v4215_v57 = vmul.f32 %v4214_v5, %v4212_v30  ;;  %v4222_v33 = vmul.f32 %v4221_v34, %v4212_v30  ;;  %v3873_v2 = vadd.s32 536870912, %v3872_v43  ;;  %v3017_v54 = vshrl.u32 %v11272_v58, %v9303_v48 }
 0x419   :  { %v3020_v40 = vshrl.u32 %v11273_v46, %v9303_v48  ;;  %v3026_v0 = vshrl.u32 %v11275_v59, %v9303_v48  ;;  %v3023_v14 = vshrl.u32 %v11274_v55, %v9303_v48  ;;  %v3028_v21 = vshll.u32 %v11275_v59, %v3013_v37 }
 0x41a   :  { %v4216_v22 = vadd.f32 -0.4999988, %v4215_v57  ;;  %v4223_v45 = vadd.f32 -0.16666654, %v4222_v33  ;;  %v9322_v25 = vshrl.u32 %v3873_v2, 30  ;;  %v9332_v63 = vor.u32 %v3017_v54, %v3016_v62 }
 0x41b   :  { %v9334_v39 = vor.u32 %v3020_v40, %v3019_v1  ;;  %v3027_v38 = vor.u32 %v3026_v0, %v3025_v23  ;;  %v3029_v44 = vshrl.u32 %v11276_v29, %v9303_v48  ;;  %v911_v36 = vmul.f32 6.2831855, %v9312_v24 }
 0x41c   :  { %v4217_v8 = vmul.f32 %v4216_v22, %v4212_v30  ;;  %v4224_v53 = vmul.f32 %v4223_v45, %v4212_v30  ;;  %v3875_v52 = vshll.u32 %v9322_v25, 30  ;;  %v9339_v5 = vor.u32 %v3023_v14, %v3022_v17 }
 0x41d   :  { %v3030_v30 = vor.u32 %v3029_v44, %v3028_v21  ;;  %vm3031_vm5 = vcmp.lt.s32.totalorder %v9314_v61, 1  ;;  %vm3034_vm14 = vcmp.lt.s32.totalorder %v9314_v61, 4  ;;  %vm4234_vm6 = vcmp.eq.s32.totalorder %v4229_v12, 2 }
 0x41e   :  { %v4218_v32 = vadd.f32 1.0, %v4217_v8  ;;  %v4225_v13 = vadd.f32 1.0, %v4224_v53  ;;  %v3876_v28 = vsub.s32 %v3872_v43, %v3875_v52  ;;  %v3039_v35 = vsel %vm3031_vm5, %v9332_v63, %v9334_v39 }
 0x41f   :  { %v3040_v43 = vsel %vm3034_vm14, %v3027_v38, 920167782  ;;  %v9349_v50 = vshll.u32 %v3007_v51, 8  ;;  %vm3033_vm2 = vcmp.lt.s32.totalorder %v9314_v61, 3  ;;  %vm3032_vm3 = vcmp.lt.s32.totalorder %v9314_v61, 2 }
 0x420   :  { %v4226_v37 = vmul.f32 %v4225_v13, %v4210_v31  ;;  %v4235_v34 = vxor.u32 2147483648, %v4218_v32  ;;  %vm3877_vm1 = vcmp.lt.s32.totalorder %v3876_v28, 0  ;;  %v3878_v16 = vsub.s32 0, %v3876_v28 }
 0x421   :  { %v943_v31 = vmul.f32 %v911_v36, %v7026_v49  ;;  %v3041_v40 = vsel %vm3033_vm2, %v9339_v5, %v3040_v43  ;;  %v3043_v22 = vsel %vm3031_vm5, %v9334_v39, %v9339_v5  ;;  %v3044_v45 = vsel %vm3034_vm14, %v3030_v30, 1326507024 }
 0x422   :  { %v4232_v57 = vxor.u32 2147483648, %v4226_v37  ;;  %v3879_v33 = vsel %vm3877_vm1, %v3878_v16, %v3876_v28  ;;  %v4236_v2 = vsel %vm4234_vm6, %v4235_v34, %v4226_v37  ;;  %v3042_v51 = vsel %vm3032_vm3, %v3039_v35, %v3041_v40 }
 0x423   :  { %v3880_v54 = vclz %v3879_v33  ;;  %vm4227_vm13 = vweird.f32 %v8985_v41  ;;  %v3048_v17 = vand.u32 65535, %v9349_v50  ;;  %v3045_v23 = vsel %vm3033_vm2, %v3027_v38, %v3044_v45 }
 0x424   :  { %v4233_v0 = vsel %vm4231_vm15, %v4218_v32, %v4232_v57  ;;  %v3072_v8 = vand.u32 65535, %v3042_v51  ;;  %v9372_v53 = vadd.f32 %v943_v31, %v7039_v4  ;;  %v3046_v41 = vsel %vm3032_vm3, %v3043_v22, %v3045_v23 }
 0x425   :  { %v4237_v62 = vsel %vm4230_vm4, %v4233_v0, %v4236_v2  ;;  %v6071_v1 = vadd.s32 4294967294, %v3880_v54  ;;  %v3073_v12 = vshrl.u32 %v3042_v51, 16  ;;  %v3049_v38 = vshrl.u32 %v9349_v50, 16 }
 0x426   :  { %v4238_v14 = vsel %vm4227_vm13, nan, %v4237_v62  ;;  %v3050_v44 = vand.u32 65535, %v3046_v41  ;;  %v3051_v32 = vshrl.u32 %v3046_v41, 16  ;;  %v3868_v13 = vadd.s32 %v9291_v42, %v9284_v7 }
 0x427   :  { %v5967_v52 = vsel %vm5944_vm9, %v8925_v47, %v4238_v14  ;;  %vm6072_vm8 = vcmp.lt.s32.totalorder %v6071_v1, 0  ;;  %v3075_v30 = vmul.u32 %v3073_v12, %v3048_v17  ;;  %vm3776_vm11 = vcmp.lt.s32.totalorder %v9114_v20, 0 }
 0x428   :  { %6000 = vst.msk [vmem:[%s11096_s1 + $0xa0] sm:$0xff] %vm5979_vm12, %v5967_v52  ;;  %v3883_v21 = vsel %vm6072_vm8, 0, %v6071_v1  ;;  %v3015_v37 = vshrl.u32 %v11268_v60, %v9303_v48  ;;  %v3053_v34 = vmul.u32 %v3051_v32, %v3048_v17  ;;  %v3054_v16 = vmul.u32 %v3050_v44, %v3049_v38 }
 0x429   :  { %v3884_v36 = vsub.s32 32, %v3883_v21  ;;  %v3888_v47 = vsub.s32 4294967266, %v3883_v21  ;;  %v4552_v35 = vand.u32 2139095040, %v9372_v53  ;;  %v3885_v43 = vshll.u32 %v3876_v28, %v3883_v21 }
 0x42a   :  { %v3076_v31 = vmul.u32 %v3072_v8, %v3049_v38  ;;  %v3898_v2 = vsub.s32 4, %v9322_v25  ;;  %v3052_v54 = vmul.u32 %v3050_v44, %v3048_v17  ;;  %v3056_v7 = vshll.u32 %v3053_v34, 16 }
 0x42b   :  { %v3886_v57 = vshrl.u32 %v3868_v13, %v3884_v36  ;;  %v3889_v33 = vadd.s32 127, %v3888_v47  ;;  %v3074_v42 = vmul.u32 %v3072_v8, %v3048_v17  ;;  %v3055_v51 = vmul.u32 %v3051_v32, %v3049_v38 }
 0x42c   :  { %v3078_v22 = vshll.u32 %v3075_v30, 16  ;;  %vm9393_vm7 = vcmp.le.f32.partialorder %v3774_v3, 0.7853982  ;;  %v3058_v45 = vshll.u32 %v3054_v16, 16  ;;  %vm3060_vm15 = vc.u32 %v3052_v54, %v3056_v7 }
 0x42d   :  { %v3887_v40 = vor.u32 %v3886_v57, %v3885_v43  ;;  %v3890_v0 = vshll.u32 %v3889_v33, 23  ;;  %v3062_v28 = vadd.s32 %v3056_v7, %v3052_v54  ;;  %v3077_v62 = vmul.u32 %v3073_v12, %v3049_v38 }
 0x42e   :  { %v3061_v14 = vsel %vm3060_vm15, 1, %v11271_v9  ;;  %v3080_v23 = vshll.u32 %v3076_v31, 16  ;;  %vm3082_vm4 = vc.u32 %v3074_v42, %v3078_v22  ;;  %v3084_v52 = vadd.s32 %v3078_v22, %v3074_v42 }
 0x42f   :  { %v3891_v1 = vor.u32 4788187, %v3890_v0  ;;  %v3063_v17 = vadd.s32 %v3061_v14, %v3055_v51  ;;  %vm3064_vm1 = vc.u32 %v3062_v28, %v3058_v45  ;;  %v3083_v8 = vsel %vm3082_vm4, 1, %v11271_v9 }
 0x430   :  { %v3894_v21 = vcvt.s32.f32 %v3887_v40  ;;  %v3065_v3 = vsel %vm3064_vm1, 1, %v11271_v9  ;;  %v3085_v44 = vadd.s32 %v3083_v8, %v3077_v62  ;;  %v3036_v32 = vsel %vm3034_vm14, %v9339_v5, 2102212464  ;;  %v814_v8 = vpop.permute.xlu0 %813 }
 0x431   :  { %v3892_v41 = vand.u32 2147483647, %v3891_v1  ;;  %v3057_v12 = vshrl.u32 %v3053_v34, 16  ;;  %v3067_v38 = vadd.s32 %v3065_v3, %v3063_v17  ;;  %vm3086_vm6 = vc.u32 %v3084_v52, %v3080_v23 }
 0x432   :  { %v3899_v36 = vsel %vm3776_vm11, %v3898_v2, %v9322_v25  ;;  %v3087_v47 = vsel %vm3086_vm6, 1, %v11271_v9  ;;  %v4553_v43 = vshrl.u32 %v4552_v35, 23  ;;  %v3059_v57 = vshrl.u32 %v3054_v16, 16 }
 0x433   :  { %v3895_v13 = vmul.f32 %v3894_v21, %v3892_v41  ;;  %v3068_v33 = vadd.s32 %v3067_v38, %v3057_v12  ;;  %v3079_v54 = vshrl.u32 %v3075_v30, 16  ;;  %v3089_v7 = vadd.s32 %v3087_v47, %v3085_v44  ;;  %v11364_v12 = vld [vmem:[#allocation33_spill] sm:$0xff] }
 0x434   :  { %v3035_v5 = vsel %vm3031_vm5, %v3015_v37, %v9332_v63  ;;  %v3037_v34 = vsel %vm3033_vm2, %v9334_v39, %v3036_v32  ;;  %v6085_v40 = vadd.s32 4294967169, %v4553_v43  ;;  %v3081_v25 = vshrl.u32 %v3076_v31, 16  ;;  %v11363_v32 = vld [vmem:[#allocation46_spill] sm:$0xff] }
 0x435   :  { %v3896_v42 = vxor.u32 2147483648, %v3895_v13  ;;  %v9413_v0 = vadd.s32 %v3068_v33, %v3059_v57  ;;  %v3090_v2 = vadd.s32 %v3089_v7, %v3079_v54  ;;  %v4549_v35 = vand.u32 2147483647, %v9372_v53 }
 0x436   :  { %v3901_v16 = vsel %vm9393_vm7, 0, %v3899_v36  ;;  %v9420_v51 = vadd.s32 %v3084_v52, %v3080_v23  ;;  %v4559_v63 = vadd.s32 1, %v6085_v40  ;;  %v3038_v37 = vsel %vm3032_vm3, %v3035_v5, %v3037_v34 }
 0x437   :  { %v3897_v30 = vsel %vm3776_vm11, %v3896_v42, %v3895_v13  ;;  %v3091_v31 = vadd.s32 %v3090_v2, %v3081_v25  ;;  %v3918_v45 = vadd.s32 3, %v3901_v16  ;;  %v4556_v62 = vand.u32 8388607, %v4549_v35 }
 0x438   :  { %v3900_v39 = vsel %vm9393_vm7, %v9114_v20, %v3897_v30  ;;  %vm3094_vm5 = vc.u32 %v9413_v0, %v9420_v51  ;;  %vm4560_vm14 = vcmp.gt.s32.totalorder %v4559_v63, 0  ;;  %v3092_v48 = vmul.u32 %v9349_v50, %v3038_v37 }
 0x439   :  { %v3902_v22 = vmul.f32 %v3900_v39, %v3900_v39  ;;  %v3095_v28 = vadd.s32 1, %v3091_v31  ;;  %v4561_v1 = vsel %vm4560_vm14, %v4559_v63, 0  ;;  %v3919_v44 = vand.u32 3, %v3918_v45 }
 0x43a   :  { %v4563_v17 = vand.u32 31, %v4561_v1  ;;  %v11365_v38 = vsel %vm6681_vm10, %v11363_v32, %v11364_v12  ;;  %v4557_v43 = vor.u32 8388608, %v4556_v62  ;;  %v9443_v57 = vshrl.u32 %v4561_v1, 5 }
 0x43b   :  { %v3903_v14 = vmul.f32 -0.001358992, %v3902_v22  ;;  %v3910_v23 = vmul.f32 -0.00019511016, %v3902_v22  ;;  %v3096_v61 = vsel %vm3094_vm5, %v3095_v28, %v3091_v31  ;;  %v9441_v13 = vsel %vm7006_vm0, %v814_v8, %v11365_v38 }
 0x43c   :  { %v3097_v21 = vadd.s32 %v3096_v61, %v3092_v48  ;;  %v9432_v3 = vsub.s32 32, %v4563_v17  ;;  %v4566_v40 = vshll.u32 %v11268_v60, %v4563_v17  ;;  %vm3921_vm2 = vcmp.eq.s32.totalorder %v3919_v44, 0 }
 0x43d   :  { %v3904_v52 = vadd.f32 0.041655596, %v3903_v14  ;;  %v3911_v41 = vadd.f32 0.008332121, %v3910_v23  ;;  %v4569_v25 = vshll.u32 %v11272_v58, %v4563_v17  ;;  %v4572_v2 = vshll.u32 %v11273_v46, %v4563_v17 }
 0x43e   :  { %v3098_v47 = vadd.s32 536870912, %v3097_v21  ;;  %v4567_v33 = vshrl.u32 %v11272_v58, %v9432_v3  ;;  %v4570_v54 = vshrl.u32 %v11273_v46, %v9432_v3  ;;  %v4576_v7 = vshrl.u32 %v11275_v59, %v9432_v3 }
 0x43f   :  { %v3905_v36 = vmul.f32 %v3904_v52, %v3902_v22  ;;  %v3912_v50 = vmul.f32 %v3911_v41, %v3902_v22  ;;  %v4573_v30 = vshrl.u32 %v11274_v55, %v9432_v3  ;;  %v4575_v16 = vshll.u32 %v11274_v55, %v4563_v17 }
 0x440   :  { %v9451_v34 = vshrl.u32 %v3098_v47, 30  ;;  %vm3920_vm3 = vcmp.lt.s32.totalorder %v3919_v44, 2  ;;  %v4578_v45 = vshll.u32 %v11275_v59, %v4563_v17  ;;  %v9461_v28 = vor.u32 %v4567_v33, %v4566_v40 }
 0x441   :  { %v3906_v42 = vadd.f32 -0.4999988, %v3905_v36  ;;  %v3913_v5 = vadd.f32 -0.16666654, %v3912_v50  ;;  %v9463_v62 = vor.u32 %v4570_v54, %v4569_v25  ;;  %v4577_v1 = vor.u32 %v4576_v7, %v4575_v16 }
 0x442   :  { %v3100_v31 = vshll.u32 %v9451_v34, 30  ;;  %v4579_v14 = vshrl.u32 %v11276_v29, %v9432_v3  ;;  %v909_v61 = vmul.f32 6.2831855, %v9441_v13  ;;  %v9468_v52 = vor.u32 %v4573_v30, %v4572_v2 }
 0x443   :  { %v3907_v63 = vmul.f32 %v3906_v42, %v3902_v22  ;;  %v3914_v37 = vmul.f32 %v3913_v5, %v3902_v22  ;;  %vm4581_vm13 = vcmp.lt.s32.totalorder %v9443_v57, 1  ;;  %vm4584_vm8 = vcmp.lt.s32.totalorder %v9443_v57, 4 }
 0x444   :  { %v3101_v8 = vsub.s32 %v3097_v21, %v3100_v31  ;;  %v4580_v22 = vor.u32 %v4579_v14, %v4578_v45  ;;  %vm3924_vm7 = vcmp.eq.s32.totalorder %v3919_v44, 2  ;;  %v4589_v12 = vsel %vm4581_vm13, %v9461_v28, %v9463_v62 }
 0x445   :  { %v3908_v23 = vadd.f32 1.0, %v3907_v63  ;;  %v3915_v48 = vadd.f32 1.0, %v3914_v37  ;;  %v4590_v21 = vsel %vm4584_vm8, %v4577_v1, 920167782  ;;  %v9478_v38 = vshll.u32 %v4557_v43, 8 }
 0x446   :  { %vm3102_vm11 = vcmp.lt.s32.totalorder %v3101_v8, 0  ;;  %v3103_v32 = vsub.s32 0, %v3101_v8  ;;  %vm4583_vm15 = vcmp.lt.s32.totalorder %v9443_v57, 3  ;;  %vm4582_vm4 = vcmp.lt.s32.totalorder %v9443_v57, 2 }
 0x447   :  { %v3916_v17 = vmul.f32 %v3915_v48, %v3900_v39  ;;  %v3925_v41 = vxor.u32 2147483648, %v3908_v23  ;;  %v941_v39 = vmul.f32 %v909_v61, %v7026_v49  ;;  %v4591_v54 = vsel %vm4583_vm15, %v9468_v52, %v4590_v21 }
 0x448   :  { %v3104_v50 = vsel %vm3102_vm11, %v3103_v32, %v3101_v8  ;;  %v4592_v43 = vsel %vm4582_vm4, %v4589_v12, %v4591_v54  ;;  %v4593_v42 = vsel %vm4581_vm13, %v9463_v62, %v9468_v52  ;;  %v4594_v5 = vsel %vm4584_vm8, %v4580_v22, 1326507024 }
 0x449   :  { %v3922_v36 = vxor.u32 2147483648, %v3916_v17  ;;  %v3926_v47 = vsel %vm3924_vm7, %v3925_v41, %v3916_v17  ;;  %v3105_v33 = vclz %v3104_v50  ;;  %vm3917_vm1 = vweird.f32 %v9114_v20 }
 0x44a   :  { %v4598_v2 = vand.u32 65535, %v9478_v38  ;;  %v4595_v16 = vsel %vm4583_vm15, %v4577_v1, %v4594_v5  ;;  %v4622_v63 = vand.u32 65535, %v4592_v43  ;;  %v9501_v37 = vadd.f32 %v941_v39, %v7039_v4 }
 0x44b   :  { %v3923_v7 = vsel %vm3921_vm2, %v3908_v23, %v3922_v36  ;;  %v6056_v25 = vadd.s32 4294967294, %v3105_v33  ;;  %v4596_v20 = vsel %vm4582_vm4, %v4593_v42, %v4595_v16  ;;  %v4623_v44 = vshrl.u32 %v4592_v43, 16 }
 0x44c   :  { %v3927_v40 = vsel %vm3920_vm3, %v3923_v7, %v3926_v47  ;;  %v4599_v1 = vshrl.u32 %v9478_v38, 16  ;;  %v4600_v14 = vand.u32 65535, %v4596_v20  ;;  %v4601_v23 = vshrl.u32 %v4596_v20, 16 }
 0x44d   :  { %v3928_v30 = vsel %vm3917_vm1, nan, %v3927_v40  ;;  %vm6057_vm6 = vcmp.lt.s32.totalorder %v6056_v25, 0  ;;  %v3093_v48 = vadd.s32 %v9420_v51, %v9413_v0  ;;  %v4625_v22 = vmul.u32 %v4623_v44, %v4598_v2 }
 0x44e   :  { %v5965_v31 = vsel %vm5944_vm9, %v9054_v26, %v3928_v30  ;;  %v3108_v45 = vsel %vm6057_vm6, 0, %v6056_v25  ;;  %vm3001_vm5 = vcmp.lt.s32.totalorder %v9243_v27, 0  ;;  %v4565_v17 = vshrl.u32 %v11268_v60, %v9432_v3 }
 0x44f   :  { %5998 = vst.msk [vmem:[%s11096_s1 + $0x90] sm:$0xff] %vm5979_vm12, %v5965_v31  ;;  %v3109_v61 = vsub.s32 32, %v3108_v45  ;;  %v3113_v26 = vsub.s32 4294967266, %v3108_v45  ;;  %v4603_v41 = vmul.u32 %v4601_v23, %v4598_v2  ;;  %v4604_v32 = vmul.u32 %v4600_v14, %v4599_v1 }
 0x450   :  { %v4242_v12 = vand.u32 2139095040, %v9501_v37  ;;  %v3110_v21 = vshll.u32 %v3101_v8, %v3108_v45  ;;  %v4626_v39 = vmul.u32 %v4622_v63, %v4599_v1  ;;  %v3123_v47 = vsub.s32 4, %v9451_v34 }
 0x451   :  { %v3111_v36 = vshrl.u32 %v3093_v48, %v3109_v61  ;;  %v3114_v50 = vadd.s32 127, %v3113_v26  ;;  %v4602_v33 = vmul.u32 %v4600_v14, %v4598_v2  ;;  %v4606_v0 = vshll.u32 %v4603_v41, 16 }
 0x452   :  { %v4624_v51 = vmul.u32 %v4622_v63, %v4598_v2  ;;  %v4605_v43 = vmul.u32 %v4601_v23, %v4599_v1  ;;  %v4628_v42 = vshll.u32 %v4625_v22, 16  ;;  %vm9522_vm14 = vcmp.le.f32.partialorder %v2999_v10, 0.7853982 }
 0x453   :  { %v3112_v54 = vor.u32 %v3111_v36, %v3110_v21  ;;  %v3115_v7 = vshll.u32 %v3114_v50, 23  ;;  %v4608_v5 = vshll.u32 %v4604_v32, 16  ;;  %vm4610_vm2 = vc.u32 %v4602_v33, %v4606_v0 }
 0x454   :  { %v4612_v8 = vadd.s32 %v4606_v0, %v4602_v33  ;;  %v4627_v40 = vmul.u32 %v4623_v44, %v4599_v1  ;;  %v4611_v30 = vsel %vm4610_vm2, 1, %v11271_v9  ;;  %v4630_v16 = vshll.u32 %v4626_v39, 16 }
 0x455   :  { %v3116_v25 = vor.u32 4788187, %v3115_v7  ;;  %vm4632_vm3 = vc.u32 %v4624_v51, %v4628_v42  ;;  %v4613_v2 = vadd.s32 %v4611_v30, %v4605_v43  ;;  %v4634_v31 = vadd.s32 %v4628_v42, %v4624_v51 }
 0x456   :  { %vm4614_vm11 = vc.u32 %v4612_v8, %v4608_v5  ;;  %v4633_v63 = vsel %vm4632_vm3, 1, %v11271_v9  ;;  %v3119_v45 = vcvt.s32.f32 %v3112_v54  ;;  %v4586_v23 = vsel %vm4584_vm8, %v9468_v52, 2102212464 }
 0x457   :  { %v3117_v20 = vand.u32 2147483647, %v3116_v25  ;;  %v4615_v10 = vsel %vm4614_vm11, 1, %v11271_v9  ;;  %v4635_v14 = vadd.s32 %v4633_v63, %v4627_v40  ;;  %v4607_v44 = vshrl.u32 %v4603_v41, 16  ;;  %v794_v63 = vpop.permute.xlu1 %793 }
 0x458   :  { %v4617_v1 = vadd.s32 %v4615_v10, %v4613_v2  ;;  %vm4636_vm7 = vc.u32 %v4634_v31, %v4630_v16  ;;  %v3124_v61 = vsel %vm3001_vm5, %v3123_v47, %v9451_v34  ;;  %v4243_v21 = vshrl.u32 %v4242_v12, 23 }
 0x459   :  { %v3120_v48 = vmul.f32 %v3119_v45, %v3117_v20  ;;  %v4637_v26 = vsel %vm4636_vm7, 1, %v11271_v9  ;;  %v4609_v36 = vshrl.u32 %v4604_v32, 16  ;;  %v4629_v33 = vshrl.u32 %v4625_v22, 16 }
 0x45a   :  { %v4618_v50 = vadd.s32 %v4617_v1, %v4607_v44  ;;  %v4639_v0 = vadd.s32 %v4637_v26, %v4635_v14  ;;  %v4585_v52 = vsel %vm4581_vm13, %v4565_v17, %v9461_v28  ;;  %v4587_v41 = vsel %vm4583_vm15, %v9463_v62, %v4586_v23  ;;  %v11368_v23 = vld [vmem:[#allocation44_spill] sm:$0xff] }
 0x45b   :  { %v3121_v51 = vxor.u32 2147483648, %v3120_v48  ;;  %v6079_v54 = vadd.s32 4294967169, %v4243_v21  ;;  %v4631_v34 = vshrl.u32 %v4626_v39, 16  ;;  %v4239_v12 = vand.u32 2147483647, %v9501_v37  ;;  %v11369_v44 = vld [vmem:[#allocation28_spill] sm:$0xff] }
 0x45c   :  { %v9542_v7 = vadd.s32 %v4618_v50, %v4609_v36  ;;  %v4640_v47 = vadd.s32 %v4639_v0, %v4629_v33  ;;  %v3126_v32 = vsel %vm9522_vm14, 0, %v3124_v61  ;;  %v9549_v43 = vadd.s32 %v4634_v31, %v4630_v16 }
 0x45d   :  { %v3122_v22 = vsel %vm3001_vm5, %v3121_v51, %v3120_v48  ;;  %v4249_v28 = vadd.s32 1, %v6079_v54  ;;  %v4588_v17 = vsel %vm4582_vm4, %v4585_v52, %v4587_v41  ;;  %v3143_v5 = vadd.s32 3, %v3126_v32 }
 0x45e   :  { %v3125_v62 = vsel %vm9522_vm14, %v9243_v27, %v3122_v22  ;;  %v4641_v39 = vadd.s32 %v4640_v47, %v4631_v34  ;;  %vm4644_vm13 = vc.u32 %v9542_v7, %v9549_v43  ;;  %v4246_v40 = vand.u32 8388607, %v4239_v12 }
 0x45f   :  { %v3127_v42 = vmul.f32 %v3125_v62, %v3125_v62  ;;  %vm4250_vm8 = vcmp.gt.s32.totalorder %v4249_v28, 0  ;;  %v4642_v3 = vmul.u32 %v9478_v38, %v4588_v17  ;;  %v3144_v14 = vand.u32 3, %v3143_v5 }
 0x460   :  { %v4645_v8 = vadd.s32 1, %v4641_v39  ;;  %v4251_v25 = vsel %vm4250_vm8, %v4249_v28, 0  ;;  %v11370_v1 = vsel %vm6681_vm10, %v11368_v23, %v11369_v44  ;;  %v4247_v21 = vor.u32 8388608, %v4246_v40 }
 0x461   :  { %v3128_v30 = vmul.f32 -0.001358992, %v3127_v42  ;;  %v3135_v16 = vmul.f32 -0.00019511016, %v3127_v42  ;;  %v4253_v2 = vand.u32 31, %v4251_v25  ;;  %v9570_v48 = vsel %vm7006_vm0, %v794_v63, %v11370_v1 }
 0x462   :  { %v4646_v57 = vsel %vm4644_vm13, %v4645_v8, %v4641_v39  ;;  %v9572_v36 = vshrl.u32 %v4251_v25, 5  ;;  %vm3146_vm15 = vcmp.eq.s32.totalorder %v3144_v14, 0  ;;  %vm3145_vm4 = vcmp.lt.s32.totalorder %v3144_v14, 2 }
 0x463   :  { %v3129_v31 = vadd.f32 0.041655596, %v3128_v30  ;;  %v3136_v20 = vadd.f32 0.008332121, %v3135_v16  ;;  %v4647_v45 = vadd.s32 %v4646_v57, %v4642_v3  ;;  %v9561_v10 = vsub.s32 32, %v4253_v2 }
 0x464   :  { %v4256_v54 = vshll.u32 %v11268_v60, %v4253_v2  ;;  %v4259_v34 = vshll.u32 %v11272_v58, %v4253_v2  ;;  %v4262_v47 = vshll.u32 %v11273_v46, %v4253_v2  ;;  %v4265_v32 = vshll.u32 %v11274_v55, %v4253_v2 }
 0x465   :  { %v3130_v61 = vmul.f32 %v3129_v31, %v3127_v42  ;;  %v3137_v38 = vmul.f32 %v3136_v20, %v3127_v42  ;;  %v4648_v26 = vadd.s32 536870912, %v4647_v45  ;;  %v4257_v50 = vshrl.u32 %v11272_v58, %v9561_v10 }
 0x466   :  { %v4260_v33 = vshrl.u32 %v11273_v46, %v9561_v10  ;;  %v4266_v0 = vshrl.u32 %v11275_v59, %v9561_v10  ;;  %v4263_v22 = vshrl.u32 %v11274_v55, %v9561_v10  ;;  %v4268_v5 = vshll.u32 %v11275_v59, %v4253_v2 }
 0x467   :  { %v3131_v51 = vadd.f32 -0.4999988, %v3130_v61  ;;  %v3138_v52 = vadd.f32 -0.16666654, %v3137_v38  ;;  %v9580_v41 = vshrl.u32 %v4648_v26, 30  ;;  %v9590_v8 = vor.u32 %v4257_v50, %v4256_v54 }
 0x468   :  { %v9592_v40 = vor.u32 %v4260_v33, %v4259_v34  ;;  %v4267_v25 = vor.u32 %v4266_v0, %v4265_v32  ;;  %v4269_v30 = vshrl.u32 %v11276_v29, %v9561_v10  ;;  %v904_v57 = vmul.f32 6.2831855, %v9570_v48 }
 0x469   :  { %v3132_v28 = vmul.f32 %v3131_v51, %v3127_v42  ;;  %v3139_v17 = vmul.f32 %v3138_v52, %v3127_v42  ;;  %v4650_v39 = vshll.u32 %v9580_v41, 30  ;;  %v9597_v31 = vor.u32 %v4263_v22, %v4262_v47 }
 0x46a   :  { %v4270_v42 = vor.u32 %v4269_v30, %v4268_v5  ;;  %vm4271_vm1 = vcmp.lt.s32.totalorder %v9572_v36, 1  ;;  %vm4274_vm6 = vcmp.lt.s32.totalorder %v9572_v36, 4  ;;  %vm3149_vm14 = vcmp.eq.s32.totalorder %v3144_v14, 2 }
 0x46b   :  { %v3133_v16 = vadd.f32 1.0, %v3132_v28  ;;  %v3140_v3 = vadd.f32 1.0, %v3139_v17  ;;  %v4651_v63 = vsub.s32 %v4647_v45, %v4650_v39  ;;  %v4279_v44 = vsel %vm4271_vm1, %v9590_v8, %v9592_v40 }
 0x46c   :  { %v4280_v45 = vsel %vm4274_vm6, %v4267_v25, 920167782  ;;  %v9607_v1 = vshll.u32 %v4247_v21, 8  ;;  %vm4273_vm2 = vcmp.lt.s32.totalorder %v9572_v36, 3  ;;  %vm4272_vm3 = vcmp.lt.s32.totalorder %v9572_v36, 2 }
 0x46d   :  { %v3141_v2 = vmul.f32 %v3140_v3, %v3125_v62  ;;  %v3150_v20 = vxor.u32 2147483648, %v3133_v16  ;;  %vm4652_vm5 = vcmp.lt.s32.totalorder %v4651_v63, 0  ;;  %v4653_v23 = vsub.s32 0, %v4651_v63 }
 0x46e   :  { %v936_v62 = vmul.f32 %v904_v57, %v7026_v49  ;;  %v4281_v33 = vsel %vm4273_vm2, %v9597_v31, %v4280_v45  ;;  %v4283_v51 = vsel %vm4271_vm1, %v9592_v40, %v9597_v31  ;;  %v4284_v52 = vsel %vm4274_vm6, %v4270_v42, 1326507024 }
 0x46f   :  { %v3147_v61 = vxor.u32 2147483648, %v3141_v2  ;;  %v4654_v38 = vsel %vm4652_vm5, %v4653_v23, %v4651_v63  ;;  %v3151_v26 = vsel %vm3149_vm14, %v3150_v20, %v3141_v2  ;;  %v4282_v21 = vsel %vm4272_vm3, %v4279_v44, %v4281_v33 }
 0x470   :  { %v4655_v50 = vclz %v4654_v38  ;;  %vm3142_vm11 = vweird.f32 %v9243_v27  ;;  %v4288_v47 = vand.u32 65535, %v9607_v1  ;;  %v4285_v32 = vsel %vm4273_vm2, %v4267_v25, %v4284_v52 }
 0x471   :  { %v3148_v0 = vsel %vm3146_vm15, %v3133_v16, %v3147_v61  ;;  %v4312_v28 = vand.u32 65535, %v4282_v21  ;;  %v9630_v17 = vadd.f32 %v936_v62, %v7039_v4  ;;  %v4286_v27 = vsel %vm4272_vm3, %v4283_v51, %v4285_v32 }
 0x472   :  { %v3152_v54 = vsel %vm3145_vm4, %v3148_v0, %v3151_v26  ;;  %v6086_v34 = vadd.s32 4294967294, %v4655_v50  ;;  %v4313_v14 = vshrl.u32 %v4282_v21, 16  ;;  %v4289_v25 = vshrl.u32 %v9607_v1, 16 }
 0x473   :  { %v3153_v22 = vsel %vm3142_vm11, nan, %v3152_v54  ;;  %v4290_v30 = vand.u32 65535, %v4286_v27  ;;  %v4291_v16 = vshrl.u32 %v4286_v27, 16  ;;  %v4643_v3 = vadd.s32 %v9549_v43, %v9542_v7 }
 0x474   :  { %v5960_v39 = vsel %vm5944_vm9, %v9183_v11, %v3153_v22  ;;  %vm6087_vm7 = vcmp.lt.s32.totalorder %v6086_v34, 0  ;;  %v4315_v42 = vmul.u32 %v4313_v14, %v4288_v47  ;;  %vm4551_vm13 = vcmp.lt.s32.totalorder %v9372_v53, 0 }
 0x475   :  { %5993 = vst.msk [vmem:[%s11096_s1 + $0x68] sm:$0xff] %vm5979_vm12, %v5960_v39  ;;  %v4658_v5 = vsel %vm6087_vm7, 0, %v6086_v34  ;;  %v4255_v2 = vshrl.u32 %v11268_v60, %v9561_v10  ;;  %v4293_v20 = vmul.u32 %v4291_v16, %v4288_v47  ;;  %v4294_v23 = vmul.u32 %v4290_v30, %v4289_v25 }
 0x476   :  { %v4659_v57 = vsub.s32 32, %v4658_v5  ;;  %v4663_v11 = vsub.s32 4294967266, %v4658_v5  ;;  %v3467_v44 = vand.u32 2139095040, %v9630_v17  ;;  %v4660_v45 = vshll.u32 %v4651_v63, %v4658_v5 }
 0x477   :  { %v4316_v62 = vmul.u32 %v4312_v28, %v4289_v25  ;;  %v4673_v26 = vsub.s32 4, %v9580_v41  ;;  %v4292_v50 = vmul.u32 %v4290_v30, %v4288_v47  ;;  %v4296_v7 = vshll.u32 %v4293_v20, 16 }
 0x478   :  { %v4661_v61 = vshrl.u32 %v4643_v3, %v4659_v57  ;;  %v4664_v38 = vadd.s32 127, %v4663_v11  ;;  %v4314_v43 = vmul.u32 %v4312_v28, %v4288_v47  ;;  %v4295_v21 = vmul.u32 %v4291_v16, %v4289_v25 }
 0x479   :  { %v4318_v51 = vshll.u32 %v4315_v42, 16  ;;  %vm9651_vm8 = vcmp.le.f32.partialorder %v4549_v35, 0.7853982  ;;  %v4298_v52 = vshll.u32 %v4294_v23, 16  ;;  %vm4300_vm15 = vc.u32 %v4292_v50, %v4296_v7 }
 0x47a   :  { %v4662_v33 = vor.u32 %v4661_v61, %v4660_v45  ;;  %v4665_v0 = vshll.u32 %v4664_v38, 23  ;;  %v4302_v63 = vadd.s32 %v4296_v7, %v4292_v50  ;;  %v4317_v54 = vmul.u32 %v4313_v14, %v4289_v25 }
 0x47b   :  { %v4301_v22 = vsel %vm4300_vm15, 1, %v11271_v9  ;;  %v4320_v32 = vshll.u32 %v4316_v62, 16  ;;  %vm4322_vm4 = vc.u32 %v4314_v43, %v4318_v51  ;;  %v4324_v39 = vadd.s32 %v4318_v51, %v4314_v43 }
 0x47c   :  { %v4666_v34 = vor.u32 4788187, %v4665_v0  ;;  %v4303_v47 = vadd.s32 %v4301_v22, %v4295_v21  ;;  %vm4304_vm5 = vc.u32 %v4302_v63, %v4298_v52  ;;  %v4323_v28 = vsel %vm4322_vm4, 1, %v11271_v9 }
 0x47d   :  { %v4669_v5 = vcvt.s32.f32 %v4662_v33  ;;  %v4305_v35 = vsel %vm4304_vm5, 1, %v11271_v9  ;;  %v4325_v30 = vadd.s32 %v4323_v28, %v4317_v54  ;;  %v4276_v16 = vsel %vm4274_vm6, %v9597_v31, 2102212464  ;;  %v834_v28 = vpop.permute.xlu2 %833 }
 0x47e   :  { %v4667_v27 = vand.u32 2147483647, %v4666_v34  ;;  %v4297_v14 = vshrl.u32 %v4293_v20, 16  ;;  %v4307_v25 = vadd.s32 %v4305_v35, %v4303_v47  ;;  %vm4326_vm14 = vc.u32 %v4324_v39, %v4320_v32 }
 0x47f   :  { %v4674_v57 = vsel %vm4551_vm13, %v4673_v26, %v9580_v41  ;;  %v4327_v11 = vsel %vm4326_vm14, 1, %v11271_v9  ;;  %v3468_v45 = vshrl.u32 %v3467_v44, 23  ;;  %v4299_v61 = vshrl.u32 %v4294_v23, 16 }
 0x480   :  { %v4670_v3 = vmul.f32 %v4669_v5, %v4667_v27  ;;  %v4308_v38 = vadd.s32 %v4307_v25, %v4297_v14  ;;  %v4319_v50 = vshrl.u32 %v4315_v42, 16  ;;  %v4329_v7 = vadd.s32 %v4327_v11, %v4325_v30  ;;  %v11374_v14 = vld [vmem:[#allocation29_spill] sm:$0xff] }
 0x481   :  { %v4275_v31 = vsel %vm4271_vm1, %v4255_v2, %v9590_v8  ;;  %v4277_v20 = vsel %vm4273_vm2, %v9592_v40, %v4276_v16  ;;  %v6064_v33 = vadd.s32 4294967169, %v3468_v45  ;;  %v4321_v41 = vshrl.u32 %v4316_v62, 16  ;;  %v11373_v16 = vld [vmem:[#allocation45_spill] sm:$0xff] }
 0x482   :  { %v4671_v43 = vxor.u32 2147483648, %v4670_v3  ;;  %v9671_v0 = vadd.s32 %v4308_v38, %v4299_v61  ;;  %v4330_v26 = vadd.s32 %v4329_v7, %v4319_v50  ;;  %v3464_v44 = vand.u32 2147483647, %v9630_v17 }
 0x483   :  { %v4676_v23 = vsel %vm9651_vm8, 0, %v4674_v57  ;;  %v9678_v21 = vadd.s32 %v4324_v39, %v4320_v32  ;;  %v3474_v8 = vadd.s32 1, %v6064_v33  ;;  %v4278_v2 = vsel %vm4272_vm3, %v4275_v31, %v4277_v20 }
 0x484   :  { %v4672_v42 = vsel %vm4551_vm13, %v4671_v43, %v4670_v3  ;;  %v4331_v62 = vadd.s32 %v4330_v26, %v4321_v41  ;;  %v4693_v52 = vadd.s32 3, %v4676_v23  ;;  %v3471_v54 = vand.u32 8388607, %v3464_v44 }
 0x485   :  { %v4675_v40 = vsel %vm9651_vm8, %v9372_v53, %v4672_v42  ;;  %vm4334_vm1 = vc.u32 %v9671_v0, %v9678_v21  ;;  %vm3475_vm6 = vcmp.gt.s32.totalorder %v3474_v8, 0  ;;  %v4332_v10 = vmul.u32 %v9607_v1, %v4278_v2 }
 0x486   :  { %v4677_v51 = vmul.f32 %v4675_v40, %v4675_v40  ;;  %v4335_v63 = vadd.s32 1, %v4331_v62  ;;  %v3476_v34 = vsel %vm3475_vm6, %v3474_v8, 0  ;;  %v4694_v30 = vand.u32 3, %v4693_v52 }
 0x487   :  { %v3478_v47 = vand.u32 31, %v3476_v34  ;;  %v11375_v25 = vsel %vm6681_vm10, %v11373_v16, %v11374_v14  ;;  %v3472_v45 = vor.u32 8388608, %v3471_v54  ;;  %v9701_v61 = vshrl.u32 %v3476_v34, 5 }
 0x488   :  { %v4678_v22 = vmul.f32 -0.001358992, %v4677_v51  ;;  %v4685_v32 = vmul.f32 -0.00019511016, %v4677_v51  ;;  %v4336_v36 = vsel %vm4334_vm1, %v4335_v63, %v4331_v62  ;;  %v9699_v3 = vsel %vm7006_vm0, %v834_v28, %v11375_v25 }
 0x489   :  { %v4337_v5 = vadd.s32 %v4336_v36, %v4332_v10  ;;  %v9690_v35 = vsub.s32 32, %v3478_v47  ;;  %v3481_v33 = vshll.u32 %v11268_v60, %v3478_v47  ;;  %vm4696_vm2 = vcmp.eq.s32.totalorder %v4694_v30, 0 }
 0x48a   :  { %v4679_v39 = vadd.f32 0.041655596, %v4678_v22  ;;  %v4686_v27 = vadd.f32 0.008332121, %v4685_v32  ;;  %v3484_v41 = vshll.u32 %v11272_v58, %v3478_v47  ;;  %v3487_v26 = vshll.u32 %v11273_v46, %v3478_v47 }
 0x48b   :  { %v4338_v11 = vadd.s32 536870912, %v4337_v5  ;;  %v3482_v38 = vshrl.u32 %v11272_v58, %v9690_v35  ;;  %v3485_v50 = vshrl.u32 %v11273_v46, %v9690_v35  ;;  %v3491_v7 = vshrl.u32 %v11275_v59, %v9690_v35 }
 0x48c   :  { %v4680_v57 = vmul.f32 %v4679_v39, %v4677_v51  ;;  %v4687_v1 = vmul.f32 %v4686_v27, %v4677_v51  ;;  %v3488_v42 = vshrl.u32 %v11274_v55, %v9690_v35  ;;  %v3490_v23 = vshll.u32 %v11274_v55, %v3478_v47 }
 0x48d   :  { %v9709_v20 = vshrl.u32 %v4338_v11, 30  ;;  %vm4695_vm3 = vcmp.lt.s32.totalorder %v4694_v30, 2  ;;  %v3493_v52 = vshll.u32 %v11275_v59, %v3478_v47  ;;  %v9719_v63 = vor.u32 %v3482_v38, %v3481_v33 }
 0x48e   :  { %v4681_v43 = vadd.f32 -0.4999988, %v4680_v57  ;;  %v4688_v31 = vadd.f32 -0.16666654, %v4687_v1  ;;  %v9721_v54 = vor.u32 %v3485_v50, %v3484_v41  ;;  %v3492_v34 = vor.u32 %v3491_v7, %v3490_v23 }
 0x48f   :  { %v4340_v62 = vshll.u32 %v9709_v20, 30  ;;  %v3494_v22 = vshrl.u32 %v11276_v29, %v9690_v35  ;;  %v914_v36 = vmul.f32 6.2831855, %v9699_v3  ;;  %v9726_v39 = vor.u32 %v3488_v42, %v3487_v26 }
 0x490   :  { %v4682_v8 = vmul.f32 %v4681_v43, %v4677_v51  ;;  %v4689_v2 = vmul.f32 %v4688_v31, %v4677_v51  ;;  %vm3496_vm11 = vcmp.lt.s32.totalorder %v9701_v61, 1  ;;  %vm3499_vm7 = vcmp.lt.s32.totalorder %v9701_v61, 4 }
 0x491   :  { %v4341_v28 = vsub.s32 %v4337_v5, %v4340_v62  ;;  %v3495_v51 = vor.u32 %v3494_v22, %v3493_v52  ;;  %vm4699_vm8 = vcmp.eq.s32.totalorder %v4694_v30, 2  ;;  %v3504_v14 = vsel %vm3496_vm11, %v9719_v63, %v9721_v54 }
 0x492   :  { %v4683_v32 = vadd.f32 1.0, %v4682_v8  ;;  %v4690_v10 = vadd.f32 1.0, %v4689_v2  ;;  %v3505_v5 = vsel %vm3499_vm7, %v3492_v34, 920167782  ;;  %v9736_v25 = vshll.u32 %v3472_v45, 8 }
 0x493   :  { %vm4342_vm13 = vcmp.lt.s32.totalorder %v4341_v28, 0  ;;  %v4343_v16 = vsub.s32 0, %v4341_v28  ;;  %vm3498_vm15 = vcmp.lt.s32.totalorder %v9701_v61, 3  ;;  %vm3497_vm4 = vcmp.lt.s32.totalorder %v9701_v61, 2 }
 0x494   :  { %v4691_v47 = vmul.f32 %v4690_v10, %v4675_v40  ;;  %v4700_v27 = vxor.u32 2147483648, %v4683_v32  ;;  %v946_v40 = vmul.f32 %v914_v36, %v7026_v49  ;;  %v3506_v50 = vsel %vm3498_vm15, %v9726_v39, %v3505_v5 }
 0x495   :  { %v4344_v1 = vsel %vm4342_vm13, %v4343_v16, %v4341_v28  ;;  %v3507_v45 = vsel %vm3497_vm4, %v3504_v14, %v3506_v50  ;;  %v3508_v43 = vsel %vm3496_vm11, %v9721_v54, %v9726_v39  ;;  %v3509_v31 = vsel %vm3499_vm7, %v3495_v51, 1326507024 }
 0x496   :  { %v4697_v57 = vxor.u32 2147483648, %v4691_v47  ;;  %v4701_v11 = vsel %vm4699_vm8, %v4700_v27, %v4691_v47  ;;  %v4345_v38 = vclz %v4344_v1  ;;  %vm4692_vm5 = vweird.f32 %v9372_v53 }
 0x497   :  { %v3513_v26 = vand.u32 65535, %v9736_v25  ;;  %v3510_v23 = vsel %vm3498_vm15, %v3492_v34, %v3509_v31  ;;  %v3537_v8 = vand.u32 65535, %v3507_v45  ;;  %v9759_v2 = vadd.f32 %v946_v40, %v7039_v4 }
 0x498   :  { %v4698_v7 = vsel %vm4696_vm2, %v4683_v32, %v4697_v57  ;;  %v6080_v41 = vadd.s32 4294967294, %v4345_v38  ;;  %v3511_v53 = vsel %vm3497_vm4, %v3508_v43, %v3510_v23  ;;  %v3538_v30 = vshrl.u32 %v3507_v45, 16 }
 0x499   :  { %v4702_v33 = vsel %vm4695_vm3, %v4698_v7, %v4701_v11  ;;  %v3514_v34 = vshrl.u32 %v9736_v25, 16  ;;  %v3515_v22 = vand.u32 65535, %v3511_v53  ;;  %v3516_v32 = vshrl.u32 %v3511_v53, 16 }
 0x49a   :  { %v4703_v42 = vsel %vm4692_vm5, nan, %v4702_v33  ;;  %vm6081_vm14 = vcmp.lt.s32.totalorder %v6080_v41, 0  ;;  %v4333_v10 = vadd.s32 %v9678_v21, %v9671_v0  ;;  %v3540_v51 = vmul.u32 %v3538_v30, %v3513_v26 }
 0x49b   :  { %v5970_v62 = vsel %vm5944_vm9, %v9312_v24, %v4703_v42  ;;  %v4348_v52 = vsel %vm6081_vm14, 0, %v6080_v41  ;;  %vm4241_vm1 = vcmp.lt.s32.totalorder %v9501_v37, 0  ;;  %v3480_v47 = vshrl.u32 %v11268_v60, %v9690_v35 }
 0x49c   :  { %6003 = vst.msk [vmem:[%s11096_s1 + $0xb8] sm:$0xff] %vm5979_vm12, %v5970_v62  ;;  %v4349_v36 = vsub.s32 32, %v4348_v52  ;;  %v4353_v24 = vsub.s32 4294967266, %v4348_v52  ;;  %v3518_v27 = vmul.u32 %v3516_v32, %v3513_v26  ;;  %v3519_v16 = vmul.u32 %v3515_v22, %v3514_v34 }
 0x49d   :  { %v5017_v14 = vand.u32 2139095040, %v9759_v2  ;;  %v4350_v5 = vshll.u32 %v4341_v28, %v4348_v52  ;;  %v3541_v40 = vmul.u32 %v3537_v8, %v3514_v34  ;;  %v4363_v11 = vsub.s32 4, %v9709_v20 }
 0x49e   :  { %v4351_v57 = vshrl.u32 %v4333_v10, %v4349_v36  ;;  %v4354_v1 = vadd.s32 127, %v4353_v24  ;;  %v3517_v38 = vmul.u32 %v3515_v22, %v3513_v26  ;;  %v3521_v0 = vshll.u32 %v3518_v27, 16 }
 0x49f   :  { %v3539_v21 = vmul.u32 %v3537_v8, %v3513_v26  ;;  %v3520_v45 = vmul.u32 %v3516_v32, %v3514_v34  ;;  %v3543_v43 = vshll.u32 %v3540_v51, 16  ;;  %vm9780_vm6 = vcmp.le.f32.partialorder %v4239_v12, 0.7853982 }
 0x4a0   :  { %v4352_v50 = vor.u32 %v4351_v57, %v4350_v5  ;;  %v4355_v7 = vshll.u32 %v4354_v1, 23  ;;  %v3523_v31 = vshll.u32 %v3519_v16, 16  ;;  %vm3525_vm2 = vc.u32 %v3517_v38, %v3521_v0 }
 0x4a1   :  { %v3527_v28 = vadd.s32 %v3521_v0, %v3517_v38  ;;  %v3542_v33 = vmul.u32 %v3538_v30, %v3514_v34  ;;  %v3526_v42 = vsel %vm3525_vm2, 1, %v11271_v9  ;;  %v3545_v23 = vshll.u32 %v3541_v40, 16 }
 0x4a2   :  { %v4356_v41 = vor.u32 4788187, %v4355_v7  ;;  %vm3547_vm3 = vc.u32 %v3539_v21, %v3543_v43  ;;  %v3528_v26 = vadd.s32 %v3526_v42, %v3520_v45  ;;  %v3549_v62 = vadd.s32 %v3543_v43, %v3539_v21 }
 0x4a3   :  { %vm3529_vm13 = vc.u32 %v3527_v28, %v3523_v31  ;;  %v3548_v8 = vsel %vm3547_vm3, 1, %v11271_v9  ;;  %v4359_v52 = vcvt.s32.f32 %v4352_v50  ;;  %v3501_v32 = vsel %vm3499_vm7, %v9726_v39, 2102212464 }
 0x4a4   :  { %v4357_v53 = vand.u32 2147483647, %v4356_v41  ;;  %v3530_v12 = vsel %vm3529_vm13, 1, %v11271_v9  ;;  %v3550_v22 = vadd.s32 %v3548_v8, %v3542_v33  ;;  %v3522_v30 = vshrl.u32 %v3518_v27, 16  ;;  %v826_v8 = vpop.permute.xlu0 %825 }
 0x4a5   :  { %v3532_v34 = vadd.s32 %v3530_v12, %v3528_v26  ;;  %vm3551_vm8 = vc.u32 %v3549_v62, %v3545_v23  ;;  %v4364_v36 = vsel %vm4241_vm1, %v4363_v11, %v9709_v20  ;;  %v5018_v5 = vshrl.u32 %v5017_v14, 23 }
 0x4a6   :  { %v4360_v10 = vmul.f32 %v4359_v52, %v4357_v53  ;;  %v3552_v24 = vsel %vm3551_vm8, 1, %v11271_v9  ;;  %v3524_v57 = vshrl.u32 %v3519_v16, 16  ;;  %v3544_v38 = vshrl.u32 %v3540_v51, 16 }
 0x4a7   :  { %v3533_v1 = vadd.s32 %v3532_v34, %v3522_v30  ;;  %v3554_v0 = vadd.s32 %v3552_v24, %v3550_v22  ;;  %v3500_v39 = vsel %vm3496_vm11, %v3480_v47, %v9719_v63  ;;  %v3502_v27 = vsel %vm3498_vm15, %v9721_v54, %v3501_v32  ;;  %v11378_v32 = vld [vmem:[#allocation47_spill] sm:$0xff] }
 0x4a8   :  { %v4361_v21 = vxor.u32 2147483648, %v4360_v10  ;;  %v6094_v50 = vadd.s32 4294967169, %v5018_v5  ;;  %v3546_v20 = vshrl.u32 %v3541_v40, 16  ;;  %v5014_v14 = vand.u32 2147483647, %v9759_v2  ;;  %v11379_v30 = vld [vmem:[#allocation3_spill] sm:$0xff] }
 0x4a9   :  { %v9800_v7 = vadd.s32 %v3533_v1, %v3524_v57  ;;  %v3555_v11 = vadd.s32 %v3554_v0, %v3544_v38  ;;  %v4366_v16 = vsel %vm9780_vm6, 0, %v4364_v36  ;;  %v9807_v45 = vadd.s32 %v3549_v62, %v3545_v23 }
 0x4aa   :  { %v4362_v51 = vsel %vm4241_vm1, %v4361_v21, %v4360_v10  ;;  %v5024_v63 = vadd.s32 1, %v6094_v50  ;;  %v3503_v47 = vsel %vm3497_vm4, %v3500_v39, %v3502_v27  ;;  %v4383_v31 = vadd.s32 3, %v4366_v16 }
 0x4ab   :  { %v4365_v54 = vsel %vm9780_vm6, %v9501_v37, %v4362_v51  ;;  %v3556_v40 = vadd.s32 %v3555_v11, %v3546_v20  ;;  %vm3559_vm11 = vc.u32 %v9800_v7, %v9807_v45  ;;  %v5021_v33 = vand.u32 8388607, %v5014_v14 }
 0x4ac   :  { %v4367_v43 = vmul.f32 %v4365_v54, %v4365_v54  ;;  %vm5025_vm7 = vcmp.gt.s32.totalorder %v5024_v63, 0  ;;  %v3557_v35 = vmul.u32 %v9736_v25, %v3503_v47  ;;  %v4384_v22 = vand.u32 3, %v4383_v31 }
 0x4ad   :  { %v3560_v28 = vadd.s32 1, %v3556_v40  ;;  %v5026_v41 = vsel %vm5025_vm7, %v5024_v63, 0  ;;  %v11380_v34 = vsel %vm6681_vm10, %v11378_v32, %v11379_v30  ;;  %v5022_v5 = vor.u32 8388608, %v5021_v33 }
 0x4ae   :  { %v4368_v42 = vmul.f32 -0.001358992, %v4367_v43  ;;  %v4375_v23 = vmul.f32 -0.00019511016, %v4367_v43  ;;  %v5028_v26 = vand.u32 31, %v5026_v41  ;;  %v9828_v10 = vsel %vm7006_vm0, %v826_v8, %v11380_v34 }
 0x4af   :  { %v3561_v61 = vsel %vm3559_vm11, %v3560_v28, %v3556_v40  ;;  %v9830_v57 = vshrl.u32 %v5026_v41, 5  ;;  %vm4386_vm15 = vcmp.eq.s32.totalorder %v4384_v22, 0  ;;  %vm4385_vm4 = vcmp.lt.s32.totalorder %v4384_v22, 2 }
 0x4b0   :  { %v4369_v62 = vadd.f32 0.041655596, %v4368_v42  ;;  %v4376_v53 = vadd.f32 0.008332121, %v4375_v23  ;;  %v3562_v52 = vadd.s32 %v3561_v61, %v3557_v35  ;;  %v9819_v12 = vsub.s32 32, %v5028_v26 }
 0x4b1   :  { %v5031_v50 = vshll.u32 %v11268_v60, %v5028_v26  ;;  %v5034_v20 = vshll.u32 %v11272_v58, %v5028_v26  ;;  %v5037_v11 = vshll.u32 %v11273_v46, %v5028_v26  ;;  %v5040_v16 = vshll.u32 %v11274_v55, %v5028_v26 }
 0x4b2   :  { %v4370_v36 = vmul.f32 %v4369_v62, %v4367_v43  ;;  %v4377_v25 = vmul.f32 %v4376_v53, %v4367_v43  ;;  %v3563_v24 = vadd.s32 536870912, %v3562_v52  ;;  %v5032_v1 = vshrl.u32 %v11272_v58, %v9819_v12 }
 0x4b3   :  { %v5035_v38 = vshrl.u32 %v11273_v46, %v9819_v12  ;;  %v5041_v0 = vshrl.u32 %v11275_v59, %v9819_v12  ;;  %v5038_v51 = vshrl.u32 %v11274_v55, %v9819_v12  ;;  %v5043_v31 = vshll.u32 %v11275_v59, %v5028_v26 }
 0x4b4   :  { %v4371_v21 = vadd.f32 -0.4999988, %v4370_v36  ;;  %v4378_v39 = vadd.f32 -0.16666654, %v4377_v25  ;;  %v9838_v27 = vshrl.u32 %v3563_v24, 30  ;;  %v9848_v28 = vor.u32 %v5032_v1, %v5031_v50 }
 0x4b5   :  { %v9850_v33 = vor.u32 %v5035_v38, %v5034_v20  ;;  %v5042_v41 = vor.u32 %v5041_v0, %v5040_v16  ;;  %v5044_v42 = vshrl.u32 %v11276_v29, %v9819_v12  ;;  %v912_v61 = vmul.f32 6.2831855, %v9828_v10 }
 0x4b6   :  { %v4372_v63 = vmul.f32 %v4371_v21, %v4367_v43  ;;  %v4379_v47 = vmul.f32 %v4378_v39, %v4367_v43  ;;  %v3565_v40 = vshll.u32 %v9838_v27, 30  ;;  %v9855_v62 = vor.u32 %v5038_v51, %v5037_v11 }
 0x4b7   :  { %v5045_v43 = vor.u32 %v5044_v42, %v5043_v31  ;;  %vm5046_vm5 = vcmp.lt.s32.totalorder %v9830_v57, 1  ;;  %vm5049_vm14 = vcmp.lt.s32.totalorder %v9830_v57, 4  ;;  %vm4389_vm6 = vcmp.eq.s32.totalorder %v4384_v22, 2 }
 0x4b8   :  { %v4373_v23 = vadd.f32 1.0, %v4372_v63  ;;  %v4380_v35 = vadd.f32 1.0, %v4379_v47  ;;  %v3566_v8 = vsub.s32 %v3562_v52, %v3565_v40  ;;  %v5054_v30 = vsel %vm5046_vm5, %v9848_v28, %v9850_v33 }
 0x4b9   :  { %v5055_v52 = vsel %vm5049_vm14, %v5042_v41, 920167782  ;;  %v9865_v34 = vshll.u32 %v5022_v5, 8  ;;  %vm5048_vm2 = vcmp.lt.s32.totalorder %v9830_v57, 3  ;;  %vm5047_vm3 = vcmp.lt.s32.totalorder %v9830_v57, 2 }
 0x4ba   :  { %v4381_v26 = vmul.f32 %v4380_v35, %v4365_v54  ;;  %v4390_v53 = vxor.u32 2147483648, %v4373_v23  ;;  %vm3567_vm1 = vcmp.lt.s32.totalorder %v3566_v8, 0  ;;  %v3568_v32 = vsub.s32 0, %v3566_v8 }
 0x4bb   :  { %v944_v54 = vmul.f32 %v912_v61, %v7026_v49  ;;  %v5056_v38 = vsel %vm5048_vm2, %v9855_v62, %v5055_v52  ;;  %v5058_v21 = vsel %vm5046_vm5, %v9850_v33, %v9855_v62  ;;  %v5059_v39 = vsel %vm5049_vm14, %v5045_v43, 1326507024 }
 0x4bc   :  { %v4387_v36 = vxor.u32 2147483648, %v4381_v26  ;;  %v3569_v25 = vsel %vm3567_vm1, %v3568_v32, %v3566_v8  ;;  %v4391_v24 = vsel %vm4389_vm6, %v4390_v53, %v4381_v26  ;;  %v5057_v5 = vsel %vm5047_vm3, %v5054_v30, %v5056_v38 }
 0x4bd   :  { %v3570_v1 = vclz %v3569_v25  ;;  %vm4382_vm13 = vweird.f32 %v9501_v37  ;;  %v5063_v11 = vand.u32 65535, %v9865_v34  ;;  %v5060_v16 = vsel %vm5048_vm2, %v5042_v41, %v5059_v39 }
 0x4be   :  { %v4388_v0 = vsel %vm4386_vm15, %v4373_v23, %v4387_v36  ;;  %v5087_v63 = vand.u32 65535, %v5057_v5  ;;  %v9888_v47 = vadd.f32 %v944_v54, %v7039_v4  ;;  %v5061_v37 = vsel %vm5047_vm3, %v5058_v21, %v5060_v16 }
 0x4bf   :  { %v4392_v50 = vsel %vm4385_vm4, %v4388_v0, %v4391_v24  ;;  %v6065_v20 = vadd.s32 4294967294, %v3570_v1  ;;  %v5088_v22 = vshrl.u32 %v5057_v5, 16  ;;  %v5064_v41 = vshrl.u32 %v9865_v34, 16 }
 0x4c0   :  { %v4393_v51 = vsel %vm4382_vm13, nan, %v4392_v50  ;;  %v5065_v42 = vand.u32 65535, %v5061_v37  ;;  %v5066_v23 = vshrl.u32 %v5061_v37, 16  ;;  %v3558_v35 = vadd.s32 %v9807_v45, %v9800_v7 }
 0x4c1   :  { %v5968_v40 = vsel %vm5944_vm9, %v9441_v13, %v4393_v51  ;;  %vm6066_vm8 = vcmp.lt.s32.totalorder %v6065_v20, 0  ;;  %v5090_v43 = vmul.u32 %v5088_v22, %v5063_v11  ;;  %vm3466_vm11 = vcmp.lt.s32.totalorder %v9630_v17, 0 }
 0x4c2   :  { %6001 = vst.msk [vmem:[%s11096_s1 + $0xa8] sm:$0xff] %vm5979_vm12, %v5968_v40  ;;  %v3573_v31 = vsel %vm6066_vm8, 0, %v6065_v20  ;;  %v5030_v26 = vshrl.u32 %v11268_v60, %v9819_v12  ;;  %v5068_v53 = vmul.u32 %v5066_v23, %v5063_v11  ;;  %v5069_v32 = vmul.u32 %v5065_v42, %v5064_v41 }
 0x4c3   :  { %v3574_v61 = vsub.s32 32, %v3573_v31  ;;  %v3578_v13 = vsub.s32 4294967266, %v3573_v31  ;;  %v4707_v30 = vand.u32 2139095040, %v9888_v47  ;;  %v3575_v52 = vshll.u32 %v3566_v8, %v3573_v31 }
 0x4c4   :  { %v5091_v54 = vmul.u32 %v5087_v63, %v5064_v41  ;;  %v3588_v24 = vsub.s32 4, %v9838_v27  ;;  %v5067_v1 = vmul.u32 %v5065_v42, %v5063_v11  ;;  %v5071_v7 = vshll.u32 %v5068_v53, 16 }
 0x4c5   :  { %v3576_v36 = vshrl.u32 %v3558_v35, %v3574_v61  ;;  %v3579_v25 = vadd.s32 127, %v3578_v13  ;;  %v5089_v45 = vmul.u32 %v5087_v63, %v5063_v11  ;;  %v5070_v5 = vmul.u32 %v5066_v23, %v5064_v41 }
 0x4c6   :  { %v5093_v21 = vshll.u32 %v5090_v43, 16  ;;  %vm9909_vm7 = vcmp.le.f32.partialorder %v3464_v44, 0.7853982  ;;  %v5073_v39 = vshll.u32 %v5069_v32, 16  ;;  %vm5075_vm15 = vc.u32 %v5067_v1, %v5071_v7 }
 0x4c7   :  { %v3577_v38 = vor.u32 %v3576_v36, %v3575_v52  ;;  %v3580_v0 = vshll.u32 %v3579_v25, 23  ;;  %v5077_v8 = vadd.s32 %v5071_v7, %v5067_v1  ;;  %v5092_v50 = vmul.u32 %v5088_v22, %v5064_v41 }
 0x4c8   :  { %v5076_v51 = vsel %vm5075_vm15, 1, %v11271_v9  ;;  %v5095_v16 = vshll.u32 %v5091_v54, 16  ;;  %vm5097_vm4 = vc.u32 %v5089_v45, %v5093_v21  ;;  %v5099_v40 = vadd.s32 %v5093_v21, %v5089_v45 }
 0x4c9   :  { %v3581_v20 = vor.u32 4788187, %v3580_v0  ;;  %v5078_v11 = vadd.s32 %v5076_v51, %v5070_v5  ;;  %vm5079_vm1 = vc.u32 %v5077_v8, %v5073_v39  ;;  %v5098_v63 = vsel %vm5097_vm4, 1, %v11271_v9 }
 0x4ca   :  { %v3584_v31 = vcvt.s32.f32 %v3577_v38  ;;  %v5080_v44 = vsel %vm5079_vm1, 1, %v11271_v9  ;;  %v5100_v42 = vadd.s32 %v5098_v63, %v5092_v50  ;;  %v5051_v23 = vsel %vm5049_vm14, %v9855_v62, 2102212464  ;;  %v806_v63 = vpop.permute.xlu1 %805 }
 0x4cb   :  { %v3582_v37 = vand.u32 2147483647, %v3581_v20  ;;  %v5072_v22 = vshrl.u32 %v5068_v53, 16  ;;  %v5082_v41 = vadd.s32 %v5080_v44, %v5078_v11  ;;  %vm5101_vm6 = vc.u32 %v5099_v40, %v5095_v16 }
 0x4cc   :  { %v3589_v61 = vsel %vm3466_vm11, %v3588_v24, %v9838_v27  ;;  %v5102_v13 = vsel %vm5101_vm6, 1, %v11271_v9  ;;  %v4708_v52 = vshrl.u32 %v4707_v30, 23  ;;  %v5074_v36 = vshrl.u32 %v5069_v32, 16 }
 0x4cd   :  { %v3585_v35 = vmul.f32 %v3584_v31, %v3582_v37  ;;  %v5083_v25 = vadd.s32 %v5082_v41, %v5072_v22  ;;  %v5094_v1 = vshrl.u32 %v5090_v43, 16  ;;  %v5104_v7 = vadd.s32 %v5102_v13, %v5100_v42  ;;  %v11384_v22 = vld [vmem:[#allocation31_spill] sm:$0xff] }
 0x4ce   :  { %v5050_v62 = vsel %vm5046_vm5, %v5030_v26, %v9848_v28  ;;  %v5052_v53 = vsel %vm5048_vm2, %v9850_v33, %v5051_v23  ;;  %v6088_v38 = vadd.s32 4294967169, %v4708_v52  ;;  %v5096_v27 = vshrl.u32 %v5091_v54, 16  ;;  %v11383_v23 = vld [vmem:[#allocation10_spill] sm:$0xff] }
 0x4cf   :  { %v3586_v45 = vxor.u32 2147483648, %v3585_v35  ;;  %v9929_v0 = vadd.s32 %v5083_v25, %v5074_v36  ;;  %v5105_v24 = vadd.s32 %v5104_v7, %v5094_v1  ;;  %v4704_v30 = vand.u32 2147483647, %v9888_v47 }
 0x4d0   :  { %v3591_v32 = vsel %vm9909_vm7, 0, %v3589_v61  ;;  %v9936_v5 = vadd.s32 %v5099_v40, %v5095_v16  ;;  %v4714_v28 = vadd.s32 1, %v6088_v38  ;;  %v5053_v26 = vsel %vm5047_vm3, %v5050_v62, %v5052_v53 }
 0x4d1   :  { %v3587_v43 = vsel %vm3466_vm11, %v3586_v45, %v3585_v35  ;;  %v5106_v54 = vadd.s32 %v5105_v24, %v5096_v27  ;;  %v3608_v39 = vadd.s32 3, %v3591_v32  ;;  %v4711_v50 = vand.u32 8388607, %v4704_v30 }
 0x4d2   :  { %v3590_v33 = vsel %vm9909_vm7, %v9630_v17, %v3587_v43  ;;  %vm5109_vm5 = vc.u32 %v9929_v0, %v9936_v5  ;;  %vm4715_vm14 = vcmp.gt.s32.totalorder %v4714_v28, 0  ;;  %v5107_v12 = vmul.u32 %v9865_v34, %v5053_v26 }
 0x4d3   :  { %v3592_v21 = vmul.f32 %v3590_v33, %v3590_v33  ;;  %v5110_v8 = vadd.s32 1, %v5106_v54  ;;  %v4716_v20 = vsel %vm4715_vm14, %v4714_v28, 0  ;;  %v3609_v42 = vand.u32 3, %v3608_v39 }
 0x4d4   :  { %v4718_v11 = vand.u32 31, %v4716_v20  ;;  %v11385_v41 = vsel %vm6681_vm10, %v11383_v23, %v11384_v22  ;;  %v4712_v52 = vor.u32 8388608, %v4711_v50  ;;  %v9959_v36 = vshrl.u32 %v4716_v20, 5 }
 0x4d5   :  { %v3593_v51 = vmul.f32 -0.001358992, %v3592_v21  ;;  %v3600_v16 = vmul.f32 -0.00019511016, %v3592_v21  ;;  %v5111_v57 = vsel %vm5109_vm5, %v5110_v8, %v5106_v54  ;;  %v9957_v35 = vsel %vm7006_vm0, %v806_v63, %v11385_v41 }
 0x4d6   :  { %v5112_v31 = vadd.s32 %v5111_v57, %v5107_v12  ;;  %v9948_v44 = vsub.s32 32, %v4718_v11  ;;  %v4721_v38 = vshll.u32 %v11268_v60, %v4718_v11  ;;  %vm3611_vm2 = vcmp.eq.s32.totalorder %v3609_v42, 0 }
 0x4d7   :  { %v3594_v40 = vadd.f32 0.041655596, %v3593_v51  ;;  %v3601_v37 = vadd.f32 0.008332121, %v3600_v16  ;;  %v4724_v27 = vshll.u32 %v11272_v58, %v4718_v11  ;;  %v4727_v24 = vshll.u32 %v11273_v46, %v4718_v11 }
 0x4d8   :  { %v5113_v13 = vadd.s32 536870912, %v5112_v31  ;;  %v4722_v25 = vshrl.u32 %v11272_v58, %v9948_v44  ;;  %v4725_v1 = vshrl.u32 %v11273_v46, %v9948_v44  ;;  %v4731_v7 = vshrl.u32 %v11275_v59, %v9948_v44 }
 0x4d9   :  { %v3595_v61 = vmul.f32 %v3594_v40, %v3592_v21  ;;  %v3602_v34 = vmul.f32 %v3601_v37, %v3592_v21  ;;  %v4728_v43 = vshrl.u32 %v11274_v55, %v9948_v44  ;;  %v4730_v32 = vshll.u32 %v11274_v55, %v4718_v11 }
 0x4da   :  { %v9967_v53 = vshrl.u32 %v5113_v13, 30  ;;  %vm3610_vm3 = vcmp.lt.s32.totalorder %v3609_v42, 2  ;;  %v4733_v39 = vshll.u32 %v11275_v59, %v4718_v11  ;;  %v9977_v8 = vor.u32 %v4722_v25, %v4721_v38 }
 0x4db   :  { %v3596_v45 = vadd.f32 -0.4999988, %v3595_v61  ;;  %v3603_v62 = vadd.f32 -0.16666654, %v3602_v34  ;;  %v9979_v50 = vor.u32 %v4725_v1, %v4724_v27  ;;  %v4732_v20 = vor.u32 %v4731_v7, %v4730_v32 }
 0x4dc   :  { %v5115_v54 = vshll.u32 %v9967_v53, 30  ;;  %v4734_v51 = vshrl.u32 %v11276_v29, %v9948_v44  ;;  %v907_v57 = vmul.f32 6.2831855, %v9957_v35  ;;  %v9984_v40 = vor.u32 %v4728_v43, %v4727_v24 }
 0x4dd   :  { %v3597_v28 = vmul.f32 %v3596_v45, %v3592_v21  ;;  %v3604_v26 = vmul.f32 %v3603_v62, %v3592_v21  ;;  %vm4736_vm13 = vcmp.lt.s32.totalorder %v9959_v36, 1  ;;  %vm4739_vm8 = vcmp.lt.s32.totalorder %v9959_v36, 4 }
 0x4de   :  { %v5116_v63 = vsub.s32 %v5112_v31, %v5115_v54  ;;  %v4735_v21 = vor.u32 %v4734_v51, %v4733_v39  ;;  %vm3614_vm7 = vcmp.eq.s32.totalorder %v3609_v42, 2  ;;  %v4744_v22 = vsel %vm4736_vm13, %v9977_v8, %v9979_v50 }
 0x4df   :  { %v3598_v16 = vadd.f32 1.0, %v3597_v28  ;;  %v3605_v12 = vadd.f32 1.0, %v3604_v26  ;;  %v4745_v31 = vsel %vm4739_vm8, %v4732_v20, 920167782  ;;  %v9994_v41 = vshll.u32 %v4712_v52, 8 }
 0x4e0   :  { %vm5117_vm11 = vcmp.lt.s32.totalorder %v5116_v63, 0  ;;  %v5118_v23 = vsub.s32 0, %v5116_v63  ;;  %vm4738_vm15 = vcmp.lt.s32.totalorder %v9959_v36, 3  ;;  %vm4737_vm4 = vcmp.lt.s32.totalorder %v9959_v36, 2 }
 0x4e1   :  { %v3606_v11 = vmul.f32 %v3605_v12, %v3590_v33  ;;  %v3615_v37 = vxor.u32 2147483648, %v3598_v16  ;;  %v939_v33 = vmul.f32 %v907_v57, %v7026_v49  ;;  %v4746_v1 = vsel %vm4738_vm15, %v9984_v40, %v4745_v31 }
 0x4e2   :  { %v5119_v34 = vsel %vm5117_vm11, %v5118_v23, %v5116_v63  ;;  %v4747_v52 = vsel %vm4737_vm4, %v4744_v22, %v4746_v1  ;;  %v4748_v45 = vsel %vm4736_vm13, %v9979_v50, %v9984_v40  ;;  %v4749_v62 = vsel %vm4739_vm8, %v4735_v21, 1326507024 }
 0x4e3   :  { %v3612_v61 = vxor.u32 2147483648, %v3606_v11  ;;  %v3616_v13 = vsel %vm3614_vm7, %v3615_v37, %v3606_v11  ;;  %v5120_v25 = vclz %v5119_v34  ;;  %vm3607_vm1 = vweird.f32 %v9630_v17 }
 0x4e4   :  { %v4753_v24 = vand.u32 65535, %v9994_v41  ;;  %v4750_v32 = vsel %vm4738_vm15, %v4732_v20, %v4749_v62  ;;  %v4777_v28 = vand.u32 65535, %v4747_v52  ;;  %v10017_v26 = vadd.f32 %v939_v33, %v7039_v4 }
 0x4e5   :  { %v3613_v7 = vsel %vm3611_vm2, %v3598_v16, %v3612_v61  ;;  %v6095_v27 = vadd.s32 4294967294, %v5120_v25  ;;  %v4751_v17 = vsel %vm4737_vm4, %v4748_v45, %v4750_v32  ;;  %v4778_v42 = vshrl.u32 %v4747_v52, 16 }
 0x4e6   :  { %v3617_v38 = vsel %vm3610_vm3, %v3613_v7, %v3616_v13  ;;  %v4754_v20 = vshrl.u32 %v9994_v41, 16  ;;  %v4755_v51 = vand.u32 65535, %v4751_v17  ;;  %v4756_v16 = vshrl.u32 %v4751_v17, 16 }
 0x4e7   :  { %v3618_v43 = vsel %vm3607_vm1, nan, %v3617_v38  ;;  %vm6096_vm6 = vcmp.lt.s32.totalorder %v6095_v27, 0  ;;  %v5108_v12 = vadd.s32 %v9936_v5, %v9929_v0  ;;  %v4780_v21 = vmul.u32 %v4778_v42, %v4753_v24 }
 0x4e8   :  { %v5963_v54 = vsel %vm5944_vm9, %v9570_v48, %v3618_v43  ;;  %v5123_v39 = vsel %vm6096_vm6, 0, %v6095_v27  ;;  %vm5016_vm5 = vcmp.lt.s32.totalorder %v9759_v2, 0  ;;  %v4720_v11 = vshrl.u32 %v11268_v60, %v9948_v44 }
 0x4e9   :  { %5996 = vst.msk [vmem:[%s11096_s1 + $0x80] sm:$0xff] %vm5979_vm12, %v5963_v54  ;;  %v5124_v57 = vsub.s32 32, %v5123_v39  ;;  %v5128_v48 = vsub.s32 4294967266, %v5123_v39  ;;  %v4758_v37 = vmul.u32 %v4756_v16, %v4753_v24  ;;  %v4759_v23 = vmul.u32 %v4755_v51, %v4754_v20 }
 0x4ea   :  { %v3932_v22 = vand.u32 2139095040, %v10017_v26  ;;  %v5125_v31 = vshll.u32 %v5116_v63, %v5123_v39  ;;  %v4781_v33 = vmul.u32 %v4777_v28, %v4754_v20  ;;  %v5138_v13 = vsub.s32 4, %v9967_v53 }
 0x4eb   :  { %v5126_v61 = vshrl.u32 %v5108_v12, %v5124_v57  ;;  %v5129_v34 = vadd.s32 127, %v5128_v48  ;;  %v4757_v25 = vmul.u32 %v4755_v51, %v4753_v24  ;;  %v4761_v0 = vshll.u32 %v4758_v37, 16 }
 0x4ec   :  { %v4779_v5 = vmul.u32 %v4777_v28, %v4753_v24  ;;  %v4760_v52 = vmul.u32 %v4756_v16, %v4754_v20  ;;  %v4783_v45 = vshll.u32 %v4780_v21, 16  ;;  %vm10038_vm14 = vcmp.le.f32.partialorder %v5014_v14, 0.7853982 }
 0x4ed   :  { %v5127_v1 = vor.u32 %v5126_v61, %v5125_v31  ;;  %v5130_v7 = vshll.u32 %v5129_v34, 23  ;;  %v4763_v62 = vshll.u32 %v4759_v23, 16  ;;  %vm4765_vm2 = vc.u32 %v4757_v25, %v4761_v0 }
 0x4ee   :  { %v4767_v63 = vadd.s32 %v4761_v0, %v4757_v25  ;;  %v4782_v38 = vmul.u32 %v4778_v42, %v4754_v20  ;;  %v4766_v43 = vsel %vm4765_vm2, 1, %v11271_v9  ;;  %v4785_v32 = vshll.u32 %v4781_v33, 16 }
 0x4ef   :  { %v5131_v27 = vor.u32 4788187, %v5130_v7  ;;  %vm4787_vm3 = vc.u32 %v4779_v5, %v4783_v45  ;;  %v4768_v24 = vadd.s32 %v4766_v43, %v4760_v52  ;;  %v4789_v54 = vadd.s32 %v4783_v45, %v4779_v5 }
 0x4f0   :  { %vm4769_vm11 = vc.u32 %v4767_v63, %v4763_v62  ;;  %v4788_v28 = vsel %vm4787_vm3, 1, %v11271_v9  ;;  %v5134_v39 = vcvt.s32.f32 %v5127_v1  ;;  %v4741_v16 = vsel %vm4739_vm8, %v9984_v40, 2102212464 }
 0x4f1   :  { %v5132_v17 = vand.u32 2147483647, %v5131_v27  ;;  %v4770_v14 = vsel %vm4769_vm11, 1, %v11271_v9  ;;  %v4790_v51 = vadd.s32 %v4788_v28, %v4782_v38  ;;  %v4762_v42 = vshrl.u32 %v4758_v37, 16  ;;  %v846_v28 = vpop.permute.xlu2 %845 }
 0x4f2   :  { %v4772_v20 = vadd.s32 %v4770_v14, %v4768_v24  ;;  %vm4791_vm7 = vc.u32 %v4789_v54, %v4785_v32  ;;  %v5139_v57 = vsel %vm5016_vm5, %v5138_v13, %v9967_v53  ;;  %v3933_v31 = vshrl.u32 %v3932_v22, 23 }
 0x4f3   :  { %v5135_v12 = vmul.f32 %v5134_v39, %v5132_v17  ;;  %v4792_v48 = vsel %vm4791_vm7, 1, %v11271_v9  ;;  %v4764_v61 = vshrl.u32 %v4759_v23, 16  ;;  %v4784_v25 = vshrl.u32 %v4780_v21, 16 }
 0x4f4   :  { %v4773_v34 = vadd.s32 %v4772_v20, %v4762_v42  ;;  %v4794_v0 = vadd.s32 %v4792_v48, %v4790_v51  ;;  %v4740_v40 = vsel %vm4736_vm13, %v4720_v11, %v9977_v8  ;;  %v4742_v37 = vsel %vm4738_vm15, %v9979_v50, %v4741_v16  ;;  %v11388_v16 = vld [vmem:[#allocation9_spill] sm:$0xff]  ;;  %v11389_v42 = vld [vmem:[#allocation32_spill] sm:$0xff] }
 0x4f5   :  { %v5136_v5 = vxor.u32 2147483648, %v5135_v12  ;;  %v6073_v1 = vadd.s32 4294967169, %v3933_v31  ;;  %v4786_v53 = vshrl.u32 %v4781_v33, 16  ;;  %v3929_v22 = vand.u32 2147483647, %v10017_v26 }
 0x4f6   :  { %v10058_v7 = vadd.s32 %v4773_v34, %v4764_v61  ;;  %v4795_v13 = vadd.s32 %v4794_v0, %v4784_v25  ;;  %v5141_v23 = vsel %vm10038_vm14, 0, %v5139_v57  ;;  %v10065_v52 = vadd.s32 %v4789_v54, %v4785_v32 }
 0x4f7   :  { %v5137_v21 = vsel %vm5016_vm5, %v5136_v5, %v5135_v12  ;;  %v3939_v8 = vadd.s32 1, %v6073_v1  ;;  %v4743_v11 = vsel %vm4737_vm4, %v4740_v40, %v4742_v37  ;;  %v5158_v62 = vadd.s32 3, %v5141_v23 }
 0x4f8   :  { %v5140_v50 = vsel %vm10038_vm14, %v9759_v2, %v5137_v21  ;;  %v4796_v33 = vadd.s32 %v4795_v13, %v4786_v53  ;;  %vm4799_vm13 = vc.u32 %v10058_v7, %v10065_v52  ;;  %v3936_v38 = vand.u32 8388607, %v3929_v22 }
 0x4f9   :  { %v5142_v45 = vmul.f32 %v5140_v50, %v5140_v50  ;;  %vm3940_vm8 = vcmp.gt.s32.totalorder %v3939_v8, 0  ;;  %v4797_v44 = vmul.u32 %v9994_v41, %v4743_v11  ;;  %v5159_v51 = vand.u32 3, %v5158_v62 }
 0x4fa   :  { %v4800_v63 = vadd.s32 1, %v4796_v33  ;;  %v3941_v27 = vsel %vm3940_vm8, %v3939_v8, 0  ;;  %v11390_v20 = vsel %vm6681_vm10, %v11388_v16, %v11389_v42  ;;  %v3937_v31 = vor.u32 8388608, %v3936_v38 }
 0x4fb   :  { %v5143_v43 = vmul.f32 -0.001358992, %v5142_v45  ;;  %v5150_v32 = vmul.f32 -0.00019511016, %v5142_v45  ;;  %v3943_v24 = vand.u32 31, %v3941_v27  ;;  %v10086_v12 = vsel %vm7006_vm0, %v846_v28, %v11390_v20 }
 0x4fc   :  { %v4801_v36 = vsel %vm4799_vm13, %v4800_v63, %v4796_v33  ;;  %v10088_v61 = vshrl.u32 %v3941_v27, 5  ;;  %vm5161_vm15 = vcmp.eq.s32.totalorder %v5159_v51, 0  ;;  %vm5160_vm4 = vcmp.lt.s32.totalorder %v5159_v51, 2 }
 0x4fd   :  { %v5144_v54 = vadd.f32 0.041655596, %v5143_v43  ;;  %v5151_v17 = vadd.f32 0.008332121, %v5150_v32  ;;  %v4802_v39 = vadd.s32 %v4801_v36, %v4797_v44  ;;  %v10077_v14 = vsub.s32 32, %v3943_v24 }
 0x4fe   :  { %v3946_v1 = vshll.u32 %v11268_v60, %v3943_v24  ;;  %v3949_v53 = vshll.u32 %v11272_v58, %v3943_v24  ;;  %v3952_v13 = vshll.u32 %v11273_v46, %v3943_v24  ;;  %v3955_v23 = vshll.u32 %v11274_v55, %v3943_v24 }
 0x4ff   :  { %v5145_v57 = vmul.f32 %v5144_v54, %v5142_v45  ;;  %v5152_v41 = vmul.f32 %v5151_v17, %v5142_v45  ;;  %v4803_v48 = vadd.s32 536870912, %v4802_v39  ;;  %v3947_v34 = vshrl.u32 %v11272_v58, %v10077_v14 }
 0x500   :  { %v3950_v25 = vshrl.u32 %v11273_v46, %v10077_v14  ;;  %v3956_v0 = vshrl.u32 %v11275_v59, %v10077_v14  ;;  %v3953_v21 = vshrl.u32 %v11274_v55, %v10077_v14  ;;  %v3958_v62 = vshll.u32 %v11275_v59, %v3943_v24 }
 0x501   :  { %v5146_v5 = vadd.f32 -0.4999988, %v5145_v57  ;;  %v5153_v40 = vadd.f32 -0.16666654, %v5152_v41  ;;  %v10096_v37 = vshrl.u32 %v4803_v48, 30  ;;  %v10106_v63 = vor.u32 %v3947_v34, %v3946_v1 }
 0x502   :  { %v10108_v38 = vor.u32 %v3950_v25, %v3949_v53  ;;  %v3957_v27 = vor.u32 %v3956_v0, %v3955_v23  ;;  %v3959_v43 = vshrl.u32 %v11276_v29, %v10077_v14  ;;  %v917_v36 = vmul.f32 6.2831855, %v10086_v12 }
 0x503   :  { %v5147_v8 = vmul.f32 %v5146_v5, %v5142_v45  ;;  %v5154_v11 = vmul.f32 %v5153_v40, %v5142_v45  ;;  %v4805_v33 = vshll.u32 %v10096_v37, 30  ;;  %v10113_v54 = vor.u32 %v3953_v21, %v3952_v13 }
 0x504   :  { %v3960_v45 = vor.u32 %v3959_v43, %v3958_v62  ;;  %vm3961_vm1 = vcmp.lt.s32.totalorder %v10088_v61, 1  ;;  %vm3964_vm6 = vcmp.lt.s32.totalorder %v10088_v61, 4  ;;  %vm5164_vm14 = vcmp.eq.s32.totalorder %v5159_v51, 2 }
 0x505   :  { %v5148_v32 = vadd.f32 1.0, %v5147_v8  ;;  %v5155_v44 = vadd.f32 1.0, %v5154_v11  ;;  %v4806_v28 = vsub.s32 %v4802_v39, %v4805_v33  ;;  %v3969_v42 = vsel %vm3961_vm1, %v10106_v63, %v10108_v38 }
 0x506   :  { %v3970_v39 = vsel %vm3964_vm6, %v3957_v27, 920167782  ;;  %v10123_v20 = vshll.u32 %v3937_v31, 8  ;;  %vm3963_vm2 = vcmp.lt.s32.totalorder %v10088_v61, 3  ;;  %vm3962_vm3 = vcmp.lt.s32.totalorder %v10088_v61, 2 }
 0x507   :  { %v5156_v24 = vmul.f32 %v5155_v44, %v5140_v50  ;;  %v5165_v17 = vxor.u32 2147483648, %v5148_v32  ;;  %vm4807_vm5 = vcmp.lt.s32.totalorder %v4806_v28, 0  ;;  %v4808_v16 = vsub.s32 0, %v4806_v28 }
 0x508   :  { %v949_v50 = vmul.f32 %v917_v36, %v7026_v49  ;;  %v3971_v25 = vsel %vm3963_vm2, %v10113_v54, %v3970_v39  ;;  %v3973_v5 = vsel %vm3961_vm1, %v10108_v38, %v10113_v54  ;;  %v3974_v40 = vsel %vm3964_vm6, %v3960_v45, 1326507024 }
 0x509   :  { %v5162_v57 = vxor.u32 2147483648, %v5156_v24  ;;  %v4809_v41 = vsel %vm4807_vm5, %v4808_v16, %v4806_v28  ;;  %v5166_v48 = vsel %vm5164_vm14, %v5165_v17, %v5156_v24  ;;  %v3972_v31 = vsel %vm3962_vm3, %v3969_v42, %v3971_v25 }
 0x50a   :  { %v4810_v34 = vclz %v4809_v41  ;;  %vm5157_vm11 = vweird.f32 %v9759_v2  ;;  %v3978_v13 = vand.u32 65535, %v10123_v20  ;;  %v3975_v23 = vsel %vm3963_vm2, %v3957_v27, %v3974_v40 }
 0x50b   :  { %v5163_v0 = vsel %vm5161_vm15, %v5148_v32, %v5162_v57  ;;  %v4002_v8 = vand.u32 65535, %v3972_v31  ;;  %v10146_v11 = vadd.f32 %v949_v50, %v7039_v4  ;;  %v3976_v2 = vsel %vm3962_vm3, %v3973_v5, %v3975_v23 }
 0x50c   :  { %v5167_v1 = vsel %vm5160_vm4, %v5163_v0, %v5166_v48  ;;  %v6089_v53 = vadd.s32 4294967294, %v4810_v34  ;;  %v4003_v51 = vshrl.u32 %v3972_v31, 16  ;;  %v3979_v27 = vshrl.u32 %v10123_v20, 16 }
 0x50d   :  { %v5168_v21 = vsel %vm5157_vm11, nan, %v5167_v1  ;;  %v3980_v43 = vand.u32 65535, %v3976_v2  ;;  %v3981_v32 = vshrl.u32 %v3976_v2, 16  ;;  %v4798_v44 = vadd.s32 %v10065_v52, %v10058_v7 }
 0x50e   :  { %v5973_v33 = vsel %vm5944_vm9, %v9699_v3, %v5168_v21  ;;  %vm6090_vm7 = vcmp.lt.s32.totalorder %v6089_v53, 0  ;;  %v4005_v45 = vmul.u32 %v4003_v51, %v3978_v13  ;;  %vm4706_vm13 = vcmp.lt.s32.totalorder %v9888_v47, 0 }
 0x50f   :  { %6006 = vst.msk [vmem:[%s11096_s1 + $0xd0] sm:$0xff] %vm5979_vm12, %v5973_v33  ;;  %v4813_v62 = vsel %vm6090_vm7, 0, %v6089_v53  ;;  %v3945_v24 = vshrl.u32 %v11268_v60, %v10077_v14  ;;  %v3983_v17 = vmul.u32 %v3981_v32, %v3978_v13  ;;  %v3984_v16 = vmul.u32 %v3980_v43, %v3979_v27 }
 0x510   :  { %v4814_v36 = vsub.s32 32, %v4813_v62  ;;  %v4818_v3 = vsub.s32 4294967266, %v4813_v62  ;;  %v5482_v42 = vand.u32 2139095040, %v10146_v11  ;;  %v4815_v39 = vshll.u32 %v4806_v28, %v4813_v62 }
 0x511   :  { %v4006_v50 = vmul.u32 %v4002_v8, %v3979_v27  ;;  %v4828_v48 = vsub.s32 4, %v10096_v37  ;;  %v3982_v34 = vmul.u32 %v3980_v43, %v3978_v13  ;;  %v3986_v7 = vshll.u32 %v3983_v17, 16 }
 0x512   :  { %v4816_v57 = vshrl.u32 %v4798_v44, %v4814_v36  ;;  %v4819_v41 = vadd.s32 127, %v4818_v3  ;;  %v4004_v52 = vmul.u32 %v4002_v8, %v3978_v13  ;;  %v3985_v31 = vmul.u32 %v3981_v32, %v3979_v27 }
 0x513   :  { %v4008_v5 = vshll.u32 %v4005_v45, 16  ;;  %vm10167_vm8 = vcmp.le.f32.partialorder %v4704_v30, 0.7853982  ;;  %v3988_v40 = vshll.u32 %v3984_v16, 16  ;;  %vm3990_vm15 = vc.u32 %v3982_v34, %v3986_v7 }
 0x514   :  { %v4817_v25 = vor.u32 %v4816_v57, %v4815_v39  ;;  %v4820_v0 = vshll.u32 %v4819_v41, 23  ;;  %v3992_v28 = vadd.s32 %v3986_v7, %v3982_v34  ;;  %v4007_v1 = vmul.u32 %v4003_v51, %v3979_v27 }
 0x515   :  { %v3991_v21 = vsel %vm3990_vm15, 1, %v11271_v9  ;;  %v4010_v23 = vshll.u32 %v4006_v50, 16  ;;  %vm4012_vm4 = vc.u32 %v4004_v52, %v4008_v5  ;;  %v4014_v33 = vadd.s32 %v4008_v5, %v4004_v52 }
 0x516   :  { %v4821_v53 = vor.u32 4788187, %v4820_v0  ;;  %v3993_v13 = vadd.s32 %v3991_v21, %v3985_v31  ;;  %vm3994_vm5 = vc.u32 %v3992_v28, %v3988_v40  ;;  %v4013_v8 = vsel %vm4012_vm4, 1, %v11271_v9 }
 0x517   :  { %v4824_v62 = vcvt.s32.f32 %v4817_v25  ;;  %v3995_v30 = vsel %vm3994_vm5, 1, %v11271_v9  ;;  %v4015_v43 = vadd.s32 %v4013_v8, %v4007_v1  ;;  %v3966_v32 = vsel %vm3964_vm6, %v10113_v54, 2102212464  ;;  %v838_v8 = vpop.permute.xlu0 %837 }
 0x518   :  { %v4822_v2 = vand.u32 2147483647, %v4821_v53  ;;  %v3987_v51 = vshrl.u32 %v3983_v17, 16  ;;  %v3997_v27 = vadd.s32 %v3995_v30, %v3993_v13  ;;  %vm4016_vm14 = vc.u32 %v4014_v33, %v4010_v23 }
 0x519   :  { %v4829_v36 = vsel %vm4706_vm13, %v4828_v48, %v10096_v37  ;;  %v4017_v3 = vsel %vm4016_vm14, 1, %v11271_v9  ;;  %v5483_v39 = vshrl.u32 %v5482_v42, 23  ;;  %v3989_v57 = vshrl.u32 %v3984_v16, 16 }
 0x51a   :  { %v4825_v44 = vmul.f32 %v4824_v62, %v4822_v2  ;;  %v3998_v41 = vadd.s32 %v3997_v27, %v3987_v51  ;;  %v4009_v34 = vshrl.u32 %v4005_v45, 16  ;;  %v4019_v7 = vadd.s32 %v4017_v3, %v4015_v43  ;;  %v11394_v51 = vld [vmem:[#allocation5_spill] sm:$0xff] }
 0x51b   :  { %v3965_v54 = vsel %vm3961_vm1, %v3945_v24, %v10106_v63  ;;  %v3967_v17 = vsel %vm3963_vm2, %v10108_v38, %v3966_v32  ;;  %v6103_v25 = vadd.s32 4294967169, %v5483_v39  ;;  %v4011_v37 = vshrl.u32 %v4006_v50, 16  ;;  %v11393_v32 = vld [vmem:[#allocation48_spill] sm:$0xff] }
 0x51c   :  { %v4826_v52 = vxor.u32 2147483648, %v4825_v44  ;;  %v10187_v0 = vadd.s32 %v3998_v41, %v3989_v57  ;;  %v4020_v48 = vadd.s32 %v4019_v7, %v4009_v34  ;;  %v5479_v42 = vand.u32 2147483647, %v10146_v11 }
 0x51d   :  { %v4831_v16 = vsel %vm10167_vm8, 0, %v4829_v36  ;;  %v10194_v31 = vadd.s32 %v4014_v33, %v4010_v23  ;;  %v5489_v63 = vadd.s32 1, %v6103_v25  ;;  %v3968_v24 = vsel %vm3962_vm3, %v3965_v54, %v3967_v17 }
 0x51e   :  { %v4827_v45 = vsel %vm4706_vm13, %v4826_v52, %v4825_v44  ;;  %v4021_v50 = vadd.s32 %v4020_v48, %v4011_v37  ;;  %v4848_v40 = vadd.s32 3, %v4831_v16  ;;  %v5486_v1 = vand.u32 8388607, %v5479_v42 }
 0x51f   :  { %v4830_v38 = vsel %vm10167_vm8, %v9888_v47, %v4827_v45  ;;  %vm4024_vm1 = vc.u32 %v10187_v0, %v10194_v31  ;;  %vm5490_vm6 = vcmp.gt.s32.totalorder %v5489_v63, 0  ;;  %v4022_v14 = vmul.u32 %v10123_v20, %v3968_v24 }
 0x520   :  { %v4832_v5 = vmul.f32 %v4830_v38, %v4830_v38  ;;  %v4025_v28 = vadd.s32 1, %v4021_v50  ;;  %v5491_v53 = vsel %vm5490_vm6, %v5489_v63, 0  ;;  %v4849_v43 = vand.u32 3, %v4848_v40 }
 0x521   :  { %v5493_v13 = vand.u32 31, %v5491_v53  ;;  %v11395_v27 = vsel %vm6681_vm10, %v11393_v32, %v11394_v51  ;;  %v5487_v39 = vor.u32 8388608, %v5486_v1  ;;  %v10217_v57 = vshrl.u32 %v5491_v53, 5 }
 0x522   :  { %v4833_v21 = vmul.f32 -0.001358992, %v4832_v5  ;;  %v4840_v23 = vmul.f32 -0.00019511016, %v4832_v5  ;;  %v4026_v61 = vsel %vm4024_vm1, %v4025_v28, %v4021_v50  ;;  %v10215_v44 = vsel %vm7006_vm0, %v838_v8, %v11395_v27 }
 0x523   :  { %v4027_v62 = vadd.s32 %v4026_v61, %v4022_v14  ;;  %v10206_v30 = vsub.s32 32, %v5493_v13  ;;  %v5496_v25 = vshll.u32 %v11268_v60, %v5493_v13  ;;  %vm4851_vm2 = vcmp.eq.s32.totalorder %v4849_v43, 0 }
 0x524   :  { %v4834_v33 = vadd.f32 0.041655596, %v4833_v21  ;;  %v4841_v2 = vadd.f32 0.008332121, %v4840_v23  ;;  %v5499_v37 = vshll.u32 %v11272_v58, %v5493_v13  ;;  %v5502_v48 = vshll.u32 %v11273_v46, %v5493_v13 }
 0x525   :  { %v4028_v3 = vadd.s32 536870912, %v4027_v62  ;;  %v5497_v41 = vshrl.u32 %v11272_v58, %v10206_v30  ;;  %v5500_v34 = vshrl.u32 %v11273_v46, %v10206_v30  ;;  %v5506_v7 = vshrl.u32 %v11275_v59, %v10206_v30 }
 0x526   :  { %v4835_v36 = vmul.f32 %v4834_v33, %v4832_v5  ;;  %v4842_v20 = vmul.f32 %v4841_v2, %v4832_v5  ;;  %v5503_v45 = vshrl.u32 %v11274_v55, %v10206_v30  ;;  %v5505_v16 = vshll.u32 %v11274_v55, %v5493_v13 }
 0x527   :  { %v10225_v17 = vshrl.u32 %v4028_v3, 30  ;;  %vm4850_vm3 = vcmp.lt.s32.totalorder %v4849_v43, 2  ;;  %v5508_v40 = vshll.u32 %v11275_v59, %v5493_v13  ;;  %v10235_v28 = vor.u32 %v5497_v41, %v5496_v25 }
 0x528   :  { %v4836_v52 = vadd.f32 -0.4999988, %v4835_v36  ;;  %v4843_v54 = vadd.f32 -0.16666654, %v4842_v20  ;;  %v10237_v1 = vor.u32 %v5500_v34, %v5499_v37  ;;  %v5507_v53 = vor.u32 %v5506_v7, %v5505_v16 }
 0x529   :  { %v4030_v50 = vshll.u32 %v10225_v17, 30  ;;  %v5509_v21 = vshrl.u32 %v11276_v29, %v10206_v30  ;;  %v915_v61 = vmul.f32 6.2831855, %v10215_v44  ;;  %v10242_v33 = vor.u32 %v5503_v45, %v5502_v48 }
 0x52a   :  { %v4837_v63 = vmul.f32 %v4836_v52, %v4832_v5  ;;  %v4844_v24 = vmul.f32 %v4843_v54, %v4832_v5  ;;  %vm5511_vm11 = vcmp.lt.s32.totalorder %v10217_v57, 1  ;;  %vm5514_vm7 = vcmp.lt.s32.totalorder %v10217_v57, 4 }
 0x52b   :  { %v4031_v8 = vsub.s32 %v4027_v62, %v4030_v50  ;;  %v5510_v5 = vor.u32 %v5509_v21, %v5508_v40  ;;  %vm4854_vm8 = vcmp.eq.s32.totalorder %v4849_v43, 2  ;;  %v5519_v51 = vsel %vm5511_vm11, %v10235_v28, %v10237_v1 }
 0x52c   :  { %v4838_v23 = vadd.f32 1.0, %v4837_v63  ;;  %v4845_v14 = vadd.f32 1.0, %v4844_v24  ;;  %v5520_v62 = vsel %vm5514_vm7, %v5507_v53, 920167782  ;;  %v10252_v27 = vshll.u32 %v5487_v39, 8 }
 0x52d   :  { %vm4032_vm13 = vcmp.lt.s32.totalorder %v4031_v8, 0  ;;  %v4033_v32 = vsub.s32 0, %v4031_v8  ;;  %vm5513_vm15 = vcmp.lt.s32.totalorder %v10217_v57, 3  ;;  %vm5512_vm4 = vcmp.lt.s32.totalorder %v10217_v57, 2 }
 0x52e   :  { %v4846_v13 = vmul.f32 %v4845_v14, %v4830_v38  ;;  %v4855_v2 = vxor.u32 2147483648, %v4838_v23  ;;  %v947_v38 = vmul.f32 %v915_v61, %v7026_v49  ;;  %v5521_v34 = vsel %vm5513_vm15, %v10242_v33, %v5520_v62 }
 0x52f   :  { %v4034_v20 = vsel %vm4032_vm13, %v4033_v32, %v4031_v8  ;;  %v5522_v39 = vsel %vm5512_vm4, %v5519_v51, %v5521_v34  ;;  %v5523_v52 = vsel %vm5511_vm11, %v10237_v1, %v10242_v33  ;;  %v5524_v54 = vsel %vm5514_vm7, %v5510_v5, 1326507024 }
 0x530   :  { %v4852_v36 = vxor.u32 2147483648, %v4846_v13  ;;  %v4856_v3 = vsel %vm4854_vm8, %v4855_v2, %v4846_v13  ;;  %v4035_v41 = vclz %v4034_v20  ;;  %vm4847_vm5 = vweird.f32 %v9888_v47 }
 0x531   :  { %v5528_v48 = vand.u32 65535, %v10252_v27  ;;  %v5525_v16 = vsel %vm5513_vm15, %v5507_v53, %v5524_v54  ;;  %v5552_v63 = vand.u32 65535, %v5522_v39  ;;  %v10275_v24 = vadd.f32 %v947_v38, %v7039_v4 }
 0x532   :  { %v4853_v7 = vsel %vm4851_vm2, %v4838_v23, %v4852_v36  ;;  %v6074_v37 = vadd.s32 4294967294, %v4035_v41  ;;  %v5526_v47 = vsel %vm5512_vm4, %v5523_v52, %v5525_v16  ;;  %v5553_v43 = vshrl.u32 %v5522_v39, 16 }
 0x533   :  { %v4857_v25 = vsel %vm4850_vm3, %v4853_v7, %v4856_v3  ;;  %v5529_v53 = vshrl.u32 %v10252_v27, 16  ;;  %v5530_v21 = vand.u32 65535, %v5526_v47  ;;  %v5531_v23 = vshrl.u32 %v5526_v47, 16 }
 0x534   :  { %v4858_v45 = vsel %vm4847_vm5, nan, %v4857_v25  ;;  %vm6075_vm14 = vcmp.lt.s32.totalorder %v6074_v37, 0  ;;  %v4023_v14 = vadd.s32 %v10194_v31, %v10187_v0  ;;  %v5555_v5 = vmul.u32 %v5553_v43, %v5528_v48 }
 0x535   :  { %v5971_v50 = vsel %vm5944_vm9, %v9828_v10, %v4858_v45  ;;  %v4038_v40 = vsel %vm6075_vm14, 0, %v6074_v37  ;;  %vm3931_vm1 = vcmp.lt.s32.totalorder %v10017_v26, 0  ;;  %v5495_v13 = vshrl.u32 %v11268_v60, %v10206_v30 }
 0x536   :  { %6004 = vst.msk [vmem:[%s11096_s1 + $0xc0] sm:$0xff] %vm5979_vm12, %v5971_v50  ;;  %v4039_v61 = vsub.s32 32, %v4038_v40  ;;  %v4043_v10 = vsub.s32 4294967266, %v4038_v40  ;;  %v5533_v2 = vmul.u32 %v5531_v23, %v5528_v48  ;;  %v5534_v32 = vmul.u32 %v5530_v21, %v5529_v53 }
 0x537   :  { %v5172_v51 = vand.u32 2139095040, %v10275_v24  ;;  %v4040_v62 = vshll.u32 %v4031_v8, %v4038_v40  ;;  %v5556_v38 = vmul.u32 %v5552_v63, %v5529_v53  ;;  %v4053_v3 = vsub.s32 4, %v10225_v17 }
 0x538   :  { %v4041_v36 = vshrl.u32 %v4023_v14, %v4039_v61  ;;  %v4044_v20 = vadd.s32 127, %v4043_v10  ;;  %v5532_v41 = vmul.u32 %v5530_v21, %v5528_v48  ;;  %v5536_v0 = vshll.u32 %v5533_v2, 16 }
 0x539   :  { %v5554_v31 = vmul.u32 %v5552_v63, %v5528_v48  ;;  %v5535_v39 = vmul.u32 %v5531_v23, %v5529_v53  ;;  %v5558_v52 = vshll.u32 %v5555_v5, 16  ;;  %vm10296_vm6 = vcmp.le.f32.partialorder %v3929_v22, 0.7853982 }
 0x53a   :  { %v4042_v34 = vor.u32 %v4041_v36, %v4040_v62  ;;  %v4045_v7 = vshll.u32 %v4044_v20, 23  ;;  %v5538_v54 = vshll.u32 %v5534_v32, 16  ;;  %vm5540_vm2 = vc.u32 %v5532_v41, %v5536_v0 }
 0x53b   :  { %v5542_v8 = vadd.s32 %v5536_v0, %v5532_v41  ;;  %v5557_v25 = vmul.u32 %v5553_v43, %v5529_v53  ;;  %v5541_v45 = vsel %vm5540_vm2, 1, %v11271_v9  ;;  %v5560_v16 = vshll.u32 %v5556_v38, 16 }
 0x53c   :  { %v4046_v37 = vor.u32 4788187, %v4045_v7  ;;  %vm5562_vm3 = vc.u32 %v5554_v31, %v5558_v52  ;;  %v5543_v48 = vadd.s32 %v5541_v45, %v5535_v39  ;;  %v5564_v50 = vadd.s32 %v5558_v52, %v5554_v31 }
 0x53d   :  { %vm5544_vm13 = vc.u32 %v5542_v8, %v5538_v54  ;;  %v5563_v63 = vsel %vm5562_vm3, 1, %v11271_v9  ;;  %v4049_v40 = vcvt.s32.f32 %v4042_v34  ;;  %v5516_v23 = vsel %vm5514_vm7, %v10242_v33, 2102212464 }
 0x53e   :  { %v4047_v47 = vand.u32 2147483647, %v4046_v37  ;;  %v5545_v22 = vsel %vm5544_vm13, 1, %v11271_v9  ;;  %v5565_v21 = vadd.s32 %v5563_v63, %v5557_v25  ;;  %v5537_v43 = vshrl.u32 %v5533_v2, 16  ;;  %v818_v63 = vpop.permute.xlu1 %817 }
 0x53f   :  { %v5547_v53 = vadd.s32 %v5545_v22, %v5543_v48  ;;  %vm5566_vm8 = vc.u32 %v5564_v50, %v5560_v16  ;;  %v4054_v61 = vsel %vm3931_vm1, %v4053_v3, %v10225_v17  ;;  %v5173_v62 = vshrl.u32 %v5172_v51, 23 }
 0x540   :  { %v4050_v14 = vmul.f32 %v4049_v40, %v4047_v47  ;;  %v5567_v10 = vsel %vm5566_vm8, 1, %v11271_v9  ;;  %v5539_v36 = vshrl.u32 %v5534_v32, 16  ;;  %v5559_v41 = vshrl.u32 %v5555_v5, 16 }
 0x541   :  { %v5548_v20 = vadd.s32 %v5547_v53, %v5537_v43  ;;  %v5569_v0 = vadd.s32 %v5567_v10, %v5565_v21  ;;  %v5515_v33 = vsel %vm5511_vm11, %v5495_v13, %v10235_v28  ;;  %v5517_v2 = vsel %vm5513_vm15, %v10237_v1, %v5516_v23  ;;  %v11398_v23 = vld [vmem:[#allocation11_spill] sm:$0xff]  ;;  %v11399_v43 = vld [vmem:[#allocation13_spill] sm:$0xff] }
 0x542   :  { %v4051_v31 = vxor.u32 2147483648, %v4050_v14  ;;  %v6097_v34 = vadd.s32 4294967169, %v5173_v62  ;;  %v5561_v17 = vshrl.u32 %v5556_v38, 16  ;;  %v5169_v51 = vand.u32 2147483647, %v10275_v24 }
 0x543   :  { %v10316_v7 = vadd.s32 %v5548_v20, %v5539_v36  ;;  %v5570_v3 = vadd.s32 %v5569_v0, %v5559_v41  ;;  %v4056_v32 = vsel %vm10296_vm6, 0, %v4054_v61  ;;  %v10323_v39 = vadd.s32 %v5564_v50, %v5560_v16 }
 0x544   :  { %v4052_v5 = vsel %vm3931_vm1, %v4051_v31, %v4050_v14  ;;  %v5179_v28 = vadd.s32 1, %v6097_v34  ;;  %v5518_v13 = vsel %vm5512_vm4, %v5515_v33, %v5517_v2  ;;  %v4073_v54 = vadd.s32 3, %v4056_v32 }
 0x545   :  { %v4055_v1 = vsel %vm10296_vm6, %v10017_v26, %v4052_v5  ;;  %v5571_v38 = vadd.s32 %v5570_v3, %v5561_v17  ;;  %vm5574_vm11 = vc.u32 %v10316_v7, %v10323_v39  ;;  %v5176_v25 = vand.u32 8388607, %v5169_v51 }
 0x546   :  { %v4057_v52 = vmul.f32 %v4055_v1, %v4055_v1  ;;  %vm5180_vm7 = vcmp.gt.s32.totalorder %v5179_v28, 0  ;;  %v5572_v30 = vmul.u32 %v10252_v27, %v5518_v13  ;;  %v4074_v21 = vand.u32 3, %v4073_v54 }
 0x547   :  { %v5575_v8 = vadd.s32 1, %v5571_v38  ;;  %v5181_v37 = vsel %vm5180_vm7, %v5179_v28, 0  ;;  %v11400_v53 = vsel %vm6681_vm10, %v11398_v23, %v11399_v43  ;;  %v5177_v62 = vor.u32 8388608, %v5176_v25 }
 0x548   :  { %v4058_v45 = vmul.f32 -0.001358992, %v4057_v52  ;;  %v4065_v16 = vmul.f32 -0.00019511016, %v4057_v52  ;;  %v5183_v48 = vand.u32 31, %v5181_v37  ;;  %v10344_v14 = vsel %vm7006_vm0, %v818_v63, %v11400_v53 }
 0x549   :  { %v5576_v57 = vsel %vm5574_vm11, %v5575_v8, %v5571_v38  ;;  %v10346_v36 = vshrl.u32 %v5181_v37, 5  ;;  %vm4076_vm15 = vcmp.eq.s32.totalorder %v4074_v21, 0  ;;  %vm4075_vm4 = vcmp.lt.s32.totalorder %v4074_v21, 2 }
 0x54a   :  { %v4059_v50 = vadd.f32 0.041655596, %v4058_v45  ;;  %v4066_v47 = vadd.f32 0.008332121, %v4065_v16  ;;  %v5577_v40 = vadd.s32 %v5576_v57, %v5572_v30  ;;  %v10335_v22 = vsub.s32 32, %v5183_v48 }
 0x54b   :  { %v5186_v34 = vshll.u32 %v11268_v60, %v5183_v48  ;;  %v5189_v17 = vshll.u32 %v11272_v58, %v5183_v48  ;;  %v5192_v3 = vshll.u32 %v11273_v46, %v5183_v48  ;;  %v5195_v32 = vshll.u32 %v11274_v55, %v5183_v48 }
 0x54c   :  { %v4060_v61 = vmul.f32 %v4059_v50, %v4057_v52  ;;  %v4067_v27 = vmul.f32 %v4066_v47, %v4057_v52  ;;  %v5578_v10 = vadd.s32 536870912, %v5577_v40  ;;  %v5187_v20 = vshrl.u32 %v11272_v58, %v10335_v22 }
 0x54d   :  { %v5190_v41 = vshrl.u32 %v11273_v46, %v10335_v22  ;;  %v5196_v0 = vshrl.u32 %v11275_v59, %v10335_v22  ;;  %v5193_v5 = vshrl.u32 %v11274_v55, %v10335_v22  ;;  %v5198_v54 = vshll.u32 %v11275_v59, %v5183_v48 }
 0x54e   :  { %v4061_v31 = vadd.f32 -0.4999988, %v4060_v61  ;;  %v4068_v33 = vadd.f32 -0.16666654, %v4067_v27  ;;  %v10354_v2 = vshrl.u32 %v5578_v10, 30  ;;  %v10364_v8 = vor.u32 %v5187_v20, %v5186_v34 }
 0x54f   :  { %v10366_v25 = vor.u32 %v5190_v41, %v5189_v17  ;;  %v5197_v37 = vor.u32 %v5196_v0, %v5195_v32  ;;  %v5199_v45 = vshrl.u32 %v11276_v29, %v10335_v22  ;;  %v910_v57 = vmul.f32 6.2831855, %v10344_v14 }
 0x550   :  { %v4062_v28 = vmul.f32 %v4061_v31, %v4057_v52  ;;  %v4069_v13 = vmul.f32 %v4068_v33, %v4057_v52  ;;  %v5580_v38 = vshll.u32 %v10354_v2, 30  ;;  %v10371_v50 = vor.u32 %v5193_v5, %v5192_v3 }
 0x551   :  { %v5200_v52 = vor.u32 %v5199_v45, %v5198_v54  ;;  %vm5201_vm5 = vcmp.lt.s32.totalorder %v10346_v36, 1  ;;  %vm5204_vm14 = vcmp.lt.s32.totalorder %v10346_v36, 4  ;;  %vm4079_vm6 = vcmp.eq.s32.totalorder %v4074_v21, 2 }
 0x552   :  { %v4063_v16 = vadd.f32 1.0, %v4062_v28  ;;  %v4070_v30 = vadd.f32 1.0, %v4069_v13  ;;  %v5581_v63 = vsub.s32 %v5577_v40, %v5580_v38  ;;  %v5209_v43 = vsel %vm5201_vm5, %v10364_v8, %v10366_v25 }
 0x553   :  { %v5210_v40 = vsel %vm5204_vm14, %v5197_v37, 920167782  ;;  %v10381_v53 = vshll.u32 %v5177_v62, 8  ;;  %vm5203_vm2 = vcmp.lt.s32.totalorder %v10346_v36, 3  ;;  %vm5202_vm3 = vcmp.lt.s32.totalorder %v10346_v36, 2 }
 0x554   :  { %v4071_v48 = vmul.f32 %v4070_v30, %v4055_v1  ;;  %v4080_v47 = vxor.u32 2147483648, %v4063_v16  ;;  %vm5582_vm1 = vcmp.lt.s32.totalorder %v5581_v63, 0  ;;  %v5583_v23 = vsub.s32 0, %v5581_v63 }
 0x555   :  { %v942_v1 = vmul.f32 %v910_v57, %v7026_v49  ;;  %v5211_v41 = vsel %vm5203_vm2, %v10371_v50, %v5210_v40  ;;  %v5213_v31 = vsel %vm5201_vm5, %v10366_v25, %v10371_v50  ;;  %v5214_v33 = vsel %vm5204_vm14, %v5200_v52, 1326507024 }
 0x556   :  { %v4077_v61 = vxor.u32 2147483648, %v4071_v48  ;;  %v5584_v27 = vsel %vm5582_vm1, %v5583_v23, %v5581_v63  ;;  %v4081_v10 = vsel %vm4079_vm6, %v4080_v47, %v4071_v48  ;;  %v5212_v62 = vsel %vm5202_vm3, %v5209_v43, %v5211_v41 }
 0x557   :  { %v5585_v20 = vclz %v5584_v27  ;;  %vm4072_vm13 = vweird.f32 %v10017_v26  ;;  %v5218_v3 = vand.u32 65535, %v10381_v53  ;;  %v5215_v32 = vsel %vm5203_vm2, %v5197_v37, %v5214_v33 }
 0x558   :  { %v4078_v0 = vsel %vm4076_vm15, %v4063_v16, %v4077_v61  ;;  %v5242_v28 = vand.u32 65535, %v5212_v62  ;;  %v10404_v13 = vadd.f32 %v942_v1, %v7039_v4  ;;  %v5216_v26 = vsel %vm5202_vm3, %v5213_v31, %v5215_v32 }
 0x559   :  { %v4082_v34 = vsel %vm4075_vm4, %v4078_v0, %v4081_v10  ;;  %v6104_v17 = vadd.s32 4294967294, %v5585_v20  ;;  %v5243_v21 = vshrl.u32 %v5212_v62, 16  ;;  %v5219_v37 = vshrl.u32 %v10381_v53, 16 }
 0x55a   :  { %v4083_v5 = vsel %vm4072_vm13, nan, %v4082_v34  ;;  %v5220_v45 = vand.u32 65535, %v5216_v26  ;;  %v5221_v16 = vshrl.u32 %v5216_v26, 16  ;;  %v5573_v30 = vadd.s32 %v10323_v39, %v10316_v7 }
 0x55b   :  { %v5966_v38 = vsel %vm5944_vm9, %v9957_v35, %v4083_v5  ;;  %vm6105_vm8 = vcmp.lt.s32.totalorder %v6104_v17, 0  ;;  %v5245_v52 = vmul.u32 %v5243_v21, %v5218_v3  ;;  %vm5481_vm11 = vcmp.lt.s32.totalorder %v10146_v11, 0 }
 0x55c   :  { %5999 = vst.msk [vmem:[%s11096_s1 + $0x98] sm:$0xff] %vm5979_vm12, %v5966_v38  ;;  %v5588_v54 = vsel %vm6105_vm8, 0, %v6104_v17  ;;  %v5185_v48 = vshrl.u32 %v11268_v60, %v10335_v22  ;;  %v5223_v47 = vmul.u32 %v5221_v16, %v5218_v3  ;;  %v5224_v23 = vmul.u32 %v5220_v45, %v5219_v37 }
 0x55d   :  { %v5589_v57 = vsub.s32 32, %v5588_v54  ;;  %v5593_v35 = vsub.s32 4294967266, %v5588_v54  ;;  %v4397_v43 = vand.u32 2139095040, %v10404_v13  ;;  %v5590_v40 = vshll.u32 %v5581_v63, %v5588_v54 }
 0x55e   :  { %v5246_v1 = vmul.u32 %v5242_v28, %v5219_v37  ;;  %v5603_v10 = vsub.s32 4, %v10354_v2  ;;  %v5222_v20 = vmul.u32 %v5220_v45, %v5218_v3  ;;  %v5226_v7 = vshll.u32 %v5223_v47, 16 }
 0x55f   :  { %v5591_v61 = vshrl.u32 %v5573_v30, %v5589_v57  ;;  %v5594_v27 = vadd.s32 127, %v5593_v35  ;;  %v5244_v39 = vmul.u32 %v5242_v28, %v5218_v3  ;;  %v5225_v62 = vmul.u32 %v5221_v16, %v5219_v37 }
 0x560   :  { %v5248_v31 = vshll.u32 %v5245_v52, 16  ;;  %vm10425_vm7 = vcmp.le.f32.partialorder %v5479_v42, 0.7853982  ;;  %v5228_v33 = vshll.u32 %v5224_v23, 16  ;;  %vm5230_vm15 = vc.u32 %v5222_v20, %v5226_v7 }
 0x561   :  { %v5592_v41 = vor.u32 %v5591_v61, %v5590_v40  ;;  %v5595_v0 = vshll.u32 %v5594_v27, 23  ;;  %v5232_v63 = vadd.s32 %v5226_v7, %v5222_v20  ;;  %v5247_v34 = vmul.u32 %v5243_v21, %v5219_v37 }
 0x562   :  { %v5231_v5 = vsel %vm5230_vm15, 1, %v11271_v9  ;;  %v5250_v32 = vshll.u32 %v5246_v1, 16  ;;  %vm5252_vm4 = vc.u32 %v5244_v39, %v5248_v31  ;;  %v5254_v38 = vadd.s32 %v5248_v31, %v5244_v39 }
 0x563   :  { %v5596_v17 = vor.u32 4788187, %v5595_v0  ;;  %v5233_v3 = vadd.s32 %v5231_v5, %v5225_v62  ;;  %vm5234_vm1 = vc.u32 %v5232_v63, %v5228_v33  ;;  %v5253_v28 = vsel %vm5252_vm4, 1, %v11271_v9 }
 0x564   :  { %v5599_v54 = vcvt.s32.f32 %v5592_v41  ;;  %v5235_v42 = vsel %vm5234_vm1, 1, %v11271_v9  ;;  %v5255_v45 = vadd.s32 %v5253_v28, %v5247_v34  ;;  %v5206_v16 = vsel %vm5204_vm14, %v10371_v50, 2102212464  ;;  %v850_v28 = vpop.permute.xlu0 %849 }
 0x565   :  { %v5597_v26 = vand.u32 2147483647, %v5596_v17  ;;  %v5227_v21 = vshrl.u32 %v5223_v47, 16  ;;  %v5237_v37 = vadd.s32 %v5235_v42, %v5233_v3  ;;  %vm5256_vm6 = vc.u32 %v5254_v38, %v5250_v32 }
 0x566   :  { %v5604_v57 = vsel %vm5481_vm11, %v5603_v10, %v10354_v2  ;;  %v5257_v35 = vsel %vm5256_vm6, 1, %v11271_v9  ;;  %v4398_v40 = vshrl.u32 %v4397_v43, 23  ;;  %v5229_v61 = vshrl.u32 %v5224_v23, 16 }
 0x567   :  { %v5600_v30 = vmul.f32 %v5599_v54, %v5597_v26  ;;  %v5238_v27 = vadd.s32 %v5237_v37, %v5227_v21  ;;  %v5249_v20 = vshrl.u32 %v5245_v52, 16  ;;  %v5259_v7 = vadd.s32 %v5257_v35, %v5255_v45  ;;  %v11404_v21 = vld [vmem:[#allocation14_spill] sm:$0xff] }
 0x568   :  { %v5205_v50 = vsel %vm5201_vm5, %v5185_v48, %v10364_v8  ;;  %v5207_v47 = vsel %vm5203_vm2, %v10366_v25, %v5206_v16  ;;  %v6082_v41 = vadd.s32 4294967169, %v4398_v40  ;;  %v5251_v2 = vshrl.u32 %v5246_v1, 16  ;;  %v11403_v16 = vld [vmem:[#allocation50_spill] sm:$0xff] }
 0x569   :  { %v5601_v39 = vxor.u32 2147483648, %v5600_v30  ;;  %v10445_v0 = vadd.s32 %v5238_v27, %v5229_v61  ;;  %v5260_v10 = vadd.s32 %v5259_v7, %v5249_v20  ;;  %v4394_v43 = vand.u32 2147483647, %v10404_v13 }
 0x56a   :  { %v5606_v23 = vsel %vm10425_vm7, 0, %v5604_v57  ;;  %v10452_v62 = vadd.s32 %v5254_v38, %v5250_v32  ;;  %v4404_v8 = vadd.s32 1, %v6082_v41  ;;  %v5208_v48 = vsel %vm5202_vm3, %v5205_v50, %v5207_v47 }
 0x56b   :  { %v5602_v52 = vsel %vm5481_vm11, %v5601_v39, %v5600_v30  ;;  %v5261_v1 = vadd.s32 %v5260_v10, %v5251_v2  ;;  %v5623_v33 = vadd.s32 3, %v5606_v23  ;;  %v4401_v34 = vand.u32 8388607, %v4394_v43 }
 0x56c   :  { %v5605_v25 = vsel %vm10425_vm7, %v10146_v11, %v5602_v52  ;;  %vm5264_vm5 = vc.u32 %v10445_v0, %v10452_v62  ;;  %vm4405_vm14 = vcmp.gt.s32.totalorder %v4404_v8, 0  ;;  %v5262_v22 = vmul.u32 %v10381_v53, %v5208_v48 }
 0x56d   :  { %v5607_v31 = vmul.f32 %v5605_v25, %v5605_v25  ;;  %v5265_v63 = vadd.s32 1, %v5261_v1  ;;  %v4406_v17 = vsel %vm4405_vm14, %v4404_v8, 0  ;;  %v5624_v45 = vand.u32 3, %v5623_v33 }
 0x56e   :  { %v4408_v3 = vand.u32 31, %v4406_v17  ;;  %v11405_v37 = vsel %vm6681_vm10, %v11403_v16, %v11404_v21  ;;  %v4402_v40 = vor.u32 8388608, %v4401_v34  ;;  %v10475_v61 = vshrl.u32 %v4406_v17, 5 }
 0x56f   :  { %v5608_v5 = vmul.f32 -0.001358992, %v5607_v31  ;;  %v5615_v32 = vmul.f32 -0.00019511016, %v5607_v31  ;;  %v5266_v36 = vsel %vm5264_vm5, %v5265_v63, %v5261_v1  ;;  %v10473_v30 = vsel %vm7006_vm0, %v850_v28, %v11405_v37 }
 0x570   :  { %v5267_v54 = vadd.s32 %v5266_v36, %v5262_v22  ;;  %v10464_v42 = vsub.s32 32, %v4408_v3  ;;  %v4411_v41 = vshll.u32 %v11268_v60, %v4408_v3  ;;  %vm5626_vm2 = vcmp.eq.s32.totalorder %v5624_v45, 0 }
 0x571   :  { %v5609_v38 = vadd.f32 0.041655596, %v5608_v5  ;;  %v5616_v26 = vadd.f32 0.008332121, %v5615_v32  ;;  %v4414_v2 = vshll.u32 %v11272_v58, %v4408_v3  ;;  %v4417_v10 = vshll.u32 %v11273_v46, %v4408_v3 }
 0x572   :  { %v5268_v35 = vadd.s32 536870912, %v5267_v54  ;;  %v4412_v27 = vshrl.u32 %v11272_v58, %v10464_v42  ;;  %v4415_v20 = vshrl.u32 %v11273_v46, %v10464_v42  ;;  %v4421_v7 = vshrl.u32 %v11275_v59, %v10464_v42 }
 0x573   :  { %v5610_v57 = vmul.f32 %v5609_v38, %v5607_v31  ;;  %v5617_v53 = vmul.f32 %v5616_v26, %v5607_v31  ;;  %v4418_v52 = vshrl.u32 %v11274_v55, %v10464_v42  ;;  %v4420_v23 = vshll.u32 %v11274_v55, %v4408_v3 }
 0x574   :  { %v10483_v47 = vshrl.u32 %v5268_v35, 30  ;;  %vm5625_vm3 = vcmp.lt.s32.totalorder %v5624_v45, 2  ;;  %v4423_v33 = vshll.u32 %v11275_v59, %v4408_v3  ;;  %v10493_v63 = vor.u32 %v4412_v27, %v4411_v41 }
 0x575   :  { %v5611_v39 = vadd.f32 -0.4999988, %v5610_v57  ;;  %v5618_v50 = vadd.f32 -0.16666654, %v5617_v53  ;;  %v10495_v34 = vor.u32 %v4415_v20, %v4414_v2  ;;  %v4422_v17 = vor.u32 %v4421_v7, %v4420_v23 }
 0x576   :  { %v5270_v1 = vshll.u32 %v10483_v47, 30  ;;  %v4424_v5 = vshrl.u32 %v11276_v29, %v10464_v42  ;;  %v918_v36 = vmul.f32 6.2831855, %v10473_v30  ;;  %v10500_v38 = vor.u32 %v4418_v52, %v4417_v10 }
 0x577   :  { %v5612_v8 = vmul.f32 %v5611_v39, %v5607_v31  ;;  %v5619_v48 = vmul.f32 %v5618_v50, %v5607_v31  ;;  %vm4426_vm13 = vcmp.lt.s32.totalorder %v10475_v61, 1  ;;  %vm4429_vm8 = vcmp.lt.s32.totalorder %v10475_v61, 4 }
 0x578   :  { %v5271_v28 = vsub.s32 %v5267_v54, %v5270_v1  ;;  %v4425_v31 = vor.u32 %v4424_v5, %v4423_v33  ;;  %vm5629_vm7 = vcmp.eq.s32.totalorder %v5624_v45, 2  ;;  %v4434_v21 = vsel %vm4426_vm13, %v10493_v63, %v10495_v34 }
 0x579   :  { %v5613_v32 = vadd.f32 1.0, %v5612_v8  ;;  %v5620_v22 = vadd.f32 1.0, %v5619_v48  ;;  %v4435_v54 = vsel %vm4429_vm8, %v4422_v17, 920167782  ;;  %v10510_v37 = vshll.u32 %v4402_v40, 8 }
 0x57a   :  { %vm5272_vm11 = vcmp.lt.s32.totalorder %v5271_v28, 0  ;;  %v5273_v16 = vsub.s32 0, %v5271_v28  ;;  %vm4428_vm15 = vcmp.lt.s32.totalorder %v10475_v61, 3  ;;  %vm4427_vm4 = vcmp.lt.s32.totalorder %v10475_v61, 2 }
 0x57b   :  { %v5621_v3 = vmul.f32 %v5620_v22, %v5605_v25  ;;  %v5630_v26 = vxor.u32 2147483648, %v5613_v32  ;;  %v950_v25 = vmul.f32 %v918_v36, %v7026_v49  ;;  %v4436_v20 = vsel %vm4428_vm15, %v10500_v38, %v4435_v54 }
 0x57c   :  { %v5274_v53 = vsel %vm5272_vm11, %v5273_v16, %v5271_v28  ;;  %v4437_v40 = vsel %vm4427_vm4, %v4434_v21, %v4436_v20  ;;  %v4438_v39 = vsel %vm4426_vm13, %v10495_v34, %v10500_v38  ;;  %v4439_v50 = vsel %vm4429_vm8, %v4425_v31, 1326507024 }
 0x57d   :  { %v5627_v57 = vxor.u32 2147483648, %v5621_v3  ;;  %v5631_v35 = vsel %vm5629_vm7, %v5630_v26, %v5621_v3  ;;  %v5275_v27 = vclz %v5274_v53  ;;  %vm5622_vm1 = vweird.f32 %v10146_v11 }
 0x57e   :  { %v4443_v10 = vand.u32 65535, %v10510_v37  ;;  %v4440_v23 = vsel %vm4428_vm15, %v4422_v17, %v4439_v50  ;;  %v4467_v8 = vand.u32 65535, %v4437_v40  ;;  %v10533_v48 = vadd.f32 %v950_v25, %v7039_v4 }
 0x57f   :  { %v5628_v7 = vsel %vm5626_vm2, %v5613_v32, %v5627_v57  ;;  %v6098_v2 = vadd.s32 4294967294, %v5275_v27  ;;  %v4441_v11 = vsel %vm4427_vm4, %v4438_v39, %v4440_v23  ;;  %v4468_v45 = vshrl.u32 %v4437_v40, 16 }
 0x580   :  { %v5632_v41 = vsel %vm5625_vm3, %v5628_v7, %v5631_v35  ;;  %v4444_v17 = vshrl.u32 %v10510_v37, 16  ;;  %v4445_v5 = vand.u32 65535, %v4441_v11  ;;  %v4446_v32 = vshrl.u32 %v4441_v11, 16 }
 0x581   :  { %v5633_v52 = vsel %vm5622_vm1, nan, %v5632_v41  ;;  %vm6099_vm6 = vcmp.lt.s32.totalorder %v6098_v2, 0  ;;  %v5263_v22 = vadd.s32 %v10452_v62, %v10445_v0  ;;  %v4470_v31 = vmul.u32 %v4468_v45, %v4443_v10 }
 0x582   :  { %v5976_v1 = vsel %vm5944_vm9, %v10086_v12, %v5633_v52  ;;  %v5278_v33 = vsel %vm6099_vm6, 0, %v6098_v2  ;;  %vm5171_vm5 = vcmp.lt.s32.totalorder %v10275_v24, 0  ;;  %v4410_v3 = vshrl.u32 %v11268_v60, %v10464_v42 }
 0x583   :  { %6009 = vst.msk [vmem:[%s11096_s1 + $0xe8] sm:$0xff] %vm5979_vm12, %v5976_v1  ;;  %v5279_v36 = vsub.s32 32, %v5278_v33  ;;  %v5283_v12 = vsub.s32 4294967266, %v5278_v33  ;;  %v4448_v26 = vmul.u32 %v4446_v32, %v4443_v10  ;;  %v4449_v16 = vmul.u32 %v4445_v5, %v4444_v17 }
 0x584   :  { %v5637_v21 = vand.u32 2139095040, %v10533_v48  ;;  %v5280_v54 = vshll.u32 %v5271_v28, %v5278_v33  ;;  %v4471_v25 = vmul.u32 %v4467_v8, %v4444_v17  ;;  %v5293_v35 = vsub.s32 4, %v10483_v47 }
 0x585   :  { %v5281_v57 = vshrl.u32 %v5263_v22, %v5279_v36  ;;  %v5284_v53 = vadd.s32 127, %v5283_v12  ;;  %v4447_v27 = vmul.u32 %v4445_v5, %v4443_v10  ;;  %v4451_v0 = vshll.u32 %v4448_v26, 16 }
 0x586   :  { %v4469_v62 = vmul.u32 %v4467_v8, %v4443_v10  ;;  %v4450_v40 = vmul.u32 %v4446_v32, %v4444_v17  ;;  %v4473_v39 = vshll.u32 %v4470_v31, 16  ;;  %vm10554_vm14 = vcmp.le.f32.partialorder %v5169_v51, 0.7853982 }
 0x587   :  { %v5282_v20 = vor.u32 %v5281_v57, %v5280_v54  ;;  %v5285_v7 = vshll.u32 %v5284_v53, 23  ;;  %v4453_v50 = vshll.u32 %v4449_v16, 16  ;;  %vm4455_vm2 = vc.u32 %v4447_v27, %v4451_v0 }
 0x588   :  { %v4457_v28 = vadd.s32 %v4451_v0, %v4447_v27  ;;  %v4472_v41 = vmul.u32 %v4468_v45, %v4444_v17  ;;  %v4456_v52 = vsel %vm4455_vm2, 1, %v11271_v9  ;;  %v4475_v23 = vshll.u32 %v4471_v25, 16 }
 0x589   :  { %v5286_v2 = vor.u32 4788187, %v5285_v7  ;;  %vm4477_vm3 = vc.u32 %v4469_v62, %v4473_v39  ;;  %v4458_v10 = vadd.s32 %v4456_v52, %v4450_v40  ;;  %v4479_v1 = vadd.s32 %v4473_v39, %v4469_v62 }
 0x58a   :  { %vm4459_vm11 = vc.u32 %v4457_v28, %v4453_v50  ;;  %v4478_v8 = vsel %vm4477_vm3, 1, %v11271_v9  ;;  %v5289_v33 = vcvt.s32.f32 %v5282_v20  ;;  %v4431_v32 = vsel %vm4429_vm8, %v10500_v38, 2102212464 }
 0x58b   :  { %v5287_v11 = vand.u32 2147483647, %v5286_v2  ;;  %v4460_v51 = vsel %vm4459_vm11, 1, %v11271_v9  ;;  %v4480_v5 = vadd.s32 %v4478_v8, %v4472_v41  ;;  %v4452_v45 = vshrl.u32 %v4448_v26, 16  ;;  %v830_v8 = vpop.permute.xlu1 %829 }
 0x58c   :  { %v4462_v17 = vadd.s32 %v4460_v51, %v4458_v10  ;;  %vm4481_vm7 = vc.u32 %v4479_v1, %v4475_v23  ;;  %v5294_v36 = vsel %vm5171_vm5, %v5293_v35, %v10483_v47  ;;  %v5638_v54 = vshrl.u32 %v5637_v21, 23 }
 0x58d   :  { %v5290_v22 = vmul.f32 %v5289_v33, %v5287_v11  ;;  %v4482_v12 = vsel %vm4481_vm7, 1, %v11271_v9  ;;  %v4454_v57 = vshrl.u32 %v4449_v16, 16  ;;  %v4474_v27 = vshrl.u32 %v4470_v31, 16 }
 0x58e   :  { %v4463_v53 = vadd.s32 %v4462_v17, %v4452_v45  ;;  %v4484_v0 = vadd.s32 %v4482_v12, %v4480_v5  ;;  %v4430_v38 = vsel %vm4426_vm13, %v4410_v3, %v10493_v63  ;;  %v4432_v26 = vsel %vm4428_vm15, %v10495_v34, %v4431_v32  ;;  %v11408_v32 = vld [vmem:[#allocation49_spill] sm:$0xff]  ;;  %v11409_v45 = vld [vmem:[#allocation12_spill] sm:$0xff] }
 0x58f   :  { %v5291_v62 = vxor.u32 2147483648, %v5290_v22  ;;  %v6106_v20 = vadd.s32 4294967169, %v5638_v54  ;;  %v4476_v47 = vshrl.u32 %v4471_v25, 16  ;;  %v5634_v21 = vand.u32 2147483647, %v10533_v48 }
 0x590   :  { %v10574_v7 = vadd.s32 %v4463_v53, %v4454_v57  ;;  %v4485_v35 = vadd.s32 %v4484_v0, %v4474_v27  ;;  %v5296_v16 = vsel %vm10554_vm14, 0, %v5294_v36  ;;  %v10581_v40 = vadd.s32 %v4479_v1, %v4475_v23 }
 0x591   :  { %v5292_v31 = vsel %vm5171_vm5, %v5291_v62, %v5290_v22  ;;  %v5644_v63 = vadd.s32 1, %v6106_v20  ;;  %v4433_v3 = vsel %vm4427_vm4, %v4430_v38, %v4432_v26  ;;  %v5313_v50 = vadd.s32 3, %v5296_v16 }
 0x592   :  { %v5295_v34 = vsel %vm10554_vm14, %v10275_v24, %v5292_v31  ;;  %v4486_v25 = vadd.s32 %v4485_v35, %v4476_v47  ;;  %vm4489_vm13 = vc.u32 %v10574_v7, %v10581_v40  ;;  %v5641_v41 = vand.u32 8388607, %v5634_v21 }
 0x593   :  { %v5297_v39 = vmul.f32 %v5295_v34, %v5295_v34  ;;  %vm5645_vm8 = vcmp.gt.s32.totalorder %v5644_v63, 0  ;;  %v4487_v42 = vmul.u32 %v10510_v37, %v4433_v3  ;;  %v5314_v5 = vand.u32 3, %v5313_v50 }
 0x594   :  { %v4490_v28 = vadd.s32 1, %v4486_v25  ;;  %v5646_v2 = vsel %vm5645_vm8, %v5644_v63, 0  ;;  %v11410_v17 = vsel %vm6681_vm10, %v11408_v32, %v11409_v45  ;;  %v5642_v54 = vor.u32 8388608, %v5641_v41 }
 0x595   :  { %v5298_v52 = vmul.f32 -0.001358992, %v5297_v39  ;;  %v5305_v23 = vmul.f32 -0.00019511016, %v5297_v39  ;;  %v5648_v10 = vand.u32 31, %v5646_v2  ;;  %v10602_v22 = vsel %vm7006_vm0, %v830_v8, %v11410_v17 }
 0x596   :  { %v4491_v61 = vsel %vm4489_vm13, %v4490_v28, %v4486_v25  ;;  %v10604_v57 = vshrl.u32 %v5646_v2, 5  ;;  %vm5316_vm15 = vcmp.eq.s32.totalorder %v5314_v5, 0  ;;  %vm5315_vm4 = vcmp.lt.s32.totalorder %v5314_v5, 2 }
 0x597   :  { %v5299_v1 = vadd.f32 0.041655596, %v5298_v52  ;;  %v5306_v11 = vadd.f32 0.008332121, %v5305_v23  ;;  %v4492_v33 = vadd.s32 %v4491_v61, %v4487_v42  ;;  %v10593_v51 = vsub.s32 32, %v5648_v10 }
 0x598   :  { %v5651_v20 = vshll.u32 %v11268_v60, %v5648_v10  ;;  %v5654_v47 = vshll.u32 %v11272_v58, %v5648_v10  ;;  %v5657_v35 = vshll.u32 %v11273_v46, %v5648_v10  ;;  %v5660_v16 = vshll.u32 %v11274_v55, %v5648_v10 }
 0x599   :  { %v5300_v36 = vmul.f32 %v5299_v1, %v5297_v39  ;;  %v5307_v37 = vmul.f32 %v5306_v11, %v5297_v39  ;;  %v4493_v12 = vadd.s32 536870912, %v4492_v33  ;;  %v5652_v53 = vshrl.u32 %v11272_v58, %v10593_v51 }
 0x59a   :  { %v5655_v27 = vshrl.u32 %v11273_v46, %v10593_v51  ;;  %v5661_v0 = vshrl.u32 %v11275_v59, %v10593_v51  ;;  %v5658_v31 = vshrl.u32 %v11274_v55, %v10593_v51  ;;  %v5663_v50 = vshll.u32 %v11275_v59, %v5648_v10 }
 0x59b   :  { %v5301_v62 = vadd.f32 -0.4999988, %v5300_v36  ;;  %v5308_v38 = vadd.f32 -0.16666654, %v5307_v37  ;;  %v10612_v26 = vshrl.u32 %v4493_v12, 30  ;;  %v10622_v28 = vor.u32 %v5652_v53, %v5651_v20 }
 0x59c   :  { %v10624_v41 = vor.u32 %v5655_v27, %v5654_v47  ;;  %v5662_v2 = vor.u32 %v5661_v0, %v5660_v16  ;;  %v5664_v52 = vshrl.u32 %v11276_v29, %v10593_v51  ;;  %v913_v61 = vmul.f32 6.2831855, %v10602_v22 }
 0x59d   :  { %v5302_v63 = vmul.f32 %v5301_v62, %v5297_v39  ;;  %v5309_v3 = vmul.f32 %v5308_v38, %v5297_v39  ;;  %v4495_v25 = vshll.u32 %v10612_v26, 30  ;;  %v10629_v1 = vor.u32 %v5658_v31, %v5657_v35 }
 0x59e   :  { %v5665_v39 = vor.u32 %v5664_v52, %v5663_v50  ;;  %vm5666_vm1 = vcmp.lt.s32.totalorder %v10604_v57, 1  ;;  %vm5669_vm6 = vcmp.lt.s32.totalorder %v10604_v57, 4  ;;  %vm5319_vm14 = vcmp.eq.s32.totalorder %v5314_v5, 2 }
 0x59f   :  { %v5303_v23 = vadd.f32 1.0, %v5302_v63  ;;  %v5310_v42 = vadd.f32 1.0, %v5309_v3  ;;  %v4496_v8 = vsub.s32 %v4492_v33, %v4495_v25  ;;  %v5674_v45 = vsel %vm5666_vm1, %v10622_v28, %v10624_v41 }
 0x5a0   :  { %v5675_v33 = vsel %vm5669_vm6, %v5662_v2, 920167782  ;;  %v10639_v17 = vshll.u32 %v5642_v54, 8  ;;  %vm5668_vm2 = vcmp.lt.s32.totalorder %v10604_v57, 3  ;;  %vm5667_vm3 = vcmp.lt.s32.totalorder %v10604_v57, 2  ;;  %v11413_v57 = vld [vmem:[#allocation8_spill] sm:$0xff] }
 0x5a1   :  { %v5311_v10 = vmul.f32 %v5310_v42, %v5295_v34  ;;  %v5320_v11 = vxor.u32 2147483648, %v5303_v23  ;;  %vm4497_vm5 = vcmp.lt.s32.totalorder %v4496_v8, 0  ;;  %v4498_v32 = vsub.s32 0, %v4496_v8 }
 0x5a2   :  { %v945_v34 = vmul.f32 %v913_v61, %v7026_v49  ;;  %v5676_v27 = vsel %vm5668_vm2, %v10629_v1, %v5675_v33  ;;  %v5678_v62 = vsel %vm5666_vm1, %v10624_v41, %v10629_v1  ;;  %v5679_v38 = vsel %vm5669_vm6, %v5665_v39, 1326507024 }
 0x5a3   :  { %v5317_v36 = vxor.u32 2147483648, %v5311_v10  ;;  %v4499_v37 = vsel %vm4497_vm5, %v4498_v32, %v4496_v8  ;;  %v5321_v12 = vsel %vm5319_vm14, %v5320_v11, %v5311_v10  ;;  %v5677_v54 = vsel %vm5667_vm3, %v5674_v45, %v5676_v27 }
 0x5a4   :  { %v4500_v53 = vclz %v4499_v37  ;;  %vm5312_vm11 = vweird.f32 %v10275_v24  ;;  %v5683_v35 = vand.u32 65535, %v10639_v17  ;;  %v5680_v16 = vsel %vm5668_vm2, %v5662_v2, %v5679_v38 }
 0x5a5   :  { %v5318_v0 = vsel %vm5316_vm15, %v5303_v23, %v5317_v36  ;;  %v5707_v63 = vand.u32 65535, %v5677_v54  ;;  %v10662_v3 = vadd.f32 %v945_v34, %v7039_v4  ;;  %v5681_v24 = vsel %vm5667_vm3, %v5678_v62, %v5680_v16 }
 0x5a6   :  { %v5322_v20 = vsel %vm5315_vm4, %v5318_v0, %v5321_v12  ;;  %v6083_v47 = vadd.s32 4294967294, %v4500_v53  ;;  %v5708_v5 = vshrl.u32 %v5677_v54, 16  ;;  %v5684_v2 = vshrl.u32 %v10639_v17, 16 }
 0x5a7   :  { %v5323_v31 = vsel %vm5312_vm11, nan, %v5322_v20  ;;  %v5685_v52 = vand.u32 65535, %v5681_v24  ;;  %v5686_v23 = vshrl.u32 %v5681_v24, 16  ;;  %v4488_v42 = vadd.s32 %v10581_v40, %v10574_v7 }
 0x5a8   :  { %v5974_v25 = vsel %vm5944_vm9, %v10215_v44, %v5323_v31  ;;  %vm6084_vm7 = vcmp.lt.s32.totalorder %v6083_v47, 0  ;;  %v5710_v39 = vmul.u32 %v5708_v5, %v5683_v35  ;;  %vm4396_vm13 = vcmp.lt.s32.totalorder %v10404_v13, 0 }
 0x5a9   :  { %6007 = vst.msk [vmem:[%s11096_s1 + $0xd8] sm:$0xff] %vm5979_vm12, %v5974_v25  ;;  %v4503_v50 = vsel %vm6084_vm7, 0, %v6083_v47  ;;  %v5650_v10 = vshrl.u32 %v11268_v60, %v10593_v51  ;;  %v5688_v11 = vmul.u32 %v5686_v23, %v5683_v35  ;;  %v5689_v32 = vmul.u32 %v5685_v52, %v5684_v2 }
 0x5aa   :  { %v4504_v61 = vsub.s32 32, %v4503_v50  ;;  %v4508_v44 = vsub.s32 4294967266, %v4503_v50  ;;  %v4862_v45 = vand.u32 2139095040, %v10662_v3  ;;  %v4505_v33 = vshll.u32 %v4496_v8, %v4503_v50 }
 0x5ab   :  { %v5711_v34 = vmul.u32 %v5707_v63, %v5684_v2  ;;  %v4518_v12 = vsub.s32 4, %v10612_v26  ;;  %v5687_v53 = vmul.u32 %v5685_v52, %v5683_v35  ;;  %v5691_v7 = vshll.u32 %v5688_v11, 16 }
 0x5ac   :  { %v4506_v36 = vshrl.u32 %v4488_v42, %v4504_v61  ;;  %v4509_v37 = vadd.s32 127, %v4508_v44  ;;  %v5709_v40 = vmul.u32 %v5707_v63, %v5683_v35  ;;  %v5690_v54 = vmul.u32 %v5686_v23, %v5684_v2 }
 0x5ad   :  { %v5713_v62 = vshll.u32 %v5710_v39, 16  ;;  %vm10683_vm8 = vcmp.le.f32.partialorder %v4394_v43, 0.7853982  ;;  %v5693_v38 = vshll.u32 %v5689_v32, 16  ;;  %vm5695_vm15 = vc.u32 %v5687_v53, %v5691_v7 }
 0x5ae   :  { %v4507_v27 = vor.u32 %v4506_v36, %v4505_v33  ;;  %v4510_v0 = vshll.u32 %v4509_v37, 23  ;;  %v5697_v8 = vadd.s32 %v5691_v7, %v5687_v53  ;;  %v5712_v20 = vmul.u32 %v5708_v5, %v5684_v2 }
 0x5af   :  { %v5696_v31 = vsel %vm5695_vm15, 1, %v11271_v9  ;;  %v5715_v16 = vshll.u32 %v5711_v34, 16  ;;  %vm5717_vm4 = vc.u32 %v5709_v40, %v5713_v62  ;;  %v5719_v25 = vadd.s32 %v5713_v62, %v5709_v40 }
 0x5b0   :  { %v4511_v47 = vor.u32 4788187, %v4510_v0  ;;  %v5698_v35 = vadd.s32 %v5696_v31, %v5690_v54  ;;  %vm5699_vm5 = vc.u32 %v5697_v8, %v5693_v38  ;;  %v5718_v63 = vsel %vm5717_vm4, 1, %v11271_v9 }
 0x5b1   :  { %v4514_v50 = vcvt.s32.f32 %v4507_v27  ;;  %v5700_v43 = vsel %vm5699_vm5, 1, %v11271_v9  ;;  %v5720_v52 = vadd.s32 %v5718_v63, %v5712_v20  ;;  %v5671_v23 = vsel %vm5669_vm6, %v10629_v1, 2102212464  ;;  %v842_v63 = vpop.permute.xlu1 %841 }
 0x5b2   :  { %v4512_v24 = vand.u32 2147483647, %v4511_v47  ;;  %v5692_v5 = vshrl.u32 %v5688_v11, 16  ;;  %v5702_v2 = vadd.s32 %v5700_v43, %v5698_v35  ;;  %vm5721_vm14 = vc.u32 %v5719_v25, %v5715_v16 }
 0x5b3   :  { %v4519_v61 = vsel %vm4396_vm13, %v4518_v12, %v10612_v26  ;;  %v5722_v44 = vsel %vm5721_vm14, 1, %v11271_v9  ;;  %v4863_v33 = vshrl.u32 %v4862_v45, 23  ;;  %v5694_v36 = vshrl.u32 %v5689_v32, 16 }
 0x5b4   :  { %v4515_v42 = vmul.f32 %v4514_v50, %v4512_v24  ;;  %v5703_v37 = vadd.s32 %v5702_v2, %v5692_v5  ;;  %v5714_v53 = vshrl.u32 %v5710_v39, 16  ;;  %v5724_v7 = vadd.s32 %v5722_v44, %v5720_v52 }
 0x5b5   :  { %v5670_v1 = vsel %vm5666_vm1, %v5650_v10, %v10622_v28  ;;  %v5672_v11 = vsel %vm5668_vm2, %v10624_v41, %v5671_v23  ;;  %v6091_v27 = vadd.s32 4294967169, %v4863_v33  ;;  %v5716_v26 = vshrl.u32 %v5711_v34, 16 }
 0x5b6   :  { %v4516_v40 = vxor.u32 2147483648, %v4515_v42  ;;  %v10703_v0 = vadd.s32 %v5703_v37, %v5694_v36  ;;  %v5725_v12 = vadd.s32 %v5724_v7, %v5714_v53  ;;  %v4859_v45 = vand.u32 2147483647, %v10662_v3 }
 0x5b7   :  { %v4521_v32 = vsel %vm10683_vm8, 0, %v4519_v61  ;;  %v10710_v54 = vadd.s32 %v5719_v25, %v5715_v16  ;;  %v4869_v28 = vadd.s32 1, %v6091_v27  ;;  %v5673_v10 = vsel %vm5667_vm3, %v5670_v1, %v5672_v11  ;;  %v11414_v25 = vld [vmem:[#allocation53_spill] sm:$0xff] }
 0x5b8   :  { %v4517_v39 = vsel %vm4396_vm13, %v4516_v40, %v4515_v42  ;;  %v5726_v34 = vadd.s32 %v5725_v12, %v5716_v26  ;;  %v4538_v38 = vadd.s32 3, %v4521_v32  ;;  %v4866_v20 = vand.u32 8388607, %v4859_v45 }
 0x5b9   :  { %v4520_v41 = vsel %vm10683_vm8, %v10404_v13, %v4517_v39  ;;  %vm5729_vm1 = vc.u32 %v10703_v0, %v10710_v54  ;;  %vm4870_vm6 = vcmp.gt.s32.totalorder %v4869_v28, 0  ;;  %v5727_v51 = vmul.u32 %v10639_v17, %v5673_v10 }
 0x5ba   :  { %v4522_v62 = vmul.f32 %v4520_v41, %v4520_v41  ;;  %v5730_v8 = vadd.s32 1, %v5726_v34  ;;  %v4871_v47 = vsel %vm4870_vm6, %v4869_v28, 0  ;;  %v714_v24 = vsel %vm6681_vm10, %v11414_v25, %v11413_v57 }
 0x5bb   :  { %v4873_v35 = vand.u32 31, %v4871_v47  ;;  %v4539_v2 = vand.u32 3, %v4538_v38  ;;  %v10730_v42 = vsel %vm7006_vm0, %v842_v63, %v714_v24  ;;  %v4867_v33 = vor.u32 8388608, %v4866_v20 }
 0x5bc   :  { %v4523_v31 = vmul.f32 -0.001358992, %v4522_v62  ;;  %v4530_v16 = vmul.f32 -0.00019511016, %v4522_v62  ;;  %v5731_v50 = vsel %vm5729_vm1, %v5730_v8, %v5726_v34  ;;  %v10732_v36 = vshrl.u32 %v4871_v47, 5 }
 0x5bd   :  { %v5732_v23 = vadd.s32 %v5731_v50, %v5727_v51  ;;  %v10726_v5 = vsub.s32 32, %v4873_v35  ;;  %v4876_v27 = vshll.u32 %v11268_v60, %v4873_v35  ;;  %vm4541_vm2 = vcmp.eq.s32.totalorder %v4539_v2, 0 }
 0x5be   :  { %v4524_v43 = vadd.f32 0.041655596, %v4523_v31  ;;  %v4531_v52 = vadd.f32 0.008332121, %v4530_v16  ;;  %v4879_v26 = vshll.u32 %v11272_v58, %v4873_v35  ;;  %v4882_v12 = vshll.u32 %v11273_v46, %v4873_v35 }
 0x5bf   :  { %v5733_v44 = vadd.s32 536870912, %v5732_v23  ;;  %v4877_v37 = vshrl.u32 %v11272_v58, %v10726_v5  ;;  %v4880_v53 = vshrl.u32 %v11273_v46, %v10726_v5  ;;  %v4886_v7 = vshrl.u32 %v11275_v59, %v10726_v5 }
 0x5c0   :  { %v4525_v61 = vmul.f32 %v4524_v43, %v4522_v62  ;;  %v4532_v17 = vmul.f32 %v4531_v52, %v4522_v62  ;;  %v4883_v39 = vshrl.u32 %v11274_v55, %v10726_v5  ;;  %v4885_v32 = vshll.u32 %v11274_v55, %v4873_v35 }
 0x5c1   :  { %v10740_v11 = vshrl.u32 %v5733_v44, 30  ;;  %vm4540_vm3 = vcmp.lt.s32.totalorder %v4539_v2, 2  ;;  %v4888_v38 = vshll.u32 %v11275_v59, %v4873_v35  ;;  %v10750_v8 = vor.u32 %v4877_v37, %v4876_v27 }
 0x5c2   :  { %v4526_v40 = vadd.f32 -0.4999988, %v4525_v61  ;;  %v4533_v1 = vadd.f32 -0.16666654, %v4532_v17  ;;  %v10752_v20 = vor.u32 %v4880_v53, %v4879_v26  ;;  %v4887_v47 = vor.u32 %v4886_v7, %v4885_v32 }
 0x5c3   :  { %v5735_v34 = vshll.u32 %v10740_v11, 30  ;;  %v4889_v31 = vshrl.u32 %v11276_v29, %v10726_v5  ;;  %v916_v57 = vmul.f32 6.2831855, %v10730_v42  ;;  %v10757_v25 = vor.u32 %v4883_v39, %v4882_v12 }
 0x5c4   :  { %v4527_v28 = vmul.f32 %v4526_v40, %v4522_v62  ;;  %v4534_v10 = vmul.f32 %v4533_v1, %v4522_v62  ;;  %vm4891_vm11 = vcmp.lt.s32.totalorder %v10732_v36, 1  ;;  %vm4894_vm7 = vcmp.lt.s32.totalorder %v10732_v36, 4 }
 0x5c5   :  { %v5736_v63 = vsub.s32 %v5732_v23, %v5735_v34  ;;  %v4890_v62 = vor.u32 %v4889_v31, %v4888_v38  ;;  %vm4544_vm8 = vcmp.eq.s32.totalorder %v4539_v2, 2  ;;  %v4899_v43 = vsel %vm4891_vm11, %v10750_v8, %v10752_v20 }
 0x5c6   :  { %v4528_v16 = vadd.f32 1.0, %v4527_v28  ;;  %v4535_v51 = vadd.f32 1.0, %v4534_v10  ;;  %v4900_v52 = vsel %vm4894_vm7, %v4887_v47, 920167782  ;;  %v10767_v23 = vshll.u32 %v4867_v33, 8 }
 0x5c7   :  { %vm5737_vm13 = vcmp.lt.s32.totalorder %v5736_v63, 0  ;;  %v5738_v50 = vsub.s32 0, %v5736_v63  ;;  %vm4893_vm15 = vcmp.lt.s32.totalorder %v10732_v36, 3  ;;  %vm4892_vm4 = vcmp.lt.s32.totalorder %v10732_v36, 2 }
 0x5c8   :  { %v4536_v35 = vmul.f32 %v4535_v51, %v4520_v41  ;;  %v4545_v24 = vxor.u32 2147483648, %v4528_v16  ;;  %v948_v41 = vmul.f32 %v916_v57, %v7026_v49  ;;  %v4901_v53 = vsel %vm4893_vm15, %v10757_v25, %v4900_v52 }
 0x5c9   :  { %v5739_v17 = vsel %vm5737_vm13, %v5738_v50, %v5736_v63  ;;  %v4902_v33 = vsel %vm4892_vm4, %v4899_v43, %v4901_v53  ;;  %v4903_v40 = vsel %vm4891_vm11, %v10752_v20, %v10757_v25  ;;  %v4904_v1 = vsel %vm4894_vm7, %v4890_v62, 1326507024 }
 0x5ca   :  { %v4542_v61 = vxor.u32 2147483648, %v4536_v35  ;;  %v4546_v44 = vsel %vm4544_vm8, %v4545_v24, %v4536_v35  ;;  %v5740_v37 = vclz %v5739_v17  ;;  %vm4537_vm5 = vweird.f32 %v10404_v13 }
 0x5cb   :  { %v4908_v12 = vand.u32 65535, %v10767_v23  ;;  %v4905_v32 = vsel %vm4893_vm15, %v4887_v47, %v4904_v1  ;;  %v4932_v28 = vand.u32 65535, %v4902_v33  ;;  %v10790_v10 = vadd.f32 %v948_v41, %v7039_v4 }
 0x5cc   :  { %v4543_v7 = vsel %vm4541_vm2, %v4528_v16, %v4542_v61  ;;  %v6107_v26 = vadd.s32 4294967294, %v5740_v37  ;;  %v4906_v13 = vsel %vm4892_vm4, %v4903_v40, %v4905_v32  ;;  %v4933_v2 = vshrl.u32 %v4902_v33, 16 }
 0x5cd   :  { %v4547_v27 = vsel %vm4540_vm3, %v4543_v7, %v4546_v44  ;;  %v4909_v47 = vshrl.u32 %v10767_v23, 16  ;;  %v4910_v31 = vand.u32 65535, %v4906_v13  ;;  %v4911_v16 = vshrl.u32 %v4906_v13, 16 }
 0x5ce   :  { %v4548_v39 = vsel %vm4537_vm5, nan, %v4547_v27  ;;  %vm6108_vm14 = vcmp.lt.s32.totalorder %v6107_v26, 0  ;;  %v5728_v51 = vadd.s32 %v10710_v54, %v10703_v0  ;;  %v4935_v62 = vmul.u32 %v4933_v2, %v4908_v12 }
 0x5cf   :  { %v5969_v34 = vsel %vm5944_vm9, %v10344_v14, %v4548_v39  ;;  %v5743_v38 = vsel %vm6108_vm14, 0, %v6107_v26  ;;  %vm5636_vm1 = vcmp.lt.s32.totalorder %v10533_v48, 0  ;;  %v4875_v35 = vshrl.u32 %v11268_v60, %v10726_v5 }
 0x5d0   :  { %6002 = vst.msk [vmem:[%s11096_s1 + $0xb0] sm:$0xff] %vm5979_vm12, %v5969_v34  ;;  %v5744_v57 = vsub.s32 32, %v5743_v38  ;;  %v5748_v14 = vsub.s32 4294967266, %v5743_v38  ;;  %v4913_v24 = vmul.u32 %v4911_v16, %v4908_v12  ;;  %v4914_v50 = vmul.u32 %v4910_v31, %v4909_v47 }
 0x5d1   :  { %v5327_v43 = vand.u32 2139095040, %v10790_v10  ;;  %v5745_v52 = vshll.u32 %v5736_v63, %v5743_v38  ;;  %v4936_v41 = vmul.u32 %v4932_v28, %v4909_v47  ;;  %v5758_v44 = vsub.s32 4, %v10740_v11 }
 0x5d2   :  { %v5746_v61 = vshrl.u32 %v5728_v51, %v5744_v57  ;;  %v5749_v17 = vadd.s32 127, %v5748_v14  ;;  %v4912_v37 = vmul.u32 %v4910_v31, %v4908_v12  ;;  %v4916_v0 = vshll.u32 %v4913_v24, 16 }
 0x5d3   :  { %v4934_v54 = vmul.u32 %v4932_v28, %v4908_v12  ;;  %v4915_v33 = vmul.u32 %v4911_v16, %v4909_v47  ;;  %v4938_v40 = vshll.u32 %v4935_v62, 16  ;;  %vm10811_vm6 = vcmp.le.f32.partialorder %v5634_v21, 0.7853982 }
 0x5d4   :  { %v5747_v53 = vor.u32 %v5746_v61, %v5745_v52  ;;  %v5750_v7 = vshll.u32 %v5749_v17, 23  ;;  %v4918_v1 = vshll.u32 %v4914_v50, 16  ;;  %vm4920_vm2 = vc.u32 %v4912_v37, %v4916_v0 }
 0x5d5   :  { %v4922_v63 = vadd.s32 %v4916_v0, %v4912_v37  ;;  %v4937_v27 = vmul.u32 %v4933_v2, %v4909_v47  ;;  %v4921_v39 = vsel %vm4920_vm2, 1, %v11271_v9  ;;  %v4940_v32 = vshll.u32 %v4936_v41, 16 }
 0x5d6   :  { %v5751_v26 = vor.u32 4788187, %v5750_v7  ;;  %vm4942_vm3 = vc.u32 %v4934_v54, %v4938_v40  ;;  %v4923_v12 = vadd.s32 %v4921_v39, %v4915_v33  ;;  %v4944_v34 = vadd.s32 %v4938_v40, %v4934_v54 }
 0x5d7   :  { %vm4924_vm13 = vc.u32 %v4922_v63, %v4918_v1  ;;  %v4943_v28 = vsel %vm4942_vm3, 1, %v11271_v9  ;;  %v5754_v38 = vcvt.s32.f32 %v5747_v53  ;;  %v4896_v16 = vsel %vm4894_vm7, %v10757_v25, 2102212464 }
 0x5d8   :  { %v5752_v13 = vand.u32 2147483647, %v5751_v26  ;;  %v4925_v21 = vsel %vm4924_vm13, 1, %v11271_v9  ;;  %v4945_v31 = vadd.s32 %v4943_v28, %v4937_v27  ;;  %v4917_v2 = vshrl.u32 %v4913_v24, 16  ;;  %v854_v28 = vpop.permute.xlu1 %853 }
 0x5d9   :  { %v4927_v47 = vadd.s32 %v4925_v21, %v4923_v12  ;;  %vm4946_vm8 = vc.u32 %v4944_v34, %v4940_v32  ;;  %v5759_v57 = vsel %vm5636_vm1, %v5758_v44, %v10740_v11  ;;  %v5328_v52 = vshrl.u32 %v5327_v43, 23 }
 0x5da   :  { %v5755_v51 = vmul.f32 %v5754_v38, %v5752_v13  ;;  %v4947_v14 = vsel %vm4946_vm8, 1, %v11271_v9  ;;  %v4919_v61 = vshrl.u32 %v4914_v50, 16  ;;  %v4939_v37 = vshrl.u32 %v4935_v62, 16 }
 0x5db   :  { %v4928_v17 = vadd.s32 %v4927_v47, %v4917_v2  ;;  %v4949_v0 = vadd.s32 %v4947_v14, %v4945_v31  ;;  %v4895_v25 = vsel %vm4891_vm11, %v4875_v35, %v10750_v8  ;;  %v4897_v24 = vsel %vm4893_vm15, %v10752_v20, %v4896_v16 }
 0x5dc   :  { %v5756_v54 = vxor.u32 2147483648, %v5755_v51  ;;  %v6100_v53 = vadd.s32 4294967169, %v5328_v52  ;;  %v4941_v11 = vshrl.u32 %v4936_v41, 16  ;;  %v5324_v43 = vand.u32 2147483647, %v10790_v10 }
 0x5dd   :  { %v10831_v7 = vadd.s32 %v4928_v17, %v4919_v61  ;;  %v4950_v44 = vadd.s32 %v4949_v0, %v4939_v37  ;;  %v5761_v50 = vsel %vm10811_vm6, 0, %v5759_v57  ;;  %v10838_v33 = vadd.s32 %v4944_v34, %v4940_v32 }
 0x5de   :  { %v5757_v62 = vsel %vm5636_vm1, %v5756_v54, %v5755_v51  ;;  %v5334_v8 = vadd.s32 1, %v6100_v53  ;;  %v4898_v35 = vsel %vm4892_vm4, %v4895_v25, %v4897_v24  ;;  %v5778_v1 = vadd.s32 3, %v5761_v50 }
 0x5df   :  { %v5760_v20 = vsel %vm10811_vm6, %v10533_v48, %v5757_v62  ;;  %v4951_v41 = vadd.s32 %v4950_v44, %v4941_v11  ;;  %vm4954_vm11 = vc.u32 %v10831_v7, %v10838_v33  ;;  %v5331_v27 = vand.u32 8388607, %v5324_v43 }
 0x5e0   :  { %v5762_v40 = vmul.f32 %v5760_v20, %v5760_v20  ;;  %vm5335_vm7 = vcmp.gt.s32.totalorder %v5334_v8, 0  ;;  %v4952_v5 = vmul.u32 %v10767_v23, %v4898_v35  ;;  %v5779_v31 = vand.u32 3, %v5778_v1 }
 0x5e1   :  { %v4955_v63 = vadd.s32 1, %v4951_v41  ;;  %v5336_v26 = vsel %vm5335_vm7, %v5334_v8, 0  ;;  %v11417_v16 = vsel %vm6681_vm10, %v7354_v18, %v6795_v15  ;;  %v5332_v57 = vor.u32 8388608, %v5331_v27 }
 0x5e2   :  { %v5763_v39 = vmul.f32 -0.001358992, %v5762_v40  ;;  %v5770_v32 = vmul.f32 -0.00019511016, %v5762_v40  ;;  %v5338_v12 = vand.u32 31, %v5336_v26  ;;  %v10859_v2 = vsel %vm7006_vm0, %v854_v28, %v11417_v16 }
 0x5e3   :  { %v4956_v36 = vsel %vm4954_vm11, %v4955_v63, %v4951_v41  ;;  %v10861_v14 = vshrl.u32 %v5336_v26, 5  ;;  %vm5781_vm10 = vcmp.eq.s32.totalorder %v5779_v31, 0  ;;  %vm5780_vm0 = vcmp.lt.s32.totalorder %v5779_v31, 2 }
 0x5e4   :  { %v5764_v34 = vadd.f32 0.041655596, %v5763_v39  ;;  %v5771_v13 = vadd.f32 0.008332121, %v5770_v32  ;;  %v4957_v38 = vadd.s32 %v4956_v36, %v4952_v5  ;;  %v10850_v21 = vsub.s32 32, %v5338_v12 }
 0x5e5   :  { %v5341_v17 = vshll.u32 %v11268_v60, %v5338_v12  ;;  %v5344_v37 = vshll.u32 %v11272_v58, %v5338_v12  ;;  %v5347_v0 = vshll.u32 %v11273_v46, %v5338_v12  ;;  %v5350_v25 = vshll.u32 %v11274_v55, %v5338_v12 }
 0x5e6   :  { %v5765_v47 = vmul.f32 %v5764_v34, %v5762_v40  ;;  %v5772_v23 = vmul.f32 %v5771_v13, %v5762_v40  ;;  %v4958_v51 = vadd.s32 536870912, %v4957_v38  ;;  %v5342_v52 = vshrl.u32 %v11272_v58, %v10850_v21 }
 0x5e7   :  { %v5345_v61 = vshrl.u32 %v11273_v46, %v10850_v21  ;;  %v5351_v6 = vshrl.u32 %v11275_v59, %v10850_v21  ;;  %v5348_v54 = vshrl.u32 %v11274_v55, %v10850_v21  ;;  %v5353_v44 = vshll.u32 %v11275_v59, %v5338_v12 }
 0x5e8   :  { %v5766_v15 = vadd.f32 -0.4999988, %v5765_v47  ;;  %v5773_v18 = vadd.f32 -0.16666654, %v5772_v23  ;;  %v10869_v19 = vshrl.u32 %v4958_v51, 30  ;;  %v10879_v62 = vor.u32 %v5342_v52, %v5341_v17 }
 0x5e9   :  { %v10881_v50 = vor.u32 %v5345_v61, %v5344_v37  ;;  %v5352_v8 = vor.u32 %v5351_v6, %v5350_v25  ;;  %v5354_v35 = vshrl.u32 %v11276_v29, %v10850_v21  ;;  %v919_v27 = vmul.f32 6.2831855, %v10859_v2 }
 0x5ea   :  { %v5767_v24 = vmul.f32 %v5766_v15, %v5762_v40  ;;  %v5774_v53 = vmul.f32 %v5773_v18, %v5762_v40  ;;  %v4960_v11 = vshll.u32 %v10869_v19, 30  ;;  %v10886_v26 = vor.u32 %v5348_v54, %v5347_v0 }
 0x5eb   :  { %v5355_v40 = vor.u32 %v5354_v35, %v5353_v44  ;;  %vm5356_vm15 = vcmp.lt.s32.totalorder %v10861_v14, 1  ;;  %vm5359_vm4 = vcmp.lt.s32.totalorder %v10861_v14, 4  ;;  %vm5784_vm14 = vcmp.eq.s32.totalorder %v5779_v31, 2 }
 0x5ec   :  { %v5768_v41 = vadd.f32 1.0, %v5767_v24  ;;  %v5775_v1 = vadd.f32 1.0, %v5774_v53  ;;  %v4961_v63 = vsub.s32 %v4957_v38, %v4960_v11  ;;  %v5364_v12 = vsel %vm5356_vm15, %v10879_v62, %v10881_v50 }
 0x5ed   :  { %v5365_v28 = vsel %vm5359_vm4, %v5352_v8, 920167782  ;;  %v10896_v36 = vshll.u32 %v5332_v57, 8  ;;  %vm5358_vm1 = vcmp.lt.s32.totalorder %v10861_v14, 3  ;;  %vm5357_vm6 = vcmp.lt.s32.totalorder %v10861_v14, 2 }
 0x5ee   :  { %v5776_v39 = vmul.f32 %v5775_v1, %v5760_v20  ;;  %v5785_v32 = vxor.u32 2147483648, %v5768_v41  ;;  %vm4962_vm5 = vcmp.lt.s32.totalorder %v4961_v63, 0  ;;  %v4963_v5 = vsub.s32 0, %v4961_v63 }
 0x5ef   :  { %v951_v20 = vmul.f32 %v919_v27, %v7026_v49  ;;  %v5366_v47 = vsel %vm5358_vm1, %v10886_v26, %v5365_v28  ;;  %v5368_v57 = vsel %vm5356_vm15, %v10881_v50, %v10886_v26  ;;  %v5369_v49 = vsel %vm5359_vm4, %v5355_v40, 1326507024 }
 0x5f0   :  { %v5782_v34 = vxor.u32 2147483648, %v5776_v39  ;;  %v4964_v13 = vsel %vm4962_vm5, %v4963_v5, %v4961_v63  ;;  %v5786_v38 = vsel %vm5784_vm14, %v5785_v32, %v5776_v39  ;;  %v5367_v51 = vsel %vm5357_vm6, %v5364_v12, %v5366_v47 }
 0x5f1   :  { %v4965_v16 = vclz %v4964_v13  ;;  %vm5777_vm2 = vweird.f32 %v10533_v48  ;;  %v5373_v6 = vand.u32 65535, %v10896_v36  ;;  %v5370_v18 = vsel %vm5358_vm1, %v5352_v8, %v5369_v49 }
 0x5f2   :  { %v5783_v23 = vsel %vm5781_vm10, %v5768_v41, %v5782_v34  ;;  %v5397_v17 = vand.u32 65535, %v5367_v51  ;;  %v10919_v37 = vadd.f32 %v951_v20, %v7039_v4  ;;  %v5371_v48 = vsel %vm5357_vm6, %v5368_v57, %v5370_v18 }
 0x5f3   :  { %v5787_v52 = vsel %vm5780_vm0, %v5783_v23, %v5786_v38  ;;  %v6092_v61 = vadd.s32 4294967294, %v4965_v16  ;;  %v5398_v31 = vshrl.u32 %v5367_v51, 16  ;;  %v5374_v25 = vshrl.u32 %v10896_v36, 16 }
 0x5f4   :  { %v5788_v15 = vsel %vm5777_vm2, nan, %v5787_v52  ;;  %v5375_v24 = vand.u32 65535, %v5371_v48  ;;  %v5376_v4 = vshrl.u32 %v5371_v48, 16  ;;  %v4953_v53 = vadd.s32 %v10838_v33, %v10831_v7 }
 0x5f5   :  { %v5977_v0 = vsel %vm5944_vm9, %v10473_v30, %v5788_v15  ;;  %vm6093_vm3 = vcmp.lt.s32.totalorder %v6092_v61, 0  ;;  %v5400_v44 = vmul.u32 %v5398_v31, %v5373_v6  ;;  %vm4861_vm13 = vcmp.lt.s32.totalorder %v10662_v3, 0 }
 0x5f6   :  { %6010 = vst.msk [vmem:[%s11096_s1 + $0xf0] sm:$0xff] %vm5979_vm12, %v5977_v0  ;;  %v4968_v54 = vsel %vm6093_vm3, 0, %v6092_v61  ;;  %v5340_v8 = vshrl.u32 %v11268_v60, %v10850_v21  ;;  %v5378_v35 = vmul.u32 %v5376_v4, %v5373_v6  ;;  %v5379_v41 = vmul.u32 %v5375_v24, %v5374_v25 }
 0x5f7   :  { %v4969_v11 = vsub.s32 32, %v4968_v54  ;;  %v4973_v30 = vsub.s32 4294967266, %v4968_v54  ;;  %v5792_v1 = vand.u32 2139095040, %v10919_v37  ;;  %v4970_v27 = vshll.u32 %v4961_v63, %v4968_v54 }
 0x5f8   :  { %v5401_v32 = vmul.u32 %v5397_v17, %v5374_v25  ;;  %v4983_v5 = vsub.s32 4, %v10869_v19  ;;  %v5377_v12 = vmul.u32 %v5375_v24, %v5373_v6  ;;  %v5381_v7 = vshll.u32 %v5378_v35, 16 }
 0x5f9   :  { %v4971_v40 = vshrl.u32 %v4953_v53, %v4969_v11  ;;  %v4974_v39 = vadd.s32 127, %v4973_v30  ;;  %v5399_v33 = vmul.u32 %v5397_v17, %v5373_v6  ;;  %v5380_v13 = vmul.u32 %v5376_v4, %v5374_v25 }
 0x5fa   :  { %v5403_v20 = vshll.u32 %v5400_v44, 16  ;;  %v5383_v38 = vshll.u32 %v5379_v41, 16  ;;  %vm5385_vm8 = vc.u32 %v5377_v12, %v5381_v7  ;;  %v5387_v21 = vadd.s32 %v5381_v7, %v5377_v12 }
 0x5fb   :  { %v4972_v28 = vor.u32 %v4971_v40, %v4970_v27  ;;  %v4975_v34 = vshll.u32 %v4974_v39, 23  ;;  %v5402_v16 = vmul.u32 %v5398_v31, %v5374_v25  ;;  %v5386_v23 = vsel %vm5385_vm8, 1, %v11271_v9 }
 0x5fc   :  { %v5405_v63 = vshll.u32 %v5401_v32, 16  ;;  %vm5407_vm11 = vc.u32 %v5399_v33, %v5403_v20  ;;  %v5388_v51 = vadd.s32 %v5386_v23, %v5380_v13  ;;  %vm5389_vm7 = vc.u32 %v5387_v21, %v5383_v38 }
 0x5fd   :  { %v4976_v47 = vor.u32 4788187, %v4975_v34  ;;  %v5408_v57 = vsel %vm5407_vm11, 1, %v11271_v9  ;;  %v5409_v49 = vadd.s32 %v5403_v20, %v5399_v33  ;;  %v4979_v61 = vcvt.s32.f32 %v4972_v28 }
 0x5fe   :  { %v5390_v6 = vsel %vm5389_vm7, 1, %v11271_v9  ;;  %v5410_v15 = vadd.s32 %v5408_v57, %v5402_v16  ;;  %v5361_v18 = vsel %vm5359_vm4, %v10886_v26, 2102212464  ;;  %v5382_v17 = vshrl.u32 %v5378_v35, 16 }
 0x5ff   :  { %v4977_v52 = vand.u32 2147483647, %v4976_v47  ;;  %v5392_v0 = vadd.s32 %v5390_v6, %v5388_v51  ;;  %vm5411_vm10 = vc.u32 %v5409_v49, %v5405_v63  ;;  %v4984_v31 = vsel %vm4861_vm13, %v4983_v5, %v10869_v19 }
 0x600   :  { %v5412_v54 = vsel %vm5411_vm10, 1, %v11271_v9  ;;  %v5793_v25 = vshrl.u32 %v5792_v1, 23  ;;  %v5384_v24 = vshrl.u32 %v5379_v41, 16  ;;  %v5404_v53 = vshrl.u32 %v5400_v44, 16 }
 0x601   :  { %v4980_v48 = vmul.f32 %v4979_v61, %v4977_v52  ;;  %v5393_v4 = vadd.s32 %v5392_v0, %v5382_v17  ;;  %v5414_v11 = vadd.s32 %v5412_v54, %v5410_v15  ;;  %v5360_v26 = vsel %vm5356_vm15, %v5340_v8, %v10879_v62 }
 0x602   :  { %v5362_v35 = vsel %vm5358_vm1, %v10881_v50, %v5361_v18  ;;  %v6109_v27 = vadd.s32 4294967169, %v5793_v25  ;;  %vm4860_vm0 = vcmp.le.f32.partialorder %v4859_v45, 0.7853982  ;;  %v5406_v1 = vshrl.u32 %v5401_v32, 16 }
 0x603   :  { %v4981_v30 = vxor.u32 2147483648, %v4980_v48  ;;  %v10956_v19 = vadd.s32 %v5393_v4, %v5384_v24  ;;  %v5415_v41 = vadd.s32 %v5414_v11, %v5404_v53  ;;  %v4986_v40 = vsel %vm4860_vm0, 0, %v4984_v31 }
 0x604   :  { %v10960_v39 = vadd.s32 %v5409_v49, %v5405_v63  ;;  %v5799_v5 = vadd.s32 1, %v6109_v27  ;;  %v5363_v50 = vsel %vm5357_vm6, %v5360_v26, %v5362_v35  ;;  %v5003_v45 = vadd.s32 3, %v4986_v40 }
 0x605   :  { %v4982_v44 = vsel %vm4861_vm13, %v4981_v30, %v4980_v48  ;;  %v5416_v8 = vadd.s32 %v5415_v41, %v5406_v1  ;;  %v5789_v7 = vand.u32 2147483647, %v10919_v37  ;;  %v5417_v13 = vmul.u32 %v10896_v36, %v5363_v50 }
 0x606   :  { %v4985_v62 = vsel %vm4860_vm0, %v10662_v3, %v4982_v44  ;;  %vm5419_vm15 = vc.u32 %v10956_v19, %v10960_v39  ;;  %vm5800_vm4 = vcmp.gt.s32.totalorder %v5799_v5, 0  ;;  %v5004_v23 = vand.u32 3, %v5003_v45 }
 0x607   :  { %v4987_v12 = vmul.f32 %v4985_v62, %v4985_v62  ;;  %v5420_v32 = vadd.s32 1, %v5416_v8  ;;  %v5801_v33 = vsel %vm5800_vm4, %v5799_v5, 0  ;;  %v5796_v49 = vand.u32 8388607, %v5789_v7 }
 0x608   :  { %v5803_v20 = vand.u32 31, %v5801_v33  ;;  %v10973_v52 = vshrl.u32 %v5801_v33, 5  ;;  %vm5005_vm5 = vcmp.lt.s32.totalorder %v5004_v23, 2  ;;  %vm5006_vm2 = vcmp.eq.s32.totalorder %v5004_v23, 0 }
 0x609   :  { %v4988_v28 = vmul.f32 -0.001358992, %v4987_v12  ;;  %v4995_v34 = vmul.f32 -0.00019511016, %v4987_v12  ;;  %v5421_v38 = vsel %vm5419_vm15, %v5420_v32, %v5416_v8  ;;  %v5797_v41 = vor.u32 8388608, %v5796_v49 }
 0x60a   :  { %v5422_v16 = vadd.s32 %v5421_v38, %v5417_v13  ;;  %v10969_v47 = vsub.s32 32, %v5803_v20  ;;  %v5806_v0 = vshll.u32 %v11268_v60, %v5803_v20  ;;  %v5809_v48 = vshll.u32 %v11272_v58, %v5803_v20 }
 0x60b   :  { %v4989_v21 = vadd.f32 0.041655596, %v4988_v28  ;;  %v4996_v14 = vadd.f32 0.008332121, %v4995_v34  ;;  %v5812_v31 = vshll.u32 %v11273_v46, %v5803_v20  ;;  %v5815_v25 = vshll.u32 %v11274_v55, %v5803_v20 }
 0x60c   :  { %v5423_v57 = vadd.s32 536870912, %v5422_v16  ;;  %v5807_v61 = vshrl.u32 %v11272_v58, %v10969_v47  ;;  %v5810_v36 = vshrl.u32 %v11273_v46, %v10969_v47  ;;  %v5816_v6 = vshrl.u32 %v11275_v59, %v10969_v47 }
 0x60d   :  { %v4990_v63 = vmul.f32 %v4989_v21, %v4987_v12  ;;  %v4997_v51 = vmul.f32 %v4996_v14, %v4987_v12  ;;  %v5813_v54 = vshrl.u32 %v11274_v55, %v10969_v47  ;;  %v5818_v11 = vshll.u32 %v11275_v59, %v5803_v20 }
 0x60e   :  { %v10981_v17 = vshrl.u32 %v5423_v57, 30  ;;  %v10991_v30 = vor.u32 %v5807_v61, %v5806_v0  ;;  %v10993_v26 = vor.u32 %v5810_v36, %v5809_v48  ;;  %v5817_v35 = vor.u32 %v5816_v6, %v5815_v25 }
 0x60f   :  { %v4991_v15 = vadd.f32 -0.4999988, %v4990_v63  ;;  %v4998_v18 = vadd.f32 -0.16666654, %v4997_v51  ;;  %v5819_v58 = vshrl.u32 %v11276_v29, %v10969_v47  ;;  %v10997_v55 = vor.u32 %v5813_v54, %v5812_v31 }
 0x610   :  { %v5425_v53 = vshll.u32 %v10981_v17, 30  ;;  %vm5821_vm14 = vcmp.lt.s32.totalorder %v10973_v52, 1  ;;  %vm5824_vm1 = vcmp.lt.s32.totalorder %v10973_v52, 4  ;;  %vm5009_vm3 = vcmp.eq.s32.totalorder %v5004_v23, 2 }
 0x611   :  { %v4992_v24 = vmul.f32 %v4991_v15, %v4987_v12  ;;  %v4999_v4 = vmul.f32 %v4998_v18, %v4987_v12  ;;  %v5820_v44 = vor.u32 %v5819_v58, %v5818_v11  ;;  %v5829_v29 = vsel %vm5821_vm14, %v10991_v30, %v10993_v26 }
 0x612   :  { %v5426_v1 = vsub.s32 %v5422_v16, %v5425_v53  ;;  %v5830_v50 = vsel %vm5824_vm1, %v5817_v35, 920167782  ;;  %vm5823_vm13 = vcmp.lt.s32.totalorder %v10973_v52, 3  ;;  %v11008_v45 = vshll.u32 %v5797_v41, 8 }
 0x613   :  { %v4993_v46 = vadd.f32 1.0, %v4992_v24  ;;  %v5000_v27 = vadd.f32 1.0, %v4999_v4  ;;  %vm5822_vm8 = vcmp.lt.s32.totalorder %v10973_v52, 2  ;;  %v5831_v33 = vsel %vm5823_vm13, %v10997_v55, %v5830_v50 }
 0x614   :  { %vm5427_vm6 = vcmp.lt.s32.totalorder %v5426_v1, 0  ;;  %v5428_v5 = vsub.s32 0, %v5426_v1  ;;  %v5832_v34 = vsel %vm5822_vm8, %v5829_v29, %v5831_v33  ;;  %v5833_v13 = vsel %vm5821_vm14, %v10993_v26, %v10997_v55 }
 0x615   :  { %v5001_v59 = vmul.f32 %v5000_v27, %v4985_v62  ;;  %v5010_v40 = vxor.u32 2147483648, %v4993_v46  ;;  %v5834_v20 = vsel %vm5824_vm1, %v5820_v44, 1326507024  ;;  %vm5002_vm11 = vweird.f32 %v10662_v3 }
 0x616   :  { %v5429_v12 = vsel %vm5427_vm6, %v5428_v5, %v5426_v1  ;;  %v5835_v16 = vsel %vm5823_vm13, %v5817_v35, %v5834_v20  ;;  %v5838_v63 = vand.u32 65535, %v11008_v45  ;;  %v5862_v51 = vand.u32 65535, %v5832_v34 }
 0x617   :  { %v5007_v8 = vxor.u32 2147483648, %v5001_v59  ;;  %v5011_v62 = vsel %vm5009_vm3, %v5010_v40, %v5001_v59  ;;  %v5430_v32 = vclz %v5429_v12  ;;  %v5836_v49 = vsel %vm5822_vm8, %v5833_v13, %v5835_v16 }
 0x618   :  { %v5863_v61 = vshrl.u32 %v5832_v34, 16  ;;  %v5839_v23 = vshrl.u32 %v11008_v45, 16  ;;  %v5840_v36 = vand.u32 65535, %v5836_v49  ;;  %v5841_v6 = vshrl.u32 %v5836_v49, 16 }
 0x619   :  { %v5008_v28 = vsel %vm5006_vm2, %v4993_v46, %v5007_v8  ;;  %v6101_v21 = vadd.s32 4294967294, %v5430_v32  ;;  %v5418_v15 = vadd.s32 %v10960_v39, %v10956_v19  ;;  %v5864_v35 = vmul.u32 %v5862_v51, %v5838_v63 }
 0x61a   :  { %v5012_v38 = vsel %vm5005_vm5, %v5008_v28, %v5011_v62  ;;  %v5865_v0 = vmul.u32 %v5863_v61, %v5838_v63  ;;  %v5843_v48 = vmul.u32 %v5841_v6, %v5838_v63  ;;  %v5844_v31 = vmul.u32 %v5840_v36, %v5839_v23 }
 0x61b   :  { %v5013_v14 = vsel %vm5002_vm11, nan, %v5012_v38  ;;  %vm6102_vm7 = vcmp.lt.s32.totalorder %v6101_v21, 0  ;;  %v5866_v4 = vmul.u32 %v5862_v51, %v5839_v23  ;;  %v5842_v53 = vmul.u32 %v5840_v36, %v5838_v63 }
 0x61c   :  { %v5972_v57 = vsel %vm5944_vm9, %v10602_v22, %v5013_v14  ;;  %v5433_v3 = vsel %vm6102_vm7, 0, %v6101_v21  ;;  %v5846_v11 = vshll.u32 %v5843_v48, 16  ;;  %v5845_v27 = vmul.u32 %v5841_v6, %v5839_v23 }
 0x61d   :  { %6005 = vst.msk [vmem:[%s11096_s1 + $0xc8] sm:$0xff] %vm5979_vm12, %v5972_v57  ;;  %v5434_v18 = vsub.s32 32, %v5433_v3  ;;  %v5438_v22 = vsub.s32 4294967266, %v5433_v3  ;;  %v5435_v54 = vshll.u32 %v5426_v1, %v5433_v3  ;;  %v5868_v41 = vshll.u32 %v5865_v0, 16 }
 0x61e   :  { %v5848_v44 = vshll.u32 %v5844_v31, 16  ;;  %vm5850_vm10 = vc.u32 %v5842_v53, %v5846_v11  ;;  %v5852_v59 = vadd.s32 %v5846_v11, %v5842_v53  ;;  %v5867_v19 = vmul.u32 %v5863_v61, %v5839_v23 }
 0x61f   :  { %v5436_v25 = vshrl.u32 %v5418_v15, %v5434_v18  ;;  %v5439_v24 = vadd.s32 127, %v5438_v22  ;;  %v5851_v40 = vsel %vm5850_vm10, 1, %v11271_v9  ;;  %v5870_v5 = vshll.u32 %v5866_v4, 16 }
 0x620   :  { %vm5872_vm0 = vc.u32 %v5864_v35, %v5868_v41  ;;  %v5853_v1 = vadd.s32 %v5851_v40, %v5845_v27  ;;  %vm5854_vm15 = vc.u32 %v5852_v59, %v5848_v44  ;;  %v5874_v50 = vadd.s32 %v5868_v41, %v5864_v35 }
 0x621   :  { %v5437_v58 = vor.u32 %v5436_v25, %v5435_v54  ;;  %v5440_v46 = vshll.u32 %v5439_v24, 23  ;;  %v5873_v29 = vsel %vm5872_vm0, 1, %v11271_v9  ;;  %v5855_v62 = vsel %vm5854_vm15, 1, %v11271_v9 }
 0x622   :  { %v5875_v32 = vadd.s32 %v5873_v29, %v5867_v19  ;;  %v5826_v33 = vsel %vm5824_vm1, %v10997_v55, 2102212464  ;;  %v5847_v28 = vshrl.u32 %v5843_v48, 16  ;;  %v5857_v34 = vadd.s32 %v5855_v62, %v5853_v1 }
 0x623   :  { %v5441_v39 = vor.u32 4788187, %v5440_v46  ;;  %v5444_v12 = vcvt.s32.f32 %v5437_v58  ;;  %vm5876_vm4 = vc.u32 %v5874_v50, %v5870_v5  ;;  %v5805_v20 = vshrl.u32 %v11268_v60, %v10969_v47 }
 0x624   :  { %v5877_v38 = vsel %vm5876_vm4, 1, %v11271_v9  ;;  %v5849_v21 = vshrl.u32 %v5844_v31, 16  ;;  %v5858_v14 = vadd.s32 %v5857_v34, %v5847_v28  ;;  %v5869_v16 = vshrl.u32 %v5865_v0, 16 }
 0x625   :  { %v5442_v8 = vand.u32 2147483647, %v5441_v39  ;;  %v5879_v63 = vadd.s32 %v5877_v38, %v5875_v32  ;;  %v5825_v57 = vsel %vm5821_vm14, %v5805_v20, %v10991_v30  ;;  %v5827_v55 = vsel %vm5823_vm13, %v10993_v26, %v5826_v33 }
 0x626   :  { %vm5326_vm5 = vcmp.lt.s32.totalorder %v10790_v10, 0  ;;  %v5859_v49 = vadd.s32 %v5858_v14, %v5849_v21  ;;  %v5871_v61 = vshrl.u32 %v5866_v4, 16  ;;  %vm11057_vm1 = vcmp.le.f32.partialorder %v5324_v43, 0.7853982 }
 0x627   :  { %v5445_v13 = vmul.f32 %v5444_v12, %v5442_v8  ;;  %v5880_v60 = vadd.s32 %v5879_v63, %v5869_v16  ;;  %v5878_v3 = vadd.s32 %v5874_v50, %v5870_v5  ;;  %v5448_v30 = vsub.s32 4, %v10981_v17 }
 0x628   :  { %v5828_v23 = vsel %vm5822_vm8, %v5825_v57, %v5827_v55  ;;  %vm5467_vm8 = vweird.f32 %v10790_v10  ;;  %vm5791_vm7 = vcmp.lt.s32.totalorder %v10919_v37, 0  ;;  %vm5790_vm10 = vcmp.le.f32.partialorder %v5789_v7, 0.7853982 }
 0x629   :  { %v5446_v51 = vxor.u32 2147483648, %v5445_v13  ;;  %v5881_v36 = vadd.s32 %v5880_v60, %v5871_v61  ;;  %vm5884_vm14 = vc.u32 %v5859_v49, %v5878_v3  ;;  %v5882_v22 = vmul.u32 %v11008_v45, %v5828_v23 }
 0x62a   :  { %v5449_v0 = vsel %vm5326_vm5, %v5448_v30, %v10981_v17 }
 0x62b   :  { %v5447_v47 = vsel %vm5326_vm5, %v5446_v51, %v5445_v13  ;;  %v5885_v43 = vadd.s32 1, %v5881_v36  ;;  %v5451_v52 = vsel %vm11057_vm1, 0, %v5449_v0  ;;  %v5883_v13 = vadd.s32 %v5878_v3, %v5859_v49 }
 0x62c   :  { %v5450_v26 = vsel %vm11057_vm1, %v10790_v10, %v5447_v47  ;;  %v5468_v46 = vadd.s32 3, %v5451_v52  ;;  %vm5932_vm5 = vweird.f32 %v10919_v37 }
 0x62d   :  { %v5452_v6 = vmul.f32 %v5450_v26, %v5450_v26  ;;  %v5886_v48 = vsel %vm5884_vm14, %v5885_v43, %v5881_v36 }
 0x62e   :  { %v5887_v25 = vadd.s32 %v5886_v48, %v5882_v22  ;;  %v5469_v19 = vand.u32 3, %v5468_v46 }
 0x62f   :  { %v5453_v15 = vmul.f32 -0.001358992, %v5452_v6  ;;  %v5460_v18 = vmul.f32 -0.00019511016, %v5452_v6 }
 0x630   :  { %v5888_v53 = vadd.s32 536870912, %v5887_v25  ;;  %vm5471_vm2 = vcmp.eq.s32.totalorder %v5469_v19, 0  ;;  %vm5474_vm3 = vcmp.eq.s32.totalorder %v5469_v19, 2  ;;  %vm5470_vm13 = vcmp.lt.s32.totalorder %v5469_v19, 2 }
 0x631   :  { %v5454_v31 = vadd.f32 0.041655596, %v5453_v15  ;;  %v5461_v54 = vadd.f32 0.008332121, %v5460_v18 }
 0x632   :  { %v5889_v58 = vshrl.u32 %v5888_v53, 30 }
 0x633   :  { %v5455_v24 = vmul.f32 %v5454_v31, %v5452_v6  ;;  %v5462_v4 = vmul.f32 %v5461_v54, %v5452_v6 }
 0x634   :  { %v5890_v41 = vshll.u32 %v5889_v58, 30  ;;  %v5913_v9 = vsub.s32 4, %v5889_v58 }
 0x635   :  { %v5456_v11 = vadd.f32 -0.4999988, %v5455_v24  ;;  %v5463_v35 = vadd.f32 -0.16666654, %v5462_v4 }
 0x636   :  { %v5891_v17 = vsub.s32 %v5887_v25, %v5890_v41 }
 0x637   :  { %v5457_v27 = vmul.f32 %v5456_v11, %v5452_v6  ;;  %v5464_v45 = vmul.f32 %v5463_v35, %v5452_v6 }
 0x638   :  { %vm5892_vm6 = vcmp.lt.s32.totalorder %v5891_v17, 0  ;;  %v5893_v5 = vsub.s32 0, %v5891_v17 }
 0x639   :  { %v5458_v44 = vadd.f32 1.0, %v5457_v27  ;;  %v5465_v59 = vadd.f32 1.0, %v5464_v45 }
 0x63a   :  { %v5894_v29 = vsel %vm5892_vm6, %v5893_v5, %v5891_v17 }
 0x63b   :  { %v5466_v39 = vmul.f32 %v5465_v59, %v5450_v26  ;;  %v5475_v40 = vxor.u32 2147483648, %v5458_v44  ;;  %v5895_v50 = vclz %v5894_v29  ;;  %v5914_v26 = vsel %vm5791_vm7, %v5913_v9, %v5889_v58 }
 0x63c   :  { %v5916_v6 = vsel %vm5790_vm10, 0, %v5914_v26 }
 0x63d   :  { %v5472_v1 = vxor.u32 2147483648, %v5466_v39  ;;  %v5476_v12 = vsel %vm5474_vm3, %v5475_v40, %v5466_v39  ;;  %v6110_v32 = vadd.s32 4294967294, %v5895_v50  ;;  %v5933_v0 = vadd.s32 3, %v5916_v6 }
 0x63f   :  { %v5473_v8 = vsel %vm5471_vm2, %v5458_v44, %v5472_v1  ;;  %vm6111_vm11 = vcmp.lt.s32.totalorder %v6110_v32, 0  ;;  %v5934_v25 = vand.u32 3, %v5933_v0 }
 0x640   :  { %v5477_v62 = vsel %vm5470_vm13, %v5473_v8, %v5476_v12  ;;  %v5898_v34 = vsel %vm6111_vm11, 0, %v6110_v32 }
 0x641   :  { %v5478_v33 = vsel %vm5467_vm8, nan, %v5477_v62  ;;  %v5899_v20 = vsub.s32 32, %v5898_v34  ;;  %v5903_v38 = vsub.s32 4294967266, %v5898_v34  ;;  %v5900_v21 = vshll.u32 %v5891_v17, %v5898_v34 }
 0x642   :  { %v5975_v28 = vsel %vm5944_vm9, %v10730_v42, %v5478_v33  ;;  %vm5936_vm0 = vcmp.eq.s32.totalorder %v5934_v25, 0  ;;  %vm5939_vm15 = vcmp.eq.s32.totalorder %v5934_v25, 2  ;;  %vm5935_vm4 = vcmp.lt.s32.totalorder %v5934_v25, 2 }
 0x643   :  { %6008 = vst.msk [vmem:[%s11096_s1 + $0xe0] sm:$0xff] %vm5979_vm12, %v5975_v28  ;;  %v5901_v14 = vshrl.u32 %v5883_v13, %v5899_v20  ;;  %v5904_v10 = vadd.s32 127, %v5903_v38 }
 0x645   :  { %v5902_v16 = vor.u32 %v5901_v14, %v5900_v21  ;;  %v5905_v63 = vshll.u32 %v5904_v10, 23 }
 0x647   :  { %v5906_v51 = vor.u32 4788187, %v5905_v63  ;;  %v5909_v55 = vcvt.s32.f32 %v5902_v16 }
 0x649   :  { %v5907_v57 = vand.u32 2147483647, %v5906_v51 }
 0x64b   :  { %v5910_v61 = vmul.f32 %v5909_v55, %v5907_v57 }
 0x64d   :  { %v5911_v42 = vxor.u32 2147483648, %v5910_v61 }
 0x64f   :  { %v5912_v60 = vsel %vm5791_vm7, %v5911_v42, %v5910_v61 }
 0x650   :  { %v5915_v49 = vsel %vm5790_vm10, %v10919_v37, %v5912_v60 }
 0x651   :  { %v5917_v47 = vmul.f32 %v5915_v49, %v5915_v49 }
 0x653   :  { %v5918_v3 = vmul.f32 -0.001358992, %v5917_v47  ;;  %v5925_v30 = vmul.f32 -0.00019511016, %v5917_v47 }
 0x655   :  { %v5919_v23 = vadd.f32 0.041655596, %v5918_v3  ;;  %v5926_v36 = vadd.f32 0.008332121, %v5925_v30 }
 0x657   :  { %v5920_v43 = vmul.f32 %v5919_v23, %v5917_v47  ;;  %v5927_v15 = vmul.f32 %v5926_v36, %v5917_v47 }
 0x659   :  { %v5921_v18 = vadd.f32 -0.4999988, %v5920_v43  ;;  %v5928_v22 = vadd.f32 -0.16666654, %v5927_v15 }
 0x65b   :  { %v5922_v48 = vmul.f32 %v5921_v18, %v5917_v47  ;;  %v5929_v31 = vmul.f32 %v5928_v22, %v5917_v47 }
 0x65d   :  { %v5923_v54 = vadd.f32 1.0, %v5922_v48  ;;  %v5930_v7 = vadd.f32 1.0, %v5929_v31 }
 0x65f   :  { %v5931_v52 = vmul.f32 %v5930_v7, %v5915_v49  ;;  %v5940_v24 = vxor.u32 2147483648, %v5923_v54 }
 0x661   :  { %v5937_v4 = vxor.u32 2147483648, %v5931_v52  ;;  %v5941_v11 = vsel %vm5939_vm15, %v5940_v24, %v5931_v52 }
 0x663   :  { %v5938_v53 = vsel %vm5936_vm0, %v5923_v54, %v5937_v4 }
 0x664   :  { %v5942_v35 = vsel %vm5935_vm4, %v5938_v53, %v5941_v11 }
 0x665   :  { %v5943_v58 = vsel %vm5932_vm5, nan, %v5942_v35 }
 0x666   :  { %v5978_v46 = vsel %vm5944_vm9, %v10859_v2, %v5943_v58 }
 0x667   :  { %6011 = vst.msk [vmem:[%s11096_s1 + $0xf8] sm:$0xff] %vm5979_vm12, %v5978_v46 }

</bundles_post_ra>
